<compile_context>
chip_gen: v7x
topology: tpu7x:2x2x1
jax: 0.10.0
libtpu: 0.0.40
codegen_flags: <defaults>
</compile_context>

<pallas_src>
import functools

import jax
import jax.numpy as jnp
from jax.experimental import pallas as pl
from jax.experimental.pallas import tpu as pltpu

# ----------------------------- DenseNet-121 config ---------------------------
GROWTH = 32
BN_SIZE = 4
BLOCK_CONFIG = (6, 12, 24, 16)
NUM_INIT = 64
NUM_CLASSES = 3
EPS = 1e-5


def _rup(x, m):
    return ((x + m - 1) // m) * m


def _pick_tile(dim_p, max_tile, unit):
    """Largest multiple of `unit` that divides dim_p and is <= max_tile."""
    best = unit
    t = unit
    cap = min(dim_p, max_tile)
    while t <= cap:
        if dim_p % t == 0:
            best = t
        t += unit
    return best


def _hw_config():
    """Per-generation tile caps (tm, tn, tk) and vmem limit."""
    try:
        vmem_cap = int(pltpu.get_tpu_info().vmem_capacity_bytes)
    except Exception:
        vmem_cap = 64 * 1024 * 1024
    if vmem_cap >= 100 * 1024 * 1024:        # v5e / v6e: 128 MiB VMEM
        return 512, 256, 512, 64 * 1024 * 1024
    return 256, 256, 512, 32 * 1024 * 1024   # v7x: 64 MiB VMEM per TC


_TM_MAX, _TN_MAX, _TK_MAX, _VMEM_LIMIT = _hw_config()


# ------------------------------ Pallas kernel ---------------------------------
def _fused_matmul_kernel(*refs, k_fuse, n_fuse):
    """Tiled matmul with optional BN+ReLU prologue (on A, per K column) and
    optional BN+ReLU epilogue (on O, per N column). f32 accumulation in VMEM."""
    idx = 0
    a_ref = refs[idx]; idx += 1
    b_ref = refs[idx]; idx += 1
    ks_ref = kb_ref = ns_ref = nb_ref = None
    if k_fuse:
        ks_ref, kb_ref = refs[idx], refs[idx + 1]; idx += 2
    if n_fuse:
        ns_ref, nb_ref = refs[idx], refs[idx + 1]; idx += 2
    o_ref = refs[idx]
    acc_ref = refs[idx + 1]

    k = pl.program_id(2)

    @pl.when(k == 0)
    def _init():
        acc_ref[...] = jnp.zeros_like(acc_ref)

    if k_fuse:
        a = a_ref[...].astype(jnp.float32)
        a = jnp.maximum(a * ks_ref[...] + kb_ref[...], 0.0).astype(jnp.bfloat16)
    else:
        a = a_ref[...]
    acc_ref[...] += jnp.dot(a, b_ref[...], preferred_element_type=jnp.float32)

    @pl.when(k == pl.num_programs(2) - 1)
    def _finalize():
        out = acc_ref[...]
        if n_fuse:
            out = jnp.maximum(out * ns_ref[...] + nb_ref[...], 0.0)
        o_ref[...] = out.astype(o_ref.dtype)


def fused_matmul(a, b, k_scale=None, k_shift=None, n_scale=None, n_shift=None,
                 out_dtype=jnp.bfloat16):
    """(M,K) @ (K,N) on the MXU (bf16 inputs, f32 accum) with optional fused
    BN+ReLU prologue (k_scale/k_shift over K) and epilogue (n_scale/n_shift over N)."""
    M, K = a.shape
    K2, N = b.shape
    assert K == K2
    k_fuse = k_scale is not None
    n_fuse = n_scale is not None

    Mp, Kp, Np = _rup(M, 8), _rup(K, 128), _rup(N, 128)
    tm = _pick_tile(Mp, _TM_MAX, 8)
    tk = _pick_tile(Kp, _TK_MAX, 128)
    tn = _pick_tile(Np, _TN_MAX, 128)

    a_p = a.astype(jnp.bfloat16)
    if Mp != M or Kp != K:
        a_p = jnp.pad(a_p, ((0, Mp - M), (0, Kp - K)))
    b_p = b.astype(jnp.bfloat16)
    if Kp != K or Np != N:
        b_p = jnp.pad(b_p, ((0, Kp - K), (0, Np - N)))

    in_specs = [
        pl.BlockSpec((tm, tk), lambda i, j, k: (i, k)),
        pl.BlockSpec((tk, tn), lambda i, j, k: (k, j)),
    ]
    operands = [a_p, b_p]
    if k_fuse:
        ks = jnp.pad(k_scale.astype(jnp.float32).reshape(1, K), ((0, 0), (0, Kp - K)))
        kb = jnp.pad(k_shift.astype(jnp.float32).reshape(1, K), ((0, 0), (0, Kp - K)))
        in_specs += [pl.BlockSpec((1, tk), lambda i, j, k: (0, k)),
                     pl.BlockSpec((1, tk), lambda i, j, k: (0, k))]
        operands += [ks, kb]
    if n_fuse:
        ns = jnp.pad(n_scale.astype(jnp.float32).reshape(1, N), ((0, 0), (0, Np - N)))
        nb = jnp.pad(n_shift.astype(jnp.float32).reshape(1, N), ((0, 0), (0, Np - N)))
        in_specs += [pl.BlockSpec((1, tn), lambda i, j, k: (0, j)),
                     pl.BlockSpec((1, tn), lambda i, j, k: (0, j))]
        operands += [ns, nb]

    kernel = functools.partial(_fused_matmul_kernel, k_fuse=k_fuse, n_fuse=n_fuse)

    out = pl.pallas_call(
        kernel,
        out_shape=jax.ShapeDtypeStruct((Mp, Np), out_dtype),
        grid_spec=pltpu.PrefetchScalarGridSpec(
            num_scalar_prefetch=0,
            grid=(Mp // tm, Np // tn, Kp // tk),
            in_specs=in_specs,
            out_specs=pl.BlockSpec((tm, tn), lambda i, j, k: (i, j)),
            scratch_shapes=[pltpu.VMEM((tm, tn), jnp.float32)],
        ),
        compiler_params=pltpu.CompilerParams(
            dimension_semantics=("parallel", "parallel", "arbitrary"),
            vmem_limit_bytes=_VMEM_LIMIT,
        ),
    )(*operands)

    if Mp != M or Np != N:
        out = out[:M, :N]
    return out


# ------------------------------ conv / pool glue ------------------------------
def _fold_bn(bn):
    scale = bn["gamma"] / jnp.sqrt(bn["var"] + EPS)
    shift = bn["beta"] - bn["mean"] * scale
    return scale, shift


def conv2d(x, w, stride=1, padding=0, k_bn=None, n_bn=None):
    """x: (B,H,W,Cin) NHWC bf16, w: (kh,kw,Cin,Cout).
    k_bn: (scale, shift) per input channel  -> fused BN+ReLU *before* the conv.
    n_bn: (scale, shift) per output channel -> fused BN+ReLU *after*  the conv."""
    B, H, W, C = x.shape
    kh, kw, _, Cout = w.shape
    if padding > 0:
        x = jnp.pad(x, ((0, 0), (padding, padding), (padding, padding), (0, 0)))
    Hp, Wp = H + 2 * padding, W + 2 * padding
    Ho = (Hp - kh) // stride + 1
    Wo = (Wp - kw) // stride + 1

    if kh == 1 and kw == 1 and stride == 1:
        a = x.reshape(B * Ho * Wo, C)
    else:
        patches = []
        for i in range(kh):
            for j in range(kw):
                patches.append(
                    x[:, i : i + stride * (Ho - 1) + 1 : stride,
                         j : j + stride * (Wo - 1) + 1 : stride, :]
                )
        # patch layout (i, j, c) matches weight reshape (kh, kw, Cin) -> kh*kw*Cin
        a = jnp.concatenate(patches, axis=-1).reshape(B * Ho * Wo, kh * kw * C)

    wm = w.reshape(kh * kw * C, Cout)

    k_scale = k_shift = n_scale = n_shift = None
    if k_bn is not None:
        s, t = k_bn
        k_scale = jnp.tile(s, kh * kw)
        k_shift = jnp.tile(t, kh * kw)
    if n_bn is not None:
        n_scale, n_shift = n_bn

    out = fused_matmul(a, wm, k_scale, k_shift, n_scale, n_shift,
                       out_dtype=jnp.bfloat16)
    return out.reshape(B, Ho, Wo, Cout)


def max_pool_3x3_s2_p1(x):
    return jax.lax.reduce_window(
        x, jnp.array(-jnp.inf, dtype=x.dtype), jax.lax.max,
        window_dimensions=(1, 3, 3, 1),
        window_strides=(1, 2, 2, 1),
        padding=((0, 0), (1, 1), (1, 1), (0, 0)),
    )


def avg_pool_2x2(x):
    B, H, W, C = x.shape
    y = x.astype(jnp.float32).reshape(B, H // 2, 2, W // 2, 2, C).mean(axis=(2, 4))
    return y.astype(jnp.bfloat16)


# ------------------------------ parameter init --------------------------------
def _bn_p(key, c):
    k1, k2, k3, k4 = jax.random.split(key, 4)
    return {
        "gamma": 1.0 + 0.1 * jax.random.normal(k1, (c,), jnp.float32),
        "beta": 0.1 * jax.random.normal(k2, (c,), jnp.float32),
        "mean": 0.1 * jax.random.normal(k3, (c,), jnp.float32),
        "var": 1.0 + 0.1 * jax.random.uniform(k4, (c,), jnp.float32),
    }


def _conv_w(key, kh, kw, cin, cout):
    fan_in = kh * kw * cin
    w = jax.random.normal(key, (kh, kw, cin, cout), jnp.float32) * (2.0 / fan_in) ** 0.5
    return w.astype(jnp.bfloat16)


def init_params(seed=42):
    key = jax.random.PRNGKey(seed)
    cnt = [0]

    def nk():
        cnt[0] += 1
        return jax.random.fold_in(key, cnt[0])

    params = {}
    params["conv0"] = _conv_w(nk(), 7, 7, 3, NUM_INIT)      # features.conv0
    params["norm0"] = _bn_p(nk(), NUM_INIT)                  # features.norm0
    c = NUM_INIT
    for bi, n_layers in enumerate(BLOCK_CONFIG):
        layers = []
        for li in range(n_layers):
            cin = c + li * GROWTH
            layers.append({
                "norm1": _bn_p(nk(), cin),
                "conv1": _conv_w(nk(), 1, 1, cin, BN_SIZE * GROWTH),
                "norm2": _bn_p(nk(), BN_SIZE * GROWTH),
                "conv2": _conv_w(nk(), 3, 3, BN_SIZE * GROWTH, GROWTH),
            })
        params[f"block{bi}"] = layers
        c = c + n_layers * GROWTH
        if bi != len(BLOCK_CONFIG) - 1:
            params[f"trans{bi}"] = {
                "norm": _bn_p(nk(), c),
                "conv": _conv_w(nk(), 1, 1, c, c // 2),
            }
            c = c // 2
    assert c == 1024
    params["norm5"] = _bn_p(nk(), c)
    params["cls_w"] = 0.05 * jax.random.normal(nk(), (c, NUM_CLASSES), jnp.float32)
    params["cls_b"] = jnp.zeros((NUM_CLASSES,), jnp.float32)
    return params


# --------------------------------- forward ------------------------------------
@jax.jit
def densenet121_forward(params, x_nchw):
    # accepts NCHW like the PyTorch module, transposes to NHWC internally
    x = jnp.transpose(x_nchw, (0, 2, 3, 1)).astype(jnp.bfloat16)

    # stem: conv7x7/2 with fused (norm0 + ReLU) epilogue, then maxpool3x3/2
    x = conv2d(x, params["conv0"], stride=2, padding=3,
               n_bn=_fold_bn(params["norm0"]))
    x = max_pool_3x3_s2_p1(x)

    for bi, n_layers in enumerate(BLOCK_CONFIG):
        for li in range(n_layers):
            p = params[f"block{bi}"][li]
            # norm1+ReLU fused as prologue, norm2+ReLU fused as epilogue of the
            # 1x1 bottleneck conv; the 3x3 conv consumes the activated output.
            y = conv2d(x, p["conv1"], stride=1, padding=0,
                       k_bn=_fold_bn(p["norm1"]), n_bn=_fold_bn(p["norm2"]))
            y = conv2d(y, p["conv2"], stride=1, padding=1)
            x = jnp.concatenate([x, y], axis=-1)                 # dense connectivity
        if bi != len(BLOCK_CONFIG) - 1:
            t = params[f"trans{bi}"]
            # transition: (norm + ReLU) fused as prologue of the 1x1 conv
            x = conv2d(x, t["conv"], stride=1, padding=0, k_bn=_fold_bn(t["norm"]))
            x = avg_pool_2x2(x)

    # norm5 -> relu -> adaptive_avg_pool2d(1,1) -> flatten -> Linear(1024, 3)
    # (1x1 spatial / (B,1024): tiny, run in plain XLA rather than a padded kernel)
    scale, shift = _fold_bn(params["norm5"])
    xf = jnp.maximum(x.astype(jnp.float32) * scale + shift, 0.0)
    feat = jnp.mean(xf, axis=(1, 2))                             # (B, 1024)
    logits = feat @ params["cls_w"] + params["cls_b"]
    return logits


# ----------------------------------- main --------------------------------------
if __name__ == "__main__":
    params = init_params(42)
    # small input consistent with the module: NCHW, 3 RGB channels, 32x32 spatial
    x = jax.random.normal(jax.random.PRNGKey(0), (2, 3, 32, 32), jnp.float32)
    out = densenet121_forward(params, x)
    out = jax.block_until_ready(out)
    assert out.shape == (2, NUM_CLASSES), out.shape
    assert bool(jnp.all(jnp.isfinite(out)))
    print("KERNEL_OK")
</pallas_src>

<mosaic_0001>
module attributes {stable_mosaic.version = 11 : i64} {
  func.func @_fused_matmul_kernel(%arg0: i32, %arg1: i32, %arg2: i32, %arg3: memref<256x256xbf16, #tpu.memory_space<vmem>>, %arg4: memref<256x128xbf16, #tpu.memory_space<vmem>>, %arg5: memref<1x128xf32, #tpu.memory_space<vmem>>, %arg6: memref<1x128xf32, #tpu.memory_space<vmem>>, %arg7: memref<256x128xbf16, #tpu.memory_space<vmem>>, %arg8: memref<256x128xf32, #tpu.memory_space<vmem>>) attributes {dimension_semantics = [#tpu.dimension_semantics<parallel>, #tpu.dimension_semantics<parallel>, #tpu.dimension_semantics<arbitrary>], iteration_bounds = array<i64: 2, 1, 1>, scalar_prefetch = 0 : i64, scratch_operands = 1 : i64, tpu.core_type = #tpu.core_type<tc>, window_params = [{transform_indices = @transform_0, window_bounds = array<i64: 256, 256>}, {transform_indices = @transform_1, window_bounds = array<i64: 256, 128>}, {transform_indices = @transform_2, window_bounds = array<i64: 1, 128>}, {transform_indices = @transform_3, window_bounds = array<i64: 1, 128>}, {transform_indices = @transform_4, window_bounds = array<i64: 256, 128>}]} {
    %c0_i32 = arith.constant 0 : i32
    %0 = arith.cmpi eq, %arg2, %c0_i32 : i32
    %1 = arith.extui %0 : i1 to i32
    %c0_i32_0 = arith.constant 0 : i32
    %2 = arith.cmpi ne, %1, %c0_i32_0 : i32
    scf.if %2 {
      %cst_10 = arith.constant 0.000000e+00 : f32
      %12 = vector.broadcast %cst_10 : f32 to vector<256x128xf32>
      %c0_11 = arith.constant 0 : index
      %c0_12 = arith.constant 0 : index
      %13 = vector.load %arg8[%c0_11, %c0_12] : memref<256x128xf32, #tpu.memory_space<vmem>>, vector<256x128xf32>
      tpu.vector_store %arg8[%c0_11, %c0_12], %12 {strides = array<i32>} : memref<256x128xf32, #tpu.memory_space<vmem>>, vector<256x128xf32>,
    } else {
    }
    %c0 = arith.constant 0 : index
    %c0_1 = arith.constant 0 : index
    %3 = vector.load %arg3[%c0, %c0_1] : memref<256x256xbf16, #tpu.memory_space<vmem>>, vector<256x256xbf16>
    %c0_2 = arith.constant 0 : index
    %c0_3 = arith.constant 0 : index
    %4 = vector.load %arg8[%c0_2, %c0_3] : memref<256x128xf32, #tpu.memory_space<vmem>>, vector<256x128xf32>
    %c0_4 = arith.constant 0 : index
    %c0_5 = arith.constant 0 : index
    %5 = vector.load %arg4[%c0_4, %c0_5] : memref<256x128xbf16, #tpu.memory_space<vmem>>, vector<256x128xbf16>
    %cst = arith.constant dense<0.000000e+00> : vector<256x128xf32>
    %6 = tpu.matmul %3, %5, %cst {dimension_numbers = #tpu.dot_dimension_numbers<[1], [0], [0], [1], [0, 0, 1, 1], [], []>} : vector<256x256xbf16>, vector<256x128xbf16>, vector<256x128xf32> -> vector<256x128xf32>
    %7 = arith.addf %4, %6 : vector<256x128xf32>
    %c0_6 = arith.constant 0 : index
    %c0_7 = arith.constant 0 : index
    %8 = vector.load %arg8[%c0_6, %c0_7] : memref<256x128xf32, #tpu.memory_space<vmem>>, vector<256x128xf32>
    tpu.vector_store %arg8[%c0_6, %c0_7], %7 {strides = array<i32>} : memref<256x128xf32, #tpu.memory_space<vmem>>, vector<256x128xf32>,
    %c0_i32_8 = arith.constant 0 : i32
    %9 = arith.cmpi eq, %arg2, %c0_i32_8 : i32
    %10 = arith.extui %9 : i1 to i32
    %c0_i32_9 = arith.constant 0 : i32
    %11 = arith.cmpi ne, %10, %c0_i32_9 : i32
    scf.if %11 {
      %c0_10 = arith.constant 0 : index
      %c0_11 = arith.constant 0 : index
      %12 = vector.load %arg8[%c0_10, %c0_11] : memref<256x128xf32, #tpu.memory_space<vmem>>, vector<256x128xf32>
      %c0_12 = arith.constant 0 : index
      %c0_13 = arith.constant 0 : index
      %13 = vector.load %arg5[%c0_12, %c0_13] : memref<1x128xf32, #tpu.memory_space<vmem>>, vector<1x128xf32>
      %14 = vector.broadcast %13 : vector<1x128xf32> to vector<256x128xf32>
      %15 = arith.mulf %12, %14 : vector<256x128xf32>
      %c0_14 = arith.constant 0 : index
      %c0_15 = arith.constant 0 : index
      %16 = vector.load %arg6[%c0_14, %c0_15] : memref<1x128xf32, #tpu.memory_space<vmem>>, vector<1x128xf32>
      %17 = vector.broadcast %16 : vector<1x128xf32> to vector<256x128xf32>
      %18 = arith.addf %15, %17 : vector<256x128xf32>
      %cst_16 = arith.constant 0.000000e+00 : f32
      %19 = vector.broadcast %cst_16 : f32 to vector<256x128xf32>
      %20 = arith.maximumf %18, %19 : vector<256x128xf32>
      %21 = arith.truncf %20 : vector<256x128xf32> to vector<256x128xbf16>
      %c0_17 = arith.constant 0 : index
      %c0_18 = arith.constant 0 : index
      %22 = vector.load %arg7[%c0_17, %c0_18] : memref<256x128xbf16, #tpu.memory_space<vmem>>, vector<256x128xbf16>
      tpu.vector_store %arg7[%c0_17, %c0_18], %21 {strides = array<i32>} : memref<256x128xbf16, #tpu.memory_space<vmem>>, vector<256x128xbf16>,
    } else {
    }
    return
  }
  func.func @transform_0(%arg0: i32, %arg1: i32, %arg2: i32) -> (i32, i32) {
    %c0_i32 = arith.constant 0 : i32
    return %arg0, %arg2 : i32, i32
  }
  func.func @transform_1(%arg0: i32, %arg1: i32, %arg2: i32) -> (i32, i32) {
    %c0_i32 = arith.constant 0 : i32
    return %arg2, %arg1 : i32, i32
  }
  func.func @transform_2(%arg0: i32, %arg1: i32, %arg2: i32) -> (i32, i32) {
    %c0_i32 = arith.constant 0 : i32
    %c0_i32_0 = arith.constant 0 : i32
    return %c0_i32, %arg1 : i32, i32
  }
  func.func @transform_3(%arg0: i32, %arg1: i32, %arg2: i32) -> (i32, i32) {
    %c0_i32 = arith.constant 0 : i32
    %c0_i32_0 = arith.constant 0 : i32
    return %c0_i32, %arg1 : i32, i32
  }
  func.func @transform_4(%arg0: i32, %arg1: i32, %arg2: i32) -> (i32, i32) {
    %c0_i32 = arith.constant 0 : i32
    return %arg0, %arg1 : i32, i32
  }
}

module attributes {stable_mosaic.version = 11 : i64} {
  func.func @_fused_matmul_kernel(%arg0: i32, %arg1: i32, %arg2: i32, %arg3: memref<128x128xbf16, #tpu.memory_space<vmem>>, %arg4: memref<128x128xbf16, #tpu.memory_space<vmem>>, %arg5: memref<1x128xf32, #tpu.memory_space<vmem>>, %arg6: memref<1x128xf32, #tpu.memory_space<vmem>>, %arg7: memref<1x128xf32, #tpu.memory_space<vmem>>, %arg8: memref<1x128xf32, #tpu.memory_space<vmem>>, %arg9: memref<128x128xbf16, #tpu.memory_space<vmem>>, %arg10: memref<128x128xf32, #tpu.memory_space<vmem>>) attributes {dimension_semantics = [#tpu.dimension_semantics<parallel>, #tpu.dimension_semantics<parallel>, #tpu.dimension_semantics<arbitrary>], iteration_bounds = array<i64: 1, 1, 1>, scalar_prefetch = 0 : i64, scratch_operands = 1 : i64, tpu.core_type = #tpu.core_type<tc>, window_params = [{transform_indices = @transform_0, window_bounds = array<i64: 128, 128>}, {transform_indices = @transform_1, window_bounds = array<i64: 128, 128>}, {transform_indices = @transform_2, window_bounds = array<i64: 1, 128>}, {transform_indices = @transform_3, window_bounds = array<i64: 1, 128>}, {transform_indices = @transform_4, window_bounds = array<i64: 1, 128>}, {transform_indices = @transform_5, window_bounds = array<i64: 1, 128>}, {transform_indices = @transform_6, window_bounds = array<i64: 128, 128>}]} {
    %c0_i32 = arith.constant 0 : i32
    %0 = arith.cmpi eq, %arg2, %c0_i32 : i32
    %1 = arith.extui %0 : i1 to i32
    %c0_i32_0 = arith.constant 0 : i32
    %2 = arith.cmpi ne, %1, %c0_i32_0 : i32
    scf.if %2 {
      %cst_15 = arith.constant 0.000000e+00 : f32
      %22 = vector.broadcast %cst_15 : f32 to vector<128x128xf32>
      %c0_16 = arith.constant 0 : index
      %c0_17 = arith.constant 0 : index
      %23 = vector.load %arg10[%c0_16, %c0_17] : memref<128x128xf32, #tpu.memory_space<vmem>>, vector<128x128xf32>
      tpu.vector_store %arg10[%c0_16, %c0_17], %22 {strides = array<i32>} : memref<128x128xf32, #tpu.memory_space<vmem>>, vector<128x128xf32>,
    } else {
    }
    %c0 = arith.constant 0 : index
    %c0_1 = arith.constant 0 : index
    %3 = vector.load %arg3[%c0, %c0_1] : memref<128x128xbf16, #tpu.memory_space<vmem>>, vector<128x128xbf16>
    %4 = arith.extf %3 : vector<128x128xbf16> to vector<128x128xf32>
    %c0_2 = arith.constant 0 : index
    %c0_3 = arith.constant 0 : index
    %5 = vector.load %arg5[%c0_2, %c0_3] : memref<1x128xf32, #tpu.memory_space<vmem>>, vector<1x128xf32>
    %6 = vector.broadcast %5 : vector<1x128xf32> to vector<128x128xf32>
    %7 = arith.mulf %4, %6 : vector<128x128xf32>
    %c0_4 = arith.constant 0 : index
    %c0_5 = arith.constant 0 : index
    %8 = vector.load %arg6[%c0_4, %c0_5] : memref<1x128xf32, #tpu.memory_space<vmem>>, vector<1x128xf32>
    %9 = vector.broadcast %8 : vector<1x128xf32> to vector<128x128xf32>
    %10 = arith.addf %7, %9 : vector<128x128xf32>
    %cst = arith.constant 0.000000e+00 : f32
    %11 = vector.broadcast %cst : f32 to vector<128x128xf32>
    %12 = arith.maximumf %10, %11 : vector<128x128xf32>
    %13 = arith.truncf %12 : vector<128x128xf32> to vector<128x128xbf16>
    %c0_6 = arith.constant 0 : index
    %c0_7 = arith.constant 0 : index
    %14 = vector.load %arg10[%c0_6, %c0_7] : memref<128x128xf32, #tpu.memory_space<vmem>>, vector<128x128xf32>
    %c0_8 = arith.constant 0 : index
    %c0_9 = arith.constant 0 : index
    %15 = vector.load %arg4[%c0_8, %c0_9] : memref<128x128xbf16, #tpu.memory_space<vmem>>, vector<128x128xbf16>
    %cst_10 = arith.constant dense<0.000000e+00> : vector<128x128xf32>
    %16 = tpu.matmul %13, %15, %cst_10 {dimension_numbers = #tpu.dot_dimension_numbers<[1], [0], [0], [1], [0, 0, 1, 1], [], []>} : vector<128x128xbf16>, vector<128x128xbf16>, vector<128x128xf32> -> vector<128x128xf32>
    %17 = arith.addf %14, %16 : vector<128x128xf32>
    %c0_11 = arith.constant 0 : index
    %c0_12 = arith.constant 0 : index
    %18 = vector.load %arg10[%c0_11, %c0_12] : memref<128x128xf32, #tpu.memory_space<vmem>>, vector<128x128xf32>
    tpu.vector_store %arg10[%c0_11, %c0_12], %17 {strides = array<i32>} : memref<128x128xf32, #tpu.memory_space<vmem>>, vector<128x128xf32>,
    %c0_i32_13 = arith.constant 0 : i32
    %19 = arith.cmpi eq, %arg2, %c0_i32_13 : i32
    %20 = arith.extui %19 : i1 to i32
    %c0_i32_14 = arith.constant 0 : i32
    %21 = arith.cmpi ne, %20, %c0_i32_14 : i32
    scf.if %21 {
      %c0_15 = arith.constant 0 : index
      %c0_16 = arith.constant 0 : index
      %22 = vector.load %arg10[%c0_15, %c0_16] : memref<128x128xf32, #tpu.memory_space<vmem>>, vector<128x128xf32>
      %c0_17 = arith.constant 0 : index
      %c0_18 = arith.constant 0 : index
      %23 = vector.load %arg7[%c0_17, %c0_18] : memref<1x128xf32, #tpu.memory_space<vmem>>, vector<1x128xf32>
      %24 = vector.broadcast %23 : vector<1x128xf32> to vector<128x128xf32>
      %25 = arith.mulf %22, %24 : vector<128x128xf32>
      %c0_19 = arith.constant 0 : index
      %c0_20 = arith.constant 0 : index
      %26 = vector.load %arg8[%c0_19, %c0_20] : memref<1x128xf32, #tpu.memory_space<vmem>>, vector<1x128xf32>
      %27 = vector.broadcast %26 : vector<1x128xf32> to vector<128x128xf32>
      %28 = arith.addf %25, %27 : vector<128x128xf32>
      %cst_21 = arith.constant 0.000000e+00 : f32
      %29 = vector.broadcast %cst_21 : f32 to vector<128x128xf32>
      %30 = arith.maximumf %28, %29 : vector<128x128xf32>
      %31 = arith.truncf %30 : vector<128x128xf32> to vector<128x128xbf16>
      %c0_22 = arith.constant 0 : index
      %c0_23 = arith.constant 0 : index
      %32 = vector.load %arg9[%c0_22, %c0_23] : memref<128x128xbf16, #tpu.memory_space<vmem>>, vector<128x128xbf16>
      tpu.vector_store %arg9[%c0_22, %c0_23], %31 {strides = array<i32>} : memref<128x128xbf16, #tpu.memory_space<vmem>>, vector<128x128xbf16>,
    } else {
    }
    return
  }
  func.func @transform_0(%arg0: i32, %arg1: i32, %arg2: i32) -> (i32, i32) {
    %c0_i32 = arith.constant 0 : i32
    return %arg0, %arg2 : i32, i32
  }
  func.func @transform_1(%arg0: i32, %arg1: i32, %arg2: i32) -> (i32, i32) {
    %c0_i32 = arith.constant 0 : i32
    return %arg2, %arg1 : i32, i32
  }
  func.func @transform_2(%arg0: i32, %arg1: i32, %arg2: i32) -> (i32, i32) {
    %c0_i32 = arith.constant 0 : i32
    %c0_i32_0 = arith.constant 0 : i32
    return %c0_i32, %arg2 : i32, i32
  }
  func.func @transform_3(%arg0: i32, %arg1: i32, %arg2: i32) -> (i32, i32) {
    %c0_i32 = arith.constant 0 : i32
    %c0_i32_0 = arith.constant 0 : i32
    return %c0_i32, %arg2 : i32, i32
  }
  func.func @transform_4(%arg0: i32, %arg1: i32, %arg2: i32) -> (i32, i32) {
    %c0_i32 = arith.constant 0 : i32
    %c0_i32_0 = arith.constant 0 : i32
    return %c0_i32, %arg1 : i32, i32
  }
  func.func @transform_5(%arg0: i32, %arg1: i32, %arg2: i32) -> (i32, i32) {
    %c0_i32 = arith.constant 0 : i32
    %c0_i32_0 = arith.constant 0 : i32
    return %c0_i32, %arg1 : i32, i32
  }
  func.func @transform_6(%arg0: i32, %arg1: i32, %arg2: i32) -> (i32, i32) {
    %c0_i32 = arith.constant 0 : i32
    return %arg0, %arg1 : i32, i32
  }
}

module attributes {stable_mosaic.version = 11 : i64} {
  func.func @_fused_matmul_kernel(%arg0: i32, %arg1: i32, %arg2: i32, %arg3: memref<128x384xbf16, #tpu.memory_space<vmem>>, %arg4: memref<384x128xbf16, #tpu.memory_space<vmem>>, %arg5: memref<128x128xbf16, #tpu.memory_space<vmem>>, %arg6: memref<128x128xf32, #tpu.memory_space<vmem>>) attributes {dimension_semantics = [#tpu.dimension_semantics<parallel>, #tpu.dimension_semantics<parallel>, #tpu.dimension_semantics<arbitrary>], iteration_bounds = array<i64: 1, 1, 3>, scalar_prefetch = 0 : i64, scratch_operands = 1 : i64, tpu.core_type = #tpu.core_type<tc>, window_params = [{transform_indices = @transform_0, window_bounds = array<i64: 128, 384>}, {transform_indices = @transform_1, window_bounds = array<i64: 384, 128>}, {transform_indices = @transform_2, window_bounds = array<i64: 128, 128>}]} {
    %c0_i32 = arith.constant 0 : i32
    %0 = arith.cmpi eq, %arg2, %c0_i32 : i32
    %1 = arith.extui %0 : i1 to i32
    %c0_i32_0 = arith.constant 0 : i32
    %2 = arith.cmpi ne, %1, %c0_i32_0 : i32
    scf.if %2 {
      %cst_9 = arith.constant 0.000000e+00 : f32
      %12 = vector.broadcast %cst_9 : f32 to vector<128x128xf32>
      %c0_10 = arith.constant 0 : index
      %c0_11 = arith.constant 0 : index
      %13 = vector.load %arg6[%c0_10, %c0_11] : memref<128x128xf32, #tpu.memory_space<vmem>>, vector<128x128xf32>
      tpu.vector_store %arg6[%c0_10, %c0_11], %12 {strides = array<i32>} : memref<128x128xf32, #tpu.memory_space<vmem>>, vector<128x128xf32>,
    } else {
    }
    %c0 = arith.constant 0 : index
    %c0_1 = arith.constant 0 : index
    %3 = vector.load %arg3[%c0, %c0_1] : memref<128x384xbf16, #tpu.memory_space<vmem>>, vector<128x384xbf16>
    %c0_2 = arith.constant 0 : index
    %c0_3 = arith.constant 0 : index
    %4 = vector.load %arg6[%c0_2, %c0_3] : memref<128x128xf32, #tpu.memory_space<vmem>>, vector<128x128xf32>
    %c0_4 = arith.constant 0 : index
    %c0_5 = arith.constant 0 : index
    %5 = vector.load %arg4[%c0_4, %c0_5] : memref<384x128xbf16, #tpu.memory_space<vmem>>, vector<384x128xbf16>
    %cst = arith.constant dense<0.000000e+00> : vector<128x128xf32>
    %6 = tpu.matmul %3, %5, %cst {dimension_numbers = #tpu.dot_dimension_numbers<[1], [0], [0], [1], [0, 0, 1, 1], [], []>} : vector<128x384xbf16>, vector<384x128xbf16>, vector<128x128xf32> -> vector<128x128xf32>
    %7 = arith.addf %4, %6 : vector<128x128xf32>
    %c0_6 = arith.constant 0 : index
    %c0_7 = arith.constant 0 : index
    %8 = vector.load %arg6[%c0_6, %c0_7] : memref<128x128xf32, #tpu.memory_space<vmem>>, vector<128x128xf32>
    tpu.vector_store %arg6[%c0_6, %c0_7], %7 {strides = array<i32>} : memref<128x128xf32, #tpu.memory_space<vmem>>, vector<128x128xf32>,
    %c2_i32 = arith.constant 2 : i32
    %9 = arith.cmpi eq, %arg2, %c2_i32 : i32
    %10 = arith.extui %9 : i1 to i32
    %c0_i32_8 = arith.constant 0 : i32
    %11 = arith.cmpi ne, %10, %c0_i32_8 : i32
    scf.if %11 {
      %c0_9 = arith.constant 0 : index
      %c0_10 = arith.constant 0 : index
      %12 = vector.load %arg6[%c0_9, %c0_10] : memref<128x128xf32, #tpu.memory_space<vmem>>, vector<128x128xf32>
      %13 = arith.truncf %12 : vector<128x128xf32> to vector<128x128xbf16>
      %c0_11 = arith.constant 0 : index
      %c0_12 = arith.constant 0 : index
      %14 = vector.load %arg5[%c0_11, %c0_12] : memref<128x128xbf16, #tpu.memory_space<vmem>>, vector<128x128xbf16>
      tpu.vector_store %arg5[%c0_11, %c0_12], %13 {strides = array<i32>} : memref<128x128xbf16, #tpu.memory_space<vmem>>, vector<128x128xbf16>,
    } else {
    }
    return
  }
  func.func @transform_0(%arg0: i32, %arg1: i32, %arg2: i32) -> (i32, i32) {
    %c0_i32 = arith.constant 0 : i32
    return %arg0, %arg2 : i32, i32
  }
  func.func @transform_1(%arg0: i32, %arg1: i32, %arg2: i32) -> (i32, i32) {
    %c0_i32 = arith.constant 0 : i32
    return %arg2, %arg1 : i32, i32
  }
  func.func @transform_2(%arg0: i32, %arg1: i32, %arg2: i32) -> (i32, i32) {
    %c0_i32 = arith.constant 0 : i32
    return %arg0, %arg1 : i32, i32
  }
}

module attributes {stable_mosaic.version = 11 : i64} {
  func.func @_fused_matmul_kernel(%arg0: i32, %arg1: i32, %arg2: i32, %arg3: memref<128x256xbf16, #tpu.memory_space<vmem>>, %arg4: memref<256x128xbf16, #tpu.memory_space<vmem>>, %arg5: memref<1x256xf32, #tpu.memory_space<vmem>>, %arg6: memref<1x256xf32, #tpu.memory_space<vmem>>, %arg7: memref<1x128xf32, #tpu.memory_space<vmem>>, %arg8: memref<1x128xf32, #tpu.memory_space<vmem>>, %arg9: memref<128x128xbf16, #tpu.memory_space<vmem>>, %arg10: memref<128x128xf32, #tpu.memory_space<vmem>>) attributes {dimension_semantics = [#tpu.dimension_semantics<parallel>, #tpu.dimension_semantics<parallel>, #tpu.dimension_semantics<arbitrary>], iteration_bounds = array<i64: 1, 1, 1>, scalar_prefetch = 0 : i64, scratch_operands = 1 : i64, tpu.core_type = #tpu.core_type<tc>, window_params = [{transform_indices = @transform_0, window_bounds = array<i64: 128, 256>}, {transform_indices = @transform_1, window_bounds = array<i64: 256, 128>}, {transform_indices = @transform_2, window_bounds = array<i64: 1, 256>}, {transform_indices = @transform_3, window_bounds = array<i64: 1, 256>}, {transform_indices = @transform_4, window_bounds = array<i64: 1, 128>}, {transform_indices = @transform_5, window_bounds = array<i64: 1, 128>}, {transform_indices = @transform_6, window_bounds = array<i64: 128, 128>}]} {
    %c0_i32 = arith.constant 0 : i32
    %0 = arith.cmpi eq, %arg2, %c0_i32 : i32
    %1 = arith.extui %0 : i1 to i32
    %c0_i32_0 = arith.constant 0 : i32
    %2 = arith.cmpi ne, %1, %c0_i32_0 : i32
    scf.if %2 {
      %cst_15 = arith.constant 0.000000e+00 : f32
      %22 = vector.broadcast %cst_15 : f32 to vector<128x128xf32>
      %c0_16 = arith.constant 0 : index
      %c0_17 = arith.constant 0 : index
      %23 = vector.load %arg10[%c0_16, %c0_17] : memref<128x128xf32, #tpu.memory_space<vmem>>, vector<128x128xf32>
      tpu.vector_store %arg10[%c0_16, %c0_17], %22 {strides = array<i32>} : memref<128x128xf32, #tpu.memory_space<vmem>>, vector<128x128xf32>,
    } else {
    }
    %c0 = arith.constant 0 : index
    %c0_1 = arith.constant 0 : index
    %3 = vector.load %arg3[%c0, %c0_1] : memref<128x256xbf16, #tpu.memory_space<vmem>>, vector<128x256xbf16>
    %4 = arith.extf %3 : vector<128x256xbf16> to vector<128x256xf32>
    %c0_2 = arith.constant 0 : index
    %c0_3 = arith.constant 0 : index
    %5 = vector.load %arg5[%c0_2, %c0_3] : memref<1x256xf32, #tpu.memory_space<vmem>>, vector<1x256xf32>
    %6 = vector.broadcast %5 : vector<1x256xf32> to vector<128x256xf32>
    %7 = arith.mulf %4, %6 : vector<128x256xf32>
    %c0_4 = arith.constant 0 : index
    %c0_5 = arith.constant 0 : index
    %8 = vector.load %arg6[%c0_4, %c0_5] : memref<1x256xf32, #tpu.memory_space<vmem>>, vector<1x256xf32>
    %9 = vector.broadcast %8 : vector<1x256xf32> to vector<128x256xf32>
    %10 = arith.addf %7, %9 : vector<128x256xf32>
    %cst = arith.constant 0.000000e+00 : f32
    %11 = vector.broadcast %cst : f32 to vector<128x256xf32>
    %12 = arith.maximumf %10, %11 : vector<128x256xf32>
    %13 = arith.truncf %12 : vector<128x256xf32> to vector<128x256xbf16>
    %c0_6 = arith.constant 0 : index
    %c0_7 = arith.constant 0 : index
    %14 = vector.load %arg10[%c0_6, %c0_7] : memref<128x128xf32, #tpu.memory_space<vmem>>, vector<128x128xf32>
    %c0_8 = arith.constant 0 : index
    %c0_9 = arith.constant 0 : index
    %15 = vector.load %arg4[%c0_8, %c0_9] : memref<256x128xbf16, #tpu.memory_space<vmem>>, vector<256x128xbf16>
    %cst_10 = arith.constant dense<0.000000e+00> : vector<128x128xf32>
    %16 = tpu.matmul %13, %15, %cst_10 {dimension_numbers = #tpu.dot_dimension_numbers<[1], [0], [0], [1], [0, 0, 1, 1], [], []>} : vector<128x256xbf16>, vector<256x128xbf16>, vector<128x128xf32> -> vector<128x128xf32>
    %17 = arith.addf %14, %16 : vector<128x128xf32>
    %c0_11 = arith.constant 0 : index
    %c0_12 = arith.constant 0 : index
    %18 = vector.load %arg10[%c0_11, %c0_12] : memref<128x128xf32, #tpu.memory_space<vmem>>, vector<128x128xf32>
    tpu.vector_store %arg10[%c0_11, %c0_12], %17 {strides = array<i32>} : memref<128x128xf32, #tpu.memory_space<vmem>>, vector<128x128xf32>,
    %c0_i32_13 = arith.constant 0 : i32
    %19 = arith.cmpi eq, %arg2, %c0_i32_13 : i32
    %20 = arith.extui %19 : i1 to i32
    %c0_i32_14 = arith.constant 0 : i32
    %21 = arith.cmpi ne, %20, %c0_i32_14 : i32
    scf.if %21 {
      %c0_15 = arith.constant 0 : index
      %c0_16 = arith.constant 0 : index
      %22 = vector.load %arg10[%c0_15, %c0_16] : memref<128x128xf32, #tpu.memory_space<vmem>>, vector<128x128xf32>
      %c0_17 = arith.constant 0 : index
      %c0_18 = arith.constant 0 : index
      %23 = vector.load %arg7[%c0_17, %c0_18] : memref<1x128xf32, #tpu.memory_space<vmem>>, vector<1x128xf32>
      %24 = vector.broadcast %23 : vector<1x128xf32> to vector<128x128xf32>
      %25 = arith.mulf %22, %24 : vector<128x128xf32>
      %c0_19 = arith.constant 0 : index
      %c0_20 = arith.constant 0 : index
      %26 = vector.load %arg8[%c0_19, %c0_20] : memref<1x128xf32, #tpu.memory_space<vmem>>, vector<1x128xf32>
      %27 = vector.broadcast %26 : vector<1x128xf32> to vector<128x128xf32>
      %28 = arith.addf %25, %27 : vector<128x128xf32>
      %cst_21 = arith.constant 0.000000e+00 : f32
      %29 = vector.broadcast %cst_21 : f32 to vector<128x128xf32>
      %30 = arith.maximumf %28, %29 : vector<128x128xf32>
      %31 = arith.truncf %30 : vector<128x128xf32> to vector<128x128xbf16>
      %c0_22 = arith.constant 0 : index
      %c0_23 = arith.constant 0 : index
      %32 = vector.load %arg9[%c0_22, %c0_23] : memref<128x128xbf16, #tpu.memory_space<vmem>>, vector<128x128xbf16>
      tpu.vector_store %arg9[%c0_22, %c0_23], %31 {strides = array<i32>} : memref<128x128xbf16, #tpu.memory_space<vmem>>, vector<128x128xbf16>,
    } else {
    }
    return
  }
  func.func @transform_0(%arg0: i32, %arg1: i32, %arg2: i32) -> (i32, i32) {
    %c0_i32 = arith.constant 0 : i32
    return %arg0, %arg2 : i32, i32
  }
  func.func @transform_1(%arg0: i32, %arg1: i32, %arg2: i32) -> (i32, i32) {
    %c0_i32 = arith.constant 0 : i32
    return %arg2, %arg1 : i32, i32
  }
  func.func @transform_2(%arg0: i32, %arg1: i32, %arg2: i32) -> (i32, i32) {
    %c0_i32 = arith.constant 0 : i32
    %c0_i32_0 = arith.constant 0 : i32
    return %c0_i32, %arg2 : i32, i32
  }
  func.func @transform_3(%arg0: i32, %arg1: i32, %arg2: i32) -> (i32, i32) {
    %c0_i32 = arith.constant 0 : i32
    %c0_i32_0 = arith.constant 0 : i32
    return %c0_i32, %arg2 : i32, i32
  }
  func.func @transform_4(%arg0: i32, %arg1: i32, %arg2: i32) -> (i32, i32) {
    %c0_i32 = arith.constant 0 : i32
    %c0_i32_0 = arith.constant 0 : i32
    return %c0_i32, %arg1 : i32, i32
  }
  func.func @transform_5(%arg0: i32, %arg1: i32, %arg2: i32) -> (i32, i32) {
    %c0_i32 = arith.constant 0 : i32
    %c0_i32_0 = arith.constant 0 : i32
    return %c0_i32, %arg1 : i32, i32
  }
  func.func @transform_6(%arg0: i32, %arg1: i32, %arg2: i32) -> (i32, i32) {
    %c0_i32 = arith.constant 0 : i32
    return %arg0, %arg1 : i32, i32
  }
}

module attributes {stable_mosaic.version = 11 : i64} {
  func.func @_fused_matmul_kernel(%arg0: i32, %arg1: i32, %arg2: i32, %arg3: memref<128x256xbf16, #tpu.memory_space<vmem>>, %arg4: memref<256x128xbf16, #tpu.memory_space<vmem>>, %arg5: memref<1x256xf32, #tpu.memory_space<vmem>>, %arg6: memref<1x256xf32, #tpu.memory_space<vmem>>, %arg7: memref<128x128xbf16, #tpu.memory_space<vmem>>, %arg8: memref<128x128xf32, #tpu.memory_space<vmem>>) attributes {dimension_semantics = [#tpu.dimension_semantics<parallel>, #tpu.dimension_semantics<parallel>, #tpu.dimension_semantics<arbitrary>], iteration_bounds = array<i64: 1, 1, 1>, scalar_prefetch = 0 : i64, scratch_operands = 1 : i64, tpu.core_type = #tpu.core_type<tc>, window_params = [{transform_indices = @transform_0, window_bounds = array<i64: 128, 256>}, {transform_indices = @transform_1, window_bounds = array<i64: 256, 128>}, {transform_indices = @transform_2, window_bounds = array<i64: 1, 256>}, {transform_indices = @transform_3, window_bounds = array<i64: 1, 256>}, {transform_indices = @transform_4, window_bounds = array<i64: 128, 128>}]} {
    %c0_i32 = arith.constant 0 : i32
    %0 = arith.cmpi eq, %arg2, %c0_i32 : i32
    %1 = arith.extui %0 : i1 to i32
    %c0_i32_0 = arith.constant 0 : i32
    %2 = arith.cmpi ne, %1, %c0_i32_0 : i32
    scf.if %2 {
      %cst_15 = arith.constant 0.000000e+00 : f32
      %22 = vector.broadcast %cst_15 : f32 to vector<128x128xf32>
      %c0_16 = arith.constant 0 : index
      %c0_17 = arith.constant 0 : index
      %23 = vector.load %arg8[%c0_16, %c0_17] : memref<128x128xf32, #tpu.memory_space<vmem>>, vector<128x128xf32>
      tpu.vector_store %arg8[%c0_16, %c0_17], %22 {strides = array<i32>} : memref<128x128xf32, #tpu.memory_space<vmem>>, vector<128x128xf32>,
    } else {
    }
    %c0 = arith.constant 0 : index
    %c0_1 = arith.constant 0 : index
    %3 = vector.load %arg3[%c0, %c0_1] : memref<128x256xbf16, #tpu.memory_space<vmem>>, vector<128x256xbf16>
    %4 = arith.extf %3 : vector<128x256xbf16> to vector<128x256xf32>
    %c0_2 = arith.constant 0 : index
    %c0_3 = arith.constant 0 : index
    %5 = vector.load %arg5[%c0_2, %c0_3] : memref<1x256xf32, #tpu.memory_space<vmem>>, vector<1x256xf32>
    %6 = vector.broadcast %5 : vector<1x256xf32> to vector<128x256xf32>
    %7 = arith.mulf %4, %6 : vector<128x256xf32>
    %c0_4 = arith.constant 0 : index
    %c0_5 = arith.constant 0 : index
    %8 = vector.load %arg6[%c0_4, %c0_5] : memref<1x256xf32, #tpu.memory_space<vmem>>, vector<1x256xf32>
    %9 = vector.broadcast %8 : vector<1x256xf32> to vector<128x256xf32>
    %10 = arith.addf %7, %9 : vector<128x256xf32>
    %cst = arith.constant 0.000000e+00 : f32
    %11 = vector.broadcast %cst : f32 to vector<128x256xf32>
    %12 = arith.maximumf %10, %11 : vector<128x256xf32>
    %13 = arith.truncf %12 : vector<128x256xf32> to vector<128x256xbf16>
    %c0_6 = arith.constant 0 : index
    %c0_7 = arith.constant 0 : index
    %14 = vector.load %arg8[%c0_6, %c0_7] : memref<128x128xf32, #tpu.memory_space<vmem>>, vector<128x128xf32>
    %c0_8 = arith.constant 0 : index
    %c0_9 = arith.constant 0 : index
    %15 = vector.load %arg4[%c0_8, %c0_9] : memref<256x128xbf16, #tpu.memory_space<vmem>>, vector<256x128xbf16>
    %cst_10 = arith.constant dense<0.000000e+00> : vector<128x128xf32>
    %16 = tpu.matmul %13, %15, %cst_10 {dimension_numbers = #tpu.dot_dimension_numbers<[1], [0], [0], [1], [0, 0, 1, 1], [], []>} : vector<128x256xbf16>, vector<256x128xbf16>, vector<128x128xf32> -> vector<128x128xf32>
    %17 = arith.addf %14, %16 : vector<128x128xf32>
    %c0_11 = arith.constant 0 : index
    %c0_12 = arith.constant 0 : index
    %18 = vector.load %arg8[%c0_11, %c0_12] : memref<128x128xf32, #tpu.memory_space<vmem>>, vector<128x128xf32>
    tpu.vector_store %arg8[%c0_11, %c0_12], %17 {strides = array<i32>} : memref<128x128xf32, #tpu.memory_space<vmem>>, vector<128x128xf32>,
    %c0_i32_13 = arith.constant 0 : i32
    %19 = arith.cmpi eq, %arg2, %c0_i32_13 : i32
    %20 = arith.extui %19 : i1 to i32
    %c0_i32_14 = arith.constant 0 : i32
    %21 = arith.cmpi ne, %20, %c0_i32_14 : i32
    scf.if %21 {
      %c0_15 = arith.constant 0 : index
      %c0_16 = arith.constant 0 : index
      %22 = vector.load %arg8[%c0_15, %c0_16] : memref<128x128xf32, #tpu.memory_space<vmem>>, vector<128x128xf32>
      %23 = arith.truncf %22 : vector<128x128xf32> to vector<128x128xbf16>
      %c0_17 = arith.constant 0 : index
      %c0_18 = arith.constant 0 : index
      %24 = vector.load %arg7[%c0_17, %c0_18] : memref<128x128xbf16, #tpu.memory_space<vmem>>, vector<128x128xbf16>
      tpu.vector_store %arg7[%c0_17, %c0_18], %23 {strides = array<i32>} : memref<128x128xbf16, #tpu.memory_space<vmem>>, vector<128x128xbf16>,
    } else {
    }
    return
  }
  func.func @transform_0(%arg0: i32, %arg1: i32, %arg2: i32) -> (i32, i32) {
    %c0_i32 = arith.constant 0 : i32
    return %arg0, %arg2 : i32, i32
  }
  func.func @transform_1(%arg0: i32, %arg1: i32, %arg2: i32) -> (i32, i32) {
    %c0_i32 = arith.constant 0 : i32
    return %arg2, %arg1 : i32, i32
  }
  func.func @transform_2(%arg0: i32, %arg1: i32, %arg2: i32) -> (i32, i32) {
    %c0_i32 = arith.constant 0 : i32
    %c0_i32_0 = arith.constant 0 : i32
    return %c0_i32, %arg2 : i32, i32
  }
  func.func @transform_3(%arg0: i32, %arg1: i32, %arg2: i32) -> (i32, i32) {
    %c0_i32 = arith.constant 0 : i32
    %c0_i32_0 = arith.constant 0 : i32
    return %c0_i32, %arg2 : i32, i32
  }
  func.func @transform_4(%arg0: i32, %arg1: i32, %arg2: i32) -> (i32, i32) {
    %c0_i32 = arith.constant 0 : i32
    return %arg0, %arg1 : i32, i32
  }
}

module attributes {stable_mosaic.version = 11 : i64} {
  func.func @_fused_matmul_kernel(%arg0: i32, %arg1: i32, %arg2: i32, %arg3: memref<32x128xbf16, #tpu.memory_space<vmem>>, %arg4: memref<128x128xbf16, #tpu.memory_space<vmem>>, %arg5: memref<1x128xf32, #tpu.memory_space<vmem>>, %arg6: memref<1x128xf32, #tpu.memory_space<vmem>>, %arg7: memref<1x128xf32, #tpu.memory_space<vmem>>, %arg8: memref<1x128xf32, #tpu.memory_space<vmem>>, %arg9: memref<32x128xbf16, #tpu.memory_space<vmem>>, %arg10: memref<32x128xf32, #tpu.memory_space<vmem>>) attributes {dimension_semantics = [#tpu.dimension_semantics<parallel>, #tpu.dimension_semantics<parallel>, #tpu.dimension_semantics<arbitrary>], iteration_bounds = array<i64: 1, 1, 1>, scalar_prefetch = 0 : i64, scratch_operands = 1 : i64, tpu.core_type = #tpu.core_type<tc>, window_params = [{transform_indices = @transform_0, window_bounds = array<i64: 32, 128>}, {transform_indices = @transform_1, window_bounds = array<i64: 128, 128>}, {transform_indices = @transform_2, window_bounds = array<i64: 1, 128>}, {transform_indices = @transform_3, window_bounds = array<i64: 1, 128>}, {transform_indices = @transform_4, window_bounds = array<i64: 1, 128>}, {transform_indices = @transform_5, window_bounds = array<i64: 1, 128>}, {transform_indices = @transform_6, window_bounds = array<i64: 32, 128>}]} {
    %c0_i32 = arith.constant 0 : i32
    %0 = arith.cmpi eq, %arg2, %c0_i32 : i32
    %1 = arith.extui %0 : i1 to i32
    %c0_i32_0 = arith.constant 0 : i32
    %2 = arith.cmpi ne, %1, %c0_i32_0 : i32
    scf.if %2 {
      %cst_15 = arith.constant 0.000000e+00 : f32
      %22 = vector.broadcast %cst_15 : f32 to vector<32x128xf32>
      %c0_16 = arith.constant 0 : index
      %c0_17 = arith.constant 0 : index
      %23 = vector.load %arg10[%c0_16, %c0_17] : memref<32x128xf32, #tpu.memory_space<vmem>>, vector<32x128xf32>
      tpu.vector_store %arg10[%c0_16, %c0_17], %22 {strides = array<i32>} : memref<32x128xf32, #tpu.memory_space<vmem>>, vector<32x128xf32>,
    } else {
    }
    %c0 = arith.constant 0 : index
    %c0_1 = arith.constant 0 : index
    %3 = vector.load %arg3[%c0, %c0_1] : memref<32x128xbf16, #tpu.memory_space<vmem>>, vector<32x128xbf16>
    %4 = arith.extf %3 : vector<32x128xbf16> to vector<32x128xf32>
    %c0_2 = arith.constant 0 : index
    %c0_3 = arith.constant 0 : index
    %5 = vector.load %arg5[%c0_2, %c0_3] : memref<1x128xf32, #tpu.memory_space<vmem>>, vector<1x128xf32>
    %6 = vector.broadcast %5 : vector<1x128xf32> to vector<32x128xf32>
    %7 = arith.mulf %4, %6 : vector<32x128xf32>
    %c0_4 = arith.constant 0 : index
    %c0_5 = arith.constant 0 : index
    %8 = vector.load %arg6[%c0_4, %c0_5] : memref<1x128xf32, #tpu.memory_space<vmem>>, vector<1x128xf32>
    %9 = vector.broadcast %8 : vector<1x128xf32> to vector<32x128xf32>
    %10 = arith.addf %7, %9 : vector<32x128xf32>
    %cst = arith.constant 0.000000e+00 : f32
    %11 = vector.broadcast %cst : f32 to vector<32x128xf32>
    %12 = arith.maximumf %10, %11 : vector<32x128xf32>
    %13 = arith.truncf %12 : vector<32x128xf32> to vector<32x128xbf16>
    %c0_6 = arith.constant 0 : index
    %c0_7 = arith.constant 0 : index
    %14 = vector.load %arg10[%c0_6, %c0_7] : memref<32x128xf32, #tpu.memory_space<vmem>>, vector<32x128xf32>
    %c0_8 = arith.constant 0 : index
    %c0_9 = arith.constant 0 : index
    %15 = vector.load %arg4[%c0_8, %c0_9] : memref<128x128xbf16, #tpu.memory_space<vmem>>, vector<128x128xbf16>
    %cst_10 = arith.constant dense<0.000000e+00> : vector<32x128xf32>
    %16 = tpu.matmul %13, %15, %cst_10 {dimension_numbers = #tpu.dot_dimension_numbers<[1], [0], [0], [1], [0, 0, 1, 1], [], []>} : vector<32x128xbf16>, vector<128x128xbf16>, vector<32x128xf32> -> vector<32x128xf32>
    %17 = arith.addf %14, %16 : vector<32x128xf32>
    %c0_11 = arith.constant 0 : index
    %c0_12 = arith.constant 0 : index
    %18 = vector.load %arg10[%c0_11, %c0_12] : memref<32x128xf32, #tpu.memory_space<vmem>>, vector<32x128xf32>
    tpu.vector_store %arg10[%c0_11, %c0_12], %17 {strides = array<i32>} : memref<32x128xf32, #tpu.memory_space<vmem>>, vector<32x128xf32>,
    %c0_i32_13 = arith.constant 0 : i32
    %19 = arith.cmpi eq, %arg2, %c0_i32_13 : i32
    %20 = arith.extui %19 : i1 to i32
    %c0_i32_14 = arith.constant 0 : i32
    %21 = arith.cmpi ne, %20, %c0_i32_14 : i32
    scf.if %21 {
      %c0_15 = arith.constant 0 : index
      %c0_16 = arith.constant 0 : index
      %22 = vector.load %arg10[%c0_15, %c0_16] : memref<32x128xf32, #tpu.memory_space<vmem>>, vector<32x128xf32>
      %c0_17 = arith.constant 0 : index
      %c0_18 = arith.constant 0 : index
      %23 = vector.load %arg7[%c0_17, %c0_18] : memref<1x128xf32, #tpu.memory_space<vmem>>, vector<1x128xf32>
      %24 = vector.broadcast %23 : vector<1x128xf32> to vector<32x128xf32>
      %25 = arith.mulf %22, %24 : vector<32x128xf32>
      %c0_19 = arith.constant 0 : index
      %c0_20 = arith.constant 0 : index
      %26 = vector.load %arg8[%c0_19, %c0_20] : memref<1x128xf32, #tpu.memory_space<vmem>>, vector<1x128xf32>
      %27 = vector.broadcast %26 : vector<1x128xf32> to vector<32x128xf32>
      %28 = arith.addf %25, %27 : vector<32x128xf32>
      %cst_21 = arith.constant 0.000000e+00 : f32
      %29 = vector.broadcast %cst_21 : f32 to vector<32x128xf32>
      %30 = arith.maximumf %28, %29 : vector<32x128xf32>
      %31 = arith.truncf %30 : vector<32x128xf32> to vector<32x128xbf16>
      %c0_22 = arith.constant 0 : index
      %c0_23 = arith.constant 0 : index
      %32 = vector.load %arg9[%c0_22, %c0_23] : memref<32x128xbf16, #tpu.memory_space<vmem>>, vector<32x128xbf16>
      tpu.vector_store %arg9[%c0_22, %c0_23], %31 {strides = array<i32>} : memref<32x128xbf16, #tpu.memory_space<vmem>>, vector<32x128xbf16>,
    } else {
    }
    return
  }
  func.func @transform_0(%arg0: i32, %arg1: i32, %arg2: i32) -> (i32, i32) {
    %c0_i32 = arith.constant 0 : i32
    return %arg0, %arg2 : i32, i32
  }
  func.func @transform_1(%arg0: i32, %arg1: i32, %arg2: i32) -> (i32, i32) {
    %c0_i32 = arith.constant 0 : i32
    return %arg2, %arg1 : i32, i32
  }
  func.func @transform_2(%arg0: i32, %arg1: i32, %arg2: i32) -> (i32, i32) {
    %c0_i32 = arith.constant 0 : i32
    %c0_i32_0 = arith.constant 0 : i32
    return %c0_i32, %arg2 : i32, i32
  }
  func.func @transform_3(%arg0: i32, %arg1: i32, %arg2: i32) -> (i32, i32) {
    %c0_i32 = arith.constant 0 : i32
    %c0_i32_0 = arith.constant 0 : i32
    return %c0_i32, %arg2 : i32, i32
  }
  func.func @transform_4(%arg0: i32, %arg1: i32, %arg2: i32) -> (i32, i32) {
    %c0_i32 = arith.constant 0 : i32
    %c0_i32_0 = arith.constant 0 : i32
    return %c0_i32, %arg1 : i32, i32
  }
  func.func @transform_5(%arg0: i32, %arg1: i32, %arg2: i32) -> (i32, i32) {
    %c0_i32 = arith.constant 0 : i32
    %c0_i32_0 = arith.constant 0 : i32
    return %c0_i32, %arg1 : i32, i32
  }
  func.func @transform_6(%arg0: i32, %arg1: i32, %arg2: i32) -> (i32, i32) {
    %c0_i32 = arith.constant 0 : i32
    return %arg0, %arg1 : i32, i32
  }
}

module attributes {stable_mosaic.version = 11 : i64} {
  func.func @_fused_matmul_kernel(%arg0: i32, %arg1: i32, %arg2: i32, %arg3: memref<32x384xbf16, #tpu.memory_space<vmem>>, %arg4: memref<384x128xbf16, #tpu.memory_space<vmem>>, %arg5: memref<32x128xbf16, #tpu.memory_space<vmem>>, %arg6: memref<32x128xf32, #tpu.memory_space<vmem>>) attributes {dimension_semantics = [#tpu.dimension_semantics<parallel>, #tpu.dimension_semantics<parallel>, #tpu.dimension_semantics<arbitrary>], iteration_bounds = array<i64: 1, 1, 3>, scalar_prefetch = 0 : i64, scratch_operands = 1 : i64, tpu.core_type = #tpu.core_type<tc>, window_params = [{transform_indices = @transform_0, window_bounds = array<i64: 32, 384>}, {transform_indices = @transform_1, window_bounds = array<i64: 384, 128>}, {transform_indices = @transform_2, window_bounds = array<i64: 32, 128>}]} {
    %c0_i32 = arith.constant 0 : i32
    %0 = arith.cmpi eq, %arg2, %c0_i32 : i32
    %1 = arith.extui %0 : i1 to i32
    %c0_i32_0 = arith.constant 0 : i32
    %2 = arith.cmpi ne, %1, %c0_i32_0 : i32
    scf.if %2 {
      %cst_9 = arith.constant 0.000000e+00 : f32
      %12 = vector.broadcast %cst_9 : f32 to vector<32x128xf32>
      %c0_10 = arith.constant 0 : index
      %c0_11 = arith.constant 0 : index
      %13 = vector.load %arg6[%c0_10, %c0_11] : memref<32x128xf32, #tpu.memory_space<vmem>>, vector<32x128xf32>
      tpu.vector_store %arg6[%c0_10, %c0_11], %12 {strides = array<i32>} : memref<32x128xf32, #tpu.memory_space<vmem>>, vector<32x128xf32>,
    } else {
    }
    %c0 = arith.constant 0 : index
    %c0_1 = arith.constant 0 : index
    %3 = vector.load %arg3[%c0, %c0_1] : memref<32x384xbf16, #tpu.memory_space<vmem>>, vector<32x384xbf16>
    %c0_2 = arith.constant 0 : index
    %c0_3 = arith.constant 0 : index
    %4 = vector.load %arg6[%c0_2, %c0_3] : memref<32x128xf32, #tpu.memory_space<vmem>>, vector<32x128xf32>
    %c0_4 = arith.constant 0 : index
    %c0_5 = arith.constant 0 : index
    %5 = vector.load %arg4[%c0_4, %c0_5] : memref<384x128xbf16, #tpu.memory_space<vmem>>, vector<384x128xbf16>
    %cst = arith.constant dense<0.000000e+00> : vector<32x128xf32>
    %6 = tpu.matmul %3, %5, %cst {dimension_numbers = #tpu.dot_dimension_numbers<[1], [0], [0], [1], [0, 0, 1, 1], [], []>} : vector<32x384xbf16>, vector<384x128xbf16>, vector<32x128xf32> -> vector<32x128xf32>
    %7 = arith.addf %4, %6 : vector<32x128xf32>
    %c0_6 = arith.constant 0 : index
    %c0_7 = arith.constant 0 : index
    %8 = vector.load %arg6[%c0_6, %c0_7] : memref<32x128xf32, #tpu.memory_space<vmem>>, vector<32x128xf32>
    tpu.vector_store %arg6[%c0_6, %c0_7], %7 {strides = array<i32>} : memref<32x128xf32, #tpu.memory_space<vmem>>, vector<32x128xf32>,
    %c2_i32 = arith.constant 2 : i32
    %9 = arith.cmpi eq, %arg2, %c2_i32 : i32
    %10 = arith.extui %9 : i1 to i32
    %c0_i32_8 = arith.constant 0 : i32
    %11 = arith.cmpi ne, %10, %c0_i32_8 : i32
    scf.if %11 {
      %c0_9 = arith.constant 0 : index
      %c0_10 = arith.constant 0 : index
      %12 = vector.load %arg6[%c0_9, %c0_10] : memref<32x128xf32, #tpu.memory_space<vmem>>, vector<32x128xf32>
      %13 = arith.truncf %12 : vector<32x128xf32> to vector<32x128xbf16>
      %c0_11 = arith.constant 0 : index
      %c0_12 = arith.constant 0 : index
      %14 = vector.load %arg5[%c0_11, %c0_12] : memref<32x128xbf16, #tpu.memory_space<vmem>>, vector<32x128xbf16>
      tpu.vector_store %arg5[%c0_11, %c0_12], %13 {strides = array<i32>} : memref<32x128xbf16, #tpu.memory_space<vmem>>, vector<32x128xbf16>,
    } else {
    }
    return
  }
  func.func @transform_0(%arg0: i32, %arg1: i32, %arg2: i32) -> (i32, i32) {
    %c0_i32 = arith.constant 0 : i32
    return %arg0, %arg2 : i32, i32
  }
  func.func @transform_1(%arg0: i32, %arg1: i32, %arg2: i32) -> (i32, i32) {
    %c0_i32 = arith.constant 0 : i32
    return %arg2, %arg1 : i32, i32
  }
  func.func @transform_2(%arg0: i32, %arg1: i32, %arg2: i32) -> (i32, i32) {
    %c0_i32 = arith.constant 0 : i32
    return %arg0, %arg1 : i32, i32
  }
}

module attributes {stable_mosaic.version = 11 : i64} {
  func.func @_fused_matmul_kernel(%arg0: i32, %arg1: i32, %arg2: i32, %arg3: memref<32x256xbf16, #tpu.memory_space<vmem>>, %arg4: memref<256x128xbf16, #tpu.memory_space<vmem>>, %arg5: memref<1x256xf32, #tpu.memory_space<vmem>>, %arg6: memref<1x256xf32, #tpu.memory_space<vmem>>, %arg7: memref<1x128xf32, #tpu.memory_space<vmem>>, %arg8: memref<1x128xf32, #tpu.memory_space<vmem>>, %arg9: memref<32x128xbf16, #tpu.memory_space<vmem>>, %arg10: memref<32x128xf32, #tpu.memory_space<vmem>>) attributes {dimension_semantics = [#tpu.dimension_semantics<parallel>, #tpu.dimension_semantics<parallel>, #tpu.dimension_semantics<arbitrary>], iteration_bounds = array<i64: 1, 1, 1>, scalar_prefetch = 0 : i64, scratch_operands = 1 : i64, tpu.core_type = #tpu.core_type<tc>, window_params = [{transform_indices = @transform_0, window_bounds = array<i64: 32, 256>}, {transform_indices = @transform_1, window_bounds = array<i64: 256, 128>}, {transform_indices = @transform_2, window_bounds = array<i64: 1, 256>}, {transform_indices = @transform_3, window_bounds = array<i64: 1, 256>}, {transform_indices = @transform_4, window_bounds = array<i64: 1, 128>}, {transform_indices = @transform_5, window_bounds = array<i64: 1, 128>}, {transform_indices = @transform_6, window_bounds = array<i64: 32, 128>}]} {
    %c0_i32 = arith.constant 0 : i32
    %0 = arith.cmpi eq, %arg2, %c0_i32 : i32
    %1 = arith.extui %0 : i1 to i32
    %c0_i32_0 = arith.constant 0 : i32
    %2 = arith.cmpi ne, %1, %c0_i32_0 : i32
    scf.if %2 {
      %cst_15 = arith.constant 0.000000e+00 : f32
      %22 = vector.broadcast %cst_15 : f32 to vector<32x128xf32>
      %c0_16 = arith.constant 0 : index
      %c0_17 = arith.constant 0 : index
      %23 = vector.load %arg10[%c0_16, %c0_17] : memref<32x128xf32, #tpu.memory_space<vmem>>, vector<32x128xf32>
      tpu.vector_store %arg10[%c0_16, %c0_17], %22 {strides = array<i32>} : memref<32x128xf32, #tpu.memory_space<vmem>>, vector<32x128xf32>,
    } else {
    }
    %c0 = arith.constant 0 : index
    %c0_1 = arith.constant 0 : index
    %3 = vector.load %arg3[%c0, %c0_1] : memref<32x256xbf16, #tpu.memory_space<vmem>>, vector<32x256xbf16>
    %4 = arith.extf %3 : vector<32x256xbf16> to vector<32x256xf32>
    %c0_2 = arith.constant 0 : index
    %c0_3 = arith.constant 0 : index
    %5 = vector.load %arg5[%c0_2, %c0_3] : memref<1x256xf32, #tpu.memory_space<vmem>>, vector<1x256xf32>
    %6 = vector.broadcast %5 : vector<1x256xf32> to vector<32x256xf32>
    %7 = arith.mulf %4, %6 : vector<32x256xf32>
    %c0_4 = arith.constant 0 : index
    %c0_5 = arith.constant 0 : index
    %8 = vector.load %arg6[%c0_4, %c0_5] : memref<1x256xf32, #tpu.memory_space<vmem>>, vector<1x256xf32>
    %9 = vector.broadcast %8 : vector<1x256xf32> to vector<32x256xf32>
    %10 = arith.addf %7, %9 : vector<32x256xf32>
    %cst = arith.constant 0.000000e+00 : f32
    %11 = vector.broadcast %cst : f32 to vector<32x256xf32>
    %12 = arith.maximumf %10, %11 : vector<32x256xf32>
    %13 = arith.truncf %12 : vector<32x256xf32> to vector<32x256xbf16>
    %c0_6 = arith.constant 0 : index
    %c0_7 = arith.constant 0 : index
    %14 = vector.load %arg10[%c0_6, %c0_7] : memref<32x128xf32, #tpu.memory_space<vmem>>, vector<32x128xf32>
    %c0_8 = arith.constant 0 : index
    %c0_9 = arith.constant 0 : index
    %15 = vector.load %arg4[%c0_8, %c0_9] : memref<256x128xbf16, #tpu.memory_space<vmem>>, vector<256x128xbf16>
    %cst_10 = arith.constant dense<0.000000e+00> : vector<32x128xf32>
    %16 = tpu.matmul %13, %15, %cst_10 {dimension_numbers = #tpu.dot_dimension_numbers<[1], [0], [0], [1], [0, 0, 1, 1], [], []>} : vector<32x256xbf16>, vector<256x128xbf16>, vector<32x128xf32> -> vector<32x128xf32>
    %17 = arith.addf %14, %16 : vector<32x128xf32>
    %c0_11 = arith.constant 0 : index
    %c0_12 = arith.constant 0 : index
    %18 = vector.load %arg10[%c0_11, %c0_12] : memref<32x128xf32, #tpu.memory_space<vmem>>, vector<32x128xf32>
    tpu.vector_store %arg10[%c0_11, %c0_12], %17 {strides = array<i32>} : memref<32x128xf32, #tpu.memory_space<vmem>>, vector<32x128xf32>,
    %c0_i32_13 = arith.constant 0 : i32
    %19 = arith.cmpi eq, %arg2, %c0_i32_13 : i32
    %20 = arith.extui %19 : i1 to i32
    %c0_i32_14 = arith.constant 0 : i32
    %21 = arith.cmpi ne, %20, %c0_i32_14 : i32
    scf.if %21 {
      %c0_15 = arith.constant 0 : index
      %c0_16 = arith.constant 0 : index
      %22 = vector.load %arg10[%c0_15, %c0_16] : memref<32x128xf32, #tpu.memory_space<vmem>>, vector<32x128xf32>
      %c0_17 = arith.constant 0 : index
      %c0_18 = arith.constant 0 : index
      %23 = vector.load %arg7[%c0_17, %c0_18] : memref<1x128xf32, #tpu.memory_space<vmem>>, vector<1x128xf32>
      %24 = vector.broadcast %23 : vector<1x128xf32> to vector<32x128xf32>
      %25 = arith.mulf %22, %24 : vector<32x128xf32>
      %c0_19 = arith.constant 0 : index
      %c0_20 = arith.constant 0 : index
      %26 = vector.load %arg8[%c0_19, %c0_20] : memref<1x128xf32, #tpu.memory_space<vmem>>, vector<1x128xf32>
      %27 = vector.broadcast %26 : vector<1x128xf32> to vector<32x128xf32>
      %28 = arith.addf %25, %27 : vector<32x128xf32>
      %cst_21 = arith.constant 0.000000e+00 : f32
      %29 = vector.broadcast %cst_21 : f32 to vector<32x128xf32>
      %30 = arith.maximumf %28, %29 : vector<32x128xf32>
      %31 = arith.truncf %30 : vector<32x128xf32> to vector<32x128xbf16>
      %c0_22 = arith.constant 0 : index
      %c0_23 = arith.constant 0 : index
      %32 = vector.load %arg9[%c0_22, %c0_23] : memref<32x128xbf16, #tpu.memory_space<vmem>>, vector<32x128xbf16>
      tpu.vector_store %arg9[%c0_22, %c0_23], %31 {strides = array<i32>} : memref<32x128xbf16, #tpu.memory_space<vmem>>, vector<32x128xbf16>,
    } else {
    }
    return
  }
  func.func @transform_0(%arg0: i32, %arg1: i32, %arg2: i32) -> (i32, i32) {
    %c0_i32 = arith.constant 0 : i32
    return %arg0, %arg2 : i32, i32
  }
  func.func @transform_1(%arg0: i32, %arg1: i32, %arg2: i32) -> (i32, i32) {
    %c0_i32 = arith.constant 0 : i32
    return %arg2, %arg1 : i32, i32
  }
  func.func @transform_2(%arg0: i32, %arg1: i32, %arg2: i32) -> (i32, i32) {
    %c0_i32 = arith.constant 0 : i32
    %c0_i32_0 = arith.constant 0 : i32
    return %c0_i32, %arg2 : i32, i32
  }
  func.func @transform_3(%arg0: i32, %arg1: i32, %arg2: i32) -> (i32, i32) {
    %c0_i32 = arith.constant 0 : i32
    %c0_i32_0 = arith.constant 0 : i32
    return %c0_i32, %arg2 : i32, i32
  }
  func.func @transform_4(%arg0: i32, %arg1: i32, %arg2: i32) -> (i32, i32) {
    %c0_i32 = arith.constant 0 : i32
    %c0_i32_0 = arith.constant 0 : i32
    return %c0_i32, %arg1 : i32, i32
  }
  func.func @transform_5(%arg0: i32, %arg1: i32, %arg2: i32) -> (i32, i32) {
    %c0_i32 = arith.constant 0 : i32
    %c0_i32_0 = arith.constant 0 : i32
    return %c0_i32, %arg1 : i32, i32
  }
  func.func @transform_6(%arg0: i32, %arg1: i32, %arg2: i32) -> (i32, i32) {
    %c0_i32 = arith.constant 0 : i32
    return %arg0, %arg1 : i32, i32
  }
}

module attributes {stable_mosaic.version = 11 : i64} {
  func.func @_fused_matmul_kernel(%arg0: i32, %arg1: i32, %arg2: i32, %arg3: memref<32x384xbf16, #tpu.memory_space<vmem>>, %arg4: memref<384x128xbf16, #tpu.memory_space<vmem>>, %arg5: memref<1x384xf32, #tpu.memory_space<vmem>>, %arg6: memref<1x384xf32, #tpu.memory_space<vmem>>, %arg7: memref<1x128xf32, #tpu.memory_space<vmem>>, %arg8: memref<1x128xf32, #tpu.memory_space<vmem>>, %arg9: memref<32x128xbf16, #tpu.memory_space<vmem>>, %arg10: memref<32x128xf32, #tpu.memory_space<vmem>>) attributes {dimension_semantics = [#tpu.dimension_semantics<parallel>, #tpu.dimension_semantics<parallel>, #tpu.dimension_semantics<arbitrary>], iteration_bounds = array<i64: 1, 1, 1>, scalar_prefetch = 0 : i64, scratch_operands = 1 : i64, tpu.core_type = #tpu.core_type<tc>, window_params = [{transform_indices = @transform_0, window_bounds = array<i64: 32, 384>}, {transform_indices = @transform_1, window_bounds = array<i64: 384, 128>}, {transform_indices = @transform_2, window_bounds = array<i64: 1, 384>}, {transform_indices = @transform_3, window_bounds = array<i64: 1, 384>}, {transform_indices = @transform_4, window_bounds = array<i64: 1, 128>}, {transform_indices = @transform_5, window_bounds = array<i64: 1, 128>}, {transform_indices = @transform_6, window_bounds = array<i64: 32, 128>}]} {
    %c0_i32 = arith.constant 0 : i32
    %0 = arith.cmpi eq, %arg2, %c0_i32 : i32
    %1 = arith.extui %0 : i1 to i32
    %c0_i32_0 = arith.constant 0 : i32
    %2 = arith.cmpi ne, %1, %c0_i32_0 : i32
    scf.if %2 {
      %cst_15 = arith.constant 0.000000e+00 : f32
      %22 = vector.broadcast %cst_15 : f32 to vector<32x128xf32>
      %c0_16 = arith.constant 0 : index
      %c0_17 = arith.constant 0 : index
      %23 = vector.load %arg10[%c0_16, %c0_17] : memref<32x128xf32, #tpu.memory_space<vmem>>, vector<32x128xf32>
      tpu.vector_store %arg10[%c0_16, %c0_17], %22 {strides = array<i32>} : memref<32x128xf32, #tpu.memory_space<vmem>>, vector<32x128xf32>,
    } else {
    }
    %c0 = arith.constant 0 : index
    %c0_1 = arith.constant 0 : index
    %3 = vector.load %arg3[%c0, %c0_1] : memref<32x384xbf16, #tpu.memory_space<vmem>>, vector<32x384xbf16>
    %4 = arith.extf %3 : vector<32x384xbf16> to vector<32x384xf32>
    %c0_2 = arith.constant 0 : index
    %c0_3 = arith.constant 0 : index
    %5 = vector.load %arg5[%c0_2, %c0_3] : memref<1x384xf32, #tpu.memory_space<vmem>>, vector<1x384xf32>
    %6 = vector.broadcast %5 : vector<1x384xf32> to vector<32x384xf32>
    %7 = arith.mulf %4, %6 : vector<32x384xf32>
    %c0_4 = arith.constant 0 : index
    %c0_5 = arith.constant 0 : index
    %8 = vector.load %arg6[%c0_4, %c0_5] : memref<1x384xf32, #tpu.memory_space<vmem>>, vector<1x384xf32>
    %9 = vector.broadcast %8 : vector<1x384xf32> to vector<32x384xf32>
    %10 = arith.addf %7, %9 : vector<32x384xf32>
    %cst = arith.constant 0.000000e+00 : f32
    %11 = vector.broadcast %cst : f32 to vector<32x384xf32>
    %12 = arith.maximumf %10, %11 : vector<32x384xf32>
    %13 = arith.truncf %12 : vector<32x384xf32> to vector<32x384xbf16>
    %c0_6 = arith.constant 0 : index
    %c0_7 = arith.constant 0 : index
    %14 = vector.load %arg10[%c0_6, %c0_7] : memref<32x128xf32, #tpu.memory_space<vmem>>, vector<32x128xf32>
    %c0_8 = arith.constant 0 : index
    %c0_9 = arith.constant 0 : index
    %15 = vector.load %arg4[%c0_8, %c0_9] : memref<384x128xbf16, #tpu.memory_space<vmem>>, vector<384x128xbf16>
    %cst_10 = arith.constant dense<0.000000e+00> : vector<32x128xf32>
    %16 = tpu.matmul %13, %15, %cst_10 {dimension_numbers = #tpu.dot_dimension_numbers<[1], [0], [0], [1], [0, 0, 1, 1], [], []>} : vector<32x384xbf16>, vector<384x128xbf16>, vector<32x128xf32> -> vector<32x128xf32>
    %17 = arith.addf %14, %16 : vector<32x128xf32>
    %c0_11 = arith.constant 0 : index
    %c0_12 = arith.constant 0 : index
    %18 = vector.load %arg10[%c0_11, %c0_12] : memref<32x128xf32, #tpu.memory_space<vmem>>, vector<32x128xf32>
    tpu.vector_store %arg10[%c0_11, %c0_12], %17 {strides = array<i32>} : memref<32x128xf32, #tpu.memory_space<vmem>>, vector<32x128xf32>,
    %c0_i32_13 = arith.constant 0 : i32
    %19 = arith.cmpi eq, %arg2, %c0_i32_13 : i32
    %20 = arith.extui %19 : i1 to i32
    %c0_i32_14 = arith.constant 0 : i32
    %21 = arith.cmpi ne, %20, %c0_i32_14 : i32
    scf.if %21 {
      %c0_15 = arith.constant 0 : index
      %c0_16 = arith.constant 0 : index
      %22 = vector.load %arg10[%c0_15, %c0_16] : memref<32x128xf32, #tpu.memory_space<vmem>>, vector<32x128xf32>
      %c0_17 = arith.constant 0 : index
      %c0_18 = arith.constant 0 : index
      %23 = vector.load %arg7[%c0_17, %c0_18] : memref<1x128xf32, #tpu.memory_space<vmem>>, vector<1x128xf32>
      %24 = vector.broadcast %23 : vector<1x128xf32> to vector<32x128xf32>
      %25 = arith.mulf %22, %24 : vector<32x128xf32>
      %c0_19 = arith.constant 0 : index
      %c0_20 = arith.constant 0 : index
      %26 = vector.load %arg8[%c0_19, %c0_20] : memref<1x128xf32, #tpu.memory_space<vmem>>, vector<1x128xf32>
      %27 = vector.broadcast %26 : vector<1x128xf32> to vector<32x128xf32>
      %28 = arith.addf %25, %27 : vector<32x128xf32>
      %cst_21 = arith.constant 0.000000e+00 : f32
      %29 = vector.broadcast %cst_21 : f32 to vector<32x128xf32>
      %30 = arith.maximumf %28, %29 : vector<32x128xf32>
      %31 = arith.truncf %30 : vector<32x128xf32> to vector<32x128xbf16>
      %c0_22 = arith.constant 0 : index
      %c0_23 = arith.constant 0 : index
      %32 = vector.load %arg9[%c0_22, %c0_23] : memref<32x128xbf16, #tpu.memory_space<vmem>>, vector<32x128xbf16>
      tpu.vector_store %arg9[%c0_22, %c0_23], %31 {strides = array<i32>} : memref<32x128xbf16, #tpu.memory_space<vmem>>, vector<32x128xbf16>,
    } else {
    }
    return
  }
  func.func @transform_0(%arg0: i32, %arg1: i32, %arg2: i32) -> (i32, i32) {
    %c0_i32 = arith.constant 0 : i32
    return %arg0, %arg2 : i32, i32
  }
  func.func @transform_1(%arg0: i32, %arg1: i32, %arg2: i32) -> (i32, i32) {
    %c0_i32 = arith.constant 0 : i32
    return %arg2, %arg1 : i32, i32
  }
  func.func @transform_2(%arg0: i32, %arg1: i32, %arg2: i32) -> (i32, i32) {
    %c0_i32 = arith.constant 0 : i32
    %c0_i32_0 = arith.constant 0 : i32
    return %c0_i32, %arg2 : i32, i32
  }
  func.func @transform_3(%arg0: i32, %arg1: i32, %arg2: i32) -> (i32, i32) {
    %c0_i32 = arith.constant 0 : i32
    %c0_i32_0 = arith.constant 0 : i32
    return %c0_i32, %arg2 : i32, i32
  }
  func.func @transform_4(%arg0: i32, %arg1: i32, %arg2: i32) -> (i32, i32) {
    %c0_i32 = arith.constant 0 : i32
    %c0_i32_0 = arith.constant 0 : i32
    return %c0_i32, %arg1 : i32, i32
  }
  func.func @transform_5(%arg0: i32, %arg1: i32, %arg2: i32) -> (i32, i32) {
    %c0_i32 = arith.constant 0 : i32
    %c0_i32_0 = arith.constant 0 : i32
    return %c0_i32, %arg1 : i32, i32
  }
  func.func @transform_6(%arg0: i32, %arg1: i32, %arg2: i32) -> (i32, i32) {
    %c0_i32 = arith.constant 0 : i32
    return %arg0, %arg1 : i32, i32
  }
}

module attributes {stable_mosaic.version = 11 : i64} {
  func.func @_fused_matmul_kernel(%arg0: i32, %arg1: i32, %arg2: i32, %arg3: memref<32x512xbf16, #tpu.memory_space<vmem>>, %arg4: memref<512x128xbf16, #tpu.memory_space<vmem>>, %arg5: memref<1x512xf32, #tpu.memory_space<vmem>>, %arg6: memref<1x512xf32, #tpu.memory_space<vmem>>, %arg7: memref<1x128xf32, #tpu.memory_space<vmem>>, %arg8: memref<1x128xf32, #tpu.memory_space<vmem>>, %arg9: memref<32x128xbf16, #tpu.memory_space<vmem>>, %arg10: memref<32x128xf32, #tpu.memory_space<vmem>>) attributes {dimension_semantics = [#tpu.dimension_semantics<parallel>, #tpu.dimension_semantics<parallel>, #tpu.dimension_semantics<arbitrary>], iteration_bounds = array<i64: 1, 1, 1>, scalar_prefetch = 0 : i64, scratch_operands = 1 : i64, tpu.core_type = #tpu.core_type<tc>, window_params = [{transform_indices = @transform_0, window_bounds = array<i64: 32, 512>}, {transform_indices = @transform_1, window_bounds = array<i64: 512, 128>}, {transform_indices = @transform_2, window_bounds = array<i64: 1, 512>}, {transform_indices = @transform_3, window_bounds = array<i64: 1, 512>}, {transform_indices = @transform_4, window_bounds = array<i64: 1, 128>}, {transform_indices = @transform_5, window_bounds = array<i64: 1, 128>}, {transform_indices = @transform_6, window_bounds = array<i64: 32, 128>}]} {
    %c0_i32 = arith.constant 0 : i32
    %0 = arith.cmpi eq, %arg2, %c0_i32 : i32
    %1 = arith.extui %0 : i1 to i32
    %c0_i32_0 = arith.constant 0 : i32
    %2 = arith.cmpi ne, %1, %c0_i32_0 : i32
    scf.if %2 {
      %cst_15 = arith.constant 0.000000e+00 : f32
      %22 = vector.broadcast %cst_15 : f32 to vector<32x128xf32>
      %c0_16 = arith.constant 0 : index
      %c0_17 = arith.constant 0 : index
      %23 = vector.load %arg10[%c0_16, %c0_17] : memref<32x128xf32, #tpu.memory_space<vmem>>, vector<32x128xf32>
      tpu.vector_store %arg10[%c0_16, %c0_17], %22 {strides = array<i32>} : memref<32x128xf32, #tpu.memory_space<vmem>>, vector<32x128xf32>,
    } else {
    }
    %c0 = arith.constant 0 : index
    %c0_1 = arith.constant 0 : index
    %3 = vector.load %arg3[%c0, %c0_1] : memref<32x512xbf16, #tpu.memory_space<vmem>>, vector<32x512xbf16>
    %4 = arith.extf %3 : vector<32x512xbf16> to vector<32x512xf32>
    %c0_2 = arith.constant 0 : index
    %c0_3 = arith.constant 0 : index
    %5 = vector.load %arg5[%c0_2, %c0_3] : memref<1x512xf32, #tpu.memory_space<vmem>>, vector<1x512xf32>
    %6 = vector.broadcast %5 : vector<1x512xf32> to vector<32x512xf32>
    %7 = arith.mulf %4, %6 : vector<32x512xf32>
    %c0_4 = arith.constant 0 : index
    %c0_5 = arith.constant 0 : index
    %8 = vector.load %arg6[%c0_4, %c0_5] : memref<1x512xf32, #tpu.memory_space<vmem>>, vector<1x512xf32>
    %9 = vector.broadcast %8 : vector<1x512xf32> to vector<32x512xf32>
    %10 = arith.addf %7, %9 : vector<32x512xf32>
    %cst = arith.constant 0.000000e+00 : f32
    %11 = vector.broadcast %cst : f32 to vector<32x512xf32>
    %12 = arith.maximumf %10, %11 : vector<32x512xf32>
    %13 = arith.truncf %12 : vector<32x512xf32> to vector<32x512xbf16>
    %c0_6 = arith.constant 0 : index
    %c0_7 = arith.constant 0 : index
    %14 = vector.load %arg10[%c0_6, %c0_7] : memref<32x128xf32, #tpu.memory_space<vmem>>, vector<32x128xf32>
    %c0_8 = arith.constant 0 : index
    %c0_9 = arith.constant 0 : index
    %15 = vector.load %arg4[%c0_8, %c0_9] : memref<512x128xbf16, #tpu.memory_space<vmem>>, vector<512x128xbf16>
    %cst_10 = arith.constant dense<0.000000e+00> : vector<32x128xf32>
    %16 = tpu.matmul %13, %15, %cst_10 {dimension_numbers = #tpu.dot_dimension_numbers<[1], [0], [0], [1], [0, 0, 1, 1], [], []>} : vector<32x512xbf16>, vector<512x128xbf16>, vector<32x128xf32> -> vector<32x128xf32>
    %17 = arith.addf %14, %16 : vector<32x128xf32>
    %c0_11 = arith.constant 0 : index
    %c0_12 = arith.constant 0 : index
    %18 = vector.load %arg10[%c0_11, %c0_12] : memref<32x128xf32, #tpu.memory_space<vmem>>, vector<32x128xf32>
    tpu.vector_store %arg10[%c0_11, %c0_12], %17 {strides = array<i32>} : memref<32x128xf32, #tpu.memory_space<vmem>>, vector<32x128xf32>,
    %c0_i32_13 = arith.constant 0 : i32
    %19 = arith.cmpi eq, %arg2, %c0_i32_13 : i32
    %20 = arith.extui %19 : i1 to i32
    %c0_i32_14 = arith.constant 0 : i32
    %21 = arith.cmpi ne, %20, %c0_i32_14 : i32
    scf.if %21 {
      %c0_15 = arith.constant 0 : index
      %c0_16 = arith.constant 0 : index
      %22 = vector.load %arg10[%c0_15, %c0_16] : memref<32x128xf32, #tpu.memory_space<vmem>>, vector<32x128xf32>
      %c0_17 = arith.constant 0 : index
      %c0_18 = arith.constant 0 : index
      %23 = vector.load %arg7[%c0_17, %c0_18] : memref<1x128xf32, #tpu.memory_space<vmem>>, vector<1x128xf32>
      %24 = vector.broadcast %23 : vector<1x128xf32> to vector<32x128xf32>
      %25 = arith.mulf %22, %24 : vector<32x128xf32>
      %c0_19 = arith.constant 0 : index
      %c0_20 = arith.constant 0 : index
      %26 = vector.load %arg8[%c0_19, %c0_20] : memref<1x128xf32, #tpu.memory_space<vmem>>, vector<1x128xf32>
      %27 = vector.broadcast %26 : vector<1x128xf32> to vector<32x128xf32>
      %28 = arith.addf %25, %27 : vector<32x128xf32>
      %cst_21 = arith.constant 0.000000e+00 : f32
      %29 = vector.broadcast %cst_21 : f32 to vector<32x128xf32>
      %30 = arith.maximumf %28, %29 : vector<32x128xf32>
      %31 = arith.truncf %30 : vector<32x128xf32> to vector<32x128xbf16>
      %c0_22 = arith.constant 0 : index
      %c0_23 = arith.constant 0 : index
      %32 = vector.load %arg9[%c0_22, %c0_23] : memref<32x128xbf16, #tpu.memory_space<vmem>>, vector<32x128xbf16>
      tpu.vector_store %arg9[%c0_22, %c0_23], %31 {strides = array<i32>} : memref<32x128xbf16, #tpu.memory_space<vmem>>, vector<32x128xbf16>,
    } else {
    }
    return
  }
  func.func @transform_0(%arg0: i32, %arg1: i32, %arg2: i32) -> (i32, i32) {
    %c0_i32 = arith.constant 0 : i32
    return %arg0, %arg2 : i32, i32
  }
  func.func @transform_1(%arg0: i32, %arg1: i32, %arg2: i32) -> (i32, i32) {
    %c0_i32 = arith.constant 0 : i32
    return %arg2, %arg1 : i32, i32
  }
  func.func @transform_2(%arg0: i32, %arg1: i32, %arg2: i32) -> (i32, i32) {
    %c0_i32 = arith.constant 0 : i32
    %c0_i32_0 = arith.constant 0 : i32
    return %c0_i32, %arg2 : i32, i32
  }
  func.func @transform_3(%arg0: i32, %arg1: i32, %arg2: i32) -> (i32, i32) {
    %c0_i32 = arith.constant 0 : i32
    %c0_i32_0 = arith.constant 0 : i32
    return %c0_i32, %arg2 : i32, i32
  }
  func.func @transform_4(%arg0: i32, %arg1: i32, %arg2: i32) -> (i32, i32) {
    %c0_i32 = arith.constant 0 : i32
    %c0_i32_0 = arith.constant 0 : i32
    return %c0_i32, %arg1 : i32, i32
  }
  func.func @transform_5(%arg0: i32, %arg1: i32, %arg2: i32) -> (i32, i32) {
    %c0_i32 = arith.constant 0 : i32
    %c0_i32_0 = arith.constant 0 : i32
    return %c0_i32, %arg1 : i32, i32
  }
  func.func @transform_6(%arg0: i32, %arg1: i32, %arg2: i32) -> (i32, i32) {
    %c0_i32 = arith.constant 0 : i32
    return %arg0, %arg1 : i32, i32
  }
}

module attributes {stable_mosaic.version = 11 : i64} {
  func.func @_fused_matmul_kernel(%arg0: i32, %arg1: i32, %arg2: i32, %arg3: memref<32x512xbf16, #tpu.memory_space<vmem>>, %arg4: memref<512x256xbf16, #tpu.memory_space<vmem>>, %arg5: memref<1x512xf32, #tpu.memory_space<vmem>>, %arg6: memref<1x512xf32, #tpu.memory_space<vmem>>, %arg7: memref<32x256xbf16, #tpu.memory_space<vmem>>, %arg8: memref<32x256xf32, #tpu.memory_space<vmem>>) attributes {dimension_semantics = [#tpu.dimension_semantics<parallel>, #tpu.dimension_semantics<parallel>, #tpu.dimension_semantics<arbitrary>], iteration_bounds = array<i64: 1, 1, 1>, scalar_prefetch = 0 : i64, scratch_operands = 1 : i64, tpu.core_type = #tpu.core_type<tc>, window_params = [{transform_indices = @transform_0, window_bounds = array<i64: 32, 512>}, {transform_indices = @transform_1, window_bounds = array<i64: 512, 256>}, {transform_indices = @transform_2, window_bounds = array<i64: 1, 512>}, {transform_indices = @transform_3, window_bounds = array<i64: 1, 512>}, {transform_indices = @transform_4, window_bounds = array<i64: 32, 256>}]} {
    %c0_i32 = arith.constant 0 : i32
    %0 = arith.cmpi eq, %arg2, %c0_i32 : i32
    %1 = arith.extui %0 : i1 to i32
    %c0_i32_0 = arith.constant 0 : i32
    %2 = arith.cmpi ne, %1, %c0_i32_0 : i32
    scf.if %2 {
      %cst_15 = arith.constant 0.000000e+00 : f32
      %22 = vector.broadcast %cst_15 : f32 to vector<32x256xf32>
      %c0_16 = arith.constant 0 : index
      %c0_17 = arith.constant 0 : index
      %23 = vector.load %arg8[%c0_16, %c0_17] : memref<32x256xf32, #tpu.memory_space<vmem>>, vector<32x256xf32>
      tpu.vector_store %arg8[%c0_16, %c0_17], %22 {strides = array<i32>} : memref<32x256xf32, #tpu.memory_space<vmem>>, vector<32x256xf32>,
    } else {
    }
    %c0 = arith.constant 0 : index
    %c0_1 = arith.constant 0 : index
    %3 = vector.load %arg3[%c0, %c0_1] : memref<32x512xbf16, #tpu.memory_space<vmem>>, vector<32x512xbf16>
    %4 = arith.extf %3 : vector<32x512xbf16> to vector<32x512xf32>
    %c0_2 = arith.constant 0 : index
    %c0_3 = arith.constant 0 : index
    %5 = vector.load %arg5[%c0_2, %c0_3] : memref<1x512xf32, #tpu.memory_space<vmem>>, vector<1x512xf32>
    %6 = vector.broadcast %5 : vector<1x512xf32> to vector<32x512xf32>
    %7 = arith.mulf %4, %6 : vector<32x512xf32>
    %c0_4 = arith.constant 0 : index
    %c0_5 = arith.constant 0 : index
    %8 = vector.load %arg6[%c0_4, %c0_5] : memref<1x512xf32, #tpu.memory_space<vmem>>, vector<1x512xf32>
    %9 = vector.broadcast %8 : vector<1x512xf32> to vector<32x512xf32>
    %10 = arith.addf %7, %9 : vector<32x512xf32>
    %cst = arith.constant 0.000000e+00 : f32
    %11 = vector.broadcast %cst : f32 to vector<32x512xf32>
    %12 = arith.maximumf %10, %11 : vector<32x512xf32>
    %13 = arith.truncf %12 : vector<32x512xf32> to vector<32x512xbf16>
    %c0_6 = arith.constant 0 : index
    %c0_7 = arith.constant 0 : index
    %14 = vector.load %arg8[%c0_6, %c0_7] : memref<32x256xf32, #tpu.memory_space<vmem>>, vector<32x256xf32>
    %c0_8 = arith.constant 0 : index
    %c0_9 = arith.constant 0 : index
    %15 = vector.load %arg4[%c0_8, %c0_9] : memref<512x256xbf16, #tpu.memory_space<vmem>>, vector<512x256xbf16>
    %cst_10 = arith.constant dense<0.000000e+00> : vector<32x256xf32>
    %16 = tpu.matmul %13, %15, %cst_10 {dimension_numbers = #tpu.dot_dimension_numbers<[1], [0], [0], [1], [0, 0, 1, 1], [], []>} : vector<32x512xbf16>, vector<512x256xbf16>, vector<32x256xf32> -> vector<32x256xf32>
    %17 = arith.addf %14, %16 : vector<32x256xf32>
    %c0_11 = arith.constant 0 : index
    %c0_12 = arith.constant 0 : index
    %18 = vector.load %arg8[%c0_11, %c0_12] : memref<32x256xf32, #tpu.memory_space<vmem>>, vector<32x256xf32>
    tpu.vector_store %arg8[%c0_11, %c0_12], %17 {strides = array<i32>} : memref<32x256xf32, #tpu.memory_space<vmem>>, vector<32x256xf32>,
    %c0_i32_13 = arith.constant 0 : i32
    %19 = arith.cmpi eq, %arg2, %c0_i32_13 : i32
    %20 = arith.extui %19 : i1 to i32
    %c0_i32_14 = arith.constant 0 : i32
    %21 = arith.cmpi ne, %20, %c0_i32_14 : i32
    scf.if %21 {
      %c0_15 = arith.constant 0 : index
      %c0_16 = arith.constant 0 : index
      %22 = vector.load %arg8[%c0_15, %c0_16] : memref<32x256xf32, #tpu.memory_space<vmem>>, vector<32x256xf32>
      %23 = arith.truncf %22 : vector<32x256xf32> to vector<32x256xbf16>
      %c0_17 = arith.constant 0 : index
      %c0_18 = arith.constant 0 : index
      %24 = vector.load %arg7[%c0_17, %c0_18] : memref<32x256xbf16, #tpu.memory_space<vmem>>, vector<32x256xbf16>
      tpu.vector_store %arg7[%c0_17, %c0_18], %23 {strides = array<i32>} : memref<32x256xbf16, #tpu.memory_space<vmem>>, vector<32x256xbf16>,
    } else {
    }
    return
  }
  func.func @transform_0(%arg0: i32, %arg1: i32, %arg2: i32) -> (i32, i32) {
    %c0_i32 = arith.constant 0 : i32
    return %arg0, %arg2 : i32, i32
  }
  func.func @transform_1(%arg0: i32, %arg1: i32, %arg2: i32) -> (i32, i32) {
    %c0_i32 = arith.constant 0 : i32
    return %arg2, %arg1 : i32, i32
  }
  func.func @transform_2(%arg0: i32, %arg1: i32, %arg2: i32) -> (i32, i32) {
    %c0_i32 = arith.constant 0 : i32
    %c0_i32_0 = arith.constant 0 : i32
    return %c0_i32, %arg2 : i32, i32
  }
  func.func @transform_3(%arg0: i32, %arg1: i32, %arg2: i32) -> (i32, i32) {
    %c0_i32 = arith.constant 0 : i32
    %c0_i32_0 = arith.constant 0 : i32
    return %c0_i32, %arg2 : i32, i32
  }
  func.func @transform_4(%arg0: i32, %arg1: i32, %arg2: i32) -> (i32, i32) {
    %c0_i32 = arith.constant 0 : i32
    return %arg0, %arg1 : i32, i32
  }
}

module attributes {stable_mosaic.version = 11 : i64} {
  func.func @_fused_matmul_kernel(%arg0: i32, %arg1: i32, %arg2: i32, %arg3: memref<8x256xbf16, #tpu.memory_space<vmem>>, %arg4: memref<256x128xbf16, #tpu.memory_space<vmem>>, %arg5: memref<1x256xf32, #tpu.memory_space<vmem>>, %arg6: memref<1x256xf32, #tpu.memory_space<vmem>>, %arg7: memref<1x128xf32, #tpu.memory_space<vmem>>, %arg8: memref<1x128xf32, #tpu.memory_space<vmem>>, %arg9: memref<8x128xbf16, #tpu.memory_space<vmem>>, %arg10: memref<8x128xf32, #tpu.memory_space<vmem>>) attributes {dimension_semantics = [#tpu.dimension_semantics<parallel>, #tpu.dimension_semantics<parallel>, #tpu.dimension_semantics<arbitrary>], iteration_bounds = array<i64: 1, 1, 1>, scalar_prefetch = 0 : i64, scratch_operands = 1 : i64, tpu.core_type = #tpu.core_type<tc>, window_params = [{transform_indices = @transform_0, window_bounds = array<i64: 8, 256>}, {transform_indices = @transform_1, window_bounds = array<i64: 256, 128>}, {transform_indices = @transform_2, window_bounds = array<i64: 1, 256>}, {transform_indices = @transform_3, window_bounds = array<i64: 1, 256>}, {transform_indices = @transform_4, window_bounds = array<i64: 1, 128>}, {transform_indices = @transform_5, window_bounds = array<i64: 1, 128>}, {transform_indices = @transform_6, window_bounds = array<i64: 8, 128>}]} {
    %c0_i32 = arith.constant 0 : i32
    %0 = arith.cmpi eq, %arg2, %c0_i32 : i32
    %1 = arith.extui %0 : i1 to i32
    %c0_i32_0 = arith.constant 0 : i32
    %2 = arith.cmpi ne, %1, %c0_i32_0 : i32
    scf.if %2 {
      %cst_15 = arith.constant 0.000000e+00 : f32
      %22 = vector.broadcast %cst_15 : f32 to vector<8x128xf32>
      %c0_16 = arith.constant 0 : index
      %c0_17 = arith.constant 0 : index
      %23 = vector.load %arg10[%c0_16, %c0_17] : memref<8x128xf32, #tpu.memory_space<vmem>>, vector<8x128xf32>
      tpu.vector_store %arg10[%c0_16, %c0_17], %22 {strides = array<i32>} : memref<8x128xf32, #tpu.memory_space<vmem>>, vector<8x128xf32>,
    } else {
    }
    %c0 = arith.constant 0 : index
    %c0_1 = arith.constant 0 : index
    %3 = vector.load %arg3[%c0, %c0_1] : memref<8x256xbf16, #tpu.memory_space<vmem>>, vector<8x256xbf16>
    %4 = arith.extf %3 : vector<8x256xbf16> to vector<8x256xf32>
    %c0_2 = arith.constant 0 : index
    %c0_3 = arith.constant 0 : index
    %5 = vector.load %arg5[%c0_2, %c0_3] : memref<1x256xf32, #tpu.memory_space<vmem>>, vector<1x256xf32>
    %6 = vector.broadcast %5 : vector<1x256xf32> to vector<8x256xf32>
    %7 = arith.mulf %4, %6 : vector<8x256xf32>
    %c0_4 = arith.constant 0 : index
    %c0_5 = arith.constant 0 : index
    %8 = vector.load %arg6[%c0_4, %c0_5] : memref<1x256xf32, #tpu.memory_space<vmem>>, vector<1x256xf32>
    %9 = vector.broadcast %8 : vector<1x256xf32> to vector<8x256xf32>
    %10 = arith.addf %7, %9 : vector<8x256xf32>
    %cst = arith.constant 0.000000e+00 : f32
    %11 = vector.broadcast %cst : f32 to vector<8x256xf32>
    %12 = arith.maximumf %10, %11 : vector<8x256xf32>
    %13 = arith.truncf %12 : vector<8x256xf32> to vector<8x256xbf16>
    %c0_6 = arith.constant 0 : index
    %c0_7 = arith.constant 0 : index
    %14 = vector.load %arg10[%c0_6, %c0_7] : memref<8x128xf32, #tpu.memory_space<vmem>>, vector<8x128xf32>
    %c0_8 = arith.constant 0 : index
    %c0_9 = arith.constant 0 : index
    %15 = vector.load %arg4[%c0_8, %c0_9] : memref<256x128xbf16, #tpu.memory_space<vmem>>, vector<256x128xbf16>
    %cst_10 = arith.constant dense<0.000000e+00> : vector<8x128xf32>
    %16 = tpu.matmul %13, %15, %cst_10 {dimension_numbers = #tpu.dot_dimension_numbers<[1], [0], [0], [1], [0, 0, 1, 1], [], []>} : vector<8x256xbf16>, vector<256x128xbf16>, vector<8x128xf32> -> vector<8x128xf32>
    %17 = arith.addf %14, %16 : vector<8x128xf32>
    %c0_11 = arith.constant 0 : index
    %c0_12 = arith.constant 0 : index
    %18 = vector.load %arg10[%c0_11, %c0_12] : memref<8x128xf32, #tpu.memory_space<vmem>>, vector<8x128xf32>
    tpu.vector_store %arg10[%c0_11, %c0_12], %17 {strides = array<i32>} : memref<8x128xf32, #tpu.memory_space<vmem>>, vector<8x128xf32>,
    %c0_i32_13 = arith.constant 0 : i32
    %19 = arith.cmpi eq, %arg2, %c0_i32_13 : i32
    %20 = arith.extui %19 : i1 to i32
    %c0_i32_14 = arith.constant 0 : i32
    %21 = arith.cmpi ne, %20, %c0_i32_14 : i32
    scf.if %21 {
      %c0_15 = arith.constant 0 : index
      %c0_16 = arith.constant 0 : index
      %22 = vector.load %arg10[%c0_15, %c0_16] : memref<8x128xf32, #tpu.memory_space<vmem>>, vector<8x128xf32>
      %c0_17 = arith.constant 0 : index
      %c0_18 = arith.constant 0 : index
      %23 = vector.load %arg7[%c0_17, %c0_18] : memref<1x128xf32, #tpu.memory_space<vmem>>, vector<1x128xf32>
      %24 = vector.broadcast %23 : vector<1x128xf32> to vector<8x128xf32>
      %25 = arith.mulf %22, %24 : vector<8x128xf32>
      %c0_19 = arith.constant 0 : index
      %c0_20 = arith.constant 0 : index
      %26 = vector.load %arg8[%c0_19, %c0_20] : memref<1x128xf32, #tpu.memory_space<vmem>>, vector<1x128xf32>
      %27 = vector.broadcast %26 : vector<1x128xf32> to vector<8x128xf32>
      %28 = arith.addf %25, %27 : vector<8x128xf32>
      %cst_21 = arith.constant 0.000000e+00 : f32
      %29 = vector.broadcast %cst_21 : f32 to vector<8x128xf32>
      %30 = arith.maximumf %28, %29 : vector<8x128xf32>
      %31 = arith.truncf %30 : vector<8x128xf32> to vector<8x128xbf16>
      %c0_22 = arith.constant 0 : index
      %c0_23 = arith.constant 0 : index
      %32 = vector.load %arg9[%c0_22, %c0_23] : memref<8x128xbf16, #tpu.memory_space<vmem>>, vector<8x128xbf16>
      tpu.vector_store %arg9[%c0_22, %c0_23], %31 {strides = array<i32>} : memref<8x128xbf16, #tpu.memory_space<vmem>>, vector<8x128xbf16>,
    } else {
    }
    return
  }
  func.func @transform_0(%arg0: i32, %arg1: i32, %arg2: i32) -> (i32, i32) {
    %c0_i32 = arith.constant 0 : i32
    return %arg0, %arg2 : i32, i32
  }
  func.func @transform_1(%arg0: i32, %arg1: i32, %arg2: i32) -> (i32, i32) {
    %c0_i32 = arith.constant 0 : i32
    return %arg2, %arg1 : i32, i32
  }
  func.func @transform_2(%arg0: i32, %arg1: i32, %arg2: i32) -> (i32, i32) {
    %c0_i32 = arith.constant 0 : i32
    %c0_i32_0 = arith.constant 0 : i32
    return %c0_i32, %arg2 : i32, i32
  }
  func.func @transform_3(%arg0: i32, %arg1: i32, %arg2: i32) -> (i32, i32) {
    %c0_i32 = arith.constant 0 : i32
    %c0_i32_0 = arith.constant 0 : i32
    return %c0_i32, %arg2 : i32, i32
  }
  func.func @transform_4(%arg0: i32, %arg1: i32, %arg2: i32) -> (i32, i32) {
    %c0_i32 = arith.constant 0 : i32
    %c0_i32_0 = arith.constant 0 : i32
    return %c0_i32, %arg1 : i32, i32
  }
  func.func @transform_5(%arg0: i32, %arg1: i32, %arg2: i32) -> (i32, i32) {
    %c0_i32 = arith.constant 0 : i32
    %c0_i32_0 = arith.constant 0 : i32
    return %c0_i32, %arg1 : i32, i32
  }
  func.func @transform_6(%arg0: i32, %arg1: i32, %arg2: i32) -> (i32, i32) {
    %c0_i32 = arith.constant 0 : i32
    return %arg0, %arg1 : i32, i32
  }
}

module attributes {stable_mosaic.version = 11 : i64} {
  func.func @_fused_matmul_kernel(%arg0: i32, %arg1: i32, %arg2: i32, %arg3: memref<8x384xbf16, #tpu.memory_space<vmem>>, %arg4: memref<384x128xbf16, #tpu.memory_space<vmem>>, %arg5: memref<8x128xbf16, #tpu.memory_space<vmem>>, %arg6: memref<8x128xf32, #tpu.memory_space<vmem>>) attributes {dimension_semantics = [#tpu.dimension_semantics<parallel>, #tpu.dimension_semantics<parallel>, #tpu.dimension_semantics<arbitrary>], iteration_bounds = array<i64: 1, 1, 3>, scalar_prefetch = 0 : i64, scratch_operands = 1 : i64, tpu.core_type = #tpu.core_type<tc>, window_params = [{transform_indices = @transform_0, window_bounds = array<i64: 8, 384>}, {transform_indices = @transform_1, window_bounds = array<i64: 384, 128>}, {transform_indices = @transform_2, window_bounds = array<i64: 8, 128>}]} {
    %c0_i32 = arith.constant 0 : i32
    %0 = arith.cmpi eq, %arg2, %c0_i32 : i32
    %1 = arith.extui %0 : i1 to i32
    %c0_i32_0 = arith.constant 0 : i32
    %2 = arith.cmpi ne, %1, %c0_i32_0 : i32
    scf.if %2 {
      %cst_9 = arith.constant 0.000000e+00 : f32
      %12 = vector.broadcast %cst_9 : f32 to vector<8x128xf32>
      %c0_10 = arith.constant 0 : index
      %c0_11 = arith.constant 0 : index
      %13 = vector.load %arg6[%c0_10, %c0_11] : memref<8x128xf32, #tpu.memory_space<vmem>>, vector<8x128xf32>
      tpu.vector_store %arg6[%c0_10, %c0_11], %12 {strides = array<i32>} : memref<8x128xf32, #tpu.memory_space<vmem>>, vector<8x128xf32>,
    } else {
    }
    %c0 = arith.constant 0 : index
    %c0_1 = arith.constant 0 : index
    %3 = vector.load %arg3[%c0, %c0_1] : memref<8x384xbf16, #tpu.memory_space<vmem>>, vector<8x384xbf16>
    %c0_2 = arith.constant 0 : index
    %c0_3 = arith.constant 0 : index
    %4 = vector.load %arg6[%c0_2, %c0_3] : memref<8x128xf32, #tpu.memory_space<vmem>>, vector<8x128xf32>
    %c0_4 = arith.constant 0 : index
    %c0_5 = arith.constant 0 : index
    %5 = vector.load %arg4[%c0_4, %c0_5] : memref<384x128xbf16, #tpu.memory_space<vmem>>, vector<384x128xbf16>
    %cst = arith.constant dense<0.000000e+00> : vector<8x128xf32>
    %6 = tpu.matmul %3, %5, %cst {dimension_numbers = #tpu.dot_dimension_numbers<[1], [0], [0], [1], [0, 0, 1, 1], [], []>} : vector<8x384xbf16>, vector<384x128xbf16>, vector<8x128xf32> -> vector<8x128xf32>
    %7 = arith.addf %4, %6 : vector<8x128xf32>
    %c0_6 = arith.constant 0 : index
    %c0_7 = arith.constant 0 : index
    %8 = vector.load %arg6[%c0_6, %c0_7] : memref<8x128xf32, #tpu.memory_space<vmem>>, vector<8x128xf32>
    tpu.vector_store %arg6[%c0_6, %c0_7], %7 {strides = array<i32>} : memref<8x128xf32, #tpu.memory_space<vmem>>, vector<8x128xf32>,
    %c2_i32 = arith.constant 2 : i32
    %9 = arith.cmpi eq, %arg2, %c2_i32 : i32
    %10 = arith.extui %9 : i1 to i32
    %c0_i32_8 = arith.constant 0 : i32
    %11 = arith.cmpi ne, %10, %c0_i32_8 : i32
    scf.if %11 {
      %c0_9 = arith.constant 0 : index
      %c0_10 = arith.constant 0 : index
      %12 = vector.load %arg6[%c0_9, %c0_10] : memref<8x128xf32, #tpu.memory_space<vmem>>, vector<8x128xf32>
      %13 = arith.truncf %12 : vector<8x128xf32> to vector<8x128xbf16>
      %c0_11 = arith.constant 0 : index
      %c0_12 = arith.constant 0 : index
      %14 = vector.load %arg5[%c0_11, %c0_12] : memref<8x128xbf16, #tpu.memory_space<vmem>>, vector<8x128xbf16>
      tpu.vector_store %arg5[%c0_11, %c0_12], %13 {strides = array<i32>} : memref<8x128xbf16, #tpu.memory_space<vmem>>, vector<8x128xbf16>,
    } else {
    }
    return
  }
  func.func @transform_0(%arg0: i32, %arg1: i32, %arg2: i32) -> (i32, i32) {
    %c0_i32 = arith.constant 0 : i32
    return %arg0, %arg2 : i32, i32
  }
  func.func @transform_1(%arg0: i32, %arg1: i32, %arg2: i32) -> (i32, i32) {
    %c0_i32 = arith.constant 0 : i32
    return %arg2, %arg1 : i32, i32
  }
  func.func @transform_2(%arg0: i32, %arg1: i32, %arg2: i32) -> (i32, i32) {
    %c0_i32 = arith.constant 0 : i32
    return %arg0, %arg1 : i32, i32
  }
}

module attributes {stable_mosaic.version = 11 : i64} {
  func.func @_fused_matmul_kernel(%arg0: i32, %arg1: i32, %arg2: i32, %arg3: memref<8x384xbf16, #tpu.memory_space<vmem>>, %arg4: memref<384x128xbf16, #tpu.memory_space<vmem>>, %arg5: memref<1x384xf32, #tpu.memory_space<vmem>>, %arg6: memref<1x384xf32, #tpu.memory_space<vmem>>, %arg7: memref<1x128xf32, #tpu.memory_space<vmem>>, %arg8: memref<1x128xf32, #tpu.memory_space<vmem>>, %arg9: memref<8x128xbf16, #tpu.memory_space<vmem>>, %arg10: memref<8x128xf32, #tpu.memory_space<vmem>>) attributes {dimension_semantics = [#tpu.dimension_semantics<parallel>, #tpu.dimension_semantics<parallel>, #tpu.dimension_semantics<arbitrary>], iteration_bounds = array<i64: 1, 1, 1>, scalar_prefetch = 0 : i64, scratch_operands = 1 : i64, tpu.core_type = #tpu.core_type<tc>, window_params = [{transform_indices = @transform_0, window_bounds = array<i64: 8, 384>}, {transform_indices = @transform_1, window_bounds = array<i64: 384, 128>}, {transform_indices = @transform_2, window_bounds = array<i64: 1, 384>}, {transform_indices = @transform_3, window_bounds = array<i64: 1, 384>}, {transform_indices = @transform_4, window_bounds = array<i64: 1, 128>}, {transform_indices = @transform_5, window_bounds = array<i64: 1, 128>}, {transform_indices = @transform_6, window_bounds = array<i64: 8, 128>}]} {
    %c0_i32 = arith.constant 0 : i32
    %0 = arith.cmpi eq, %arg2, %c0_i32 : i32
    %1 = arith.extui %0 : i1 to i32
    %c0_i32_0 = arith.constant 0 : i32
    %2 = arith.cmpi ne, %1, %c0_i32_0 : i32
    scf.if %2 {
      %cst_15 = arith.constant 0.000000e+00 : f32
      %22 = vector.broadcast %cst_15 : f32 to vector<8x128xf32>
      %c0_16 = arith.constant 0 : index
      %c0_17 = arith.constant 0 : index
      %23 = vector.load %arg10[%c0_16, %c0_17] : memref<8x128xf32, #tpu.memory_space<vmem>>, vector<8x128xf32>
      tpu.vector_store %arg10[%c0_16, %c0_17], %22 {strides = array<i32>} : memref<8x128xf32, #tpu.memory_space<vmem>>, vector<8x128xf32>,
    } else {
    }
    %c0 = arith.constant 0 : index
    %c0_1 = arith.constant 0 : index
    %3 = vector.load %arg3[%c0, %c0_1] : memref<8x384xbf16, #tpu.memory_space<vmem>>, vector<8x384xbf16>
    %4 = arith.extf %3 : vector<8x384xbf16> to vector<8x384xf32>
    %c0_2 = arith.constant 0 : index
    %c0_3 = arith.constant 0 : index
    %5 = vector.load %arg5[%c0_2, %c0_3] : memref<1x384xf32, #tpu.memory_space<vmem>>, vector<1x384xf32>
    %6 = vector.broadcast %5 : vector<1x384xf32> to vector<8x384xf32>
    %7 = arith.mulf %4, %6 : vector<8x384xf32>
    %c0_4 = arith.constant 0 : index
    %c0_5 = arith.constant 0 : index
    %8 = vector.load %arg6[%c0_4, %c0_5] : memref<1x384xf32, #tpu.memory_space<vmem>>, vector<1x384xf32>
    %9 = vector.broadcast %8 : vector<1x384xf32> to vector<8x384xf32>
    %10 = arith.addf %7, %9 : vector<8x384xf32>
    %cst = arith.constant 0.000000e+00 : f32
    %11 = vector.broadcast %cst : f32 to vector<8x384xf32>
    %12 = arith.maximumf %10, %11 : vector<8x384xf32>
    %13 = arith.truncf %12 : vector<8x384xf32> to vector<8x384xbf16>
    %c0_6 = arith.constant 0 : index
    %c0_7 = arith.constant 0 : index
    %14 = vector.load %arg10[%c0_6, %c0_7] : memref<8x128xf32, #tpu.memory_space<vmem>>, vector<8x128xf32>
    %c0_8 = arith.constant 0 : index
    %c0_9 = arith.constant 0 : index
    %15 = vector.load %arg4[%c0_8, %c0_9] : memref<384x128xbf16, #tpu.memory_space<vmem>>, vector<384x128xbf16>
    %cst_10 = arith.constant dense<0.000000e+00> : vector<8x128xf32>
    %16 = tpu.matmul %13, %15, %cst_10 {dimension_numbers = #tpu.dot_dimension_numbers<[1], [0], [0], [1], [0, 0, 1, 1], [], []>} : vector<8x384xbf16>, vector<384x128xbf16>, vector<8x128xf32> -> vector<8x128xf32>
    %17 = arith.addf %14, %16 : vector<8x128xf32>
    %c0_11 = arith.constant 0 : index
    %c0_12 = arith.constant 0 : index
    %18 = vector.load %arg10[%c0_11, %c0_12] : memref<8x128xf32, #tpu.memory_space<vmem>>, vector<8x128xf32>
    tpu.vector_store %arg10[%c0_11, %c0_12], %17 {strides = array<i32>} : memref<8x128xf32, #tpu.memory_space<vmem>>, vector<8x128xf32>,
    %c0_i32_13 = arith.constant 0 : i32
    %19 = arith.cmpi eq, %arg2, %c0_i32_13 : i32
    %20 = arith.extui %19 : i1 to i32
    %c0_i32_14 = arith.constant 0 : i32
    %21 = arith.cmpi ne, %20, %c0_i32_14 : i32
    scf.if %21 {
      %c0_15 = arith.constant 0 : index
      %c0_16 = arith.constant 0 : index
      %22 = vector.load %arg10[%c0_15, %c0_16] : memref<8x128xf32, #tpu.memory_space<vmem>>, vector<8x128xf32>
      %c0_17 = arith.constant 0 : index
      %c0_18 = arith.constant 0 : index
      %23 = vector.load %arg7[%c0_17, %c0_18] : memref<1x128xf32, #tpu.memory_space<vmem>>, vector<1x128xf32>
      %24 = vector.broadcast %23 : vector<1x128xf32> to vector<8x128xf32>
      %25 = arith.mulf %22, %24 : vector<8x128xf32>
      %c0_19 = arith.constant 0 : index
      %c0_20 = arith.constant 0 : index
      %26 = vector.load %arg8[%c0_19, %c0_20] : memref<1x128xf32, #tpu.memory_space<vmem>>, vector<1x128xf32>
      %27 = vector.broadcast %26 : vector<1x128xf32> to vector<8x128xf32>
      %28 = arith.addf %25, %27 : vector<8x128xf32>
      %cst_21 = arith.constant 0.000000e+00 : f32
      %29 = vector.broadcast %cst_21 : f32 to vector<8x128xf32>
      %30 = arith.maximumf %28, %29 : vector<8x128xf32>
      %31 = arith.truncf %30 : vector<8x128xf32> to vector<8x128xbf16>
      %c0_22 = arith.constant 0 : index
      %c0_23 = arith.constant 0 : index
      %32 = vector.load %arg9[%c0_22, %c0_23] : memref<8x128xbf16, #tpu.memory_space<vmem>>, vector<8x128xbf16>
      tpu.vector_store %arg9[%c0_22, %c0_23], %31 {strides = array<i32>} : memref<8x128xbf16, #tpu.memory_space<vmem>>, vector<8x128xbf16>,
    } else {
    }
    return
  }
  func.func @transform_0(%arg0: i32, %arg1: i32, %arg2: i32) -> (i32, i32) {
    %c0_i32 = arith.constant 0 : i32
    return %arg0, %arg2 : i32, i32
  }
  func.func @transform_1(%arg0: i32, %arg1: i32, %arg2: i32) -> (i32, i32) {
    %c0_i32 = arith.constant 0 : i32
    return %arg2, %arg1 : i32, i32
  }
  func.func @transform_2(%arg0: i32, %arg1: i32, %arg2: i32) -> (i32, i32) {
    %c0_i32 = arith.constant 0 : i32
    %c0_i32_0 = arith.constant 0 : i32
    return %c0_i32, %arg2 : i32, i32
  }
  func.func @transform_3(%arg0: i32, %arg1: i32, %arg2: i32) -> (i32, i32) {
    %c0_i32 = arith.constant 0 : i32
    %c0_i32_0 = arith.constant 0 : i32
    return %c0_i32, %arg2 : i32, i32
  }
  func.func @transform_4(%arg0: i32, %arg1: i32, %arg2: i32) -> (i32, i32) {
    %c0_i32 = arith.constant 0 : i32
    %c0_i32_0 = arith.constant 0 : i32
    return %c0_i32, %arg1 : i32, i32
  }
  func.func @transform_5(%arg0: i32, %arg1: i32, %arg2: i32) -> (i32, i32) {
    %c0_i32 = arith.constant 0 : i32
    %c0_i32_0 = arith.constant 0 : i32
    return %c0_i32, %arg1 : i32, i32
  }
  func.func @transform_6(%arg0: i32, %arg1: i32, %arg2: i32) -> (i32, i32) {
    %c0_i32 = arith.constant 0 : i32
    return %arg0, %arg1 : i32, i32
  }
}

module attributes {stable_mosaic.version = 11 : i64} {
  func.func @_fused_matmul_kernel(%arg0: i32, %arg1: i32, %arg2: i32, %arg3: memref<8x512xbf16, #tpu.memory_space<vmem>>, %arg4: memref<512x128xbf16, #tpu.memory_space<vmem>>, %arg5: memref<1x512xf32, #tpu.memory_space<vmem>>, %arg6: memref<1x512xf32, #tpu.memory_space<vmem>>, %arg7: memref<1x128xf32, #tpu.memory_space<vmem>>, %arg8: memref<1x128xf32, #tpu.memory_space<vmem>>, %arg9: memref<8x128xbf16, #tpu.memory_space<vmem>>, %arg10: memref<8x128xf32, #tpu.memory_space<vmem>>) attributes {dimension_semantics = [#tpu.dimension_semantics<parallel>, #tpu.dimension_semantics<parallel>, #tpu.dimension_semantics<arbitrary>], iteration_bounds = array<i64: 1, 1, 1>, scalar_prefetch = 0 : i64, scratch_operands = 1 : i64, tpu.core_type = #tpu.core_type<tc>, window_params = [{transform_indices = @transform_0, window_bounds = array<i64: 8, 512>}, {transform_indices = @transform_1, window_bounds = array<i64: 512, 128>}, {transform_indices = @transform_2, window_bounds = array<i64: 1, 512>}, {transform_indices = @transform_3, window_bounds = array<i64: 1, 512>}, {transform_indices = @transform_4, window_bounds = array<i64: 1, 128>}, {transform_indices = @transform_5, window_bounds = array<i64: 1, 128>}, {transform_indices = @transform_6, window_bounds = array<i64: 8, 128>}]} {
    %c0_i32 = arith.constant 0 : i32
    %0 = arith.cmpi eq, %arg2, %c0_i32 : i32
    %1 = arith.extui %0 : i1 to i32
    %c0_i32_0 = arith.constant 0 : i32
    %2 = arith.cmpi ne, %1, %c0_i32_0 : i32
    scf.if %2 {
      %cst_15 = arith.constant 0.000000e+00 : f32
      %22 = vector.broadcast %cst_15 : f32 to vector<8x128xf32>
      %c0_16 = arith.constant 0 : index
      %c0_17 = arith.constant 0 : index
      %23 = vector.load %arg10[%c0_16, %c0_17] : memref<8x128xf32, #tpu.memory_space<vmem>>, vector<8x128xf32>
      tpu.vector_store %arg10[%c0_16, %c0_17], %22 {strides = array<i32>} : memref<8x128xf32, #tpu.memory_space<vmem>>, vector<8x128xf32>,
    } else {
    }
    %c0 = arith.constant 0 : index
    %c0_1 = arith.constant 0 : index
    %3 = vector.load %arg3[%c0, %c0_1] : memref<8x512xbf16, #tpu.memory_space<vmem>>, vector<8x512xbf16>
    %4 = arith.extf %3 : vector<8x512xbf16> to vector<8x512xf32>
    %c0_2 = arith.constant 0 : index
    %c0_3 = arith.constant 0 : index
    %5 = vector.load %arg5[%c0_2, %c0_3] : memref<1x512xf32, #tpu.memory_space<vmem>>, vector<1x512xf32>
    %6 = vector.broadcast %5 : vector<1x512xf32> to vector<8x512xf32>
    %7 = arith.mulf %4, %6 : vector<8x512xf32>
    %c0_4 = arith.constant 0 : index
    %c0_5 = arith.constant 0 : index
    %8 = vector.load %arg6[%c0_4, %c0_5] : memref<1x512xf32, #tpu.memory_space<vmem>>, vector<1x512xf32>
    %9 = vector.broadcast %8 : vector<1x512xf32> to vector<8x512xf32>
    %10 = arith.addf %7, %9 : vector<8x512xf32>
    %cst = arith.constant 0.000000e+00 : f32
    %11 = vector.broadcast %cst : f32 to vector<8x512xf32>
    %12 = arith.maximumf %10, %11 : vector<8x512xf32>
    %13 = arith.truncf %12 : vector<8x512xf32> to vector<8x512xbf16>
    %c0_6 = arith.constant 0 : index
    %c0_7 = arith.constant 0 : index
    %14 = vector.load %arg10[%c0_6, %c0_7] : memref<8x128xf32, #tpu.memory_space<vmem>>, vector<8x128xf32>
    %c0_8 = arith.constant 0 : index
    %c0_9 = arith.constant 0 : index
    %15 = vector.load %arg4[%c0_8, %c0_9] : memref<512x128xbf16, #tpu.memory_space<vmem>>, vector<512x128xbf16>
    %cst_10 = arith.constant dense<0.000000e+00> : vector<8x128xf32>
    %16 = tpu.matmul %13, %15, %cst_10 {dimension_numbers = #tpu.dot_dimension_numbers<[1], [0], [0], [1], [0, 0, 1, 1], [], []>} : vector<8x512xbf16>, vector<512x128xbf16>, vector<8x128xf32> -> vector<8x128xf32>
    %17 = arith.addf %14, %16 : vector<8x128xf32>
    %c0_11 = arith.constant 0 : index
    %c0_12 = arith.constant 0 : index
    %18 = vector.load %arg10[%c0_11, %c0_12] : memref<8x128xf32, #tpu.memory_space<vmem>>, vector<8x128xf32>
    tpu.vector_store %arg10[%c0_11, %c0_12], %17 {strides = array<i32>} : memref<8x128xf32, #tpu.memory_space<vmem>>, vector<8x128xf32>,
    %c0_i32_13 = arith.constant 0 : i32
    %19 = arith.cmpi eq, %arg2, %c0_i32_13 : i32
    %20 = arith.extui %19 : i1 to i32
    %c0_i32_14 = arith.constant 0 : i32
    %21 = arith.cmpi ne, %20, %c0_i32_14 : i32
    scf.if %21 {
      %c0_15 = arith.constant 0 : index
      %c0_16 = arith.constant 0 : index
      %22 = vector.load %arg10[%c0_15, %c0_16] : memref<8x128xf32, #tpu.memory_space<vmem>>, vector<8x128xf32>
      %c0_17 = arith.constant 0 : index
      %c0_18 = arith.constant 0 : index
      %23 = vector.load %arg7[%c0_17, %c0_18] : memref<1x128xf32, #tpu.memory_space<vmem>>, vector<1x128xf32>
      %24 = vector.broadcast %23 : vector<1x128xf32> to vector<8x128xf32>
      %25 = arith.mulf %22, %24 : vector<8x128xf32>
      %c0_19 = arith.constant 0 : index
      %c0_20 = arith.constant 0 : index
      %26 = vector.load %arg8[%c0_19, %c0_20] : memref<1x128xf32, #tpu.memory_space<vmem>>, vector<1x128xf32>
      %27 = vector.broadcast %26 : vector<1x128xf32> to vector<8x128xf32>
      %28 = arith.addf %25, %27 : vector<8x128xf32>
      %cst_21 = arith.constant 0.000000e+00 : f32
      %29 = vector.broadcast %cst_21 : f32 to vector<8x128xf32>
      %30 = arith.maximumf %28, %29 : vector<8x128xf32>
      %31 = arith.truncf %30 : vector<8x128xf32> to vector<8x128xbf16>
      %c0_22 = arith.constant 0 : index
      %c0_23 = arith.constant 0 : index
      %32 = vector.load %arg9[%c0_22, %c0_23] : memref<8x128xbf16, #tpu.memory_space<vmem>>, vector<8x128xbf16>
      tpu.vector_store %arg9[%c0_22, %c0_23], %31 {strides = array<i32>} : memref<8x128xbf16, #tpu.memory_space<vmem>>, vector<8x128xbf16>,
    } else {
    }
    return
  }
  func.func @transform_0(%arg0: i32, %arg1: i32, %arg2: i32) -> (i32, i32) {
    %c0_i32 = arith.constant 0 : i32
    return %arg0, %arg2 : i32, i32
  }
  func.func @transform_1(%arg0: i32, %arg1: i32, %arg2: i32) -> (i32, i32) {
    %c0_i32 = arith.constant 0 : i32
    return %arg2, %arg1 : i32, i32
  }
  func.func @transform_2(%arg0: i32, %arg1: i32, %arg2: i32) -> (i32, i32) {
    %c0_i32 = arith.constant 0 : i32
    %c0_i32_0 = arith.constant 0 : i32
    return %c0_i32, %arg2 : i32, i32
  }
  func.func @transform_3(%arg0: i32, %arg1: i32, %arg2: i32) -> (i32, i32) {
    %c0_i32 = arith.constant 0 : i32
    %c0_i32_0 = arith.constant 0 : i32
    return %c0_i32, %arg2 : i32, i32
  }
  func.func @transform_4(%arg0: i32, %arg1: i32, %arg2: i32) -> (i32, i32) {
    %c0_i32 = arith.constant 0 : i32
    %c0_i32_0 = arith.constant 0 : i32
    return %c0_i32, %arg1 : i32, i32
  }
  func.func @transform_5(%arg0: i32, %arg1: i32, %arg2: i32) -> (i32, i32) {
    %c0_i32 = arith.constant 0 : i32
    %c0_i32_0 = arith.constant 0 : i32
    return %c0_i32, %arg1 : i32, i32
  }
  func.func @transform_6(%arg0: i32, %arg1: i32, %arg2: i32) -> (i32, i32) {
    %c0_i32 = arith.constant 0 : i32
    return %arg0, %arg1 : i32, i32
  }
}

module attributes {stable_mosaic.version = 11 : i64} {
  func.func @_fused_matmul_kernel(%arg0: i32, %arg1: i32, %arg2: i32, %arg3: memref<8x128xbf16, #tpu.memory_space<vmem>>, %arg4: memref<128x128xbf16, #tpu.memory_space<vmem>>, %arg5: memref<1x128xf32, #tpu.memory_space<vmem>>, %arg6: memref<1x128xf32, #tpu.memory_space<vmem>>, %arg7: memref<1x128xf32, #tpu.memory_space<vmem>>, %arg8: memref<1x128xf32, #tpu.memory_space<vmem>>, %arg9: memref<8x128xbf16, #tpu.memory_space<vmem>>, %arg10: memref<8x128xf32, #tpu.memory_space<vmem>>) attributes {dimension_semantics = [#tpu.dimension_semantics<parallel>, #tpu.dimension_semantics<parallel>, #tpu.dimension_semantics<arbitrary>], iteration_bounds = array<i64: 1, 1, 5>, scalar_prefetch = 0 : i64, scratch_operands = 1 : i64, tpu.core_type = #tpu.core_type<tc>, window_params = [{transform_indices = @transform_0, window_bounds = array<i64: 8, 128>}, {transform_indices = @transform_1, window_bounds = array<i64: 128, 128>}, {transform_indices = @transform_2, window_bounds = array<i64: 1, 128>}, {transform_indices = @transform_3, window_bounds = array<i64: 1, 128>}, {transform_indices = @transform_4, window_bounds = array<i64: 1, 128>}, {transform_indices = @transform_5, window_bounds = array<i64: 1, 128>}, {transform_indices = @transform_6, window_bounds = array<i64: 8, 128>}]} {
    %c0_i32 = arith.constant 0 : i32
    %0 = arith.cmpi eq, %arg2, %c0_i32 : i32
    %1 = arith.extui %0 : i1 to i32
    %c0_i32_0 = arith.constant 0 : i32
    %2 = arith.cmpi ne, %1, %c0_i32_0 : i32
    scf.if %2 {
      %cst_14 = arith.constant 0.000000e+00 : f32
      %22 = vector.broadcast %cst_14 : f32 to vector<8x128xf32>
      %c0_15 = arith.constant 0 : index
      %c0_16 = arith.constant 0 : index
      %23 = vector.load %arg10[%c0_15, %c0_16] : memref<8x128xf32, #tpu.memory_space<vmem>>, vector<8x128xf32>
      tpu.vector_store %arg10[%c0_15, %c0_16], %22 {strides = array<i32>} : memref<8x128xf32, #tpu.memory_space<vmem>>, vector<8x128xf32>,
    } else {
    }
    %c0 = arith.constant 0 : index
    %c0_1 = arith.constant 0 : index
    %3 = vector.load %arg3[%c0, %c0_1] : memref<8x128xbf16, #tpu.memory_space<vmem>>, vector<8x128xbf16>
    %4 = arith.extf %3 : vector<8x128xbf16> to vector<8x128xf32>
    %c0_2 = arith.constant 0 : index
    %c0_3 = arith.constant 0 : index
    %5 = vector.load %arg5[%c0_2, %c0_3] : memref<1x128xf32, #tpu.memory_space<vmem>>, vector<1x128xf32>
    %6 = vector.broadcast %5 : vector<1x128xf32> to vector<8x128xf32>
    %7 = arith.mulf %4, %6 : vector<8x128xf32>
    %c0_4 = arith.constant 0 : index
    %c0_5 = arith.constant 0 : index
    %8 = vector.load %arg6[%c0_4, %c0_5] : memref<1x128xf32, #tpu.memory_space<vmem>>, vector<1x128xf32>
    %9 = vector.broadcast %8 : vector<1x128xf32> to vector<8x128xf32>
    %10 = arith.addf %7, %9 : vector<8x128xf32>
    %cst = arith.constant 0.000000e+00 : f32
    %11 = vector.broadcast %cst : f32 to vector<8x128xf32>
    %12 = arith.maximumf %10, %11 : vector<8x128xf32>
    %13 = arith.truncf %12 : vector<8x128xf32> to vector<8x128xbf16>
    %c0_6 = arith.constant 0 : index
    %c0_7 = arith.constant 0 : index
    %14 = vector.load %arg10[%c0_6, %c0_7] : memref<8x128xf32, #tpu.memory_space<vmem>>, vector<8x128xf32>
    %c0_8 = arith.constant 0 : index
    %c0_9 = arith.constant 0 : index
    %15 = vector.load %arg4[%c0_8, %c0_9] : memref<128x128xbf16, #tpu.memory_space<vmem>>, vector<128x128xbf16>
    %cst_10 = arith.constant dense<0.000000e+00> : vector<8x128xf32>
    %16 = tpu.matmul %13, %15, %cst_10 {dimension_numbers = #tpu.dot_dimension_numbers<[1], [0], [0], [1], [0, 0, 1, 1], [], []>} : vector<8x128xbf16>, vector<128x128xbf16>, vector<8x128xf32> -> vector<8x128xf32>
    %17 = arith.addf %14, %16 : vector<8x128xf32>
    %c0_11 = arith.constant 0 : index
    %c0_12 = arith.constant 0 : index
    %18 = vector.load %arg10[%c0_11, %c0_12] : memref<8x128xf32, #tpu.memory_space<vmem>>, vector<8x128xf32>
    tpu.vector_store %arg10[%c0_11, %c0_12], %17 {strides = array<i32>} : memref<8x128xf32, #tpu.memory_space<vmem>>, vector<8x128xf32>,
    %c4_i32 = arith.constant 4 : i32
    %19 = arith.cmpi eq, %arg2, %c4_i32 : i32
    %20 = arith.extui %19 : i1 to i32
    %c0_i32_13 = arith.constant 0 : i32
    %21 = arith.cmpi ne, %20, %c0_i32_13 : i32
    scf.if %21 {
      %c0_14 = arith.constant 0 : index
      %c0_15 = arith.constant 0 : index
      %22 = vector.load %arg10[%c0_14, %c0_15] : memref<8x128xf32, #tpu.memory_space<vmem>>, vector<8x128xf32>
      %c0_16 = arith.constant 0 : index
      %c0_17 = arith.constant 0 : index
      %23 = vector.load %arg7[%c0_16, %c0_17] : memref<1x128xf32, #tpu.memory_space<vmem>>, vector<1x128xf32>
      %24 = vector.broadcast %23 : vector<1x128xf32> to vector<8x128xf32>
      %25 = arith.mulf %22, %24 : vector<8x128xf32>
      %c0_18 = arith.constant 0 : index
      %c0_19 = arith.constant 0 : index
      %26 = vector.load %arg8[%c0_18, %c0_19] : memref<1x128xf32, #tpu.memory_space<vmem>>, vector<1x128xf32>
      %27 = vector.broadcast %26 : vector<1x128xf32> to vector<8x128xf32>
      %28 = arith.addf %25, %27 : vector<8x128xf32>
      %cst_20 = arith.constant 0.000000e+00 : f32
      %29 = vector.broadcast %cst_20 : f32 to vector<8x128xf32>
      %30 = arith.maximumf %28, %29 : vector<8x128xf32>
      %31 = arith.truncf %30 : vector<8x128xf32> to vector<8x128xbf16>
      %c0_21 = arith.constant 0 : index
      %c0_22 = arith.constant 0 : index
      %32 = vector.load %arg9[%c0_21, %c0_22] : memref<8x128xbf16, #tpu.memory_space<vmem>>, vector<8x128xbf16>
      tpu.vector_store %arg9[%c0_21, %c0_22], %31 {strides = array<i32>} : memref<8x128xbf16, #tpu.memory_space<vmem>>, vector<8x128xbf16>,
    } else {
    }
    return
  }
  func.func @transform_0(%arg0: i32, %arg1: i32, %arg2: i32) -> (i32, i32) {
    %c0_i32 = arith.constant 0 : i32
    return %arg0, %arg2 : i32, i32
  }
  func.func @transform_1(%arg0: i32, %arg1: i32, %arg2: i32) -> (i32, i32) {
    %c0_i32 = arith.constant 0 : i32
    return %arg2, %arg1 : i32, i32
  }
  func.func @transform_2(%arg0: i32, %arg1: i32, %arg2: i32) -> (i32, i32) {
    %c0_i32 = arith.constant 0 : i32
    %c0_i32_0 = arith.constant 0 : i32
    return %c0_i32, %arg2 : i32, i32
  }
  func.func @transform_3(%arg0: i32, %arg1: i32, %arg2: i32) -> (i32, i32) {
    %c0_i32 = arith.constant 0 : i32
    %c0_i32_0 = arith.constant 0 : i32
    return %c0_i32, %arg2 : i32, i32
  }
  func.func @transform_4(%arg0: i32, %arg1: i32, %arg2: i32) -> (i32, i32) {
    %c0_i32 = arith.constant 0 : i32
    %c0_i32_0 = arith.constant 0 : i32
    return %c0_i32, %arg1 : i32, i32
  }
  func.func @transform_5(%arg0: i32, %arg1: i32, %arg2: i32) -> (i32, i32) {
    %c0_i32 = arith.constant 0 : i32
    %c0_i32_0 = arith.constant 0 : i32
    return %c0_i32, %arg1 : i32, i32
  }
  func.func @transform_6(%arg0: i32, %arg1: i32, %arg2: i32) -> (i32, i32) {
    %c0_i32 = arith.constant 0 : i32
    return %arg0, %arg1 : i32, i32
  }
}

module attributes {stable_mosaic.version = 11 : i64} {
  func.func @_fused_matmul_kernel(%arg0: i32, %arg1: i32, %arg2: i32, %arg3: memref<8x384xbf16, #tpu.memory_space<vmem>>, %arg4: memref<384x128xbf16, #tpu.memory_space<vmem>>, %arg5: memref<1x384xf32, #tpu.memory_space<vmem>>, %arg6: memref<1x384xf32, #tpu.memory_space<vmem>>, %arg7: memref<1x128xf32, #tpu.memory_space<vmem>>, %arg8: memref<1x128xf32, #tpu.memory_space<vmem>>, %arg9: memref<8x128xbf16, #tpu.memory_space<vmem>>, %arg10: memref<8x128xf32, #tpu.memory_space<vmem>>) attributes {dimension_semantics = [#tpu.dimension_semantics<parallel>, #tpu.dimension_semantics<parallel>, #tpu.dimension_semantics<arbitrary>], iteration_bounds = array<i64: 1, 1, 2>, scalar_prefetch = 0 : i64, scratch_operands = 1 : i64, tpu.core_type = #tpu.core_type<tc>, window_params = [{transform_indices = @transform_0, window_bounds = array<i64: 8, 384>}, {transform_indices = @transform_1, window_bounds = array<i64: 384, 128>}, {transform_indices = @transform_2, window_bounds = array<i64: 1, 384>}, {transform_indices = @transform_3, window_bounds = array<i64: 1, 384>}, {transform_indices = @transform_4, window_bounds = array<i64: 1, 128>}, {transform_indices = @transform_5, window_bounds = array<i64: 1, 128>}, {transform_indices = @transform_6, window_bounds = array<i64: 8, 128>}]} {
    %c0_i32 = arith.constant 0 : i32
    %0 = arith.cmpi eq, %arg2, %c0_i32 : i32
    %1 = arith.extui %0 : i1 to i32
    %c0_i32_0 = arith.constant 0 : i32
    %2 = arith.cmpi ne, %1, %c0_i32_0 : i32
    scf.if %2 {
      %cst_14 = arith.constant 0.000000e+00 : f32
      %22 = vector.broadcast %cst_14 : f32 to vector<8x128xf32>
      %c0_15 = arith.constant 0 : index
      %c0_16 = arith.constant 0 : index
      %23 = vector.load %arg10[%c0_15, %c0_16] : memref<8x128xf32, #tpu.memory_space<vmem>>, vector<8x128xf32>
      tpu.vector_store %arg10[%c0_15, %c0_16], %22 {strides = array<i32>} : memref<8x128xf32, #tpu.memory_space<vmem>>, vector<8x128xf32>,
    } else {
    }
    %c0 = arith.constant 0 : index
    %c0_1 = arith.constant 0 : index
    %3 = vector.load %arg3[%c0, %c0_1] : memref<8x384xbf16, #tpu.memory_space<vmem>>, vector<8x384xbf16>
    %4 = arith.extf %3 : vector<8x384xbf16> to vector<8x384xf32>
    %c0_2 = arith.constant 0 : index
    %c0_3 = arith.constant 0 : index
    %5 = vector.load %arg5[%c0_2, %c0_3] : memref<1x384xf32, #tpu.memory_space<vmem>>, vector<1x384xf32>
    %6 = vector.broadcast %5 : vector<1x384xf32> to vector<8x384xf32>
    %7 = arith.mulf %4, %6 : vector<8x384xf32>
    %c0_4 = arith.constant 0 : index
    %c0_5 = arith.constant 0 : index
    %8 = vector.load %arg6[%c0_4, %c0_5] : memref<1x384xf32, #tpu.memory_space<vmem>>, vector<1x384xf32>
    %9 = vector.broadcast %8 : vector<1x384xf32> to vector<8x384xf32>
    %10 = arith.addf %7, %9 : vector<8x384xf32>
    %cst = arith.constant 0.000000e+00 : f32
    %11 = vector.broadcast %cst : f32 to vector<8x384xf32>
    %12 = arith.maximumf %10, %11 : vector<8x384xf32>
    %13 = arith.truncf %12 : vector<8x384xf32> to vector<8x384xbf16>
    %c0_6 = arith.constant 0 : index
    %c0_7 = arith.constant 0 : index
    %14 = vector.load %arg10[%c0_6, %c0_7] : memref<8x128xf32, #tpu.memory_space<vmem>>, vector<8x128xf32>
    %c0_8 = arith.constant 0 : index
    %c0_9 = arith.constant 0 : index
    %15 = vector.load %arg4[%c0_8, %c0_9] : memref<384x128xbf16, #tpu.memory_space<vmem>>, vector<384x128xbf16>
    %cst_10 = arith.constant dense<0.000000e+00> : vector<8x128xf32>
    %16 = tpu.matmul %13, %15, %cst_10 {dimension_numbers = #tpu.dot_dimension_numbers<[1], [0], [0], [1], [0, 0, 1, 1], [], []>} : vector<8x384xbf16>, vector<384x128xbf16>, vector<8x128xf32> -> vector<8x128xf32>
    %17 = arith.addf %14, %16 : vector<8x128xf32>
    %c0_11 = arith.constant 0 : index
    %c0_12 = arith.constant 0 : index
    %18 = vector.load %arg10[%c0_11, %c0_12] : memref<8x128xf32, #tpu.memory_space<vmem>>, vector<8x128xf32>
    tpu.vector_store %arg10[%c0_11, %c0_12], %17 {strides = array<i32>} : memref<8x128xf32, #tpu.memory_space<vmem>>, vector<8x128xf32>,
    %c1_i32 = arith.constant 1 : i32
    %19 = arith.cmpi eq, %arg2, %c1_i32 : i32
    %20 = arith.extui %19 : i1 to i32
    %c0_i32_13 = arith.constant 0 : i32
    %21 = arith.cmpi ne, %20, %c0_i32_13 : i32
    scf.if %21 {
      %c0_14 = arith.constant 0 : index
      %c0_15 = arith.constant 0 : index
      %22 = vector.load %arg10[%c0_14, %c0_15] : memref<8x128xf32, #tpu.memory_space<vmem>>, vector<8x128xf32>
      %c0_16 = arith.constant 0 : index
      %c0_17 = arith.constant 0 : index
      %23 = vector.load %arg7[%c0_16, %c0_17] : memref<1x128xf32, #tpu.memory_space<vmem>>, vector<1x128xf32>
      %24 = vector.broadcast %23 : vector<1x128xf32> to vector<8x128xf32>
      %25 = arith.mulf %22, %24 : vector<8x128xf32>
      %c0_18 = arith.constant 0 : index
      %c0_19 = arith.constant 0 : index
      %26 = vector.load %arg8[%c0_18, %c0_19] : memref<1x128xf32, #tpu.memory_space<vmem>>, vector<1x128xf32>
      %27 = vector.broadcast %26 : vector<1x128xf32> to vector<8x128xf32>
      %28 = arith.addf %25, %27 : vector<8x128xf32>
      %cst_20 = arith.constant 0.000000e+00 : f32
      %29 = vector.broadcast %cst_20 : f32 to vector<8x128xf32>
      %30 = arith.maximumf %28, %29 : vector<8x128xf32>
      %31 = arith.truncf %30 : vector<8x128xf32> to vector<8x128xbf16>
      %c0_21 = arith.constant 0 : index
      %c0_22 = arith.constant 0 : index
      %32 = vector.load %arg9[%c0_21, %c0_22] : memref<8x128xbf16, #tpu.memory_space<vmem>>, vector<8x128xbf16>
      tpu.vector_store %arg9[%c0_21, %c0_22], %31 {strides = array<i32>} : memref<8x128xbf16, #tpu.memory_space<vmem>>, vector<8x128xbf16>,
    } else {
    }
    return
  }
  func.func @transform_0(%arg0: i32, %arg1: i32, %arg2: i32) -> (i32, i32) {
    %c0_i32 = arith.constant 0 : i32
    return %arg0, %arg2 : i32, i32
  }
  func.func @transform_1(%arg0: i32, %arg1: i32, %arg2: i32) -> (i32, i32) {
    %c0_i32 = arith.constant 0 : i32
    return %arg2, %arg1 : i32, i32
  }
  func.func @transform_2(%arg0: i32, %arg1: i32, %arg2: i32) -> (i32, i32) {
    %c0_i32 = arith.constant 0 : i32
    %c0_i32_0 = arith.constant 0 : i32
    return %c0_i32, %arg2 : i32, i32
  }
  func.func @transform_3(%arg0: i32, %arg1: i32, %arg2: i32) -> (i32, i32) {
    %c0_i32 = arith.constant 0 : i32
    %c0_i32_0 = arith.constant 0 : i32
    return %c0_i32, %arg2 : i32, i32
  }
  func.func @transform_4(%arg0: i32, %arg1: i32, %arg2: i32) -> (i32, i32) {
    %c0_i32 = arith.constant 0 : i32
    %c0_i32_0 = arith.constant 0 : i32
    return %c0_i32, %arg1 : i32, i32
  }
  func.func @transform_5(%arg0: i32, %arg1: i32, %arg2: i32) -> (i32, i32) {
    %c0_i32 = arith.constant 0 : i32
    %c0_i32_0 = arith.constant 0 : i32
    return %c0_i32, %arg1 : i32, i32
  }
  func.func @transform_6(%arg0: i32, %arg1: i32, %arg2: i32) -> (i32, i32) {
    %c0_i32 = arith.constant 0 : i32
    return %arg0, %arg1 : i32, i32
  }
}

module attributes {stable_mosaic.version = 11 : i64} {
  func.func @_fused_matmul_kernel(%arg0: i32, %arg1: i32, %arg2: i32, %arg3: memref<8x128xbf16, #tpu.memory_space<vmem>>, %arg4: memref<128x128xbf16, #tpu.memory_space<vmem>>, %arg5: memref<1x128xf32, #tpu.memory_space<vmem>>, %arg6: memref<1x128xf32, #tpu.memory_space<vmem>>, %arg7: memref<1x128xf32, #tpu.memory_space<vmem>>, %arg8: memref<1x128xf32, #tpu.memory_space<vmem>>, %arg9: memref<8x128xbf16, #tpu.memory_space<vmem>>, %arg10: memref<8x128xf32, #tpu.memory_space<vmem>>) attributes {dimension_semantics = [#tpu.dimension_semantics<parallel>, #tpu.dimension_semantics<parallel>, #tpu.dimension_semantics<arbitrary>], iteration_bounds = array<i64: 1, 1, 7>, scalar_prefetch = 0 : i64, scratch_operands = 1 : i64, tpu.core_type = #tpu.core_type<tc>, window_params = [{transform_indices = @transform_0, window_bounds = array<i64: 8, 128>}, {transform_indices = @transform_1, window_bounds = array<i64: 128, 128>}, {transform_indices = @transform_2, window_bounds = array<i64: 1, 128>}, {transform_indices = @transform_3, window_bounds = array<i64: 1, 128>}, {transform_indices = @transform_4, window_bounds = array<i64: 1, 128>}, {transform_indices = @transform_5, window_bounds = array<i64: 1, 128>}, {transform_indices = @transform_6, window_bounds = array<i64: 8, 128>}]} {
    %c0_i32 = arith.constant 0 : i32
    %0 = arith.cmpi eq, %arg2, %c0_i32 : i32
    %1 = arith.extui %0 : i1 to i32
    %c0_i32_0 = arith.constant 0 : i32
    %2 = arith.cmpi ne, %1, %c0_i32_0 : i32
    scf.if %2 {
      %cst_14 = arith.constant 0.000000e+00 : f32
      %22 = vector.broadcast %cst_14 : f32 to vector<8x128xf32>
      %c0_15 = arith.constant 0 : index
      %c0_16 = arith.constant 0 : index
      %23 = vector.load %arg10[%c0_15, %c0_16] : memref<8x128xf32, #tpu.memory_space<vmem>>, vector<8x128xf32>
      tpu.vector_store %arg10[%c0_15, %c0_16], %22 {strides = array<i32>} : memref<8x128xf32, #tpu.memory_space<vmem>>, vector<8x128xf32>,
    } else {
    }
    %c0 = arith.constant 0 : index
    %c0_1 = arith.constant 0 : index
    %3 = vector.load %arg3[%c0, %c0_1] : memref<8x128xbf16, #tpu.memory_space<vmem>>, vector<8x128xbf16>
    %4 = arith.extf %3 : vector<8x128xbf16> to vector<8x128xf32>
    %c0_2 = arith.constant 0 : index
    %c0_3 = arith.constant 0 : index
    %5 = vector.load %arg5[%c0_2, %c0_3] : memref<1x128xf32, #tpu.memory_space<vmem>>, vector<1x128xf32>
    %6 = vector.broadcast %5 : vector<1x128xf32> to vector<8x128xf32>
    %7 = arith.mulf %4, %6 : vector<8x128xf32>
    %c0_4 = arith.constant 0 : index
    %c0_5 = arith.constant 0 : index
    %8 = vector.load %arg6[%c0_4, %c0_5] : memref<1x128xf32, #tpu.memory_space<vmem>>, vector<1x128xf32>
    %9 = vector.broadcast %8 : vector<1x128xf32> to vector<8x128xf32>
    %10 = arith.addf %7, %9 : vector<8x128xf32>
    %cst = arith.constant 0.000000e+00 : f32
    %11 = vector.broadcast %cst : f32 to vector<8x128xf32>
    %12 = arith.maximumf %10, %11 : vector<8x128xf32>
    %13 = arith.truncf %12 : vector<8x128xf32> to vector<8x128xbf16>
    %c0_6 = arith.constant 0 : index
    %c0_7 = arith.constant 0 : index
    %14 = vector.load %arg10[%c0_6, %c0_7] : memref<8x128xf32, #tpu.memory_space<vmem>>, vector<8x128xf32>
    %c0_8 = arith.constant 0 : index
    %c0_9 = arith.constant 0 : index
    %15 = vector.load %arg4[%c0_8, %c0_9] : memref<128x128xbf16, #tpu.memory_space<vmem>>, vector<128x128xbf16>
    %cst_10 = arith.constant dense<0.000000e+00> : vector<8x128xf32>
    %16 = tpu.matmul %13, %15, %cst_10 {dimension_numbers = #tpu.dot_dimension_numbers<[1], [0], [0], [1], [0, 0, 1, 1], [], []>} : vector<8x128xbf16>, vector<128x128xbf16>, vector<8x128xf32> -> vector<8x128xf32>
    %17 = arith.addf %14, %16 : vector<8x128xf32>
    %c0_11 = arith.constant 0 : index
    %c0_12 = arith.constant 0 : index
    %18 = vector.load %arg10[%c0_11, %c0_12] : memref<8x128xf32, #tpu.memory_space<vmem>>, vector<8x128xf32>
    tpu.vector_store %arg10[%c0_11, %c0_12], %17 {strides = array<i32>} : memref<8x128xf32, #tpu.memory_space<vmem>>, vector<8x128xf32>,
    %c6_i32 = arith.constant 6 : i32
    %19 = arith.cmpi eq, %arg2, %c6_i32 : i32
    %20 = arith.extui %19 : i1 to i32
    %c0_i32_13 = arith.constant 0 : i32
    %21 = arith.cmpi ne, %20, %c0_i32_13 : i32
    scf.if %21 {
      %c0_14 = arith.constant 0 : index
      %c0_15 = arith.constant 0 : index
      %22 = vector.load %arg10[%c0_14, %c0_15] : memref<8x128xf32, #tpu.memory_space<vmem>>, vector<8x128xf32>
      %c0_16 = arith.constant 0 : index
      %c0_17 = arith.constant 0 : index
      %23 = vector.load %arg7[%c0_16, %c0_17] : memref<1x128xf32, #tpu.memory_space<vmem>>, vector<1x128xf32>
      %24 = vector.broadcast %23 : vector<1x128xf32> to vector<8x128xf32>
      %25 = arith.mulf %22, %24 : vector<8x128xf32>
      %c0_18 = arith.constant 0 : index
      %c0_19 = arith.constant 0 : index
      %26 = vector.load %arg8[%c0_18, %c0_19] : memref<1x128xf32, #tpu.memory_space<vmem>>, vector<1x128xf32>
      %27 = vector.broadcast %26 : vector<1x128xf32> to vector<8x128xf32>
      %28 = arith.addf %25, %27 : vector<8x128xf32>
      %cst_20 = arith.constant 0.000000e+00 : f32
      %29 = vector.broadcast %cst_20 : f32 to vector<8x128xf32>
      %30 = arith.maximumf %28, %29 : vector<8x128xf32>
      %31 = arith.truncf %30 : vector<8x128xf32> to vector<8x128xbf16>
      %c0_21 = arith.constant 0 : index
      %c0_22 = arith.constant 0 : index
      %32 = vector.load %arg9[%c0_21, %c0_22] : memref<8x128xbf16, #tpu.memory_space<vmem>>, vector<8x128xbf16>
      tpu.vector_store %arg9[%c0_21, %c0_22], %31 {strides = array<i32>} : memref<8x128xbf16, #tpu.memory_space<vmem>>, vector<8x128xbf16>,
    } else {
    }
    return
  }
  func.func @transform_0(%arg0: i32, %arg1: i32, %arg2: i32) -> (i32, i32) {
    %c0_i32 = arith.constant 0 : i32
    return %arg0, %arg2 : i32, i32
  }
  func.func @transform_1(%arg0: i32, %arg1: i32, %arg2: i32) -> (i32, i32) {
    %c0_i32 = arith.constant 0 : i32
    return %arg2, %arg1 : i32, i32
  }
  func.func @transform_2(%arg0: i32, %arg1: i32, %arg2: i32) -> (i32, i32) {
    %c0_i32 = arith.constant 0 : i32
    %c0_i32_0 = arith.constant 0 : i32
    return %c0_i32, %arg2 : i32, i32
  }
  func.func @transform_3(%arg0: i32, %arg1: i32, %arg2: i32) -> (i32, i32) {
    %c0_i32 = arith.constant 0 : i32
    %c0_i32_0 = arith.constant 0 : i32
    return %c0_i32, %arg2 : i32, i32
  }
  func.func @transform_4(%arg0: i32, %arg1: i32, %arg2: i32) -> (i32, i32) {
    %c0_i32 = arith.constant 0 : i32
    %c0_i32_0 = arith.constant 0 : i32
    return %c0_i32, %arg1 : i32, i32
  }
  func.func @transform_5(%arg0: i32, %arg1: i32, %arg2: i32) -> (i32, i32) {
    %c0_i32 = arith.constant 0 : i32
    %c0_i32_0 = arith.constant 0 : i32
    return %c0_i32, %arg1 : i32, i32
  }
  func.func @transform_6(%arg0: i32, %arg1: i32, %arg2: i32) -> (i32, i32) {
    %c0_i32 = arith.constant 0 : i32
    return %arg0, %arg1 : i32, i32
  }
}

module attributes {stable_mosaic.version = 11 : i64} {
  func.func @_fused_matmul_kernel(%arg0: i32, %arg1: i32, %arg2: i32, %arg3: memref<8x512xbf16, #tpu.memory_space<vmem>>, %arg4: memref<512x128xbf16, #tpu.memory_space<vmem>>, %arg5: memref<1x512xf32, #tpu.memory_space<vmem>>, %arg6: memref<1x512xf32, #tpu.memory_space<vmem>>, %arg7: memref<1x128xf32, #tpu.memory_space<vmem>>, %arg8: memref<1x128xf32, #tpu.memory_space<vmem>>, %arg9: memref<8x128xbf16, #tpu.memory_space<vmem>>, %arg10: memref<8x128xf32, #tpu.memory_space<vmem>>) attributes {dimension_semantics = [#tpu.dimension_semantics<parallel>, #tpu.dimension_semantics<parallel>, #tpu.dimension_semantics<arbitrary>], iteration_bounds = array<i64: 1, 1, 2>, scalar_prefetch = 0 : i64, scratch_operands = 1 : i64, tpu.core_type = #tpu.core_type<tc>, window_params = [{transform_indices = @transform_0, window_bounds = array<i64: 8, 512>}, {transform_indices = @transform_1, window_bounds = array<i64: 512, 128>}, {transform_indices = @transform_2, window_bounds = array<i64: 1, 512>}, {transform_indices = @transform_3, window_bounds = array<i64: 1, 512>}, {transform_indices = @transform_4, window_bounds = array<i64: 1, 128>}, {transform_indices = @transform_5, window_bounds = array<i64: 1, 128>}, {transform_indices = @transform_6, window_bounds = array<i64: 8, 128>}]} {
    %c0_i32 = arith.constant 0 : i32
    %0 = arith.cmpi eq, %arg2, %c0_i32 : i32
    %1 = arith.extui %0 : i1 to i32
    %c0_i32_0 = arith.constant 0 : i32
    %2 = arith.cmpi ne, %1, %c0_i32_0 : i32
    scf.if %2 {
      %cst_14 = arith.constant 0.000000e+00 : f32
      %22 = vector.broadcast %cst_14 : f32 to vector<8x128xf32>
      %c0_15 = arith.constant 0 : index
      %c0_16 = arith.constant 0 : index
      %23 = vector.load %arg10[%c0_15, %c0_16] : memref<8x128xf32, #tpu.memory_space<vmem>>, vector<8x128xf32>
      tpu.vector_store %arg10[%c0_15, %c0_16], %22 {strides = array<i32>} : memref<8x128xf32, #tpu.memory_space<vmem>>, vector<8x128xf32>,
    } else {
    }
    %c0 = arith.constant 0 : index
    %c0_1 = arith.constant 0 : index
    %3 = vector.load %arg3[%c0, %c0_1] : memref<8x512xbf16, #tpu.memory_space<vmem>>, vector<8x512xbf16>
    %4 = arith.extf %3 : vector<8x512xbf16> to vector<8x512xf32>
    %c0_2 = arith.constant 0 : index
    %c0_3 = arith.constant 0 : index
    %5 = vector.load %arg5[%c0_2, %c0_3] : memref<1x512xf32, #tpu.memory_space<vmem>>, vector<1x512xf32>
    %6 = vector.broadcast %5 : vector<1x512xf32> to vector<8x512xf32>
    %7 = arith.mulf %4, %6 : vector<8x512xf32>
    %c0_4 = arith.constant 0 : index
    %c0_5 = arith.constant 0 : index
    %8 = vector.load %arg6[%c0_4, %c0_5] : memref<1x512xf32, #tpu.memory_space<vmem>>, vector<1x512xf32>
    %9 = vector.broadcast %8 : vector<1x512xf32> to vector<8x512xf32>
    %10 = arith.addf %7, %9 : vector<8x512xf32>
    %cst = arith.constant 0.000000e+00 : f32
    %11 = vector.broadcast %cst : f32 to vector<8x512xf32>
    %12 = arith.maximumf %10, %11 : vector<8x512xf32>
    %13 = arith.truncf %12 : vector<8x512xf32> to vector<8x512xbf16>
    %c0_6 = arith.constant 0 : index
    %c0_7 = arith.constant 0 : index
    %14 = vector.load %arg10[%c0_6, %c0_7] : memref<8x128xf32, #tpu.memory_space<vmem>>, vector<8x128xf32>
    %c0_8 = arith.constant 0 : index
    %c0_9 = arith.constant 0 : index
    %15 = vector.load %arg4[%c0_8, %c0_9] : memref<512x128xbf16, #tpu.memory_space<vmem>>, vector<512x128xbf16>
    %cst_10 = arith.constant dense<0.000000e+00> : vector<8x128xf32>
    %16 = tpu.matmul %13, %15, %cst_10 {dimension_numbers = #tpu.dot_dimension_numbers<[1], [0], [0], [1], [0, 0, 1, 1], [], []>} : vector<8x512xbf16>, vector<512x128xbf16>, vector<8x128xf32> -> vector<8x128xf32>
    %17 = arith.addf %14, %16 : vector<8x128xf32>
    %c0_11 = arith.constant 0 : index
    %c0_12 = arith.constant 0 : index
    %18 = vector.load %arg10[%c0_11, %c0_12] : memref<8x128xf32, #tpu.memory_space<vmem>>, vector<8x128xf32>
    tpu.vector_store %arg10[%c0_11, %c0_12], %17 {strides = array<i32>} : memref<8x128xf32, #tpu.memory_space<vmem>>, vector<8x128xf32>,
    %c1_i32 = arith.constant 1 : i32
    %19 = arith.cmpi eq, %arg2, %c1_i32 : i32
    %20 = arith.extui %19 : i1 to i32
    %c0_i32_13 = arith.constant 0 : i32
    %21 = arith.cmpi ne, %20, %c0_i32_13 : i32
    scf.if %21 {
      %c0_14 = arith.constant 0 : index
      %c0_15 = arith.constant 0 : index
      %22 = vector.load %arg10[%c0_14, %c0_15] : memref<8x128xf32, #tpu.memory_space<vmem>>, vector<8x128xf32>
      %c0_16 = arith.constant 0 : index
      %c0_17 = arith.constant 0 : index
      %23 = vector.load %arg7[%c0_16, %c0_17] : memref<1x128xf32, #tpu.memory_space<vmem>>, vector<1x128xf32>
      %24 = vector.broadcast %23 : vector<1x128xf32> to vector<8x128xf32>
      %25 = arith.mulf %22, %24 : vector<8x128xf32>
      %c0_18 = arith.constant 0 : index
      %c0_19 = arith.constant 0 : index
      %26 = vector.load %arg8[%c0_18, %c0_19] : memref<1x128xf32, #tpu.memory_space<vmem>>, vector<1x128xf32>
      %27 = vector.broadcast %26 : vector<1x128xf32> to vector<8x128xf32>
      %28 = arith.addf %25, %27 : vector<8x128xf32>
      %cst_20 = arith.constant 0.000000e+00 : f32
      %29 = vector.broadcast %cst_20 : f32 to vector<8x128xf32>
      %30 = arith.maximumf %28, %29 : vector<8x128xf32>
      %31 = arith.truncf %30 : vector<8x128xf32> to vector<8x128xbf16>
      %c0_21 = arith.constant 0 : index
      %c0_22 = arith.constant 0 : index
      %32 = vector.load %arg9[%c0_21, %c0_22] : memref<8x128xbf16, #tpu.memory_space<vmem>>, vector<8x128xbf16>
      tpu.vector_store %arg9[%c0_21, %c0_22], %31 {strides = array<i32>} : memref<8x128xbf16, #tpu.memory_space<vmem>>, vector<8x128xbf16>,
    } else {
    }
    return
  }
  func.func @transform_0(%arg0: i32, %arg1: i32, %arg2: i32) -> (i32, i32) {
    %c0_i32 = arith.constant 0 : i32
    return %arg0, %arg2 : i32, i32
  }
  func.func @transform_1(%arg0: i32, %arg1: i32, %arg2: i32) -> (i32, i32) {
    %c0_i32 = arith.constant 0 : i32
    return %arg2, %arg1 : i32, i32
  }
  func.func @transform_2(%arg0: i32, %arg1: i32, %arg2: i32) -> (i32, i32) {
    %c0_i32 = arith.constant 0 : i32
    %c0_i32_0 = arith.constant 0 : i32
    return %c0_i32, %arg2 : i32, i32
  }
  func.func @transform_3(%arg0: i32, %arg1: i32, %arg2: i32) -> (i32, i32) {
    %c0_i32 = arith.constant 0 : i32
    %c0_i32_0 = arith.constant 0 : i32
    return %c0_i32, %arg2 : i32, i32
  }
  func.func @transform_4(%arg0: i32, %arg1: i32, %arg2: i32) -> (i32, i32) {
    %c0_i32 = arith.constant 0 : i32
    %c0_i32_0 = arith.constant 0 : i32
    return %c0_i32, %arg1 : i32, i32
  }
  func.func @transform_5(%arg0: i32, %arg1: i32, %arg2: i32) -> (i32, i32) {
    %c0_i32 = arith.constant 0 : i32
    %c0_i32_0 = arith.constant 0 : i32
    return %c0_i32, %arg1 : i32, i32
  }
  func.func @transform_6(%arg0: i32, %arg1: i32, %arg2: i32) -> (i32, i32) {
    %c0_i32 = arith.constant 0 : i32
    return %arg0, %arg1 : i32, i32
  }
}

module attributes {stable_mosaic.version = 11 : i64} {
  func.func @_fused_matmul_kernel(%arg0: i32, %arg1: i32, %arg2: i32, %arg3: memref<8x512xbf16, #tpu.memory_space<vmem>>, %arg4: memref<512x256xbf16, #tpu.memory_space<vmem>>, %arg5: memref<1x512xf32, #tpu.memory_space<vmem>>, %arg6: memref<1x512xf32, #tpu.memory_space<vmem>>, %arg7: memref<8x256xbf16, #tpu.memory_space<vmem>>, %arg8: memref<8x256xf32, #tpu.memory_space<vmem>>) attributes {dimension_semantics = [#tpu.dimension_semantics<parallel>, #tpu.dimension_semantics<parallel>, #tpu.dimension_semantics<arbitrary>], iteration_bounds = array<i64: 1, 2, 2>, scalar_prefetch = 0 : i64, scratch_operands = 1 : i64, tpu.core_type = #tpu.core_type<tc>, window_params = [{transform_indices = @transform_0, window_bounds = array<i64: 8, 512>}, {transform_indices = @transform_1, window_bounds = array<i64: 512, 256>}, {transform_indices = @transform_2, window_bounds = array<i64: 1, 512>}, {transform_indices = @transform_3, window_bounds = array<i64: 1, 512>}, {transform_indices = @transform_4, window_bounds = array<i64: 8, 256>}]} {
    %c0_i32 = arith.constant 0 : i32
    %0 = arith.cmpi eq, %arg2, %c0_i32 : i32
    %1 = arith.extui %0 : i1 to i32
    %c0_i32_0 = arith.constant 0 : i32
    %2 = arith.cmpi ne, %1, %c0_i32_0 : i32
    scf.if %2 {
      %cst_14 = arith.constant 0.000000e+00 : f32
      %22 = vector.broadcast %cst_14 : f32 to vector<8x256xf32>
      %c0_15 = arith.constant 0 : index
      %c0_16 = arith.constant 0 : index
      %23 = vector.load %arg8[%c0_15, %c0_16] : memref<8x256xf32, #tpu.memory_space<vmem>>, vector<8x256xf32>
      tpu.vector_store %arg8[%c0_15, %c0_16], %22 {strides = array<i32>} : memref<8x256xf32, #tpu.memory_space<vmem>>, vector<8x256xf32>,
    } else {
    }
    %c0 = arith.constant 0 : index
    %c0_1 = arith.constant 0 : index
    %3 = vector.load %arg3[%c0, %c0_1] : memref<8x512xbf16, #tpu.memory_space<vmem>>, vector<8x512xbf16>
    %4 = arith.extf %3 : vector<8x512xbf16> to vector<8x512xf32>
    %c0_2 = arith.constant 0 : index
    %c0_3 = arith.constant 0 : index
    %5 = vector.load %arg5[%c0_2, %c0_3] : memref<1x512xf32, #tpu.memory_space<vmem>>, vector<1x512xf32>
    %6 = vector.broadcast %5 : vector<1x512xf32> to vector<8x512xf32>
    %7 = arith.mulf %4, %6 : vector<8x512xf32>
    %c0_4 = arith.constant 0 : index
    %c0_5 = arith.constant 0 : index
    %8 = vector.load %arg6[%c0_4, %c0_5] : memref<1x512xf32, #tpu.memory_space<vmem>>, vector<1x512xf32>
    %9 = vector.broadcast %8 : vector<1x512xf32> to vector<8x512xf32>
    %10 = arith.addf %7, %9 : vector<8x512xf32>
    %cst = arith.constant 0.000000e+00 : f32
    %11 = vector.broadcast %cst : f32 to vector<8x512xf32>
    %12 = arith.maximumf %10, %11 : vector<8x512xf32>
    %13 = arith.truncf %12 : vector<8x512xf32> to vector<8x512xbf16>
    %c0_6 = arith.constant 0 : index
    %c0_7 = arith.constant 0 : index
    %14 = vector.load %arg8[%c0_6, %c0_7] : memref<8x256xf32, #tpu.memory_space<vmem>>, vector<8x256xf32>
    %c0_8 = arith.constant 0 : index
    %c0_9 = arith.constant 0 : index
    %15 = vector.load %arg4[%c0_8, %c0_9] : memref<512x256xbf16, #tpu.memory_space<vmem>>, vector<512x256xbf16>
    %cst_10 = arith.constant dense<0.000000e+00> : vector<8x256xf32>
    %16 = tpu.matmul %13, %15, %cst_10 {dimension_numbers = #tpu.dot_dimension_numbers<[1], [0], [0], [1], [0, 0, 1, 1], [], []>} : vector<8x512xbf16>, vector<512x256xbf16>, vector<8x256xf32> -> vector<8x256xf32>
    %17 = arith.addf %14, %16 : vector<8x256xf32>
    %c0_11 = arith.constant 0 : index
    %c0_12 = arith.constant 0 : index
    %18 = vector.load %arg8[%c0_11, %c0_12] : memref<8x256xf32, #tpu.memory_space<vmem>>, vector<8x256xf32>
    tpu.vector_store %arg8[%c0_11, %c0_12], %17 {strides = array<i32>} : memref<8x256xf32, #tpu.memory_space<vmem>>, vector<8x256xf32>,
    %c1_i32 = arith.constant 1 : i32
    %19 = arith.cmpi eq, %arg2, %c1_i32 : i32
    %20 = arith.extui %19 : i1 to i32
    %c0_i32_13 = arith.constant 0 : i32
    %21 = arith.cmpi ne, %20, %c0_i32_13 : i32
    scf.if %21 {
      %c0_14 = arith.constant 0 : index
      %c0_15 = arith.constant 0 : index
      %22 = vector.load %arg8[%c0_14, %c0_15] : memref<8x256xf32, #tpu.memory_space<vmem>>, vector<8x256xf32>
      %23 = arith.truncf %22 : vector<8x256xf32> to vector<8x256xbf16>
      %c0_16 = arith.constant 0 : index
      %c0_17 = arith.constant 0 : index
      %24 = vector.load %arg7[%c0_16, %c0_17] : memref<8x256xbf16, #tpu.memory_space<vmem>>, vector<8x256xbf16>
      tpu.vector_store %arg7[%c0_16, %c0_17], %23 {strides = array<i32>} : memref<8x256xbf16, #tpu.memory_space<vmem>>, vector<8x256xbf16>,
    } else {
    }
    return
  }
  func.func @transform_0(%arg0: i32, %arg1: i32, %arg2: i32) -> (i32, i32) {
    %c0_i32 = arith.constant 0 : i32
    return %arg0, %arg2 : i32, i32
  }
  func.func @transform_1(%arg0: i32, %arg1: i32, %arg2: i32) -> (i32, i32) {
    %c0_i32 = arith.constant 0 : i32
    return %arg2, %arg1 : i32, i32
  }
  func.func @transform_2(%arg0: i32, %arg1: i32, %arg2: i32) -> (i32, i32) {
    %c0_i32 = arith.constant 0 : i32
    %c0_i32_0 = arith.constant 0 : i32
    return %c0_i32, %arg2 : i32, i32
  }
  func.func @transform_3(%arg0: i32, %arg1: i32, %arg2: i32) -> (i32, i32) {
    %c0_i32 = arith.constant 0 : i32
    %c0_i32_0 = arith.constant 0 : i32
    return %c0_i32, %arg2 : i32, i32
  }
  func.func @transform_4(%arg0: i32, %arg1: i32, %arg2: i32) -> (i32, i32) {
    %c0_i32 = arith.constant 0 : i32
    return %arg0, %arg1 : i32, i32
  }
}

</mosaic_0001>

<bundles_post_ra>
// kernel: densenet121_forward.121
= control target key start
LH: loop header
LB: loop body
LE: loop exit
PB: predicated region body
PF: predicated region fallthrough
CT: control target
= control target key end

     0   :  { %s895_s1 = inlined_call_operand.vmem [shape: bf16[128,128], index: 1, kind: input, shape index: {}]   ;;  %s896_s0 = inlined_call_operand.vmem [shape: bf16[128,128], index: 0, kind: input, shape index: {}]   ;;  %s897_s2 = inlined_call_operand.vmem [shape: f32[1,128], index: 2, kind: input, shape index: {}]   ;;  %s898_s3 = inlined_call_operand.vmem [shape: f32[1,128], index: 3, kind: input, shape index: {}]   ;;  %s899_s4 = inlined_call_operand.vmem [shape: f32[1,128], index: 4, kind: input, shape index: {}]   ;;  %s900_s5 = inlined_call_operand.vmem [shape: f32[1,128], index: 5, kind: input, shape index: {}]   ;;  %s901_s6 = inlined_call_operand.vmem [shape: bf16[128,128], index: 6, kind: output, shape index: {}]  }
   0x1   :  { %v714_v0 = vld [vmem:[%s895_s1] sm:$0xff]   ;;  %v715_v1 = vld [vmem:[%s895_s1 + $0x8] sm:$0xff]   ;;  %v716_v2 = vld [vmem:[%s895_s1 + $0x10] sm:$0xff]  }
   0x2   :  { %666 = vmatprep.subr.bf16.mxu0 %v714_v0  ;;  %698 = vmatprep.subr.bf16.mxu1 %v714_v0  ;;  %v717_v3 = vld [vmem:[%s895_s1 + $0x18] sm:$0xff]   ;;  %v565_v4 = vld [vmem:[%s896_s0] sm:$0xff]   ;;  %v636_v9 = vld [vmem:[%s896_s0 + $0x8] sm:$0xff]  }
   0x3   :  { %667 = vmatpush3.bf16.msra.mxu0 %v714_v0  ;;  %706 = vmatpush3.bf16.msra.mxu1 %v714_v0  ;;  %v775_v5 = vld [vmem:[%s897_s2] ss:$0 sm:$0xff]  ;;  %v566_v6 = vunpack.c.l.bf16 %v565_v4  ;;  %v567_v7 = vunpack.c.h.bf16 %v565_v4  ;;  %v640_v13 = vld [vmem:[%s896_s0 + $0x28] sm:$0xff]   ;;  %v637_v16 = vld [vmem:[%s896_s0 + $0x10] sm:$0xff]   ;;  %v570_v20 = vunpack.c.l.bf16 %v636_v9  ;;  %v571_v21 = vunpack.c.h.bf16 %v636_v9 }
   0x4   :  { %668 = vmatprep.subr.bf16.mxu0 %v715_v1  ;;  %699 = vmatprep.subr.bf16.mxu1 %v715_v1  ;;  %v639_v8 = vld [vmem:[%s896_s0 + $0x20] sm:$0xff]   ;;  %v586_v24 = vunpack.c.l.bf16 %v640_v13  ;;  %v587_v25 = vunpack.c.h.bf16 %v640_v13  ;;  %v574_v28 = vunpack.c.l.bf16 %v637_v16  ;;  %v641_v31 = vld [vmem:[%s896_s0 + $0x30] sm:$0xff]   ;;  %v719_v32 = vld [vmem:[%s895_s1 + $0x28] sm:$0xff]   ;;  %v575_v40 = vunpack.c.h.bf16 %v637_v16 }
   0x5   :  { %v786_v10 = vld [vmem:[%s898_s3] ss:$0 sm:$0xff]  ;;  %v582_v11 = vunpack.c.l.bf16 %v639_v8  ;;  %v583_v12 = vunpack.c.h.bf16 %v639_v8  ;;  %v83_v14 = vmul.f32 %v566_v6, %v775_v5  ;;  %v84_v15 = vmul.f32 %v567_v7, %v775_v5  ;;  %v638_v44 = vld [vmem:[%s896_s0 + $0x18] sm:$0xff]   ;;  %v720_v48 = vld [vmem:[%s895_s1 + $0x30] sm:$0xff]  }
   0x6   :  { %v718_v17 = vld [vmem:[%s895_s1 + $0x20] sm:$0xff]   ;;  %v85_v35 = vmul.f32 %v570_v20, %v775_v5  ;;  %v86_v36 = vmul.f32 %v571_v21, %v775_v5  ;;  %v93_v38 = vmul.f32 %v586_v24, %v775_v5  ;;  %v94_v39 = vmul.f32 %v587_v25, %v775_v5  ;;  %v642_v47 = vld [vmem:[%s896_s0 + $0x38] sm:$0xff]  }
   0x7   :  { %669 = vmatpush3.bf16.msra.mxu0 %v715_v1  ;;  %707 = vmatpush3.bf16.msra.mxu1 %v715_v1  ;;  %v91_v18 = vmul.f32 %v582_v11, %v775_v5  ;;  %v92_v19 = vmul.f32 %v583_v12, %v775_v5  ;;  %v106_v22 = vadd.f32 %v786_v10, %v83_v14  ;;  %v590_v43 = vunpack.c.l.bf16 %v641_v31  ;;  %v721_v63 = vld [vmem:[%s895_s1 + $0x38] sm:$0xff]  }
   0x8   :  { %670 = vmatprep.subr.bf16.mxu0 %v716_v2  ;;  %700 = vmatprep.subr.bf16.mxu1 %v716_v2  ;;  %v107_v23 = vadd.f32 %v786_v10, %v84_v15  ;;  %v87_v42 = vmul.f32 %v574_v28, %v775_v5  ;;  %v88_v45 = vmul.f32 %v575_v40, %v775_v5  ;;  %v591_v46 = vunpack.c.h.bf16 %v641_v31  ;;  %v853_v28 = vld [vmem:[%s900_s5] ss:$0 sm:$0xff] }
   0x9   :  { %v114_v26 = vadd.f32 %v786_v10, %v91_v18  ;;  %v115_v27 = vadd.f32 %v786_v10, %v92_v19  ;;  %v122_v29 = vmax.f32 %v106_v22, 0.0  ;;  %v108_v49 = vadd.f32 %v786_v10, %v85_v35 }
   0xa   :  { %v123_v30 = vmax.f32 %v107_v23, 0.0  ;;  %v109_v50 = vadd.f32 %v786_v10, %v86_v36  ;;  %v95_v51 = vmul.f32 %v590_v43, %v775_v5  ;;  %v116_v52 = vadd.f32 %v786_v10, %v93_v38 }
   0xb   :  { %671 = vmatpush3.bf16.msra.mxu0 %v716_v2  ;;  %708 = vmatpush3.bf16.msra.mxu1 %v716_v2  ;;  %v130_v33 = vmax.f32 %v114_v26, 0.0  ;;  %v131_v34 = vmax.f32 %v115_v27, 0.0  ;;  %v117_v53 = vadd.f32 %v786_v10, %v94_v39  ;;  %v96_v54 = vmul.f32 %v591_v46, %v775_v5 }
   0xc   :  { %672 = vmatprep.subr.bf16.mxu0 %v717_v3  ;;  %701 = vmatprep.subr.bf16.mxu1 %v717_v3  ;;  %v138_v37 = vpack.c.bf16 %v123_v30, %v122_v29  ;;  %v578_v55 = vunpack.c.l.bf16 %v638_v44  ;;  %v110_v56 = vadd.f32 %v786_v10, %v87_v42  ;;  %v579_v57 = vunpack.c.h.bf16 %v638_v44 }
   0xd   :  { %v142_v41 = vpack.c.bf16 %v131_v34, %v130_v33  ;;  %v594_v58 = vunpack.c.l.bf16 %v642_v47  ;;  %v595_v59 = vunpack.c.h.bf16 %v642_v47  ;;  %v111_v60 = vadd.f32 %v786_v10, %v88_v45 }
   0xe   :  { %682 = vmatprep.mubr.bf16.mxu0 %v138_v37  ;;  %v118_v61 = vadd.f32 %v786_v10, %v95_v51  ;;  %v119_v62 = vadd.f32 %v786_v10, %v96_v54  ;;  %v124_v0 = vmax.f32 %v108_v49, 0.0  ;;  %v125_v1 = vmax.f32 %v109_v50, 0.0 }
   0xf   :  { %673 = vmatpush3.bf16.msra.mxu0 %v717_v3  ;;  %709 = vmatpush3.bf16.msra.mxu1 %v717_v3  ;;  %v132_v2 = vmax.f32 %v116_v52, 0.0  ;;  %v133_v3 = vmax.f32 %v117_v53, 0.0  ;;  %v89_v4 = vmul.f32 %v578_v55, %v775_v5  ;;  %v90_v6 = vmul.f32 %v579_v57, %v775_v5 }
  0x10   :  { %674 = vmatprep.subr.bf16.mxu0 %v718_v17  ;;  %702 = vmatprep.subr.bf16.mxu1 %v718_v17  ;;  %v97_v7 = vmul.f32 %v594_v58, %v775_v5  ;;  %v98_v8 = vmul.f32 %v595_v59, %v775_v5  ;;  %v126_v9 = vmax.f32 %v110_v56, 0.0  ;;  %v127_v11 = vmax.f32 %v111_v60, 0.0 }
  0x11   :  { %690 = vmatprep.mubr.bf16.mxu1 %v142_v41  ;;  %v134_v12 = vmax.f32 %v118_v61, 0.0  ;;  %v135_v13 = vmax.f32 %v119_v62, 0.0  ;;  %v139_v14 = vpack.c.bf16 %v125_v1, %v124_v0  ;;  %v143_v15 = vpack.c.bf16 %v133_v3, %v132_v2 }
  0x12   :  { %v112_v16 = vadd.f32 %v786_v10, %v89_v4  ;;  %v120_v18 = vadd.f32 %v786_v10, %v97_v7  ;;  %v121_v19 = vadd.f32 %v786_v10, %v98_v8  ;;  %v140_v5 = vpack.c.bf16 %v127_v11, %v126_v9 }
  0x13   :  { %675 = vmatpush3.bf16.msra.mxu0 %v718_v17  ;;  %710 = vmatpush3.bf16.msra.mxu1 %v718_v17  ;;  %v113_v17 = vadd.f32 %v786_v10, %v90_v6  ;;  %v144_v20 = vpack.c.bf16 %v135_v13, %v134_v12  ;;  %v530_v10 = vld [vmem:[%s899_s4] ss:$0 sm:$0xff] }
  0x14   :  { %676 = vmatprep.subr.bf16.mxu0 %v719_v32  ;;  %703 = vmatprep.subr.bf16.mxu1 %v719_v32  ;;  %v128_v21 = vmax.f32 %v112_v16, 0.0  ;;  %v136_v23 = vmax.f32 %v120_v18, 0.0  ;;  %v137_v24 = vmax.f32 %v121_v19, 0.0 }
  0x15   :  { %v129_v22 = vmax.f32 %v113_v17, 0.0 }
  0x16   :  { %v145_v26 = vpack.c.bf16 %v137_v24, %v136_v23 }
  0x17   :  { %677 = vmatpush3.bf16.msra.mxu0 %v719_v32  ;;  %711 = vmatpush3.bf16.msra.mxu1 %v719_v32  ;;  %v141_v25 = vpack.c.bf16 %v129_v22, %v128_v21 }
  0x18   :  { %678 = vmatprep.subr.bf16.mxu0 %v720_v48  ;;  %704 = vmatprep.subr.bf16.mxu1 %v720_v48 }
  0x1b   :  { %679 = vmatpush3.bf16.msra.mxu0 %v720_v48  ;;  %712 = vmatpush3.bf16.msra.mxu1 %v720_v48 }
  0x1c   :  { %680 = vmatprep.subr.bf16.mxu0 %v721_v63  ;;  %705 = vmatprep.subr.bf16.mxu1 %v721_v63 }
  0x1f   :  { %681 = vmatpush3.bf16.msra.mxu0 %v721_v63  ;;  %713 = vmatpush3.bf16.msra.mxu1 %v721_v63 }
  0x22   :  { %683 = vmatmul.mubr.bf16.vlgmr.msra.gmra.mrb[0].mxu0 %v139_v14  ;;  %691 = vmatmul.mubr.bf16.vlgmr.msra.gmra.mrb[0].mxu1 %v143_v15 }
  0x23   :  { %686 = vmatprep.mubr.bf16.mxu0 %v140_v5  ;;  %694 = vmatprep.mubr.bf16.mxu1 %v144_v20 }
  0x2a   :  { %687 = vmatmul.mubr.bf16.gmra.mrb[4].mxu0 %v141_v25  ;;  %695 = vmatmul.mubr.bf16.gmra.mrb[4].mxu1 %v145_v26 }
  0xf5   :  { %v684_v27 = vpop.f32.mrb[0].mxu0  ;;  %v692_v29 = vpop.f32.mrb[0].mxu1 }
  0xf6   :  { %v383_v30 = vmul.f32 %v684_v27, %v530_v10  ;;  %v391_v31 = vmul.f32 %v692_v29, %v530_v10  ;;  %v260_v32 = vpop.f32.mrb[1].mxu0  ;;  %v292_v33 = vpop.f32.mrb[1].mxu1 }
  0xf7   :  { %v381_v34 = vmul.f32 %v530_v10, %v260_v32  ;;  %v389_v35 = vmul.f32 %v530_v10, %v292_v33  ;;  %v685_v36 = vpop.f32.mrb[2].mxu0  ;;  %v693_v37 = vpop.f32.mrb[2].mxu1 }
  0xf8   :  { %v406_v38 = vadd.f32 %v853_v28, %v383_v30  ;;  %v414_v39 = vadd.f32 %v853_v28, %v391_v31  ;;  %v384_v40 = vmul.f32 %v685_v36, %v530_v10  ;;  %v392_v41 = vmul.f32 %v693_v37, %v530_v10  ;;  %v263_v42 = vpop.f32.mrb[3].mxu0  ;;  %v295_v43 = vpop.f32.mrb[3].mxu1 }
  0xf9   :  { %v404_v44 = vadd.f32 %v853_v28, %v381_v34  ;;  %v412_v45 = vadd.f32 %v853_v28, %v389_v35  ;;  %v382_v46 = vmul.f32 %v530_v10, %v263_v42  ;;  %v390_v47 = vmul.f32 %v530_v10, %v295_v43 }
  0xfa   :  { %v407_v48 = vadd.f32 %v853_v28, %v384_v40  ;;  %v415_v49 = vadd.f32 %v853_v28, %v392_v41  ;;  %v422_v52 = vmax.f32 %v406_v38, 0.0  ;;  %v430_v53 = vmax.f32 %v414_v39, 0.0 }
  0xfb   :  { %v405_v50 = vadd.f32 %v853_v28, %v382_v46  ;;  %v413_v51 = vadd.f32 %v853_v28, %v390_v47  ;;  %v420_v56 = vmax.f32 %v404_v44, 0.0  ;;  %v428_v57 = vmax.f32 %v412_v45, 0.0 }
  0xfc   :  { %v423_v54 = vmax.f32 %v407_v48, 0.0  ;;  %v431_v55 = vmax.f32 %v415_v49, 0.0 }
  0xfd   :  { %v421_v58 = vmax.f32 %v405_v50, 0.0  ;;  %v429_v59 = vmax.f32 %v413_v51, 0.0  ;;  %v688_v60 = vpop.f32.mrb[4].mxu0  ;;  %v696_v61 = vpop.f32.mrb[4].mxu1 }
  0xfe   :  { %v604_v62 = vpack.c.bf16 %v423_v54, %v422_v52  ;;  %v624_v63 = vpack.c.bf16 %v431_v55, %v430_v53  ;;  %v387_v0 = vmul.f32 %v688_v60, %v530_v10  ;;  %v395_v1 = vmul.f32 %v696_v61, %v530_v10  ;;  %v276_v2 = vpop.f32.mrb[5].mxu0  ;;  %v308_v3 = vpop.f32.mrb[5].mxu1 }
  0xff   :  { %v599_v4 = vpack.c.bf16 %v421_v58, %v420_v56  ;;  %v619_v6 = vpack.c.bf16 %v429_v59, %v428_v57  ;;  %v385_v7 = vmul.f32 %v530_v10, %v276_v2  ;;  %v393_v8 = vmul.f32 %v530_v10, %v308_v3  ;;  %v689_v9 = vpop.f32.mrb[6].mxu0  ;;  %v697_v11 = vpop.f32.mrb[6].mxu1 }
 0x100   :  { %643 = vst [vmem:[%s901_s6 + $0x8] sm:$0xff] %v604_v62   ;;  %647 = vst [vmem:[%s901_s6 + $0x28] sm:$0xff] %v624_v63   ;;  %v410_v12 = vadd.f32 %v853_v28, %v387_v0  ;;  %v418_v13 = vadd.f32 %v853_v28, %v395_v1  ;;  %v388_v14 = vmul.f32 %v689_v9, %v530_v10  ;;  %v279_v16 = vpop.f32.mrb[7].mxu0  ;;  %v311_v17 = vpop.f32.mrb[7].mxu1 }
 0x101   :  { %v396_v15 = vmul.f32 %v697_v11, %v530_v10  ;;  %600 = vst [vmem:[%s901_s6] sm:$0xff] %v599_v4   ;;  %646 = vst [vmem:[%s901_s6 + $0x20] sm:$0xff] %v619_v6   ;;  %v408_v18 = vadd.f32 %v853_v28, %v385_v7  ;;  %v416_v19 = vadd.f32 %v853_v28, %v393_v8 }
 0x102   :  { %v386_v5 = vmul.f32 %v530_v10, %v279_v16  ;;  %v394_v20 = vmul.f32 %v530_v10, %v311_v17  ;;  %v411_v21 = vadd.f32 %v853_v28, %v388_v14  ;;  %v426_v25 = vmax.f32 %v410_v12, 0.0 }
 0x103   :  { %v419_v22 = vadd.f32 %v853_v28, %v396_v15  ;;  %v434_v26 = vmax.f32 %v418_v13, 0.0  ;;  %v424_v30 = vmax.f32 %v408_v18, 0.0  ;;  %v432_v31 = vmax.f32 %v416_v19, 0.0 }
 0x104   :  { %v409_v23 = vadd.f32 %v853_v28, %v386_v5  ;;  %v417_v24 = vadd.f32 %v853_v28, %v394_v20  ;;  %v427_v27 = vmax.f32 %v411_v21, 0.0 }
 0x105   :  { %v435_v29 = vmax.f32 %v419_v22, 0.0 }
 0x106   :  { %v425_v32 = vmax.f32 %v409_v23, 0.0  ;;  %v433_v33 = vmax.f32 %v417_v24, 0.0  ;;  %v614_v34 = vpack.c.bf16 %v427_v27, %v426_v25 }
 0x107   :  { %v634_v35 = vpack.c.bf16 %v435_v29, %v434_v26 }
 0x108   :  { %v609_v36 = vpack.c.bf16 %v425_v32, %v424_v30  ;;  %v629_v10 = vpack.c.bf16 %v433_v33, %v432_v31  ;;  %645 = vst [vmem:[%s901_s6 + $0x18] sm:$0xff] %v614_v34  }
 0x109   :  { %649 = vst [vmem:[%s901_s6 + $0x38] sm:$0xff] %v634_v35  }
 0x10a   :  { %644 = vst [vmem:[%s901_s6 + $0x10] sm:$0xff] %v609_v36   ;;  %648 = vst [vmem:[%s901_s6 + $0x30] sm:$0xff] %v629_v10  }

// kernel: densenet121_forward.120
= control target key start
LH: loop header
LB: loop body
LE: loop exit
PB: predicated region body
PF: predicated region fallthrough
CT: control target
= control target key end

     0   :  { %s1843_s15 = smov 0   ;;  %s1845_s16 = smov 0   ;;  %s2054_s0 = inlined_call_operand.vmem [shape: bf16[512,256], index: 0, kind: input, shape index: {}]   ;;  %s2055_s1 = inlined_call_operand.vmem [shape: bf16[256,128], index: 1, kind: input, shape index: {}]   ;;  %s2056_s2 = inlined_call_operand.vmem [shape: f32[1,128], index: 2, kind: input, shape index: {}]   ;;  %s2057_s3 = inlined_call_operand.vmem [shape: f32[1,128], index: 3, kind: input, shape index: {}]   ;;  %s2058_s4 = inlined_call_operand.vmem [shape: bf16[512,128], index: 4, kind: output, shape index: {}]  }
   0x1   :  { %s1847_s17 = smov 0  }
   0x2 LB: > { %s33_s18 = sadd.s32 1, %s1812_s16  ;;  %p1360_p0 = scmp.ge.s32.totalorder %s1816_s17, 1  ;;  %s1816_s17 = sphi %s1847_s17, %s14_s17   ;;  %s1812_s16 = sphi %s1845_s16, %s2060_s16   ;;  %s1808_s15 = sphi %s1843_s15, %s2059_s15  }
   0x3   : > { %p35_p1 = scmp.ge.s32.totalorder %s33_s18, 2  ;;  %p224_p2 = scmp.lt.s32.totalorder %s1816_s17, 3 }
   0x5   : > { %s2062_s18 = smov (%p35_p1, %s33_s18), 0  ;;  %p225_p3 = pnand %p1360_p0, %p224_p2 }
   0x6   : > { %v1730_v0 = vld [vmem:[%s2055_s1 + $0x40] sm:$0xff] (!%p225_p3)   ;;  %s1361_s21 = sshll.u32 (!%p225_p3), %s1808_s15, 5  ;;  %v1732_v2 = vld [vmem:[%s2055_s1 + $0x48] sm:$0xff] (!%p225_p3)   ;;  %v1734_v4 = vld [vmem:[%s2055_s1 + $0x50] sm:$0xff] (!%p225_p3)  }
   0x7   : > { %228 = sbr.rel (%p225_p3) target bundleno = 322 (0x142), region = 36  ;;  %v1731_v1 = vld [vmem:[%s2055_s1] sm:$0xff] (!%p225_p3)   ;;  %1578 = vmatprep.subr.bf16.mxu0 (!%p225_p3), %v1730_v0  ;;  %1690 = vmatprep.subr.bf16.mxu1 (!%p225_p3), %v1730_v0  ;;  %v1733_v3 = vld [vmem:[%s2055_s1 + $0x8] sm:$0xff] (!%p225_p3)   ;;  %p274_p4 = scmp.lt.s32.totalorder (!%p225_p3), %s1361_s21, 63  ;;  %v1735_v5 = vld [vmem:[%s2055_s1 + $0x10] sm:$0xff] (!%p225_p3)  }
   0x8   : > { %1579 = vmatpush3.bf16.msra.mxu0 (!%p225_p3), %v1731_v1  ;;  %1698 = vmatpush3.bf16.msra.mxu1 (!%p225_p3), %v1731_v1  ;;  %v1736_v6 = vld [vmem:[%s2055_s1 + $0x58] sm:$0xff] (!%p225_p3)   ;;  %v1738_v8 = vld [vmem:[%s2055_s1 + $0x60] sm:$0xff] (!%p225_p3)   ;;  %v1740_v10 = vld [vmem:[%s2055_s1 + $0x68] sm:$0xff] (!%p225_p3)  }
   0x9   : > { %1580 = vmatprep.subr.bf16.mxu0 (!%p225_p3), %v1732_v2  ;;  %1691 = vmatprep.subr.bf16.mxu1 (!%p225_p3), %v1732_v2  ;;  %v1737_v7 = vld [vmem:[%s2055_s1 + $0x18] sm:$0xff] (!%p225_p3)   ;;  %v1739_v9 = vld [vmem:[%s2055_s1 + $0x20] sm:$0xff] (!%p225_p3)   ;;  %v1741_v13 = vld [vmem:[%s2055_s1 + $0x28] sm:$0xff] (!%p225_p3)  }
   0xa   : > { %v1742_v14 = vld [vmem:[%s2055_s1 + $0x70] sm:$0xff] (!%p225_p3)   ;;  %v1744_v16 = vld [vmem:[%s2055_s1 + $0x78] sm:$0xff] (!%p225_p3)   ;;  %v1952_v51 = vld [vmem:[%s2056_s2] ss:$0 sm:$0xff] (!%p225_p3) }
   0xb   : > { %v1743_v15 = vld [vmem:[%s2055_s1 + $0x30] sm:$0xff] (!%p225_p3)   ;;  %v1745_v17 = vld [vmem:[%s2055_s1 + $0x38] sm:$0xff] (!%p225_p3)   ;;  %v1957_v57 = vld [vmem:[%s2057_s3] ss:$0 sm:$0xff] (!%p225_p3) }
   0xc   : > { %1581 = vmatpush3.bf16.msra.mxu0 (!%p225_p3), %v1733_v3  ;;  %1699 = vmatpush3.bf16.msra.mxu1 (!%p225_p3), %v1733_v3 }
   0xd   : > { %1582 = vmatprep.subr.bf16.mxu0 (!%p225_p3), %v1734_v4  ;;  %1692 = vmatprep.subr.bf16.mxu1 (!%p225_p3), %v1734_v4 }
   0xe   : > { %s2064_s21 = smov (!%p274_p4, %s1361_s21), 63 }
   0xf   : > { %s1450_s10 = sshll.u32 %s2064_s21, 3  ;;  %s1365_s12 = sshll.u32 %s2064_s21, 2 }
  0x10   : > { %1583 = vmatpush3.bf16.msra.mxu0 %v1735_v5  ;;  %1700 = vmatpush3.bf16.msra.mxu1 %v1735_v5  ;;  %s1894_s15 = scalar_lea.vmem %s2054_s0, %s1450_s10  ;;  %s1971_s21 = scalar_lea.vmem %s2058_s4, %s1365_s12 }
  0x11   : > { %1584 = vmatprep.subr.bf16.mxu0 %v1736_v6  ;;  %1693 = vmatprep.subr.bf16.mxu1 %v1736_v6  ;;  %v1748_v11 = vld [vmem:[%s1894_s15 + $0x4] ss:$8 sps:$4 sm:$0xff]   ;;  %v1746_v18 = vld [vmem:[%s1894_s15] ss:$8 sps:$4 sm:$0xff]   ;;  %v1752_v20 = vld [vmem:[%s1894_s15 + $0x14] ss:$8 sps:$4 sm:$0xff]  }
  0x12   : > { %v1751_v12 = vld [vmem:[%s1894_s15 + $0x84] ss:$8 sps:$4 sm:$0xff]   ;;  %729 = vmatprep.mubr.bf16.mxu0 %v1748_v11  ;;  %v1749_v19 = vld [vmem:[%s1894_s15 + $0x80] ss:$8 sps:$4 sm:$0xff]   ;;  %v1754_v21 = vld [vmem:[%s1894_s15 + $0x94] ss:$8 sps:$4 sm:$0xff]  }
  0x13   : > { %793 = vmatprep.mubr.bf16.mxu1 %v1751_v12  ;;  %v1756_v22 = vld [vmem:[%s1894_s15 + $0x10] ss:$8 sps:$4 sm:$0xff]   ;;  %v1758_v24 = vld [vmem:[%s1894_s15 + $0x24] ss:$8 sps:$4 sm:$0xff]   ;;  %v1762_v26 = vld [vmem:[%s1894_s15 + $0x20] ss:$8 sps:$4 sm:$0xff]  }
  0x14   : > { %1585 = vmatpush3.bf16.msra.mxu0 %v1737_v7  ;;  %1701 = vmatpush3.bf16.msra.mxu1 %v1737_v7  ;;  %v1757_v23 = vld [vmem:[%s1894_s15 + $0x90] ss:$8 sps:$4 sm:$0xff]   ;;  %v1760_v25 = vld [vmem:[%s1894_s15 + $0xa4] ss:$8 sps:$4 sm:$0xff]   ;;  %v1763_v27 = vld [vmem:[%s1894_s15 + $0xa0] ss:$8 sps:$4 sm:$0xff]  }
  0x15   : > { %1586 = vmatprep.subr.bf16.mxu0 %v1738_v8  ;;  %1694 = vmatprep.subr.bf16.mxu1 %v1738_v8  ;;  %v1764_v28 = vld [vmem:[%s1894_s15 + $0x34] ss:$8 sps:$4 sm:$0xff]   ;;  %v1768_v30 = vld [vmem:[%s1894_s15 + $0x30] ss:$8 sps:$4 sm:$0xff]   ;;  %v1770_v32 = vld [vmem:[%s1894_s15 + $0x44] ss:$8 sps:$4 sm:$0xff]  }
  0x16   : > { %v1766_v29 = vld [vmem:[%s1894_s15 + $0xb4] ss:$8 sps:$4 sm:$0xff]   ;;  %v1769_v31 = vld [vmem:[%s1894_s15 + $0xb0] ss:$8 sps:$4 sm:$0xff]   ;;  %v1772_v33 = vld [vmem:[%s1894_s15 + $0xc4] ss:$8 sps:$4 sm:$0xff]  }
  0x17   : > { %v1774_v34 = vld [vmem:[%s1894_s15 + $0x40] ss:$8 sps:$4 sm:$0xff]   ;;  %v1776_v36 = vld [vmem:[%s1894_s15 + $0x54] ss:$8 sps:$4 sm:$0xff]   ;;  %v1780_v38 = vld [vmem:[%s1894_s15 + $0x50] ss:$8 sps:$4 sm:$0xff]  }
  0x18   : > { %1587 = vmatpush3.bf16.msra.mxu0 %v1739_v9  ;;  %1702 = vmatpush3.bf16.msra.mxu1 %v1739_v9  ;;  %v1775_v35 = vld [vmem:[%s1894_s15 + $0xc0] ss:$8 sps:$4 sm:$0xff]   ;;  %v1778_v37 = vld [vmem:[%s1894_s15 + $0xd4] ss:$8 sps:$4 sm:$0xff]   ;;  %v1781_v39 = vld [vmem:[%s1894_s15 + $0xd0] ss:$8 sps:$4 sm:$0xff]  }
  0x19   : > { %1588 = vmatprep.subr.bf16.mxu0 %v1740_v10  ;;  %1695 = vmatprep.subr.bf16.mxu1 %v1740_v10  ;;  %v1782_v40 = vld [vmem:[%s1894_s15 + $0x64] ss:$8 sps:$4 sm:$0xff]   ;;  %v1786_v42 = vld [vmem:[%s1894_s15 + $0x60] ss:$8 sps:$4 sm:$0xff]   ;;  %v1788_v44 = vld [vmem:[%s1894_s15 + $0x74] ss:$8 sps:$4 sm:$0xff]  }
  0x1a   : > { %v1784_v41 = vld [vmem:[%s1894_s15 + $0xe4] ss:$8 sps:$4 sm:$0xff]   ;;  %v1787_v43 = vld [vmem:[%s1894_s15 + $0xe0] ss:$8 sps:$4 sm:$0xff]   ;;  %v1790_v45 = vld [vmem:[%s1894_s15 + $0xf4] ss:$8 sps:$4 sm:$0xff]  }
  0x1b   : > { %v1792_v46 = vld [vmem:[%s1894_s15 + $0x70] ss:$8 sps:$4 sm:$0xff]  }
  0x1c   : > { %1589 = vmatpush3.bf16.msra.mxu0 %v1741_v13  ;;  %1703 = vmatpush3.bf16.msra.mxu1 %v1741_v13  ;;  %v1793_v47 = vld [vmem:[%s1894_s15 + $0xf0] ss:$8 sps:$4 sm:$0xff]  }
  0x1d   : > { %1590 = vmatprep.subr.bf16.mxu0 %v1742_v14  ;;  %1696 = vmatprep.subr.bf16.mxu1 %v1742_v14 }
  0x20   : > { %1591 = vmatpush3.bf16.msra.mxu0 %v1743_v15  ;;  %1704 = vmatpush3.bf16.msra.mxu1 %v1743_v15 }
  0x21   : > { %1592 = vmatprep.subr.bf16.mxu0 %v1744_v16  ;;  %1697 = vmatprep.subr.bf16.mxu1 %v1744_v16 }
  0x24   : > { %1593 = vmatpush3.bf16.msra.mxu0 %v1745_v17  ;;  %1705 = vmatpush3.bf16.msra.mxu1 %v1745_v17 }
  0x27   : > { %730 = vmatmul.mubr.bf16.vlgmr.msra.gmra.mrb[0].mxu0 %v1746_v18  ;;  %794 = vmatmul.mubr.bf16.vlgmr.msra.gmra.mrb[0].mxu1 %v1749_v19 }
  0x28   : > { %737 = vmatprep.mubr.bf16.mxu0 %v1752_v20  ;;  %801 = vmatprep.mubr.bf16.mxu1 %v1754_v21 }
  0x2f   : > { %738 = vmatmul.mubr.bf16.gmra.mrb[4].mxu0 %v1756_v22  ;;  %802 = vmatmul.mubr.bf16.gmra.mrb[4].mxu1 %v1757_v23 }
  0x30   : > { %745 = vmatprep.mubr.bf16.mxu0 %v1758_v24  ;;  %809 = vmatprep.mubr.bf16.mxu1 %v1760_v25 }
  0x37   : > { %746 = vmatmul.mubr.bf16.gmra.mrb[8].mxu0 %v1762_v26  ;;  %810 = vmatmul.mubr.bf16.gmra.mrb[8].mxu1 %v1763_v27 }
  0x38   : > { %753 = vmatprep.mubr.bf16.mxu0 %v1764_v28  ;;  %817 = vmatprep.mubr.bf16.mxu1 %v1766_v29 }
  0x3f   : > { %754 = vmatmul.mubr.bf16.gmra.mrb[12].mxu0 %v1768_v30  ;;  %818 = vmatmul.mubr.bf16.gmra.mrb[12].mxu1 %v1769_v31 }
  0x40   : > { %761 = vmatprep.mubr.bf16.mxu0 %v1770_v32  ;;  %825 = vmatprep.mubr.bf16.mxu1 %v1772_v33 }
  0x47   : > { %762 = vmatmul.mubr.bf16.gmra.mrb[16].mxu0 %v1774_v34  ;;  %826 = vmatmul.mubr.bf16.gmra.mrb[16].mxu1 %v1775_v35 }
  0x48   : > { %769 = vmatprep.mubr.bf16.mxu0 %v1776_v36  ;;  %833 = vmatprep.mubr.bf16.mxu1 %v1778_v37 }
  0x4f   : > { %770 = vmatmul.mubr.bf16.gmra.mrb[20].mxu0 %v1780_v38  ;;  %834 = vmatmul.mubr.bf16.gmra.mrb[20].mxu1 %v1781_v39 }
  0x50   : > { %777 = vmatprep.mubr.bf16.mxu0 %v1782_v40  ;;  %841 = vmatprep.mubr.bf16.mxu1 %v1784_v41 }
  0x57   : > { %778 = vmatmul.mubr.bf16.gmra.mrb[24].mxu0 %v1786_v42  ;;  %842 = vmatmul.mubr.bf16.gmra.mrb[24].mxu1 %v1787_v43 }
  0x58   : > { %785 = vmatprep.mubr.bf16.mxu0 %v1788_v44  ;;  %849 = vmatprep.mubr.bf16.mxu1 %v1790_v45 }
  0x5f   : > { %786 = vmatmul.mubr.bf16.gmra.mrb[28].mxu0 %v1792_v46  ;;  %850 = vmatmul.mubr.bf16.gmra.mrb[28].mxu1 %v1793_v47 }
  0xfa   : > { %v1594_v48 = vpop.f32.mrb[0].mxu0  ;;  %v1642_v49 = vpop.f32.mrb[0].mxu1 }
  0xfb   : > { %v1595_v50 = vpop.f32.mrb[1].mxu0  ;;  %v1643_v52 = vpop.f32.mrb[1].mxu1 }
  0xfc   : > { %v1596_v53 = vadd.f32 %v1595_v50, %v1594_v48  ;;  %v1644_v54 = vadd.f32 %v1643_v52, %v1642_v49  ;;  %v1597_v55 = vpop.f32.mrb[2].mxu0  ;;  %v1645_v56 = vpop.f32.mrb[2].mxu1 }
  0xfd   : > { %v1598_v58 = vpop.f32.mrb[3].mxu0  ;;  %v1646_v59 = vpop.f32.mrb[3].mxu1 }
  0xfe   : > { %v964_v60 = vmul.f32 %v1596_v53, %v1952_v51  ;;  %v980_v61 = vmul.f32 %v1644_v54, %v1952_v51  ;;  %v1599_v62 = vadd.f32 %v1598_v58, %v1597_v55  ;;  %v1647_v63 = vadd.f32 %v1646_v59, %v1645_v56 }
 0x100   : > { %v1003_v0 = vadd.f32 %v1957_v57, %v964_v60  ;;  %v1019_v1 = vadd.f32 %v1957_v57, %v980_v61  ;;  %v965_v2 = vmul.f32 %v1599_v62, %v1952_v51  ;;  %v981_v3 = vmul.f32 %v1647_v63, %v1952_v51 }
 0x102   : > { %v1004_v4 = vadd.f32 %v1957_v57, %v965_v2  ;;  %v1020_v5 = vadd.f32 %v1957_v57, %v981_v3  ;;  %v1600_v6 = vpop.f32.mrb[4].mxu0  ;;  %v1648_v7 = vpop.f32.mrb[4].mxu1  ;;  %v1035_v8 = vmax.f32 %v1003_v0, 0.0  ;;  %v1051_v9 = vmax.f32 %v1019_v1, 0.0 }
 0x103   : > { %v1601_v10 = vpop.f32.mrb[5].mxu0  ;;  %v1649_v11 = vpop.f32.mrb[5].mxu1 }
 0x104   : > { %v1036_v12 = vmax.f32 %v1004_v4, 0.0  ;;  %v1052_v13 = vmax.f32 %v1020_v5, 0.0  ;;  %v1602_v14 = vadd.f32 %v1601_v10, %v1600_v6  ;;  %v1650_v15 = vadd.f32 %v1649_v11, %v1648_v7  ;;  %v1603_v16 = vpop.f32.mrb[6].mxu0  ;;  %v1651_v17 = vpop.f32.mrb[6].mxu1 }
 0x105   : > { %v1604_v18 = vpop.f32.mrb[7].mxu0  ;;  %v1652_v19 = vpop.f32.mrb[7].mxu1 }
 0x106   : > { %v1486_v20 = vpack.c.bf16 %v1036_v12, %v1035_v8  ;;  %v1526_v21 = vpack.c.bf16 %v1052_v13, %v1051_v9  ;;  %v966_v22 = vmul.f32 %v1602_v14, %v1952_v51  ;;  %v982_v23 = vmul.f32 %v1650_v15, %v1952_v51 }
 0x107   : > { %v1605_v24 = vadd.f32 %v1604_v18, %v1603_v16  ;;  %v1653_v25 = vadd.f32 %v1652_v19, %v1651_v17 }
 0x108   : > { %1487 = vst [vmem:[%s1971_s21] sm:$0xff] %v1486_v20   ;;  %1570 = vst [vmem:[%s1971_s21 + $0x40] sm:$0xff] %v1526_v21   ;;  %v1005_v26 = vadd.f32 %v1957_v57, %v966_v22  ;;  %v1021_v27 = vadd.f32 %v1957_v57, %v982_v23 }
 0x109   : > { %v967_v28 = vmul.f32 %v1605_v24, %v1952_v51  ;;  %v983_v29 = vmul.f32 %v1653_v25, %v1952_v51 }
 0x10a   : > { %v1606_v30 = vpop.f32.mrb[8].mxu0  ;;  %v1654_v31 = vpop.f32.mrb[8].mxu1  ;;  %v1037_v40 = vmax.f32 %v1005_v26, 0.0  ;;  %v1053_v41 = vmax.f32 %v1021_v27, 0.0 }
 0x10b   : > { %v1006_v32 = vadd.f32 %v1957_v57, %v967_v28  ;;  %v1022_v33 = vadd.f32 %v1957_v57, %v983_v29  ;;  %v1607_v34 = vpop.f32.mrb[9].mxu0  ;;  %v1655_v35 = vpop.f32.mrb[9].mxu1 }
 0x10c   : > { %v1608_v36 = vadd.f32 %v1607_v34, %v1606_v30  ;;  %v1656_v37 = vadd.f32 %v1655_v35, %v1654_v31  ;;  %v1609_v38 = vpop.f32.mrb[10].mxu0  ;;  %v1657_v39 = vpop.f32.mrb[10].mxu1 }
 0x10d   : > { %v1038_v42 = vmax.f32 %v1006_v32, 0.0  ;;  %v1054_v43 = vmax.f32 %v1022_v33, 0.0  ;;  %v1610_v44 = vpop.f32.mrb[11].mxu0  ;;  %v1658_v45 = vpop.f32.mrb[11].mxu1 }
 0x10e   : > { %v968_v46 = vmul.f32 %v1608_v36, %v1952_v51  ;;  %v984_v47 = vmul.f32 %v1656_v37, %v1952_v51  ;;  %v1611_v48 = vadd.f32 %v1610_v44, %v1609_v38  ;;  %v1659_v49 = vadd.f32 %v1658_v45, %v1657_v39 }
 0x10f   : > { %v1491_v50 = vpack.c.bf16 %v1038_v42, %v1037_v40  ;;  %v1531_v52 = vpack.c.bf16 %v1054_v43, %v1053_v41 }
 0x110   : > { %v1007_v53 = vadd.f32 %v1957_v57, %v968_v46  ;;  %v1023_v54 = vadd.f32 %v1957_v57, %v984_v47  ;;  %v969_v55 = vmul.f32 %v1611_v48, %v1952_v51  ;;  %v985_v56 = vmul.f32 %v1659_v49, %v1952_v51 }
 0x111   : > { %1563 = vst [vmem:[%s1971_s21 + $0x8] sm:$0xff] %v1491_v50   ;;  %1571 = vst [vmem:[%s1971_s21 + $0x48] sm:$0xff] %v1531_v52  }
 0x112   : > { %v1008_v58 = vadd.f32 %v1957_v57, %v969_v55  ;;  %v1024_v59 = vadd.f32 %v1957_v57, %v985_v56  ;;  %v1612_v60 = vpop.f32.mrb[12].mxu0  ;;  %v1660_v61 = vpop.f32.mrb[12].mxu1  ;;  %v1039_v62 = vmax.f32 %v1007_v53, 0.0  ;;  %v1055_v63 = vmax.f32 %v1023_v54, 0.0 }
 0x113   : > { %v1613_v0 = vpop.f32.mrb[13].mxu0  ;;  %v1661_v1 = vpop.f32.mrb[13].mxu1 }
 0x114   : > { %v1040_v2 = vmax.f32 %v1008_v58, 0.0  ;;  %v1056_v3 = vmax.f32 %v1024_v59, 0.0  ;;  %v1614_v4 = vadd.f32 %v1613_v0, %v1612_v60  ;;  %v1662_v5 = vadd.f32 %v1661_v1, %v1660_v61  ;;  %v1615_v6 = vpop.f32.mrb[14].mxu0  ;;  %v1663_v7 = vpop.f32.mrb[14].mxu1 }
 0x115   : > { %v1616_v8 = vpop.f32.mrb[15].mxu0  ;;  %v1664_v9 = vpop.f32.mrb[15].mxu1 }
 0x116   : > { %v1496_v10 = vpack.c.bf16 %v1040_v2, %v1039_v62  ;;  %v1536_v11 = vpack.c.bf16 %v1056_v3, %v1055_v63  ;;  %v970_v12 = vmul.f32 %v1614_v4, %v1952_v51  ;;  %v986_v13 = vmul.f32 %v1662_v5, %v1952_v51 }
 0x117   : > { %v1617_v14 = vadd.f32 %v1616_v8, %v1615_v6  ;;  %v1665_v15 = vadd.f32 %v1664_v9, %v1663_v7 }
 0x118   : > { %1564 = vst [vmem:[%s1971_s21 + $0x10] sm:$0xff] %v1496_v10   ;;  %1572 = vst [vmem:[%s1971_s21 + $0x50] sm:$0xff] %v1536_v11   ;;  %v1009_v16 = vadd.f32 %v1957_v57, %v970_v12  ;;  %v1025_v17 = vadd.f32 %v1957_v57, %v986_v13 }
 0x119   : > { %v971_v18 = vmul.f32 %v1617_v14, %v1952_v51  ;;  %v987_v19 = vmul.f32 %v1665_v15, %v1952_v51 }
 0x11a   : > { %v1618_v20 = vpop.f32.mrb[16].mxu0  ;;  %v1666_v21 = vpop.f32.mrb[16].mxu1  ;;  %v1041_v30 = vmax.f32 %v1009_v16, 0.0  ;;  %v1057_v31 = vmax.f32 %v1025_v17, 0.0 }
 0x11b   : > { %v1010_v22 = vadd.f32 %v1957_v57, %v971_v18  ;;  %v1026_v23 = vadd.f32 %v1957_v57, %v987_v19  ;;  %v1619_v24 = vpop.f32.mrb[17].mxu0  ;;  %v1667_v25 = vpop.f32.mrb[17].mxu1 }
 0x11c   : > { %v1620_v26 = vadd.f32 %v1619_v24, %v1618_v20  ;;  %v1668_v27 = vadd.f32 %v1667_v25, %v1666_v21  ;;  %v1621_v28 = vpop.f32.mrb[18].mxu0  ;;  %v1669_v29 = vpop.f32.mrb[18].mxu1 }
 0x11d   : > { %v1042_v32 = vmax.f32 %v1010_v22, 0.0  ;;  %v1058_v33 = vmax.f32 %v1026_v23, 0.0  ;;  %v1622_v34 = vpop.f32.mrb[19].mxu0  ;;  %v1670_v35 = vpop.f32.mrb[19].mxu1 }
 0x11e   : > { %v972_v36 = vmul.f32 %v1620_v26, %v1952_v51  ;;  %v988_v37 = vmul.f32 %v1668_v27, %v1952_v51  ;;  %v1623_v38 = vadd.f32 %v1622_v34, %v1621_v28  ;;  %v1671_v39 = vadd.f32 %v1670_v35, %v1669_v29 }
 0x11f   : > { %v1501_v40 = vpack.c.bf16 %v1042_v32, %v1041_v30  ;;  %v1541_v41 = vpack.c.bf16 %v1058_v33, %v1057_v31 }
 0x120   : > { %v1011_v42 = vadd.f32 %v1957_v57, %v972_v36  ;;  %v1027_v43 = vadd.f32 %v1957_v57, %v988_v37  ;;  %v973_v44 = vmul.f32 %v1623_v38, %v1952_v51  ;;  %v989_v45 = vmul.f32 %v1671_v39, %v1952_v51 }
 0x121   : > { %1565 = vst [vmem:[%s1971_s21 + $0x18] sm:$0xff] %v1501_v40   ;;  %1573 = vst [vmem:[%s1971_s21 + $0x58] sm:$0xff] %v1541_v41  }
 0x122   : > { %v1012_v46 = vadd.f32 %v1957_v57, %v973_v44  ;;  %v1028_v47 = vadd.f32 %v1957_v57, %v989_v45  ;;  %v1624_v48 = vpop.f32.mrb[20].mxu0  ;;  %v1672_v49 = vpop.f32.mrb[20].mxu1  ;;  %v1043_v50 = vmax.f32 %v1011_v42, 0.0  ;;  %v1059_v52 = vmax.f32 %v1027_v43, 0.0 }
 0x123   : > { %v1625_v53 = vpop.f32.mrb[21].mxu0  ;;  %v1673_v54 = vpop.f32.mrb[21].mxu1 }
 0x124   : > { %v1044_v55 = vmax.f32 %v1012_v46, 0.0  ;;  %v1060_v56 = vmax.f32 %v1028_v47, 0.0  ;;  %v1626_v58 = vadd.f32 %v1625_v53, %v1624_v48  ;;  %v1674_v59 = vadd.f32 %v1673_v54, %v1672_v49  ;;  %v1627_v60 = vpop.f32.mrb[22].mxu0  ;;  %v1675_v61 = vpop.f32.mrb[22].mxu1 }
 0x125   : > { %v1628_v62 = vpop.f32.mrb[23].mxu0  ;;  %v1676_v63 = vpop.f32.mrb[23].mxu1 }
 0x126   : > { %v1506_v0 = vpack.c.bf16 %v1044_v55, %v1043_v50  ;;  %v1546_v1 = vpack.c.bf16 %v1060_v56, %v1059_v52  ;;  %v974_v2 = vmul.f32 %v1626_v58, %v1952_v51  ;;  %v990_v3 = vmul.f32 %v1674_v59, %v1952_v51 }
 0x127   : > { %v1629_v4 = vadd.f32 %v1628_v62, %v1627_v60  ;;  %v1677_v5 = vadd.f32 %v1676_v63, %v1675_v61 }
 0x128   : > { %1566 = vst [vmem:[%s1971_s21 + $0x20] sm:$0xff] %v1506_v0   ;;  %1574 = vst [vmem:[%s1971_s21 + $0x60] sm:$0xff] %v1546_v1   ;;  %v1013_v6 = vadd.f32 %v1957_v57, %v974_v2  ;;  %v1029_v7 = vadd.f32 %v1957_v57, %v990_v3 }
 0x129   : > { %v975_v8 = vmul.f32 %v1629_v4, %v1952_v51  ;;  %v991_v9 = vmul.f32 %v1677_v5, %v1952_v51 }
 0x12a   : > { %v1630_v10 = vpop.f32.mrb[24].mxu0  ;;  %v1678_v11 = vpop.f32.mrb[24].mxu1  ;;  %v1045_v20 = vmax.f32 %v1013_v6, 0.0  ;;  %v1061_v21 = vmax.f32 %v1029_v7, 0.0 }
 0x12b   : > { %v1014_v12 = vadd.f32 %v1957_v57, %v975_v8  ;;  %v1030_v13 = vadd.f32 %v1957_v57, %v991_v9  ;;  %v1631_v14 = vpop.f32.mrb[25].mxu0  ;;  %v1679_v15 = vpop.f32.mrb[25].mxu1 }
 0x12c   : > { %v1632_v16 = vadd.f32 %v1631_v14, %v1630_v10  ;;  %v1680_v17 = vadd.f32 %v1679_v15, %v1678_v11  ;;  %v1633_v18 = vpop.f32.mrb[26].mxu0  ;;  %v1681_v19 = vpop.f32.mrb[26].mxu1 }
 0x12d   : > { %v1046_v22 = vmax.f32 %v1014_v12, 0.0  ;;  %v1062_v23 = vmax.f32 %v1030_v13, 0.0  ;;  %v1634_v24 = vpop.f32.mrb[27].mxu0  ;;  %v1682_v25 = vpop.f32.mrb[27].mxu1 }
 0x12e   : > { %v976_v26 = vmul.f32 %v1632_v16, %v1952_v51  ;;  %v992_v27 = vmul.f32 %v1680_v17, %v1952_v51  ;;  %v1635_v28 = vadd.f32 %v1634_v24, %v1633_v18  ;;  %v1683_v29 = vadd.f32 %v1682_v25, %v1681_v19 }
 0x12f   : > { %v1511_v30 = vpack.c.bf16 %v1046_v22, %v1045_v20  ;;  %v1551_v31 = vpack.c.bf16 %v1062_v23, %v1061_v21 }
 0x130   : > { %v1015_v32 = vadd.f32 %v1957_v57, %v976_v26  ;;  %v1031_v33 = vadd.f32 %v1957_v57, %v992_v27  ;;  %v977_v34 = vmul.f32 %v1635_v28, %v1952_v51  ;;  %v993_v35 = vmul.f32 %v1683_v29, %v1952_v51 }
 0x131   : > { %1567 = vst [vmem:[%s1971_s21 + $0x28] sm:$0xff] %v1511_v30   ;;  %1575 = vst [vmem:[%s1971_s21 + $0x68] sm:$0xff] %v1551_v31  }
 0x132   : > { %v1016_v36 = vadd.f32 %v1957_v57, %v977_v34  ;;  %v1032_v37 = vadd.f32 %v1957_v57, %v993_v35  ;;  %v1636_v38 = vpop.f32.mrb[28].mxu0  ;;  %v1684_v39 = vpop.f32.mrb[28].mxu1  ;;  %v1047_v40 = vmax.f32 %v1015_v32, 0.0  ;;  %v1063_v41 = vmax.f32 %v1031_v33, 0.0 }
 0x133   : > { %v1637_v42 = vpop.f32.mrb[29].mxu0  ;;  %v1685_v43 = vpop.f32.mrb[29].mxu1 }
 0x134   : > { %v1048_v44 = vmax.f32 %v1016_v36, 0.0  ;;  %v1064_v45 = vmax.f32 %v1032_v37, 0.0  ;;  %v1638_v46 = vadd.f32 %v1637_v42, %v1636_v38  ;;  %v1686_v47 = vadd.f32 %v1685_v43, %v1684_v39  ;;  %v1639_v48 = vpop.f32.mrb[30].mxu0  ;;  %v1687_v49 = vpop.f32.mrb[30].mxu1 }
 0x135   : > { %v1640_v50 = vpop.f32.mrb[31].mxu0  ;;  %v1688_v52 = vpop.f32.mrb[31].mxu1 }
 0x136   : > { %v1516_v53 = vpack.c.bf16 %v1048_v44, %v1047_v40  ;;  %v1556_v54 = vpack.c.bf16 %v1064_v45, %v1063_v41  ;;  %v978_v55 = vmul.f32 %v1638_v46, %v1952_v51  ;;  %v994_v56 = vmul.f32 %v1686_v47, %v1952_v51 }
 0x137   : > { %v1641_v58 = vadd.f32 %v1640_v50, %v1639_v48  ;;  %v1689_v59 = vadd.f32 %v1688_v52, %v1687_v49 }
 0x138   : > { %1568 = vst [vmem:[%s1971_s21 + $0x30] sm:$0xff] %v1516_v53   ;;  %1576 = vst [vmem:[%s1971_s21 + $0x70] sm:$0xff] %v1556_v54   ;;  %v1017_v60 = vadd.f32 %v1957_v57, %v978_v55  ;;  %v1033_v61 = vadd.f32 %v1957_v57, %v994_v56 }
 0x139   : > { %v979_v62 = vmul.f32 %v1641_v58, %v1952_v51  ;;  %v995_v63 = vmul.f32 %v1689_v59, %v1952_v51 }
 0x13a   : > { %v1049_v2 = vmax.f32 %v1017_v60, 0.0  ;;  %v1065_v3 = vmax.f32 %v1033_v61, 0.0 }
 0x13b   : > { %v1018_v0 = vadd.f32 %v1957_v57, %v979_v62  ;;  %v1034_v1 = vadd.f32 %v1957_v57, %v995_v63 }
 0x13d   : > { %v1050_v4 = vmax.f32 %v1018_v0, 0.0  ;;  %v1066_v5 = vmax.f32 %v1034_v1, 0.0 }
 0x13f   : > { %v1521_v6 = vpack.c.bf16 %v1050_v4, %v1049_v2  ;;  %v1561_v7 = vpack.c.bf16 %v1066_v5, %v1065_v3 }
 0x141   : > { %1569 = vst [vmem:[%s1971_s21 + $0x38] sm:$0xff] %v1521_v6   ;;  %1577 = vst [vmem:[%s1971_s21 + $0x78] sm:$0xff] %v1561_v7  }
 0x142 PF: > { %s14_s17 = sadd.s32 1, %s1816_s17   ;;  %s2059_s15 = smov %s1812_s16 }
 0x143   : > { %p11_p5 = scmp.ge.s32.totalorder %s14_s17, 4   ;;  %s2060_s16 = smov %s2062_s18 }
 0x145   :  { %13 = sbr.rel (!%p11_p5) target bundleno = 2 (0x2), region = 83 }

// kernel: densenet121_forward.122
= control target key start
LH: loop header
LB: loop body
LE: loop exit
PB: predicated region body
PF: predicated region fallthrough
CT: control target
= control target key end

     0   :  { %s1560_s9 = smov 0   ;;  %s1562_s10 = smov 0   ;;  %s1771_s0 = inlined_call_operand.vmem [shape: bf16[128,1152], index: 0, kind: input, shape index: {}]   ;;  %s1772_s1 = inlined_call_operand.vmem [shape: bf16[1152,128], index: 1, kind: input, shape index: {}]   ;;  %s1773_s2 = inlined_call_operand.vmem [shape: bf16[128,128], index: 2, kind: output, shape index: {}]  }
   0x1   :  { %s1564_s11 = smov 0   ;;  %s1566_s12 = smov 0  }
   0x2   :  { %s1568_s13 = smov 0  }
   0x3 LB: > { %s24_s14 = sadd.s32 1, %s1538_s12  ;;  %p47_p1 = scmp.ne.s32.totalorder %s1530_s10, %s1526_s9  ;;  %s1542_s13 = sphi %s1568_s13, %s12_s13   ;;  %s1538_s12 = sphi %s1566_s12, %s1777_s12   ;;  %s1534_s11 = sphi %s1564_s11, %s1776_s11   ;;  %s1530_s10 = sphi %s1562_s10, %s1775_s10   ;;  %s1526_s9 = sphi %s1560_s9, %s1774_s9  }
   0x4   : > { %p25_p0 = scmp.ge.s32.totalorder %s24_s14, 3  ;;  %p48_p2 = scmp.eq.s32.totalorder %s1542_s13, 0 }
   0x5   : > { %s40_s16 = sadd.s32 1, %s1530_s10  ;;  %p1123_p5 = scmp.ge.s32.totalorder %s1542_s13, 3 }
   0x6   : > { %s1779_s14 = smov (%p25_p0, %s24_s14), 0  ;;  %p49_p3 = por %p48_p2, %p47_p1 }
   0x7   : > { %s36_s15 = ssub.s32 %s1538_s12, %s1779_s14  ;;  %129 = sbr.rel (%p1123_p5) target bundleno = 37 (0x25), region = 16 }
   0x8   : > { %p38_p4 = scmp.eq.s32.totalorder %s36_s15, 0 }
   0xa   : > { %s1595_s17 = scalar_select %p38_p4, %s1530_s10, %s40_s16  }
   0xe   : > { %132 = sbr.rel (!%p49_p3) target bundleno = 37 (0x25), region = 20  ;;  %s134_s18 = sand.u32 (%p49_p3), 1, %s1530_s10  }
   0xf   : > { %s1229_s19 = smul.u32 (%p49_p3), 12, %s1538_s12 }
  0x10   : > { %s1405_s20 = smul.u32 (%p49_p3), 192, %s134_s18 }
  0x11   : > { %s1603_s23 = scalar_lea.vmem (%p49_p3), %s1771_s0, %s1229_s19 }
  0x12   : > { %v157_v0 = vld [vmem:[%s1603_s23] sm:$0xff] (%p49_p3)  ;;  %v161_v2 = vld [vmem:[%s1603_s23 + $0x48] sm:$0xff] (%p49_p3)  ;;  %s1608_s24 = scalar_lea.vmem (%p49_p3), [#allocation3], %s1405_s20  ;;  %v165_v4 = vld [vmem:[%s1603_s23 + $0x90] sm:$0xff] (%p49_p3) }
  0x13   : > { %v159_v1 = vld [vmem:[%s1603_s23 + $0x24] sm:$0xff] (%p49_p3)  ;;  %158 = vst [vmem:[%s1608_s24] sm:$0xff] (%p49_p3), %v157_v0  ;;  %162 = vst [vmem:[%s1608_s24 + $0x18] sm:$0xff] (%p49_p3), %v161_v2  ;;  %v163_v3 = vld [vmem:[%s1603_s23 + $0x6c] sm:$0xff] (%p49_p3) }
  0x14   : > { %160 = vst [vmem:[%s1608_s24 + $0xc] sm:$0xff] (%p49_p3), %v159_v1  ;;  %v167_v5 = vld [vmem:[%s1603_s23 + $0xb4] sm:$0xff] (%p49_p3)  ;;  %164 = vst [vmem:[%s1608_s24 + $0x24] sm:$0xff] (%p49_p3), %v163_v3  ;;  %v171_v7 = vld [vmem:[%s1603_s23 + $0xfc] sm:$0xff] (%p49_p3) }
  0x15   : > { %166 = vst [vmem:[%s1608_s24 + $0x30] sm:$0xff] %v165_v4  ;;  %168 = vst [vmem:[%s1608_s24 + $0x3c] sm:$0xff] %v167_v5  ;;  %v169_v6 = vld [vmem:[%s1603_s23 + $0xd8] sm:$0xff]  ;;  %v173_v8 = vld [vmem:[%s1603_s23 + $0x120] sm:$0xff] }
  0x16   : > { %170 = vst [vmem:[%s1608_s24 + $0x48] sm:$0xff] %v169_v6  ;;  %172 = vst [vmem:[%s1608_s24 + $0x54] sm:$0xff] %v171_v7  ;;  %v175_v9 = vld [vmem:[%s1603_s23 + $0x144] sm:$0xff]  ;;  %v179_v11 = vld [vmem:[%s1603_s23 + $0x18c] sm:$0xff] }
  0x17   : > { %174 = vst [vmem:[%s1608_s24 + $0x60] sm:$0xff] %v173_v8  ;;  %v177_v10 = vld [vmem:[%s1603_s23 + $0x168] sm:$0xff]  ;;  %176 = vst [vmem:[%s1608_s24 + $0x6c] sm:$0xff] %v175_v9  ;;  %v181_v12 = vld [vmem:[%s1603_s23 + $0x1b0] sm:$0xff] }
  0x18   : > { %178 = vst [vmem:[%s1608_s24 + $0x78] sm:$0xff] %v177_v10  ;;  %180 = vst [vmem:[%s1608_s24 + $0x84] sm:$0xff] %v179_v11  ;;  %v183_v13 = vld [vmem:[%s1603_s23 + $0x1d4] sm:$0xff]  ;;  %v187_v15 = vld [vmem:[%s1603_s23 + $0x21c] sm:$0xff] }
  0x19   : > { %v185_v14 = vld [vmem:[%s1603_s23 + $0x1f8] sm:$0xff]  ;;  %182 = vst [vmem:[%s1608_s24 + $0x90] sm:$0xff] %v181_v12  ;;  %184 = vst [vmem:[%s1608_s24 + $0x9c] sm:$0xff] %v183_v13  ;;  %v1125_v16 = vld [vmem:[%s1603_s23 + $0x8] sm:$0xf] }
  0x1a   : > { %186 = vst [vmem:[%s1608_s24 + $0xa8] sm:$0xff] %v185_v14  ;;  %v1127_v17 = vld [vmem:[%s1603_s23 + $0x2c] sm:$0xf]  ;;  %188 = vst [vmem:[%s1608_s24 + $0xb4] sm:$0xff] %v187_v15  ;;  %v1129_v18 = vld [vmem:[%s1603_s23 + $0x50] sm:$0xf] }
  0x1b   : > { %1126 = vst [vmem:[%s1608_s24 + $0x8] sm:$0xf] %v1125_v16  ;;  %1128 = vst [vmem:[%s1608_s24 + $0x14] sm:$0xf] %v1127_v17  ;;  %v1131_v19 = vld [vmem:[%s1603_s23 + $0x74] sm:$0xf] }
  0x1c   : > { %v1133_v20 = vld [vmem:[%s1603_s23 + $0x98] sm:$0xf]  ;;  %1130 = vst [vmem:[%s1608_s24 + $0x20] sm:$0xf] %v1129_v18  ;;  %1132 = vst [vmem:[%s1608_s24 + $0x2c] sm:$0xf] %v1131_v19 }
  0x1d   : > { %1134 = vst [vmem:[%s1608_s24 + $0x38] sm:$0xf] %v1133_v20  ;;  %v1135_v21 = vld [vmem:[%s1603_s23 + $0xbc] sm:$0xf]  ;;  %v1137_v22 = vld [vmem:[%s1603_s23 + $0xe0] sm:$0xf] }
  0x1e   : > { %v1139_v23 = vld [vmem:[%s1603_s23 + $0x104] sm:$0xf]  ;;  %1136 = vst [vmem:[%s1608_s24 + $0x44] sm:$0xf] %v1135_v21  ;;  %1138 = vst [vmem:[%s1608_s24 + $0x50] sm:$0xf] %v1137_v22 }
  0x1f   : > { %1140 = vst [vmem:[%s1608_s24 + $0x5c] sm:$0xf] %v1139_v23  ;;  %v1141_v24 = vld [vmem:[%s1603_s23 + $0x128] sm:$0xf]  ;;  %v1143_v25 = vld [vmem:[%s1603_s23 + $0x14c] sm:$0xf] }
  0x20   : > { %v1145_v26 = vld [vmem:[%s1603_s23 + $0x170] sm:$0xf]  ;;  %1142 = vst [vmem:[%s1608_s24 + $0x68] sm:$0xf] %v1141_v24  ;;  %1144 = vst [vmem:[%s1608_s24 + $0x74] sm:$0xf] %v1143_v25 }
  0x21   : > { %1146 = vst [vmem:[%s1608_s24 + $0x80] sm:$0xf] %v1145_v26  ;;  %v1147_v27 = vld [vmem:[%s1603_s23 + $0x194] sm:$0xf]  ;;  %v1149_v28 = vld [vmem:[%s1603_s23 + $0x1b8] sm:$0xf] }
  0x22   : > { %v1151_v29 = vld [vmem:[%s1603_s23 + $0x1dc] sm:$0xf]  ;;  %1148 = vst [vmem:[%s1608_s24 + $0x8c] sm:$0xf] %v1147_v27  ;;  %1150 = vst [vmem:[%s1608_s24 + $0x98] sm:$0xf] %v1149_v28 }
  0x23   : > { %1152 = vst [vmem:[%s1608_s24 + $0xa4] sm:$0xf] %v1151_v29  ;;  %v1153_v30 = vld [vmem:[%s1603_s23 + $0x200] sm:$0xf]  ;;  %v1155_v31 = vld [vmem:[%s1603_s23 + $0x224] sm:$0xf] }
  0x24   : > { %1154 = vst [vmem:[%s1608_s24 + $0xb0] sm:$0xf] %v1153_v30  ;;  %1156 = vst [vmem:[%s1608_s24 + $0xbc] sm:$0xf] %v1155_v31 }
  0x25 PF: > { %p1157_p6 = scmp.ge.s32.totalorder %s1542_s13, 1  ;;  %p244_p7 = scmp.lt.s32.totalorder %s1542_s13, 4 }
  0x27   : > { %p245_p8 = pnand %p1157_p6, %p244_p7 }
  0x28   : > { %s251_s25 = sand.u32 (!%p245_p8), 1, %s1526_s9   ;;  %s285_s26 = smul.u32 (!%p245_p8), 48, %s1534_s11 }
  0x29   : > { %248 = sbr.rel (%p245_p8) target bundleno = 379 (0x17b), region = 50  ;;  %p1159_p10 = scmp.ne.s32.totalorder (!%p245_p8), %s1534_s11, 0 }
  0x2a   : > { %s1406_s27 = smul.u32 (!%p245_p8), 192, %s251_s25  ;;  %p286_p9 = scmp.lt.s32.totalorder (!%p245_p8), %s285_s26, 143 }
  0x2c   : > { %s1680_s4 = scalar_lea.vmem (!%p245_p8), [#allocation3], %s1406_s27 }
  0x30   : > { %s1781_s26 = smov (!%p286_p9, %s285_s26), 143  ;;  %307 = sbr.rel (%p1159_p10) target bundleno = 58 (0x3a), region = 58 }
  0x31   : > { %s1158_s28 = sshll.u32 %s1781_s26, 2  ;;  %v1544_v32 = vmov (!%p1159_p10), 0.0  }
  0x32   : > { %s1678_s3 = scalar_lea.vmem %s1772_s1, %s1158_s28  ;;  %308 = vst [vmem:[#allocation2] sm:$0xff] (!%p1159_p10), %v1544_v32  ;;  %309 = vst [vmem:[#allocation2 + $0x8] sm:$0xff] (!%p1159_p10), %v1544_v32 }
  0x33   : > { %310 = vst [vmem:[#allocation2 + $0x10] sm:$0xff] (!%p1159_p10), %v1544_v32  ;;  %311 = vst [vmem:[#allocation2 + $0x18] sm:$0xff] (!%p1159_p10), %v1544_v32 }
  0x34   : > { %312 = vst [vmem:[#allocation2 + $0x20] sm:$0xff] (!%p1159_p10), %v1544_v32  ;;  %313 = vst [vmem:[#allocation2 + $0x28] sm:$0xff] (!%p1159_p10), %v1544_v32 }
  0x35   : > { %314 = vst [vmem:[#allocation2 + $0x30] sm:$0xff] (!%p1159_p10), %v1544_v32  ;;  %315 = vst [vmem:[#allocation2 + $0x38] sm:$0xff] (!%p1159_p10), %v1544_v32 }
  0x36   : > { %316 = vst [vmem:[#allocation2 + $0x40] sm:$0xff] (!%p1159_p10), %v1544_v32  ;;  %317 = vst [vmem:[#allocation2 + $0x48] sm:$0xff] (!%p1159_p10), %v1544_v32 }
  0x37   : > { %318 = vst [vmem:[#allocation2 + $0x50] sm:$0xff] %v1544_v32  ;;  %319 = vst [vmem:[#allocation2 + $0x58] sm:$0xff] %v1544_v32 }
  0x38   : > { %320 = vst [vmem:[#allocation2 + $0x60] sm:$0xff] %v1544_v32  ;;  %321 = vst [vmem:[#allocation2 + $0x68] sm:$0xff] %v1544_v32 }
  0x39   : > { %322 = vst [vmem:[#allocation2 + $0x70] sm:$0xff] %v1544_v32  ;;  %323 = vst [vmem:[#allocation2 + $0x78] sm:$0xff] %v1544_v32 }
  0x3a PF: > { %v1448_v33 = vld [vmem:[%s1678_s3 + $0x40] sm:$0xff]   ;;  %v1451_v36 = vld [vmem:[%s1678_s3 + $0x48] sm:$0xff]   ;;  %v1454_v39 = vld [vmem:[%s1678_s3 + $0x50] sm:$0xff]   ;;  %p1208_p11 = scmp.ne.s32.totalorder %s1534_s11, 2 }
  0x3b   : > { %v1449_v34 = vld [vmem:[%s1678_s3] sm:$0xff]   ;;  %1293 = vmatprep.subr.bf16.mxu0 %v1448_v33  ;;  %v1452_v37 = vld [vmem:[%s1678_s3 + $0x8] sm:$0xff]   ;;  %v1455_v40 = vld [vmem:[%s1678_s3 + $0x10] sm:$0xff]  }
  0x3c   : > { %v1450_v35 = vld [vmem:[%s1678_s3 + $0x80] sm:$0xff]   ;;  %1294 = vmatpush3.bf16.msra.mxu0 %v1449_v34  ;;  %v1453_v38 = vld [vmem:[%s1678_s3 + $0x88] sm:$0xff]   ;;  %v1456_v41 = vld [vmem:[%s1678_s3 + $0x90] sm:$0xff]  }
  0x3d   : > { %1373 = vmatprep.subr.bf16.mxu1 %v1450_v35  ;;  %1295 = vmatprep.subr.bf16.mxu0 %v1451_v36  ;;  %v1457_v42 = vld [vmem:[%s1678_s3 + $0x58] sm:$0xff]   ;;  %v1460_v45 = vld [vmem:[%s1678_s3 + $0x60] sm:$0xff]   ;;  %v1463_v48 = vld [vmem:[%s1678_s3 + $0x68] sm:$0xff]  }
  0x3e   : > { %1374 = vmatpush3.bf16.msra.mxu1 %v1450_v35  ;;  %v1458_v43 = vld [vmem:[%s1678_s3 + $0x18] sm:$0xff]   ;;  %v1462_v46 = vld [vmem:[%s1678_s3 + $0xa0] sm:$0xff]   ;;  %v1465_v49 = vld [vmem:[%s1678_s3 + $0xa8] sm:$0xff]  }
  0x3f   : > { %1375 = vmatprep.subr.bf16.mxu1 %v1453_v38  ;;  %v1459_v44 = vld [vmem:[%s1678_s3 + $0x98] sm:$0xff]   ;;  %v1461_v47 = vld [vmem:[%s1678_s3 + $0x20] sm:$0xff]   ;;  %v1464_v50 = vld [vmem:[%s1678_s3 + $0x28] sm:$0xff]  }
  0x40   : > { %1296 = vmatpush3.bf16.msra.mxu0 %v1452_v37  ;;  %v1466_v51 = vld [vmem:[%s1678_s3 + $0x70] sm:$0xff]   ;;  %v1469_v54 = vld [vmem:[%s1678_s3 + $0x78] sm:$0xff]   ;;  %v1472_v59 = vld [vmem:[%s1680_s4] ss:$12 sps:$4 sm:$0xff]  }
  0x41   : > { %1297 = vmatprep.subr.bf16.mxu0 %v1454_v39  ;;  %v1467_v52 = vld [vmem:[%s1678_s3 + $0x30] sm:$0xff]   ;;  %v1471_v55 = vld [vmem:[%s1678_s3 + $0xb8] sm:$0xff]   ;;  %v1476_v61 = vld [vmem:[%s1680_s4 + $0x20] ss:$12 sps:$4 sm:$0xff]  }
  0x42   : > { %1376 = vmatpush3.bf16.msra.mxu1 %v1453_v38  ;;  %v1468_v53 = vld [vmem:[%s1678_s3 + $0xb0] sm:$0xff]   ;;  %v1470_v58 = vld [vmem:[%s1678_s3 + $0x38] sm:$0xff]   ;;  %v1492_v5 = vld [vmem:[%s1680_s4 + $0x80] ss:$12 sps:$4 sm:$0xff]  }
  0x43   : > { %1377 = vmatprep.subr.bf16.mxu1 %v1456_v41  ;;  %v1474_v56 = vld [vmem:[%s1680_s4 + $0x4] ss:$12 sps:$4 sm:$0xff]   ;;  %v1475_v57 = vld [vmem:[%s1680_s4 + $0x8] ss:$12 sps:$4 sm:$0xff]   ;;  %v1485_v4 = vld [vmem:[%s1680_s4 + $0x4c] ss:$12 sps:$4 sm:$0xff]  }
  0x44   : > { %1298 = vmatpush3.bf16.msra.mxu0 %v1455_v40  ;;  %724 = vmatprep.mubr.bf16.mxu0 %v1474_v56  ;;  %v1477_v60 = vld [vmem:[%s1680_s4 + $0x1c] ss:$12 sps:$4 sm:$0xff]   ;;  %v1483_v62 = vld [vmem:[%s1680_s4 + $0x38] ss:$12 sps:$4 sm:$0xff]   ;;  %v1480_v0 = vld [vmem:[%s1680_s4 + $0x34] ss:$12 sps:$4 sm:$0xff]  }
  0x45   : > { %1299 = vmatprep.subr.bf16.mxu0 %v1457_v42  ;;  %1389 = vmatprep.mubr.bf16.mxu1 %v1475_v57  ;;  %v1479_v63 = vld [vmem:[%s1680_s4 + $0x18] ss:$12 sps:$4 sm:$0xff]   ;;  %v1484_v1 = vld [vmem:[%s1680_s4 + $0x50] ss:$12 sps:$4 sm:$0xff]   ;;  %v1491_v2 = vld [vmem:[%s1680_s4 + $0x68] ss:$12 sps:$4 sm:$0xff]  }
  0x46   : > { %1378 = vmatpush3.bf16.msra.mxu1 %v1456_v41  ;;  %v1482_v3 = vld [vmem:[%s1680_s4 + $0x30] ss:$12 sps:$4 sm:$0xff]   ;;  %v1499_v6 = vld [vmem:[%s1680_s4 + $0x98] ss:$12 sps:$4 sm:$0xff]   ;;  %v1487_v7 = vld [vmem:[%s1680_s4 + $0x48] ss:$12 sps:$4 sm:$0xff]  }
  0x47   : > { %1379 = vmatprep.subr.bf16.mxu1 %v1459_v44  ;;  %v1488_v8 = vld [vmem:[%s1680_s4 + $0x64] ss:$12 sps:$4 sm:$0xff]   ;;  %v1490_v10 = vld [vmem:[%s1680_s4 + $0x60] ss:$12 sps:$4 sm:$0xff]   ;;  %v1493_v11 = vld [vmem:[%s1680_s4 + $0x7c] ss:$12 sps:$4 sm:$0xff]  }
  0x48   : > { %1300 = vmatpush3.bf16.msra.mxu0 %v1458_v43  ;;  %v1500_v9 = vld [vmem:[%s1680_s4 + $0xb0] ss:$12 sps:$4 sm:$0xff]   ;;  %v1495_v12 = vld [vmem:[%s1680_s4 + $0x78] ss:$12 sps:$4 sm:$0xff]   ;;  %v1496_v13 = vld [vmem:[%s1680_s4 + $0x94] ss:$12 sps:$4 sm:$0xff]  }
  0x49   : > { %1301 = vmatprep.subr.bf16.mxu0 %v1460_v45  ;;  %v1498_v14 = vld [vmem:[%s1680_s4 + $0x90] ss:$12 sps:$4 sm:$0xff]   ;;  %v1501_v15 = vld [vmem:[%s1680_s4 + $0xac] ss:$12 sps:$4 sm:$0xff]   ;;  %v1503_v16 = vld [vmem:[%s1680_s4 + $0xa8] ss:$12 sps:$4 sm:$0xff]  }
  0x4a   : > { %1380 = vmatpush3.bf16.msra.mxu1 %v1459_v44  ;;  %v356_v23 = vld [vmem:[#allocation2] sm:$0xff]  ;;  %v357_v28 = vld [vmem:[#allocation2 + $0x8] sm:$0xff]  ;;  %v358_v38 = vld [vmem:[#allocation2 + $0x10] sm:$0xff] }
  0x4b   : > { %1381 = vmatprep.subr.bf16.mxu1 %v1462_v46  ;;  %v359_v44 = vld [vmem:[#allocation2 + $0x18] sm:$0xff] }
  0x4c   : > { %1302 = vmatpush3.bf16.msra.mxu0 %v1461_v47 }
  0x4d   : > { %1303 = vmatprep.subr.bf16.mxu0 %v1463_v48 }
  0x4e   : > { %1382 = vmatpush3.bf16.msra.mxu1 %v1462_v46 }
  0x4f   : > { %1383 = vmatprep.subr.bf16.mxu1 %v1465_v49 }
  0x50   : > { %1304 = vmatpush3.bf16.msra.mxu0 %v1464_v50 }
  0x51   : > { %1305 = vmatprep.subr.bf16.mxu0 %v1466_v51 }
  0x52   : > { %1384 = vmatpush3.bf16.msra.mxu1 %v1465_v49 }
  0x53   : > { %1385 = vmatprep.subr.bf16.mxu1 %v1468_v53 }
  0x54   : > { %1306 = vmatpush3.bf16.msra.mxu0 %v1467_v52 }
  0x55   : > { %1307 = vmatprep.subr.bf16.mxu0 %v1469_v54 }
  0x56   : > { %1386 = vmatpush3.bf16.msra.mxu1 %v1468_v53 }
  0x57   : > { %1387 = vmatprep.subr.bf16.mxu1 %v1471_v55 }
  0x58   : > { %1308 = vmatpush3.bf16.msra.mxu0 %v1470_v58 }
  0x5a   : > { %1388 = vmatpush3.bf16.msra.mxu1 %v1471_v55  ;;  %v360_v55 = vld [vmem:[#allocation2 + $0x20] sm:$0xff] }
  0x5b   : > { %725 = vmatmul.mubr.bf16.vlgmr.msra.gmra.mrb[0].mxu0 %v1472_v59 }
  0x5c   : > { %732 = vmatprep.mubr.bf16.mxu0 %v1477_v60  ;;  %v361_v60 = vld [vmem:[#allocation2 + $0x28] sm:$0xff] }
  0x5d   : > { %1390 = vmatmul.mubr.bf16.vlgmr.msra.gmra.mrb[0].mxu1 %v1476_v61 }
  0x5e   : > { %1393 = vmatprep.mubr.bf16.mxu1 %v1483_v62 }
  0x63   : > { %733 = vmatmul.mubr.bf16.gmra.mrb[4].mxu0 %v1479_v63 }
  0x64   : > { %740 = vmatprep.mubr.bf16.mxu0 %v1480_v0 }
  0x65   : > { %1394 = vmatmul.mubr.bf16.gmra.mrb[4].mxu1 %v1484_v1 }
  0x66   : > { %1397 = vmatprep.mubr.bf16.mxu1 %v1491_v2 }
  0x6b   : > { %741 = vmatmul.mubr.bf16.gmra.mrb[8].mxu0 %v1482_v3 }
  0x6c   : > { %748 = vmatprep.mubr.bf16.mxu0 %v1485_v4 }
  0x6d   : > { %1398 = vmatmul.mubr.bf16.gmra.mrb[8].mxu1 %v1492_v5 }
  0x6e   : > { %1401 = vmatprep.mubr.bf16.mxu1 %v1499_v6  ;;  %v362_v6 = vld [vmem:[#allocation2 + $0x30] sm:$0xff] }
  0x73   : > { %749 = vmatmul.mubr.bf16.gmra.mrb[12].mxu0 %v1487_v7 }
  0x74   : > { %756 = vmatprep.mubr.bf16.mxu0 %v1488_v8 }
  0x75   : > { %1402 = vmatmul.mubr.bf16.gmra.mrb[12].mxu1 %v1500_v9 }
  0x7b   : > { %757 = vmatmul.mubr.bf16.gmra.mrb[16].mxu0 %v1490_v10 }
  0x7c   : > { %764 = vmatprep.mubr.bf16.mxu0 %v1493_v11 }
  0x83   : > { %765 = vmatmul.mubr.bf16.gmra.mrb[20].mxu0 %v1495_v12  ;;  %v363_v12 = vld [vmem:[#allocation2 + $0x38] sm:$0xff] }
  0x84   : > { %772 = vmatprep.mubr.bf16.mxu0 %v1496_v13 }
  0x8b   : > { %773 = vmatmul.mubr.bf16.gmra.mrb[24].mxu0 %v1498_v14 }
  0x8c   : > { %780 = vmatprep.mubr.bf16.mxu0 %v1501_v15 }
  0x93   : > { %781 = vmatmul.mubr.bf16.gmra.mrb[28].mxu0 %v1503_v16 }
 0x12e   : > { %v1309_v17 = vpop.f32.mrb[0].mxu0 }
 0x12f   : > { %v1310_v18 = vpop.f32.mrb[1].mxu0 }
 0x130   : > { %v1311_v19 = vadd.f32 %v1310_v18, %v1309_v17  ;;  %v1312_v20 = vpop.f32.mrb[2].mxu0  ;;  %v1391_v21 = vpop.f32.mrb[0].mxu1 }
 0x131   : > { %v1313_v22 = vpop.f32.mrb[3].mxu0  ;;  %v823_v24 = vpop.f32.mrb[1].mxu1 }
 0x132   : > { %v1314_v25 = vadd.f32 %v1313_v22, %v1312_v20  ;;  %v824_v26 = vadd.f32 %v1311_v19, %v823_v24  ;;  %v1392_v27 = vpop.f32.mrb[2].mxu1  ;;  %v364_v22 = vld [vmem:[#allocation2 + $0x40] sm:$0xff] }
 0x133   : > { %v826_v29 = vpop.f32.mrb[3].mxu1 }
 0x134   : > { %v886_v30 = vadd.f32 %v824_v26, %v356_v23  ;;  %v827_v31 = vadd.f32 %v1314_v25, %v826_v29  ;;  %v365_v25 = vld [vmem:[#allocation2 + $0x48] sm:$0xff] }
 0x136   : > { %902 = vst [vmem:[#allocation2] sm:$0xff] %v886_v30  ;;  %v887_v32 = vadd.f32 %v827_v31, %v357_v28  ;;  %v1315_v33 = vpop.f32.mrb[4].mxu0 }
 0x137   : > { %v1316_v34 = vpop.f32.mrb[5].mxu0 }
 0x138   : > { %903 = vst [vmem:[#allocation2 + $0x8] sm:$0xff] %v887_v32  ;;  %v1317_v35 = vadd.f32 %v1316_v34, %v1315_v33  ;;  %v1318_v36 = vpop.f32.mrb[6].mxu0  ;;  %v1395_v37 = vpop.f32.mrb[4].mxu1  ;;  %v366_v33 = vld [vmem:[#allocation2 + $0x50] sm:$0xff] }
 0x139   : > { %v1319_v39 = vpop.f32.mrb[7].mxu0  ;;  %v839_v40 = vpop.f32.mrb[5].mxu1 }
 0x13a   : > { %v832_v41 = vadd.f32 %v1391_v21, %v1317_v35  ;;  %v1320_v42 = vadd.f32 %v1319_v39, %v1318_v36  ;;  %v1396_v43 = vpop.f32.mrb[6].mxu1 }
 0x13b   : > { %v842_v45 = vpop.f32.mrb[7].mxu1 }
 0x13c   : > { %v888_v46 = vadd.f32 %v832_v41, %v358_v38  ;;  %v835_v47 = vadd.f32 %v1392_v27, %v1320_v42 }
 0x13e   : > { %904 = vst [vmem:[#allocation2 + $0x10] sm:$0xff] %v888_v46  ;;  %v889_v48 = vadd.f32 %v835_v47, %v359_v44  ;;  %v1321_v49 = vpop.f32.mrb[8].mxu0  ;;  %v368_v46 = vld [vmem:[#allocation2 + $0x60] sm:$0xff] }
 0x13f   : > { %v1322_v50 = vpop.f32.mrb[9].mxu0 }
 0x140   : > { %905 = vst [vmem:[#allocation2 + $0x18] sm:$0xff] %v889_v48  ;;  %v1323_v51 = vadd.f32 %v1322_v50, %v1321_v49  ;;  %v1324_v52 = vpop.f32.mrb[10].mxu0  ;;  %v1399_v53 = vpop.f32.mrb[8].mxu1  ;;  %v369_v49 = vld [vmem:[#allocation2 + $0x68] sm:$0xff] }
 0x141   : > { %v1325_v54 = vpop.f32.mrb[11].mxu0  ;;  %v855_v56 = vpop.f32.mrb[9].mxu1 }
 0x142   : > { %v1326_v57 = vadd.f32 %v1325_v54, %v1324_v52  ;;  %v840_v58 = vadd.f32 %v1323_v51, %v839_v40  ;;  %v1400_v59 = vpop.f32.mrb[10].mxu1 }
 0x143   : > { %v858_v61 = vpop.f32.mrb[11].mxu1 }
 0x144   : > { %v890_v62 = vadd.f32 %v840_v58, %v360_v55  ;;  %v843_v63 = vadd.f32 %v1326_v57, %v842_v45  ;;  %v370_v57 = vld [vmem:[#allocation2 + $0x70] sm:$0xff] }
 0x146   : > { %906 = vst [vmem:[#allocation2 + $0x20] sm:$0xff] %v890_v62  ;;  %v891_v0 = vadd.f32 %v843_v63, %v361_v60  ;;  %v1327_v1 = vpop.f32.mrb[12].mxu0 }
 0x147   : > { %v1328_v2 = vpop.f32.mrb[13].mxu0 }
 0x148   : > { %907 = vst [vmem:[#allocation2 + $0x28] sm:$0xff] %v891_v0  ;;  %v1329_v3 = vadd.f32 %v1328_v2, %v1327_v1  ;;  %v1330_v4 = vpop.f32.mrb[14].mxu0  ;;  %v1403_v5 = vpop.f32.mrb[12].mxu1  ;;  %v922_v1 = vld [vmem:[#allocation2] sm:$0xff] (!%p1208_p11)  ;;  %v923_v2 = vld [vmem:[#allocation2 + $0x8] sm:$0xff] (!%p1208_p11) }
 0x149   : > { %v1331_v7 = vpop.f32.mrb[15].mxu0  ;;  %v871_v8 = vpop.f32.mrb[13].mxu1 }
 0x14a   : > { %v848_v9 = vadd.f32 %v1395_v37, %v1329_v3  ;;  %v1332_v10 = vadd.f32 %v1331_v7, %v1330_v4  ;;  %v1404_v11 = vpop.f32.mrb[14].mxu1  ;;  %v367_v37 = vld [vmem:[#allocation2 + $0x58] sm:$0xff]  ;;  %v924_v3 = vld [vmem:[#allocation2 + $0x10] sm:$0xff] (!%p1208_p11)  ;;  %v1249_v4 = vpack.c.bf16 (!%p1208_p11), %v923_v2, %v922_v1 }
 0x14b   : > { %v874_v13 = vpop.f32.mrb[15].mxu1 }
 0x14c   : > { %v892_v14 = vadd.f32 %v848_v9, %v362_v6  ;;  %v851_v15 = vadd.f32 %v1396_v43, %v1332_v10  ;;  %v925_v6 = vld [vmem:[#allocation2 + $0x18] sm:$0xff] (!%p1208_p11)  ;;  %1250 = vst [vmem:[%s1773_s2] sm:$0xff] (!%p1208_p11), %v1249_v4  }
 0x14d   : > { %v926_v7 = vld [vmem:[#allocation2 + $0x20] sm:$0xff] (!%p1208_p11)  ;;  %v1254_v9 = vpack.c.bf16 (!%p1208_p11), %v925_v6, %v924_v3 }
 0x14e   : > { %908 = vst [vmem:[#allocation2 + $0x30] sm:$0xff] %v892_v14  ;;  %v893_v16 = vadd.f32 %v851_v15, %v363_v12  ;;  %v1333_v17 = vpop.f32.mrb[16].mxu0 }
 0x14f   : > { %v1334_v18 = vpop.f32.mrb[17].mxu0  ;;  %1286 = vst [vmem:[%s1773_s2 + $0x8] sm:$0xff] (!%p1208_p11), %v1254_v9  }
 0x150   : > { %909 = vst [vmem:[#allocation2 + $0x38] sm:$0xff] %v893_v16  ;;  %v1335_v19 = vadd.f32 %v1334_v18, %v1333_v17  ;;  %v1336_v20 = vpop.f32.mrb[18].mxu0 }
 0x151   : > { %v1337_v21 = vpop.f32.mrb[19].mxu0 }
 0x152   : > { %v1338_v23 = vadd.f32 %v1337_v21, %v1336_v20  ;;  %v856_v24 = vadd.f32 %v1335_v19, %v855_v56 }
 0x154   : > { %v894_v26 = vadd.f32 %v856_v24, %v364_v22  ;;  %v859_v27 = vadd.f32 %v1338_v23, %v858_v61  ;;  %v371_v61 = vld [vmem:[#allocation2 + $0x78] sm:$0xff] }
 0x156   : > { %910 = vst [vmem:[#allocation2 + $0x40] sm:$0xff] %v894_v26  ;;  %v895_v28 = vadd.f32 %v859_v27, %v365_v25  ;;  %v1339_v29 = vpop.f32.mrb[20].mxu0 }
 0x157   : > { %v1340_v30 = vpop.f32.mrb[21].mxu0  ;;  %v929_v12 = vld [vmem:[#allocation2 + $0x38] sm:$0xff] (!%p1208_p11) }
 0x158   : > { %911 = vst [vmem:[#allocation2 + $0x48] sm:$0xff] %v895_v28  ;;  %v1341_v31 = vadd.f32 %v1340_v30, %v1339_v29  ;;  %v1342_v32 = vpop.f32.mrb[22].mxu0 }
 0x159   : > { %v1343_v34 = vpop.f32.mrb[23].mxu0 }
 0x15a   : > { %v864_v35 = vadd.f32 %v1399_v53, %v1341_v31  ;;  %v1344_v36 = vadd.f32 %v1343_v34, %v1342_v32 }
 0x15c   : > { %v896_v38 = vadd.f32 %v864_v35, %v366_v33  ;;  %v867_v39 = vadd.f32 %v1400_v59, %v1344_v36 }
 0x15e   : > { %912 = vst [vmem:[#allocation2 + $0x50] sm:$0xff] %v896_v38  ;;  %v897_v40 = vadd.f32 %v867_v39, %v367_v37  ;;  %v1345_v41 = vpop.f32.mrb[24].mxu0 }
 0x15f   : > { %v1346_v42 = vpop.f32.mrb[25].mxu0  ;;  %v931_v14 = vld [vmem:[#allocation2 + $0x48] sm:$0xff] (!%p1208_p11) }
 0x160   : > { %913 = vst [vmem:[#allocation2 + $0x58] sm:$0xff] %v897_v40  ;;  %v1347_v43 = vadd.f32 %v1346_v42, %v1345_v41  ;;  %v1348_v44 = vpop.f32.mrb[26].mxu0 }
 0x161   : > { %v1349_v45 = vpop.f32.mrb[27].mxu0 }
 0x162   : > { %v1350_v47 = vadd.f32 %v1349_v45, %v1348_v44  ;;  %v872_v48 = vadd.f32 %v1347_v43, %v871_v8  ;;  %v927_v8 = vld [vmem:[#allocation2 + $0x28] sm:$0xff] (!%p1208_p11) }
 0x163   : > { %v1259_v10 = vpack.c.bf16 (!%p1208_p11), %v927_v8, %v926_v7 }
 0x164   : > { %v898_v50 = vadd.f32 %v872_v48, %v368_v46  ;;  %v875_v51 = vadd.f32 %v1350_v47, %v874_v13  ;;  %v930_v13 = vld [vmem:[#allocation2 + $0x40] sm:$0xff] (!%p1208_p11) }
 0x165   : > { %v932_v15 = vld [vmem:[#allocation2 + $0x50] sm:$0xff] (!%p1208_p11)  ;;  %1287 = vst [vmem:[%s1773_s2 + $0x10] sm:$0xff] (!%p1208_p11), %v1259_v10   ;;  %v1269_v17 = vpack.c.bf16 (!%p1208_p11), %v931_v14, %v930_v13 }
 0x166   : > { %914 = vst [vmem:[#allocation2 + $0x60] sm:$0xff] %v898_v50  ;;  %v899_v52 = vadd.f32 %v875_v51, %v369_v49  ;;  %v1351_v53 = vpop.f32.mrb[28].mxu0 }
 0x167   : > { %v1352_v54 = vpop.f32.mrb[29].mxu0  ;;  %v933_v16 = vld [vmem:[#allocation2 + $0x58] sm:$0xff] (!%p1208_p11)  ;;  %1289 = vst [vmem:[%s1773_s2 + $0x20] sm:$0xff] (!%p1208_p11), %v1269_v17  }
 0x168   : > { %915 = vst [vmem:[#allocation2 + $0x68] sm:$0xff] %v899_v52  ;;  %v1353_v55 = vadd.f32 %v1352_v54, %v1351_v53  ;;  %v1354_v56 = vpop.f32.mrb[30].mxu0  ;;  %v1274_v18 = vpack.c.bf16 (!%p1208_p11), %v933_v16, %v932_v15 }
 0x169   : > { %v1355_v58 = vpop.f32.mrb[31].mxu0 }
 0x16a   : > { %v880_v59 = vadd.f32 %v1403_v5, %v1353_v55  ;;  %v1356_v60 = vadd.f32 %v1355_v58, %v1354_v56  ;;  %921 = sbr.rel (%p1208_p11) target bundleno = 379 (0x17b), region = 62  ;;  %v928_v5 = vld [vmem:[#allocation2 + $0x30] sm:$0xff] (!%p1208_p11)  ;;  %1290 = vst [vmem:[%s1773_s2 + $0x28] sm:$0xff] (!%p1208_p11), %v1274_v18  }
 0x16c   : > { %v900_v62 = vadd.f32 %v880_v59, %v370_v57  ;;  %v883_v63 = vadd.f32 %v1404_v11, %v1356_v60  ;;  %v1264_v11 = vpack.c.bf16 (!%p1208_p11), %v929_v12, %v928_v5 }
 0x16d   : > { %v934_v19 = vld [vmem:[#allocation2 + $0x60] sm:$0xff] (!%p1208_p11) }
 0x16e   : > { %916 = vst [vmem:[#allocation2 + $0x70] sm:$0xff] %v900_v62  ;;  %v901_v0 = vadd.f32 %v883_v63, %v371_v61  ;;  %1288 = vst [vmem:[%s1773_s2 + $0x18] sm:$0xff] (!%p1208_p11), %v1264_v11  }
 0x16f   : > { %v935_v20 = vld [vmem:[#allocation2 + $0x68] sm:$0xff] (!%p1208_p11) }
 0x170   : > { %917 = vst [vmem:[#allocation2 + $0x78] sm:$0xff] %v901_v0  ;;  %v1279_v22 = vpack.c.bf16 (!%p1208_p11), %v935_v20, %v934_v19 }
 0x172   : > { %1291 = vst [vmem:[%s1773_s2 + $0x30] sm:$0xff] %v1279_v22  }
 0x175   : > { %v936_v21 = vld [vmem:[#allocation2 + $0x70] sm:$0xff] }
 0x177   : > { %v937_v23 = vld [vmem:[#allocation2 + $0x78] sm:$0xff] }
 0x178   : > { %v1284_v24 = vpack.c.bf16 %v937_v23, %v936_v21 }
 0x17a   : > { %1292 = vst [vmem:[%s1773_s2 + $0x38] sm:$0xff] %v1284_v24  }
 0x17b PF: > { %s12_s13 = sadd.s32 1, %s1542_s13   ;;  %s1774_s9 = smov %s1530_s10 }
 0x17c   : > { %p9_p12 = scmp.ge.s32.totalorder %s12_s13, 5   ;;  %s1775_s10 = smov %s1595_s17 }
 0x17d   : > { %s1776_s11 = smov %s1538_s12  ;;  %s1777_s12 = smov %s1779_s14 }
 0x17e   :  { %11 = sbr.rel (!%p9_p12) target bundleno = 3 (0x3), region = 106 }

// kernel: densenet121_forward.127
= control target key start
LH: loop header
LB: loop body
LE: loop exit
PB: predicated region body
PF: predicated region fallthrough
CT: control target
= control target key end

     0   :  { %v94_v5 = vlaneseq  ;;  %s1138_s1 = inlined_call_operand.vmem [shape: bf16[256,128], index: 1, kind: input, shape index: {}]   ;;  %s1139_s0 = inlined_call_operand.vmem [shape: bf16[128,256], index: 0, kind: input, shape index: {}]   ;;  %s1140_s2 = inlined_call_operand.vmem [shape: f32[1,256], index: 2, kind: input, shape index: {}]   ;;  %s1141_s3 = inlined_call_operand.vmem [shape: f32[1,256], index: 3, kind: input, shape index: {}]   ;;  %s1142_s4 = inlined_call_operand.vmem [shape: f32[1,128], index: 4, kind: input, shape index: {}]   ;;  %s1143_s5 = inlined_call_operand.vmem [shape: f32[1,128], index: 5, kind: input, shape index: {}]   ;;  %s1144_s6 = inlined_call_operand.vmem [shape: bf16[128,128], index: 6, kind: output, shape index: {}]  }
   0x1   :  { %v843_v0 = vld [vmem:[%s1138_s1 + $0x40] sm:$0xff]   ;;  %v845_v2 = vld [vmem:[%s1138_s1 + $0x48] sm:$0xff]   ;;  %v847_v4 = vld [vmem:[%s1138_s1 + $0x50] sm:$0xff]  }
   0x2   :  { %v844_v1 = vld [vmem:[%s1138_s1] sm:$0xff]   ;;  %763 = vmatprep.subr.bf16.mxu0 %v843_v0  ;;  %827 = vmatprep.subr.bf16.mxu1 %v843_v0  ;;  %v846_v3 = vld [vmem:[%s1138_s1 + $0x8] sm:$0xff]   ;;  %v848_v6 = vld [vmem:[%s1138_s1 + $0x10] sm:$0xff]   ;;  %v95_v8 = vshrl.u32 %v94_v5, 7 }
   0x3   :  { %764 = vmatpush3.bf16.msra.mxu0 %v844_v1  ;;  %835 = vmatpush3.bf16.msra.mxu1 %v844_v1  ;;  %v849_v7 = vld [vmem:[%s1138_s1 + $0x58] sm:$0xff]   ;;  %v851_v10 = vld [vmem:[%s1138_s1 + $0x60] sm:$0xff]   ;;  %v853_v14 = vld [vmem:[%s1138_s1 + $0x68] sm:$0xff]  }
   0x4   :  { %765 = vmatprep.subr.bf16.mxu0 %v845_v2  ;;  %828 = vmatprep.subr.bf16.mxu1 %v845_v2  ;;  %v850_v9 = vld [vmem:[%s1138_s1 + $0x18] sm:$0xff]   ;;  %v96_v11 = vsub.s32 0, %v95_v8  ;;  %v852_v12 = vld [vmem:[%s1138_s1 + $0x20] sm:$0xff]   ;;  %v100_v13 = vsub.s32 1, %v95_v8  ;;  %v45_v16 = vld [vmem:[%s1139_s0 + $0x8] sm:$0xff] }
   0x5   :  { %v44_v15 = vld [vmem:[%s1139_s0] sm:$0xff]  ;;  %v62_v20 = vunpack.c.l.bf16 %v45_v16  ;;  %v63_v21 = vunpack.c.h.bf16 %v45_v16  ;;  %v53_v24 = vld [vmem:[%s1139_s0 + $0x48] sm:$0xff]  ;;  %v956_v29 = vld [vmem:[%s1139_s0 + $0x10] sm:$0xff] }
   0x6   :  { %v92_v17 = vld [vmem:[%s1140_s2] sm:$0x3]  ;;  %v60_v18 = vunpack.c.l.bf16 %v44_v15  ;;  %v61_v19 = vunpack.c.h.bf16 %v44_v15  ;;  %v854_v30 = vld [vmem:[%s1138_s1 + $0x28] sm:$0xff]   ;;  %v78_v33 = vunpack.c.l.bf16 %v53_v24  ;;  %v79_v34 = vunpack.c.h.bf16 %v53_v24  ;;  %v855_v35 = vld [vmem:[%s1138_s1 + $0x70] sm:$0xff]  }
   0x7   :  { %766 = vmatpush3.bf16.msra.mxu0 %v846_v3  ;;  %836 = vmatpush3.bf16.msra.mxu1 %v846_v3  ;;  %v136_v22 = vld [vmem:[%s1141_s3] sm:$0x3]  ;;  %v945_v25 = vrot.slane %v92_v17, %v96_v11  ;;  %v947_v26 = vrot.slane %v92_v17, %v100_v13  ;;  %v47_v39 = vld [vmem:[%s1139_s0 + $0x18] sm:$0xff]  ;;  %v65_v40 = vunpack.c.h.bf16 %v956_v29  ;;  %v856_v49 = vld [vmem:[%s1138_s1 + $0x30] sm:$0xff]  }
   0x8   :  { %767 = vmatprep.subr.bf16.mxu0 %v847_v4  ;;  %829 = vmatprep.subr.bf16.mxu1 %v847_v4  ;;  %v52_v23 = vld [vmem:[%s1139_s0 + $0x40] sm:$0xff]  ;;  %v949_v27 = vrot.slane %v136_v22, %v96_v11  ;;  %v951_v28 = vrot.slane %v136_v22, %v100_v13  ;;  %v67_v53 = vunpack.c.h.bf16 %v47_v39  ;;  %v857_v54 = vld [vmem:[%s1138_s1 + $0x78] sm:$0xff]   ;;  %v54_v59 = vld [vmem:[%s1139_s0 + $0x50] sm:$0xff]  ;;  %v64_v13 = vunpack.c.l.bf16 %v956_v29 }
   0x9   :  { %v76_v31 = vunpack.c.l.bf16 %v52_v23  ;;  %v77_v32 = vunpack.c.h.bf16 %v52_v23  ;;  %v105_v36 = vmul.f32 %v947_v26, %v61_v19  ;;  %v107_v37 = vmul.f32 %v947_v26, %v63_v21  ;;  %v55_v0 = vld [vmem:[%s1139_s0 + $0x58] sm:$0xff] }
   0xa   :  { %v104_v38 = vmul.f32 %v945_v25, %v60_v18  ;;  %v123_v42 = vmul.f32 %v947_v26, %v79_v34  ;;  %v106_v43 = vmul.f32 %v945_v25, %v62_v20  ;;  %v122_v48 = vmul.f32 %v945_v25, %v78_v33  ;;  %v858_v5 = vld [vmem:[%s1138_s1 + $0x38] sm:$0xff]   ;;  %v48_v18 = vld [vmem:[%s1139_s0 + $0x20] sm:$0xff] }
   0xb   :  { %768 = vmatpush3.bf16.msra.mxu0 %v848_v6  ;;  %837 = vmatpush3.bf16.msra.mxu1 %v848_v6  ;;  %v121_v41 = vmul.f32 %v947_v26, %v77_v32  ;;  %v120_v44 = vmul.f32 %v945_v25, %v76_v31  ;;  %v149_v45 = vadd.f32 %v951_v28, %v105_v36  ;;  %v66_v16 = vunpack.c.l.bf16 %v47_v39  ;;  %v49_v31 = vld [vmem:[%s1139_s0 + $0x28] sm:$0xff]  ;;  %v56_v36 = vld [vmem:[%s1139_s0 + $0x60] sm:$0xff] }
   0xc   :  { %769 = vmatprep.subr.bf16.mxu0 %v849_v7  ;;  %830 = vmatprep.subr.bf16.mxu1 %v849_v7  ;;  %v151_v46 = vadd.f32 %v951_v28, %v107_v37  ;;  %v148_v47 = vadd.f32 %v949_v27, %v104_v38  ;;  %v167_v51 = vadd.f32 %v951_v28, %v123_v42  ;;  %v80_v17 = vunpack.c.l.bf16 %v54_v59 }
   0xd   :  { %v165_v50 = vadd.f32 %v951_v28, %v121_v41  ;;  %v150_v52 = vadd.f32 %v949_v27, %v106_v43  ;;  %v181_v55 = vmax.f32 %v149_v45, 0.0  ;;  %v164_v58 = vadd.f32 %v949_v27, %v120_v44  ;;  %v57_v41 = vld [vmem:[%s1139_s0 + $0x68] sm:$0xff] }
   0xe   :  { %v183_v56 = vmax.f32 %v151_v46, 0.0  ;;  %v180_v57 = vmax.f32 %v148_v47, 0.0  ;;  %v199_v61 = vmax.f32 %v167_v51, 0.0  ;;  %v166_v63 = vadd.f32 %v949_v27, %v122_v48 }
   0xf   :  { %770 = vmatpush3.bf16.msra.mxu0 %v850_v9  ;;  %838 = vmatpush3.bf16.msra.mxu1 %v850_v9  ;;  %v197_v60 = vmax.f32 %v165_v50, 0.0  ;;  %v182_v62 = vmax.f32 %v150_v52, 0.0  ;;  %v196_v2 = vmax.f32 %v164_v58, 0.0  ;;  %v109_v3 = vmul.f32 %v947_v26, %v65_v40 }
  0x10   :  { %771 = vmatprep.subr.bf16.mxu0 %v851_v10  ;;  %831 = vmatprep.subr.bf16.mxu1 %v851_v10  ;;  %v213_v1 = vpack.c.bf16 %v183_v56, %v181_v55  ;;  %v111_v4 = vmul.f32 %v947_v26, %v67_v53  ;;  %v198_v8 = vmax.f32 %v166_v63, 0.0  ;;  %v81_v9 = vunpack.c.h.bf16 %v54_v59 }
  0x11   :  { %v221_v6 = vpack.c.bf16 %v199_v61, %v197_v60  ;;  %v212_v7 = vpack.c.bf16 %v182_v62, %v180_v57  ;;  %v153_v10 = vadd.f32 %v951_v28, %v109_v3  ;;  %v108_v22 = vmul.f32 %v945_v25, %v64_v13  ;;  %v50_v62 = vld [vmem:[%s1139_s0 + $0x30] sm:$0xff] }
  0x12   :  { %v155_v11 = vadd.f32 %v951_v28, %v111_v4  ;;  %404 = vmatprep.mubr.bf16.mxu0 %v213_v1  ;;  %v125_v15 = vmul.f32 %v947_v26, %v81_v9  ;;  %v110_v24 = vmul.f32 %v945_v25, %v66_v16  ;;  %v82_v29 = vunpack.c.l.bf16 %v55_v0 }
  0x13   :  { %772 = vmatpush3.bf16.msra.mxu0 %v852_v12  ;;  %839 = vmatpush3.bf16.msra.mxu1 %v852_v12  ;;  %v83_v12 = vunpack.c.h.bf16 %v55_v0  ;;  %v185_v19 = vmax.f32 %v153_v10, 0.0  ;;  %v152_v34 = vadd.f32 %v949_v27, %v108_v22  ;;  %v71_v44 = vunpack.c.h.bf16 %v49_v31 }
  0x14   :  { %773 = vmatprep.subr.bf16.mxu0 %v853_v14  ;;  %832 = vmatprep.subr.bf16.mxu1 %v853_v14  ;;  %v220_v14 = vpack.c.bf16 %v198_v8, %v196_v2  ;;  %v187_v20 = vmax.f32 %v155_v11, 0.0  ;;  %v169_v23 = vadd.f32 %v951_v28, %v125_v15  ;;  %v154_v38 = vadd.f32 %v949_v27, %v110_v24 }
  0x15   :  { %436 = vmatprep.mubr.bf16.mxu1 %v221_v6  ;;  %v127_v21 = vmul.f32 %v947_v26, %v83_v12  ;;  %v126_v39 = vmul.f32 %v945_v25, %v82_v29  ;;  %v184_v43 = vmax.f32 %v152_v34, 0.0  ;;  %v115_v51 = vmul.f32 %v947_v26, %v71_v44  ;;  %v58_v12 = vld [vmem:[%s1139_s0 + $0x70] sm:$0xff] }
  0x16   :  { %v215_v32 = vpack.c.bf16 %v187_v20, %v185_v19  ;;  %v201_v37 = vmax.f32 %v169_v23, 0.0  ;;  %v186_v46 = vmax.f32 %v154_v38, 0.0  ;;  %v87_v53 = vunpack.c.h.bf16 %v57_v41 }
  0x17   :  { %774 = vmatpush3.bf16.msra.mxu0 %v854_v30  ;;  %840 = vmatpush3.bf16.msra.mxu1 %v854_v30  ;;  %v124_v30 = vmul.f32 %v945_v25, %v80_v17  ;;  %v171_v33 = vadd.f32 %v951_v28, %v127_v21  ;;  %v170_v47 = vadd.f32 %v949_v27, %v126_v39  ;;  %v68_v57 = vunpack.c.l.bf16 %v48_v18  ;;  %v59_v17 = vld [vmem:[%s1139_s0 + $0x78] sm:$0xff] }
  0x18   :  { %775 = vmatprep.subr.bf16.mxu0 %v855_v35  ;;  %833 = vmatprep.subr.bf16.mxu1 %v855_v35  ;;  %v69_v35 = vunpack.c.h.bf16 %v48_v18  ;;  %v159_v58 = vadd.f32 %v951_v28, %v115_v51  ;;  %v131_v60 = vmul.f32 %v947_v26, %v87_v53  ;;  %v70_v61 = vunpack.c.l.bf16 %v49_v31 }
  0x19   :  { %v168_v40 = vadd.f32 %v949_v27, %v124_v30  ;;  %v203_v42 = vmax.f32 %v171_v33, 0.0  ;;  %v202_v55 = vmax.f32 %v170_v47, 0.0  ;;  %v112_v1 = vmul.f32 %v945_v25, %v68_v57 }
  0x1a   :  { %v113_v45 = vmul.f32 %v947_v26, %v69_v35  ;;  %v84_v2 = vunpack.c.l.bf16 %v56_v36  ;;  %v191_v3 = vmax.f32 %v159_v58, 0.0  ;;  %v175_v4 = vadd.f32 %v951_v28, %v131_v60 }
  0x1b   :  { %776 = vmatpush3.bf16.msra.mxu0 %v856_v49  ;;  %841 = vmatpush3.bf16.msra.mxu1 %v856_v49  ;;  %v200_v48 = vmax.f32 %v168_v40, 0.0  ;;  %v85_v49 = vunpack.c.h.bf16 %v56_v36  ;;  %v223_v50 = vpack.c.bf16 %v203_v42, %v201_v37  ;;  %v86_v6 = vunpack.c.l.bf16 %v57_v41 }
  0x1c   :  { %777 = vmatprep.subr.bf16.mxu0 %v857_v54  ;;  %834 = vmatprep.subr.bf16.mxu1 %v857_v54  ;;  %v157_v52 = vadd.f32 %v951_v28, %v113_v45  ;;  %v214_v54 = vpack.c.bf16 %v186_v46, %v184_v43  ;;  %v156_v9 = vadd.f32 %v949_v27, %v112_v1  ;;  %v73_v11 = vunpack.c.h.bf16 %v50_v62 }
  0x1d   :  { %v129_v56 = vmul.f32 %v947_v26, %v85_v49  ;;  %v222_v63 = vpack.c.bf16 %v202_v55, %v200_v48  ;;  %v128_v10 = vmul.f32 %v945_v25, %v84_v2  ;;  %v130_v16 = vmul.f32 %v945_v25, %v86_v6 }
  0x1e   :  { %v189_v59 = vmax.f32 %v157_v52, 0.0  ;;  %v188_v18 = vmax.f32 %v156_v9, 0.0  ;;  %v117_v21 = vmul.f32 %v947_v26, %v73_v11  ;;  %v89_v29 = vunpack.c.h.bf16 %v58_v12 }
  0x1f   :  { %778 = vmatpush3.bf16.msra.mxu0 %v858_v5  ;;  %842 = vmatpush3.bf16.msra.mxu1 %v858_v5  ;;  %v173_v0 = vadd.f32 %v951_v28, %v129_v56  ;;  %v114_v5 = vmul.f32 %v945_v25, %v70_v61  ;;  %v172_v19 = vadd.f32 %v949_v27, %v128_v10  ;;  %v91_v33 = vunpack.c.h.bf16 %v59_v17 }
  0x20   :  { %v217_v13 = vpack.c.bf16 %v191_v3, %v189_v59  ;;  %v174_v24 = vadd.f32 %v949_v27, %v130_v16  ;;  %v133_v36 = vmul.f32 %v947_v26, %v89_v29  ;;  %v72_v37 = vunpack.c.l.bf16 %v50_v62 }
  0x21   :  { %v205_v8 = vmax.f32 %v173_v0, 0.0  ;;  %v158_v15 = vadd.f32 %v949_v27, %v114_v5  ;;  %v204_v30 = vmax.f32 %v172_v19, 0.0  ;;  %v135_v40 = vmul.f32 %v947_v26, %v91_v33 }
  0x22   :  { %405 = vmatmul.mubr.bf16.vlgmr.msra.gmra.mrb[0].mxu0 %v212_v7  ;;  %437 = vmatmul.mubr.bf16.vlgmr.msra.gmra.mrb[0].mxu1 %v220_v14  ;;  %v51_v7 = vld [vmem:[%s1139_s0 + $0x38] sm:$0xff]  ;;  %v207_v14 = vmax.f32 %v175_v4, 0.0  ;;  %v206_v35 = vmax.f32 %v174_v24, 0.0  ;;  %v177_v43 = vadd.f32 %v951_v28, %v133_v36  ;;  %v116_v44 = vmul.f32 %v945_v25, %v72_v37 }
  0x23   :  { %412 = vmatprep.mubr.bf16.mxu0 %v215_v32  ;;  %444 = vmatprep.mubr.bf16.mxu1 %v223_v50  ;;  %v75_v20 = vunpack.c.h.bf16 %v51_v7  ;;  %v190_v23 = vmax.f32 %v158_v15, 0.0  ;;  %v161_v32 = vadd.f32 %v951_v28, %v117_v21  ;;  %v74_v41 = vunpack.c.l.bf16 %v51_v7  ;;  %v1080_v7 = vld [vmem:[%s1143_s5] ss:$0 sm:$0xff] }
  0x24   :  { %v225_v22 = vpack.c.bf16 %v207_v14, %v205_v8  ;;  %v224_v42 = vpack.c.bf16 %v206_v35, %v204_v30  ;;  %v88_v45 = vunpack.c.l.bf16 %v58_v12  ;;  %v179_v47 = vadd.f32 %v951_v28, %v135_v40 }
  0x25   :  { %v119_v31 = vmul.f32 %v947_v26, %v75_v20  ;;  %v216_v34 = vpack.c.bf16 %v190_v23, %v188_v18  ;;  %v193_v39 = vmax.f32 %v161_v32, 0.0  ;;  %v118_v48 = vmul.f32 %v945_v25, %v74_v41 }
  0x26   :  { %v90_v49 = vunpack.c.l.bf16 %v59_v17  ;;  %v209_v50 = vmax.f32 %v177_v43, 0.0  ;;  %v160_v51 = vadd.f32 %v949_v27, %v116_v44  ;;  %v132_v26 = vmul.f32 %v945_v25, %v88_v45 }
  0x27   :  { %v163_v38 = vadd.f32 %v951_v28, %v119_v31  ;;  %v211_v53 = vmax.f32 %v179_v47, 0.0 }
  0x28   :  { %v134_v55 = vmul.f32 %v945_v25, %v90_v49  ;;  %v192_v56 = vmax.f32 %v160_v51, 0.0  ;;  %v176_v57 = vadd.f32 %v949_v27, %v132_v26  ;;  %v1075_v25 = vld [vmem:[%s1142_s4] ss:$0 sm:$0xff] }
  0x29   :  { %v195_v46 = vmax.f32 %v163_v38, 0.0  ;;  %v227_v28 = vpack.c.bf16 %v211_v53, %v209_v50 }
  0x2a   :  { %413 = vmatmul.mubr.bf16.gmra.mrb[4].mxu0 %v214_v54  ;;  %445 = vmatmul.mubr.bf16.gmra.mrb[4].mxu1 %v222_v63  ;;  %v162_v54 = vadd.f32 %v949_v27, %v118_v48  ;;  %v178_v59 = vadd.f32 %v949_v27, %v134_v55  ;;  %v208_v60 = vmax.f32 %v176_v57, 0.0 }
  0x2b   :  { %420 = vmatprep.mubr.bf16.mxu0 %v217_v13  ;;  %452 = vmatprep.mubr.bf16.mxu1 %v225_v22  ;;  %v219_v52 = vpack.c.bf16 %v195_v46, %v193_v39 }
  0x2c   :  { %v194_v58 = vmax.f32 %v162_v54, 0.0  ;;  %v210_v62 = vmax.f32 %v178_v59, 0.0 }
  0x2e   :  { %v218_v61 = vpack.c.bf16 %v194_v58, %v192_v56  ;;  %v226_v63 = vpack.c.bf16 %v210_v62, %v208_v60 }
  0x32   :  { %421 = vmatmul.mubr.bf16.gmra.mrb[8].mxu0 %v216_v34  ;;  %453 = vmatmul.mubr.bf16.gmra.mrb[8].mxu1 %v224_v42 }
  0x33   :  { %428 = vmatprep.mubr.bf16.mxu0 %v219_v52  ;;  %460 = vmatprep.mubr.bf16.mxu1 %v227_v28 }
  0x3a   :  { %429 = vmatmul.mubr.bf16.gmra.mrb[12].mxu0 %v218_v61  ;;  %461 = vmatmul.mubr.bf16.gmra.mrb[12].mxu1 %v226_v63 }
  0xf5   :  { %v779_v0 = vpop.f32.mrb[0].mxu0  ;;  %v803_v1 = vpop.f32.mrb[0].mxu1 }
  0xf6   :  { %v780_v2 = vpop.f32.mrb[1].mxu0  ;;  %v804_v3 = vpop.f32.mrb[1].mxu1 }
  0xf7   :  { %v781_v4 = vadd.f32 %v780_v2, %v779_v0  ;;  %v805_v5 = vadd.f32 %v804_v3, %v803_v1  ;;  %v782_v6 = vpop.f32.mrb[2].mxu0  ;;  %v806_v27 = vpop.f32.mrb[2].mxu1 }
  0xf8   :  { %v783_v8 = vpop.f32.mrb[3].mxu0  ;;  %v807_v9 = vpop.f32.mrb[3].mxu1 }
  0xf9   :  { %v527_v10 = vmul.f32 %v781_v4, %v1075_v25  ;;  %v535_v11 = vmul.f32 %v805_v5, %v1075_v25  ;;  %v784_v12 = vadd.f32 %v783_v8, %v782_v6  ;;  %v808_v13 = vadd.f32 %v807_v9, %v806_v27 }
  0xfb   :  { %v550_v14 = vadd.f32 %v1080_v7, %v527_v10  ;;  %v558_v15 = vadd.f32 %v1080_v7, %v535_v11  ;;  %v528_v16 = vmul.f32 %v784_v12, %v1075_v25  ;;  %v536_v17 = vmul.f32 %v808_v13, %v1075_v25 }
  0xfd   :  { %v551_v18 = vadd.f32 %v1080_v7, %v528_v16  ;;  %v559_v19 = vadd.f32 %v1080_v7, %v536_v17  ;;  %v785_v20 = vpop.f32.mrb[4].mxu0  ;;  %v809_v21 = vpop.f32.mrb[4].mxu1  ;;  %v566_v22 = vmax.f32 %v550_v14, 0.0  ;;  %v574_v23 = vmax.f32 %v558_v15, 0.0 }
  0xfe   :  { %v786_v24 = vpop.f32.mrb[5].mxu0  ;;  %v810_v29 = vpop.f32.mrb[5].mxu1 }
  0xff   :  { %v567_v30 = vmax.f32 %v551_v18, 0.0  ;;  %v575_v31 = vmax.f32 %v559_v19, 0.0  ;;  %v787_v32 = vadd.f32 %v786_v24, %v785_v20  ;;  %v811_v33 = vadd.f32 %v810_v29, %v809_v21  ;;  %v788_v34 = vpop.f32.mrb[6].mxu0  ;;  %v812_v35 = vpop.f32.mrb[6].mxu1 }
 0x100   :  { %v789_v36 = vpop.f32.mrb[7].mxu0  ;;  %v813_v37 = vpop.f32.mrb[7].mxu1 }
 0x101   :  { %v719_v38 = vpack.c.bf16 %v567_v30, %v566_v22  ;;  %v739_v39 = vpack.c.bf16 %v575_v31, %v574_v23  ;;  %v529_v40 = vmul.f32 %v787_v32, %v1075_v25  ;;  %v537_v41 = vmul.f32 %v811_v33, %v1075_v25 }
 0x102   :  { %v790_v42 = vadd.f32 %v789_v36, %v788_v34  ;;  %v814_v43 = vadd.f32 %v813_v37, %v812_v35 }
 0x103   :  { %720 = vst [vmem:[%s1144_s6] sm:$0xff] %v719_v38   ;;  %759 = vst [vmem:[%s1144_s6 + $0x20] sm:$0xff] %v739_v39   ;;  %v552_v44 = vadd.f32 %v1080_v7, %v529_v40  ;;  %v560_v45 = vadd.f32 %v1080_v7, %v537_v41 }
 0x104   :  { %v530_v46 = vmul.f32 %v790_v42, %v1075_v25  ;;  %v538_v47 = vmul.f32 %v814_v43, %v1075_v25 }
 0x105   :  { %v791_v48 = vpop.f32.mrb[8].mxu0  ;;  %v815_v49 = vpop.f32.mrb[8].mxu1  ;;  %v568_v57 = vmax.f32 %v552_v44, 0.0  ;;  %v576_v28 = vmax.f32 %v560_v45, 0.0 }
 0x106   :  { %v553_v50 = vadd.f32 %v1080_v7, %v530_v46  ;;  %v561_v51 = vadd.f32 %v1080_v7, %v538_v47  ;;  %v792_v26 = vpop.f32.mrb[9].mxu0  ;;  %v816_v52 = vpop.f32.mrb[9].mxu1 }
 0x107   :  { %v793_v53 = vadd.f32 %v792_v26, %v791_v48  ;;  %v817_v54 = vadd.f32 %v816_v52, %v815_v49  ;;  %v794_v55 = vpop.f32.mrb[10].mxu0  ;;  %v818_v56 = vpop.f32.mrb[10].mxu1 }
 0x108   :  { %v569_v58 = vmax.f32 %v553_v50, 0.0  ;;  %v577_v59 = vmax.f32 %v561_v51, 0.0  ;;  %v795_v60 = vpop.f32.mrb[11].mxu0  ;;  %v819_v61 = vpop.f32.mrb[11].mxu1 }
 0x109   :  { %v531_v62 = vmul.f32 %v793_v53, %v1075_v25  ;;  %v539_v63 = vmul.f32 %v817_v54, %v1075_v25  ;;  %v796_v0 = vadd.f32 %v795_v60, %v794_v55  ;;  %v820_v1 = vadd.f32 %v819_v61, %v818_v56 }
 0x10a   :  { %v724_v2 = vpack.c.bf16 %v569_v58, %v568_v57  ;;  %v744_v3 = vpack.c.bf16 %v577_v59, %v576_v28 }
 0x10b   :  { %v554_v4 = vadd.f32 %v1080_v7, %v531_v62  ;;  %v562_v5 = vadd.f32 %v1080_v7, %v539_v63  ;;  %v532_v6 = vmul.f32 %v796_v0, %v1075_v25  ;;  %v540_v27 = vmul.f32 %v820_v1, %v1075_v25 }
 0x10c   :  { %756 = vst [vmem:[%s1144_s6 + $0x8] sm:$0xff] %v724_v2   ;;  %760 = vst [vmem:[%s1144_s6 + $0x28] sm:$0xff] %v744_v3  }
 0x10d   :  { %v555_v8 = vadd.f32 %v1080_v7, %v532_v6  ;;  %v563_v9 = vadd.f32 %v1080_v7, %v540_v27  ;;  %v797_v10 = vpop.f32.mrb[12].mxu0  ;;  %v570_v11 = vmax.f32 %v554_v4, 0.0  ;;  %v821_v12 = vpop.f32.mrb[12].mxu1  ;;  %v578_v14 = vmax.f32 %v562_v5, 0.0 }
 0x10e   :  { %v798_v13 = vpop.f32.mrb[13].mxu0  ;;  %v822_v18 = vpop.f32.mrb[13].mxu1 }
 0x10f   :  { %v571_v15 = vmax.f32 %v555_v8, 0.0  ;;  %v579_v16 = vmax.f32 %v563_v9, 0.0  ;;  %v799_v17 = vadd.f32 %v798_v13, %v797_v10  ;;  %v800_v19 = vpop.f32.mrb[14].mxu0  ;;  %v823_v20 = vadd.f32 %v822_v18, %v821_v12  ;;  %v824_v21 = vpop.f32.mrb[14].mxu1 }
 0x110   :  { %v801_v22 = vpop.f32.mrb[15].mxu0  ;;  %v825_v31 = vpop.f32.mrb[15].mxu1 }
 0x111   :  { %v729_v23 = vpack.c.bf16 %v571_v15, %v570_v11  ;;  %v749_v24 = vpack.c.bf16 %v579_v16, %v578_v14  ;;  %v533_v29 = vmul.f32 %v799_v17, %v1075_v25  ;;  %v802_v30 = vadd.f32 %v801_v22, %v800_v19 }
 0x112   :  { %v541_v32 = vmul.f32 %v823_v20, %v1075_v25  ;;  %v826_v33 = vadd.f32 %v825_v31, %v824_v21 }
 0x113   :  { %757 = vst [vmem:[%s1144_s6 + $0x10] sm:$0xff] %v729_v23   ;;  %761 = vst [vmem:[%s1144_s6 + $0x30] sm:$0xff] %v749_v24   ;;  %v556_v34 = vadd.f32 %v1080_v7, %v533_v29  ;;  %v534_v35 = vmul.f32 %v802_v30, %v1075_v25 }
 0x114   :  { %v564_v36 = vadd.f32 %v1080_v7, %v541_v32  ;;  %v542_v37 = vmul.f32 %v826_v33, %v1075_v25 }
 0x115   :  { %v557_v38 = vadd.f32 %v1080_v7, %v534_v35  ;;  %v572_v40 = vmax.f32 %v556_v34, 0.0 }
 0x116   :  { %v565_v39 = vadd.f32 %v1080_v7, %v542_v37  ;;  %v580_v42 = vmax.f32 %v564_v36, 0.0 }
 0x117   :  { %v573_v41 = vmax.f32 %v557_v38, 0.0 }
 0x118   :  { %v581_v43 = vmax.f32 %v565_v39, 0.0 }
 0x119   :  { %v734_v44 = vpack.c.bf16 %v573_v41, %v572_v40 }
 0x11a   :  { %v754_v45 = vpack.c.bf16 %v581_v43, %v580_v42 }
 0x11b   :  { %758 = vst [vmem:[%s1144_s6 + $0x18] sm:$0xff] %v734_v44  }
 0x11c   :  { %762 = vst [vmem:[%s1144_s6 + $0x38] sm:$0xff] %v754_v45  }

// kernel: densenet121_forward.133
= control target key start
LH: loop header
LB: loop body
LE: loop exit
PB: predicated region body
PF: predicated region fallthrough
CT: control target
= control target key end

     0   :  { %v88_v5 = vlaneseq  ;;  %s1016_s1 = inlined_call_operand.vmem [shape: bf16[256,128], index: 1, kind: input, shape index: {}]   ;;  %s1017_s0 = inlined_call_operand.vmem [shape: bf16[128,256], index: 0, kind: input, shape index: {}]   ;;  %s1018_s2 = inlined_call_operand.vmem [shape: f32[1,256], index: 2, kind: input, shape index: {}]   ;;  %s1019_s3 = inlined_call_operand.vmem [shape: f32[1,256], index: 3, kind: input, shape index: {}]   ;;  %s1020_s4 = inlined_call_operand.vmem [shape: bf16[128,128], index: 4, kind: output, shape index: {}]  }
   0x1   :  { %v773_v0 = vld [vmem:[%s1016_s1 + $0x40] sm:$0xff]   ;;  %v775_v2 = vld [vmem:[%s1016_s1 + $0x48] sm:$0xff]   ;;  %v777_v4 = vld [vmem:[%s1016_s1 + $0x50] sm:$0xff]  }
   0x2   :  { %v774_v1 = vld [vmem:[%s1016_s1] sm:$0xff]   ;;  %693 = vmatprep.subr.bf16.mxu0 %v773_v0  ;;  %757 = vmatprep.subr.bf16.mxu1 %v773_v0  ;;  %v776_v3 = vld [vmem:[%s1016_s1 + $0x8] sm:$0xff]   ;;  %v778_v6 = vld [vmem:[%s1016_s1 + $0x10] sm:$0xff]   ;;  %v89_v8 = vshrl.u32 %v88_v5, 7 }
   0x3   :  { %694 = vmatpush3.bf16.msra.mxu0 %v774_v1  ;;  %765 = vmatpush3.bf16.msra.mxu1 %v774_v1  ;;  %v779_v7 = vld [vmem:[%s1016_s1 + $0x58] sm:$0xff]   ;;  %v781_v10 = vld [vmem:[%s1016_s1 + $0x60] sm:$0xff]   ;;  %v783_v14 = vld [vmem:[%s1016_s1 + $0x68] sm:$0xff]  }
   0x4   :  { %695 = vmatprep.subr.bf16.mxu0 %v775_v2  ;;  %758 = vmatprep.subr.bf16.mxu1 %v775_v2  ;;  %v780_v9 = vld [vmem:[%s1016_s1 + $0x18] sm:$0xff]   ;;  %v90_v11 = vsub.s32 0, %v89_v8  ;;  %v782_v12 = vld [vmem:[%s1016_s1 + $0x20] sm:$0xff]   ;;  %v94_v13 = vsub.s32 1, %v89_v8  ;;  %v39_v16 = vld [vmem:[%s1017_s0 + $0x8] sm:$0xff] }
   0x5   :  { %v38_v15 = vld [vmem:[%s1017_s0] sm:$0xff]  ;;  %v56_v20 = vunpack.c.l.bf16 %v39_v16  ;;  %v57_v21 = vunpack.c.h.bf16 %v39_v16  ;;  %v47_v24 = vld [vmem:[%s1017_s0 + $0x48] sm:$0xff]  ;;  %v876_v29 = vld [vmem:[%s1017_s0 + $0x10] sm:$0xff] }
   0x6   :  { %v86_v17 = vld [vmem:[%s1018_s2] sm:$0x3]  ;;  %v54_v18 = vunpack.c.l.bf16 %v38_v15  ;;  %v55_v19 = vunpack.c.h.bf16 %v38_v15  ;;  %v784_v30 = vld [vmem:[%s1016_s1 + $0x28] sm:$0xff]   ;;  %v72_v33 = vunpack.c.l.bf16 %v47_v24  ;;  %v73_v34 = vunpack.c.h.bf16 %v47_v24  ;;  %v785_v35 = vld [vmem:[%s1016_s1 + $0x70] sm:$0xff]  }
   0x7   :  { %696 = vmatpush3.bf16.msra.mxu0 %v776_v3  ;;  %766 = vmatpush3.bf16.msra.mxu1 %v776_v3  ;;  %v130_v22 = vld [vmem:[%s1019_s3] sm:$0x3]  ;;  %v865_v25 = vrot.slane %v86_v17, %v90_v11  ;;  %v867_v26 = vrot.slane %v86_v17, %v94_v13  ;;  %v41_v39 = vld [vmem:[%s1017_s0 + $0x18] sm:$0xff]  ;;  %v59_v40 = vunpack.c.h.bf16 %v876_v29  ;;  %v786_v49 = vld [vmem:[%s1016_s1 + $0x30] sm:$0xff]  }
   0x8   :  { %697 = vmatprep.subr.bf16.mxu0 %v777_v4  ;;  %759 = vmatprep.subr.bf16.mxu1 %v777_v4  ;;  %v46_v23 = vld [vmem:[%s1017_s0 + $0x40] sm:$0xff]  ;;  %v869_v27 = vrot.slane %v130_v22, %v90_v11  ;;  %v871_v28 = vrot.slane %v130_v22, %v94_v13  ;;  %v61_v53 = vunpack.c.h.bf16 %v41_v39  ;;  %v787_v54 = vld [vmem:[%s1016_s1 + $0x78] sm:$0xff]   ;;  %v48_v59 = vld [vmem:[%s1017_s0 + $0x50] sm:$0xff]  ;;  %v58_v13 = vunpack.c.l.bf16 %v876_v29 }
   0x9   :  { %v70_v31 = vunpack.c.l.bf16 %v46_v23  ;;  %v71_v32 = vunpack.c.h.bf16 %v46_v23  ;;  %v99_v36 = vmul.f32 %v867_v26, %v55_v19  ;;  %v101_v37 = vmul.f32 %v867_v26, %v57_v21  ;;  %v49_v0 = vld [vmem:[%s1017_s0 + $0x58] sm:$0xff] }
   0xa   :  { %v98_v38 = vmul.f32 %v865_v25, %v54_v18  ;;  %v117_v42 = vmul.f32 %v867_v26, %v73_v34  ;;  %v100_v43 = vmul.f32 %v865_v25, %v56_v20  ;;  %v116_v48 = vmul.f32 %v865_v25, %v72_v33  ;;  %v788_v5 = vld [vmem:[%s1016_s1 + $0x38] sm:$0xff]   ;;  %v42_v18 = vld [vmem:[%s1017_s0 + $0x20] sm:$0xff] }
   0xb   :  { %698 = vmatpush3.bf16.msra.mxu0 %v778_v6  ;;  %767 = vmatpush3.bf16.msra.mxu1 %v778_v6  ;;  %v115_v41 = vmul.f32 %v867_v26, %v71_v32  ;;  %v114_v44 = vmul.f32 %v865_v25, %v70_v31  ;;  %v143_v45 = vadd.f32 %v871_v28, %v99_v36  ;;  %v60_v16 = vunpack.c.l.bf16 %v41_v39  ;;  %v43_v31 = vld [vmem:[%s1017_s0 + $0x28] sm:$0xff]  ;;  %v50_v36 = vld [vmem:[%s1017_s0 + $0x60] sm:$0xff] }
   0xc   :  { %699 = vmatprep.subr.bf16.mxu0 %v779_v7  ;;  %760 = vmatprep.subr.bf16.mxu1 %v779_v7  ;;  %v145_v46 = vadd.f32 %v871_v28, %v101_v37  ;;  %v142_v47 = vadd.f32 %v869_v27, %v98_v38  ;;  %v161_v51 = vadd.f32 %v871_v28, %v117_v42  ;;  %v74_v17 = vunpack.c.l.bf16 %v48_v59 }
   0xd   :  { %v159_v50 = vadd.f32 %v871_v28, %v115_v41  ;;  %v144_v52 = vadd.f32 %v869_v27, %v100_v43  ;;  %v175_v55 = vmax.f32 %v143_v45, 0.0  ;;  %v158_v58 = vadd.f32 %v869_v27, %v114_v44  ;;  %v51_v41 = vld [vmem:[%s1017_s0 + $0x68] sm:$0xff] }
   0xe   :  { %v177_v56 = vmax.f32 %v145_v46, 0.0  ;;  %v174_v57 = vmax.f32 %v142_v47, 0.0  ;;  %v193_v61 = vmax.f32 %v161_v51, 0.0  ;;  %v160_v63 = vadd.f32 %v869_v27, %v116_v48 }
   0xf   :  { %700 = vmatpush3.bf16.msra.mxu0 %v780_v9  ;;  %768 = vmatpush3.bf16.msra.mxu1 %v780_v9  ;;  %v191_v60 = vmax.f32 %v159_v50, 0.0  ;;  %v176_v62 = vmax.f32 %v144_v52, 0.0  ;;  %v190_v2 = vmax.f32 %v158_v58, 0.0  ;;  %v103_v3 = vmul.f32 %v867_v26, %v59_v40 }
  0x10   :  { %701 = vmatprep.subr.bf16.mxu0 %v781_v10  ;;  %761 = vmatprep.subr.bf16.mxu1 %v781_v10  ;;  %v207_v1 = vpack.c.bf16 %v177_v56, %v175_v55  ;;  %v105_v4 = vmul.f32 %v867_v26, %v61_v53  ;;  %v192_v8 = vmax.f32 %v160_v63, 0.0  ;;  %v75_v9 = vunpack.c.h.bf16 %v48_v59 }
  0x11   :  { %v215_v6 = vpack.c.bf16 %v193_v61, %v191_v60  ;;  %v206_v7 = vpack.c.bf16 %v176_v62, %v174_v57  ;;  %v147_v10 = vadd.f32 %v871_v28, %v103_v3  ;;  %v102_v22 = vmul.f32 %v865_v25, %v58_v13  ;;  %v44_v62 = vld [vmem:[%s1017_s0 + $0x30] sm:$0xff] }
  0x12   :  { %v149_v11 = vadd.f32 %v871_v28, %v105_v4  ;;  %398 = vmatprep.mubr.bf16.mxu0 %v207_v1  ;;  %v119_v15 = vmul.f32 %v867_v26, %v75_v9  ;;  %v104_v24 = vmul.f32 %v865_v25, %v60_v16  ;;  %v76_v29 = vunpack.c.l.bf16 %v49_v0 }
  0x13   :  { %702 = vmatpush3.bf16.msra.mxu0 %v782_v12  ;;  %769 = vmatpush3.bf16.msra.mxu1 %v782_v12  ;;  %v77_v12 = vunpack.c.h.bf16 %v49_v0  ;;  %v179_v19 = vmax.f32 %v147_v10, 0.0  ;;  %v146_v34 = vadd.f32 %v869_v27, %v102_v22  ;;  %v65_v44 = vunpack.c.h.bf16 %v43_v31 }
  0x14   :  { %703 = vmatprep.subr.bf16.mxu0 %v783_v14  ;;  %762 = vmatprep.subr.bf16.mxu1 %v783_v14  ;;  %v214_v14 = vpack.c.bf16 %v192_v8, %v190_v2  ;;  %v181_v20 = vmax.f32 %v149_v11, 0.0  ;;  %v163_v23 = vadd.f32 %v871_v28, %v119_v15  ;;  %v148_v38 = vadd.f32 %v869_v27, %v104_v24 }
  0x15   :  { %430 = vmatprep.mubr.bf16.mxu1 %v215_v6  ;;  %v121_v21 = vmul.f32 %v867_v26, %v77_v12  ;;  %v120_v39 = vmul.f32 %v865_v25, %v76_v29  ;;  %v178_v43 = vmax.f32 %v146_v34, 0.0  ;;  %v109_v51 = vmul.f32 %v867_v26, %v65_v44  ;;  %v52_v12 = vld [vmem:[%s1017_s0 + $0x70] sm:$0xff] }
  0x16   :  { %v209_v32 = vpack.c.bf16 %v181_v20, %v179_v19  ;;  %v195_v37 = vmax.f32 %v163_v23, 0.0  ;;  %v180_v46 = vmax.f32 %v148_v38, 0.0  ;;  %v81_v53 = vunpack.c.h.bf16 %v51_v41 }
  0x17   :  { %704 = vmatpush3.bf16.msra.mxu0 %v784_v30  ;;  %770 = vmatpush3.bf16.msra.mxu1 %v784_v30  ;;  %v118_v30 = vmul.f32 %v865_v25, %v74_v17  ;;  %v165_v33 = vadd.f32 %v871_v28, %v121_v21  ;;  %v164_v47 = vadd.f32 %v869_v27, %v120_v39  ;;  %v62_v57 = vunpack.c.l.bf16 %v42_v18  ;;  %v53_v17 = vld [vmem:[%s1017_s0 + $0x78] sm:$0xff] }
  0x18   :  { %705 = vmatprep.subr.bf16.mxu0 %v785_v35  ;;  %763 = vmatprep.subr.bf16.mxu1 %v785_v35  ;;  %v63_v35 = vunpack.c.h.bf16 %v42_v18  ;;  %v153_v58 = vadd.f32 %v871_v28, %v109_v51  ;;  %v125_v60 = vmul.f32 %v867_v26, %v81_v53  ;;  %v64_v61 = vunpack.c.l.bf16 %v43_v31 }
  0x19   :  { %v162_v40 = vadd.f32 %v869_v27, %v118_v30  ;;  %v197_v42 = vmax.f32 %v165_v33, 0.0  ;;  %v196_v55 = vmax.f32 %v164_v47, 0.0  ;;  %v106_v1 = vmul.f32 %v865_v25, %v62_v57 }
  0x1a   :  { %v107_v45 = vmul.f32 %v867_v26, %v63_v35  ;;  %v78_v2 = vunpack.c.l.bf16 %v50_v36  ;;  %v185_v3 = vmax.f32 %v153_v58, 0.0  ;;  %v169_v4 = vadd.f32 %v871_v28, %v125_v60 }
  0x1b   :  { %706 = vmatpush3.bf16.msra.mxu0 %v786_v49  ;;  %771 = vmatpush3.bf16.msra.mxu1 %v786_v49  ;;  %v194_v48 = vmax.f32 %v162_v40, 0.0  ;;  %v79_v49 = vunpack.c.h.bf16 %v50_v36  ;;  %v217_v50 = vpack.c.bf16 %v197_v42, %v195_v37  ;;  %v80_v6 = vunpack.c.l.bf16 %v51_v41 }
  0x1c   :  { %707 = vmatprep.subr.bf16.mxu0 %v787_v54  ;;  %764 = vmatprep.subr.bf16.mxu1 %v787_v54  ;;  %v151_v52 = vadd.f32 %v871_v28, %v107_v45  ;;  %v208_v54 = vpack.c.bf16 %v180_v46, %v178_v43  ;;  %v150_v9 = vadd.f32 %v869_v27, %v106_v1  ;;  %v67_v11 = vunpack.c.h.bf16 %v44_v62 }
  0x1d   :  { %v123_v56 = vmul.f32 %v867_v26, %v79_v49  ;;  %v216_v63 = vpack.c.bf16 %v196_v55, %v194_v48  ;;  %v122_v10 = vmul.f32 %v865_v25, %v78_v2  ;;  %v124_v16 = vmul.f32 %v865_v25, %v80_v6 }
  0x1e   :  { %v183_v59 = vmax.f32 %v151_v52, 0.0  ;;  %v182_v18 = vmax.f32 %v150_v9, 0.0  ;;  %v111_v21 = vmul.f32 %v867_v26, %v67_v11  ;;  %v83_v29 = vunpack.c.h.bf16 %v52_v12 }
  0x1f   :  { %708 = vmatpush3.bf16.msra.mxu0 %v788_v5  ;;  %772 = vmatpush3.bf16.msra.mxu1 %v788_v5  ;;  %v167_v0 = vadd.f32 %v871_v28, %v123_v56  ;;  %v108_v5 = vmul.f32 %v865_v25, %v64_v61  ;;  %v166_v19 = vadd.f32 %v869_v27, %v122_v10  ;;  %v85_v33 = vunpack.c.h.bf16 %v53_v17 }
  0x20   :  { %v211_v13 = vpack.c.bf16 %v185_v3, %v183_v59  ;;  %v168_v24 = vadd.f32 %v869_v27, %v124_v16  ;;  %v127_v36 = vmul.f32 %v867_v26, %v83_v29  ;;  %v66_v37 = vunpack.c.l.bf16 %v44_v62 }
  0x21   :  { %v199_v8 = vmax.f32 %v167_v0, 0.0  ;;  %v152_v15 = vadd.f32 %v869_v27, %v108_v5  ;;  %v198_v30 = vmax.f32 %v166_v19, 0.0  ;;  %v129_v40 = vmul.f32 %v867_v26, %v85_v33 }
  0x22   :  { %399 = vmatmul.mubr.bf16.vlgmr.msra.gmra.mrb[0].mxu0 %v206_v7  ;;  %431 = vmatmul.mubr.bf16.vlgmr.msra.gmra.mrb[0].mxu1 %v214_v14  ;;  %v45_v7 = vld [vmem:[%s1017_s0 + $0x38] sm:$0xff]  ;;  %v201_v14 = vmax.f32 %v169_v4, 0.0  ;;  %v200_v35 = vmax.f32 %v168_v24, 0.0  ;;  %v171_v43 = vadd.f32 %v871_v28, %v127_v36  ;;  %v110_v44 = vmul.f32 %v865_v25, %v66_v37 }
  0x23   :  { %406 = vmatprep.mubr.bf16.mxu0 %v209_v32  ;;  %438 = vmatprep.mubr.bf16.mxu1 %v217_v50  ;;  %v69_v20 = vunpack.c.h.bf16 %v45_v7  ;;  %v184_v23 = vmax.f32 %v152_v15, 0.0  ;;  %v155_v32 = vadd.f32 %v871_v28, %v111_v21  ;;  %v68_v41 = vunpack.c.l.bf16 %v45_v7 }
  0x24   :  { %v219_v22 = vpack.c.bf16 %v201_v14, %v199_v8  ;;  %v218_v42 = vpack.c.bf16 %v200_v35, %v198_v30  ;;  %v82_v45 = vunpack.c.l.bf16 %v52_v12  ;;  %v173_v47 = vadd.f32 %v871_v28, %v129_v40 }
  0x25   :  { %v113_v31 = vmul.f32 %v867_v26, %v69_v20  ;;  %v210_v34 = vpack.c.bf16 %v184_v23, %v182_v18  ;;  %v187_v39 = vmax.f32 %v155_v32, 0.0  ;;  %v112_v48 = vmul.f32 %v865_v25, %v68_v41 }
  0x26   :  { %v84_v49 = vunpack.c.l.bf16 %v53_v17  ;;  %v203_v50 = vmax.f32 %v171_v43, 0.0  ;;  %v154_v51 = vadd.f32 %v869_v27, %v110_v44  ;;  %v126_v26 = vmul.f32 %v865_v25, %v82_v45 }
  0x27   :  { %v157_v38 = vadd.f32 %v871_v28, %v113_v31  ;;  %v205_v53 = vmax.f32 %v173_v47, 0.0 }
  0x28   :  { %v128_v55 = vmul.f32 %v865_v25, %v84_v49  ;;  %v186_v56 = vmax.f32 %v154_v51, 0.0  ;;  %v170_v57 = vadd.f32 %v869_v27, %v126_v26 }
  0x29   :  { %v189_v46 = vmax.f32 %v157_v38, 0.0  ;;  %v221_v28 = vpack.c.bf16 %v205_v53, %v203_v50 }
  0x2a   :  { %407 = vmatmul.mubr.bf16.gmra.mrb[4].mxu0 %v208_v54  ;;  %439 = vmatmul.mubr.bf16.gmra.mrb[4].mxu1 %v216_v63  ;;  %v156_v54 = vadd.f32 %v869_v27, %v112_v48  ;;  %v172_v59 = vadd.f32 %v869_v27, %v128_v55  ;;  %v202_v60 = vmax.f32 %v170_v57, 0.0 }
  0x2b   :  { %414 = vmatprep.mubr.bf16.mxu0 %v211_v13  ;;  %446 = vmatprep.mubr.bf16.mxu1 %v219_v22  ;;  %v213_v52 = vpack.c.bf16 %v189_v46, %v187_v39 }
  0x2c   :  { %v188_v58 = vmax.f32 %v156_v54, 0.0  ;;  %v204_v62 = vmax.f32 %v172_v59, 0.0 }
  0x2e   :  { %v212_v61 = vpack.c.bf16 %v188_v58, %v186_v56  ;;  %v220_v63 = vpack.c.bf16 %v204_v62, %v202_v60 }
  0x32   :  { %415 = vmatmul.mubr.bf16.gmra.mrb[8].mxu0 %v210_v34  ;;  %447 = vmatmul.mubr.bf16.gmra.mrb[8].mxu1 %v218_v42 }
  0x33   :  { %422 = vmatprep.mubr.bf16.mxu0 %v213_v52  ;;  %454 = vmatprep.mubr.bf16.mxu1 %v221_v28 }
  0x3a   :  { %423 = vmatmul.mubr.bf16.gmra.mrb[12].mxu0 %v212_v61  ;;  %455 = vmatmul.mubr.bf16.gmra.mrb[12].mxu1 %v220_v63 }
  0xf5   :  { %v709_v0 = vpop.f32.mrb[0].mxu0  ;;  %v733_v1 = vpop.f32.mrb[0].mxu1 }
  0xf6   :  { %v710_v2 = vpop.f32.mrb[1].mxu0  ;;  %v734_v3 = vpop.f32.mrb[1].mxu1 }
  0xf7   :  { %v711_v25 = vadd.f32 %v710_v2, %v709_v0  ;;  %v735_v4 = vadd.f32 %v734_v3, %v733_v1  ;;  %v712_v5 = vpop.f32.mrb[2].mxu0  ;;  %v736_v6 = vpop.f32.mrb[2].mxu1 }
  0xf8   :  { %v713_v7 = vpop.f32.mrb[3].mxu0  ;;  %v737_v8 = vpop.f32.mrb[3].mxu1 }
  0xf9   :  { %v714_v9 = vadd.f32 %v713_v7, %v712_v5  ;;  %v738_v10 = vadd.f32 %v737_v8, %v736_v6 }
  0xfb   :  { %v649_v27 = vpack.c.bf16 %v714_v9, %v711_v25  ;;  %v669_v11 = vpack.c.bf16 %v738_v10, %v735_v4 }
  0xfd   :  { %650 = vst [vmem:[%s1020_s4] sm:$0xff] %v649_v27   ;;  %689 = vst [vmem:[%s1020_s4 + $0x20] sm:$0xff] %v669_v11   ;;  %v715_v12 = vpop.f32.mrb[4].mxu0  ;;  %v739_v13 = vpop.f32.mrb[4].mxu1 }
  0xfe   :  { %v716_v14 = vpop.f32.mrb[5].mxu0  ;;  %v740_v15 = vpop.f32.mrb[5].mxu1 }
  0xff   :  { %v717_v16 = vadd.f32 %v716_v14, %v715_v12  ;;  %v741_v17 = vadd.f32 %v740_v15, %v739_v13  ;;  %v718_v18 = vpop.f32.mrb[6].mxu0  ;;  %v742_v19 = vpop.f32.mrb[6].mxu1 }
 0x100   :  { %v719_v20 = vpop.f32.mrb[7].mxu0  ;;  %v743_v21 = vpop.f32.mrb[7].mxu1 }
 0x101   :  { %v720_v22 = vadd.f32 %v719_v20, %v718_v18  ;;  %v744_v23 = vadd.f32 %v743_v21, %v742_v19 }
 0x103   :  { %v654_v24 = vpack.c.bf16 %v720_v22, %v717_v16  ;;  %v674_v29 = vpack.c.bf16 %v744_v23, %v741_v17 }
 0x105   :  { %686 = vst [vmem:[%s1020_s4 + $0x8] sm:$0xff] %v654_v24   ;;  %690 = vst [vmem:[%s1020_s4 + $0x28] sm:$0xff] %v674_v29   ;;  %v721_v30 = vpop.f32.mrb[8].mxu0  ;;  %v745_v31 = vpop.f32.mrb[8].mxu1 }
 0x106   :  { %v722_v32 = vpop.f32.mrb[9].mxu0  ;;  %v746_v33 = vpop.f32.mrb[9].mxu1 }
 0x107   :  { %v723_v34 = vadd.f32 %v722_v32, %v721_v30  ;;  %v747_v35 = vadd.f32 %v746_v33, %v745_v31  ;;  %v724_v36 = vpop.f32.mrb[10].mxu0  ;;  %v748_v37 = vpop.f32.mrb[10].mxu1 }
 0x108   :  { %v725_v38 = vpop.f32.mrb[11].mxu0  ;;  %v749_v39 = vpop.f32.mrb[11].mxu1 }
 0x109   :  { %v726_v40 = vadd.f32 %v725_v38, %v724_v36  ;;  %v750_v41 = vadd.f32 %v749_v39, %v748_v37 }
 0x10b   :  { %v659_v42 = vpack.c.bf16 %v726_v40, %v723_v34  ;;  %v679_v43 = vpack.c.bf16 %v750_v41, %v747_v35 }
 0x10d   :  { %687 = vst [vmem:[%s1020_s4 + $0x10] sm:$0xff] %v659_v42   ;;  %691 = vst [vmem:[%s1020_s4 + $0x30] sm:$0xff] %v679_v43   ;;  %v727_v44 = vpop.f32.mrb[12].mxu0  ;;  %v751_v45 = vpop.f32.mrb[12].mxu1 }
 0x10e   :  { %v728_v46 = vpop.f32.mrb[13].mxu0  ;;  %v752_v48 = vpop.f32.mrb[13].mxu1 }
 0x10f   :  { %v729_v47 = vadd.f32 %v728_v46, %v727_v44  ;;  %v730_v49 = vpop.f32.mrb[14].mxu0  ;;  %v753_v50 = vadd.f32 %v752_v48, %v751_v45  ;;  %v754_v51 = vpop.f32.mrb[14].mxu1 }
 0x110   :  { %v731_v26 = vpop.f32.mrb[15].mxu0  ;;  %v755_v53 = vpop.f32.mrb[15].mxu1 }
 0x111   :  { %v732_v52 = vadd.f32 %v731_v26, %v730_v49  ;;  %v756_v54 = vadd.f32 %v755_v53, %v754_v51 }
 0x113   :  { %v664_v55 = vpack.c.bf16 %v732_v52, %v729_v47  ;;  %v684_v56 = vpack.c.bf16 %v756_v54, %v753_v50 }
 0x115   :  { %688 = vst [vmem:[%s1020_s4 + $0x18] sm:$0xff] %v664_v55   ;;  %692 = vst [vmem:[%s1020_s4 + $0x38] sm:$0xff] %v684_v56  }

// kernel: densenet121_forward.134
= control target key start
LH: loop header
LB: loop body
LE: loop exit
PB: predicated region body
PF: predicated region fallthrough
CT: control target
= control target key end

     0   :  { %s411_s1 = inlined_call_operand.vmem [shape: bf16[128,128], index: 1, kind: input, shape index: {}]   ;;  %s412_s0 = inlined_call_operand.vmem [shape: bf16[32,128], index: 0, kind: input, shape index: {}]   ;;  %s413_s2 = inlined_call_operand.vmem [shape: f32[1,128], index: 2, kind: input, shape index: {}]   ;;  %s414_s3 = inlined_call_operand.vmem [shape: f32[1,128], index: 3, kind: input, shape index: {}]   ;;  %s415_s4 = inlined_call_operand.vmem [shape: f32[1,128], index: 4, kind: input, shape index: {}]   ;;  %s416_s5 = inlined_call_operand.vmem [shape: f32[1,128], index: 5, kind: input, shape index: {}]   ;;  %s417_s6 = inlined_call_operand.vmem [shape: bf16[32,128], index: 6, kind: output, shape index: {}]  }
   0x1   :  { %v320_v0 = vld [vmem:[%s411_s1] sm:$0xff]   ;;  %v321_v1 = vld [vmem:[%s411_s1 + $0x8] sm:$0xff]   ;;  %v322_v2 = vld [vmem:[%s411_s1 + $0x10] sm:$0xff]  }
   0x2   :  { %300 = vmatprep.subr.bf16.mxu0 %v320_v0  ;;  %v323_v3 = vld [vmem:[%s411_s1 + $0x18] sm:$0xff]   ;;  %v271_v4 = vld [vmem:[%s412_s0] sm:$0xff]   ;;  %v288_v9 = vld [vmem:[%s412_s0 + $0x8] sm:$0xff]  }
   0x3   :  { %301 = vmatpush3.bf16.msra.mxu0 %v320_v0  ;;  %v250_v5 = vld [vmem:[%s413_s2] ss:$0 sm:$0xff]  ;;  %v272_v6 = vunpack.c.l.bf16 %v271_v4  ;;  %v273_v7 = vunpack.c.h.bf16 %v271_v4  ;;  %v276_v15 = vunpack.c.l.bf16 %v288_v9  ;;  %v277_v16 = vunpack.c.h.bf16 %v288_v9  ;;  %v325_v19 = vld [vmem:[%s411_s1 + $0x28] sm:$0xff]   ;;  %v326_v23 = vld [vmem:[%s411_s1 + $0x30] sm:$0xff]  }
   0x4   :  { %302 = vmatprep.subr.bf16.mxu0 %v321_v1  ;;  %v251_v8 = vld [vmem:[%s414_s3] ss:$0 sm:$0xff]  ;;  %v327_v26 = vld [vmem:[%s411_s1 + $0x38] sm:$0xff]  }
   0x5   :  { %v47_v10 = vmul.f32 %v272_v6, %v250_v5  ;;  %v48_v11 = vmul.f32 %v273_v7, %v250_v5  ;;  %v324_v12 = vld [vmem:[%s411_s1 + $0x20] sm:$0xff]   ;;  %v49_v21 = vmul.f32 %v276_v15, %v250_v5  ;;  %v50_v22 = vmul.f32 %v277_v16, %v250_v5 }
   0x6   :  { %v260_v30 = vld [vmem:[%s415_s4] ss:$0 sm:$0xff] }
   0x7   :  { %303 = vmatpush3.bf16.msra.mxu0 %v321_v1  ;;  %v58_v13 = vadd.f32 %v251_v8, %v47_v10  ;;  %v59_v14 = vadd.f32 %v251_v8, %v48_v11  ;;  %v60_v24 = vadd.f32 %v251_v8, %v49_v21  ;;  %v61_v25 = vadd.f32 %v251_v8, %v50_v22  ;;  %v261_v32 = vld [vmem:[%s416_s5] ss:$0 sm:$0xff] }
   0x8   :  { %304 = vmatprep.subr.bf16.mxu0 %v322_v2 }
   0x9   :  { %v62_v17 = vmax.f32 %v58_v13, 0.0  ;;  %v63_v18 = vmax.f32 %v59_v14, 0.0  ;;  %v64_v27 = vmax.f32 %v60_v24, 0.0  ;;  %v65_v28 = vmax.f32 %v61_v25, 0.0 }
   0xb   :  { %305 = vmatpush3.bf16.msra.mxu0 %v322_v2  ;;  %v66_v20 = vpack.c.bf16 %v63_v18, %v62_v17  ;;  %v67_v29 = vpack.c.bf16 %v65_v28, %v64_v27 }
   0xc   :  { %306 = vmatprep.subr.bf16.mxu0 %v323_v3 }
   0xd   :  { %316 = vmatprep.mubr.bf16.mxu0 %v66_v20 }
   0xf   :  { %307 = vmatpush3.bf16.msra.mxu0 %v323_v3 }
  0x10   :  { %308 = vmatprep.subr.bf16.mxu0 %v324_v12 }
  0x13   :  { %309 = vmatpush3.bf16.msra.mxu0 %v324_v12 }
  0x14   :  { %310 = vmatprep.subr.bf16.mxu0 %v325_v19 }
  0x17   :  { %311 = vmatpush3.bf16.msra.mxu0 %v325_v19 }
  0x18   :  { %312 = vmatprep.subr.bf16.mxu0 %v326_v23 }
  0x1b   :  { %313 = vmatpush3.bf16.msra.mxu0 %v326_v23 }
  0x1c   :  { %314 = vmatprep.subr.bf16.mxu0 %v327_v26 }
  0x1f   :  { %315 = vmatpush3.bf16.msra.mxu0 %v327_v26 }
  0x22   :  { %317 = vmatmul.mubr.bf16.vlgmr.msra.gmra.mrb[0].mxu0 %v67_v29 }
  0xf5   :  { %v318_v31 = vpop.f32.mrb[0].mxu0 }
  0xf6   :  { %v209_v33 = vmul.f32 %v318_v31, %v260_v30  ;;  %v170_v34 = vpop.f32.mrb[1].mxu0 }
  0xf7   :  { %v207_v35 = vmul.f32 %v260_v30, %v170_v34  ;;  %v319_v36 = vpop.f32.mrb[2].mxu0 }
  0xf8   :  { %v220_v37 = vadd.f32 %v261_v32, %v209_v33  ;;  %v210_v38 = vmul.f32 %v319_v36, %v260_v30  ;;  %v173_v39 = vpop.f32.mrb[3].mxu0 }
  0xf9   :  { %v218_v40 = vadd.f32 %v261_v32, %v207_v35  ;;  %v208_v41 = vmul.f32 %v260_v30, %v173_v39 }
  0xfa   :  { %v221_v42 = vadd.f32 %v261_v32, %v210_v38  ;;  %v224_v44 = vmax.f32 %v220_v37, 0.0 }
  0xfb   :  { %v219_v43 = vadd.f32 %v261_v32, %v208_v41  ;;  %v222_v46 = vmax.f32 %v218_v40, 0.0 }
  0xfc   :  { %v225_v45 = vmax.f32 %v221_v42, 0.0 }
  0xfd   :  { %v223_v47 = vmax.f32 %v219_v43, 0.0 }
  0xfe   :  { %v286_v48 = vpack.c.bf16 %v225_v45, %v224_v44 }
  0xff   :  { %v281_v49 = vpack.c.bf16 %v223_v47, %v222_v46 }
 0x100   :  { %289 = vst [vmem:[%s417_s6 + $0x8] sm:$0xff] %v286_v48  }
 0x101   :  { %282 = vst [vmem:[%s417_s6] sm:$0xff] %v281_v49  }

// kernel: tile.146
= control target key start
LH: loop header
LB: loop body
LE: loop exit
PB: predicated region body
PF: predicated region fallthrough
CT: control target
= control target key end

     0   :  { %s46_s0 = inlined_call_operand.vmem [shape: f32[288], index: 0, kind: input, shape index: {}]   ;;  %s47_s1 = inlined_call_operand.vmem [shape: f32[1,288], index: 1, kind: output, shape index: {}]  }
   0x1   :  { %v4_v0 = vld [vmem:[%s46_s0] ss:$0 sm:$0xff]  ;;  %v14_v1 = vld [vmem:[%s46_s0 + $0x1] ss:$0 sm:$0xff]  ;;  %v16_v2 = vld [vmem:[%s46_s0 + $0x2] ss:$0 sm:$0xff] }
   0x2   :  { %5 = vst [vmem:[%s47_s1] sm:$0x1] %v4_v0  ;;  %15 = vst [vmem:[%s47_s1 + $0x1] sm:$0x1] %v14_v1 }
   0x3   :  { %17 = vst [vmem:[%s47_s1 + $0x2] sm:$0x1] %v16_v2 }

// kernel: densenet121_forward.135
= control target key start
LH: loop header
LB: loop body
LE: loop exit
PB: predicated region body
PF: predicated region fallthrough
CT: control target
= control target key end

     0   :  { %s996_s9 = smov 0   ;;  %s998_s10 = smov 0   ;;  %s1103_s0 = inlined_call_operand.vmem [shape: bf16[32,1152], index: 0, kind: input, shape index: {}]   ;;  %s1104_s1 = inlined_call_operand.vmem [shape: bf16[1152,128], index: 1, kind: input, shape index: {}]   ;;  %s1105_s2 = inlined_call_operand.vmem [shape: bf16[32,128], index: 2, kind: output, shape index: {}]  }
   0x1   :  { %s1000_s11 = smov 0   ;;  %s1002_s12 = smov 0  }
   0x2   :  { %s1004_s13 = smov 0  }
   0x3 LB: > { %s24_s14 = sadd.s32 1, %s974_s12  ;;  %p47_p1 = scmp.ne.s32.totalorder %s966_s10, %s962_s9  ;;  %s978_s13 = sphi %s1004_s13, %s12_s13   ;;  %s974_s12 = sphi %s1002_s12, %s1109_s12   ;;  %s970_s11 = sphi %s1000_s11, %s1108_s11   ;;  %s966_s10 = sphi %s998_s10, %s1107_s10   ;;  %s962_s9 = sphi %s996_s9, %s1106_s9  }
   0x4   : > { %p25_p0 = scmp.ge.s32.totalorder %s24_s14, 3  ;;  %p48_p2 = scmp.eq.s32.totalorder %s978_s13, 0 }
   0x5   : > { %s40_s16 = sadd.s32 1, %s966_s10  ;;  %p739_p5 = scmp.ge.s32.totalorder %s978_s13, 3 }
   0x6   : > { %s1111_s14 = smov (%p25_p0, %s24_s14), 0  ;;  %p49_p3 = por %p48_p2, %p47_p1 }
   0x7   : > { %s36_s15 = ssub.s32 %s974_s12, %s1111_s14  ;;  %129 = sbr.rel (%p739_p5) target bundleno = 23 (0x17), region = 16 }
   0x8   : > { %p38_p4 = scmp.eq.s32.totalorder %s36_s15, 0 }
   0xa   : > { %s1031_s17 = scalar_select %p38_p4, %s966_s10, %s40_s16  }
   0xe   : > { %132 = sbr.rel (!%p49_p3) target bundleno = 23 (0x17), region = 20  ;;  %s134_s18 = sand.u32 (%p49_p3), 1, %s966_s10  }
   0xf   : > { %s791_s19 = smul.u32 (%p49_p3), 12, %s974_s12 }
  0x10   : > { %s865_s20 = smul.u32 (%p49_p3), 48, %s134_s18 }
  0x11   : > { %s142_s23 = scalar_lea.vmem (%p49_p3), %s1103_s0, %s791_s19 }
  0x12   : > { %v157_v0 = vld [vmem:[%s142_s23] sm:$0xff] (%p49_p3)  ;;  %v161_v2 = vld [vmem:[%s142_s23 + $0x48] sm:$0xff] (%p49_p3)  ;;  %s136_s24 = scalar_lea.vmem (%p49_p3), [#allocation3], %s865_s20  ;;  %v745_v6 = vld [vmem:[%s142_s23 + $0x50] sm:$0xf] (%p49_p3) }
  0x13   : > { %v159_v1 = vld [vmem:[%s142_s23 + $0x24] sm:$0xff] (%p49_p3)  ;;  %158 = vst [vmem:[%s136_s24] sm:$0xff] (%p49_p3), %v157_v0  ;;  %162 = vst [vmem:[%s136_s24 + $0x18] sm:$0xff] (%p49_p3), %v161_v2  ;;  %v163_v3 = vld [vmem:[%s142_s23 + $0x6c] sm:$0xff] (%p49_p3) }
  0x14   : > { %160 = vst [vmem:[%s136_s24 + $0xc] sm:$0xff] (%p49_p3), %v159_v1  ;;  %v741_v4 = vld [vmem:[%s142_s23 + $0x8] sm:$0xf] (%p49_p3)  ;;  %v743_v5 = vld [vmem:[%s142_s23 + $0x2c] sm:$0xf] (%p49_p3)  ;;  %164 = vst [vmem:[%s136_s24 + $0x24] sm:$0xff] (%p49_p3), %v163_v3 }
  0x15   : > { %742 = vst [vmem:[%s136_s24 + $0x8] sm:$0xf] %v741_v4  ;;  %744 = vst [vmem:[%s136_s24 + $0x14] sm:$0xf] %v743_v5  ;;  %v747_v7 = vld [vmem:[%s142_s23 + $0x74] sm:$0xf] }
  0x16   : > { %746 = vst [vmem:[%s136_s24 + $0x20] sm:$0xf] %v745_v6  ;;  %748 = vst [vmem:[%s136_s24 + $0x2c] sm:$0xf] %v747_v7 }
  0x17 PF: > { %p749_p6 = scmp.ge.s32.totalorder %s978_s13, 1  ;;  %p196_p7 = scmp.lt.s32.totalorder %s978_s13, 4 }
  0x19   : > { %p197_p8 = pnand %p749_p6, %p196_p7 }
  0x1a   : > { %s203_s25 = sand.u32 (!%p197_p8), 1, %s962_s9   ;;  %s237_s26 = smul.u32 (!%p197_p8), 48, %s970_s11 }
  0x1b   : > { %200 = sbr.rel (%p197_p8) target bundleno = 314 (0x13a), region = 50  ;;  %p751_p10 = scmp.ne.s32.totalorder (!%p197_p8), %s970_s11, 0 }
  0x1c   : > { %s866_s27 = smul.u32 (!%p197_p8), 48, %s203_s25  ;;  %p238_p9 = scmp.lt.s32.totalorder (!%p197_p8), %s237_s26, 143 }
  0x1e   : > { %s1048_s4 = scalar_lea.vmem (!%p197_p8), [#allocation3], %s866_s27 }
  0x22   : > { %s1113_s26 = smov (!%p238_p9, %s237_s26), 143  ;;  %259 = sbr.rel (%p751_p10) target bundleno = 41 (0x29), region = 58 }
  0x23   : > { %s750_s28 = sshll.u32 %s1113_s26, 2  ;;  %v980_v8 = vmov (!%p751_p10), 0.0  }
  0x24   : > { %s1046_s3 = scalar_lea.vmem %s1104_s1, %s750_s28  ;;  %260 = vst [vmem:[#allocation2] sm:$0xff] (!%p751_p10), %v980_v8  ;;  %261 = vst [vmem:[#allocation2 + $0x8] sm:$0xff] (!%p751_p10), %v980_v8 }
  0x25   : > { %262 = vst [vmem:[#allocation2 + $0x10] sm:$0xff] (!%p751_p10), %v980_v8  ;;  %263 = vst [vmem:[#allocation2 + $0x18] sm:$0xff] (!%p751_p10), %v980_v8 }
  0x29 PF: > { %v908_v9 = vld [vmem:[%s1046_s3 + $0x40] sm:$0xff]   ;;  %v911_v12 = vld [vmem:[%s1046_s3 + $0x48] sm:$0xff]   ;;  %v914_v15 = vld [vmem:[%s1046_s3 + $0x50] sm:$0xff]   ;;  %p782_p11 = scmp.ne.s32.totalorder %s970_s11, 2 }
  0x2a   : > { %v909_v10 = vld [vmem:[%s1046_s3] sm:$0xff]   ;;  %807 = vmatprep.subr.bf16.mxu0 %v908_v9  ;;  %v912_v13 = vld [vmem:[%s1046_s3 + $0x8] sm:$0xff]   ;;  %v915_v16 = vld [vmem:[%s1046_s3 + $0x10] sm:$0xff]  }
  0x2b   : > { %v910_v11 = vld [vmem:[%s1046_s3 + $0x80] sm:$0xff]   ;;  %808 = vmatpush3.bf16.msra.mxu0 %v909_v10  ;;  %v913_v14 = vld [vmem:[%s1046_s3 + $0x88] sm:$0xff]   ;;  %v916_v17 = vld [vmem:[%s1046_s3 + $0x90] sm:$0xff]  }
  0x2c   : > { %845 = vmatprep.subr.bf16.mxu1 %v910_v11  ;;  %809 = vmatprep.subr.bf16.mxu0 %v911_v12  ;;  %v917_v18 = vld [vmem:[%s1046_s3 + $0x58] sm:$0xff]   ;;  %v920_v21 = vld [vmem:[%s1046_s3 + $0x60] sm:$0xff]   ;;  %v923_v24 = vld [vmem:[%s1046_s3 + $0x68] sm:$0xff]  }
  0x2d   : > { %846 = vmatpush3.bf16.msra.mxu1 %v910_v11  ;;  %v918_v19 = vld [vmem:[%s1046_s3 + $0x18] sm:$0xff]   ;;  %v922_v22 = vld [vmem:[%s1046_s3 + $0xa0] sm:$0xff]   ;;  %v925_v25 = vld [vmem:[%s1046_s3 + $0xa8] sm:$0xff]  }
  0x2e   : > { %847 = vmatprep.subr.bf16.mxu1 %v913_v14  ;;  %v919_v20 = vld [vmem:[%s1046_s3 + $0x98] sm:$0xff]   ;;  %v921_v23 = vld [vmem:[%s1046_s3 + $0x20] sm:$0xff]   ;;  %v924_v26 = vld [vmem:[%s1046_s3 + $0x28] sm:$0xff]  }
  0x2f   : > { %810 = vmatpush3.bf16.msra.mxu0 %v912_v13  ;;  %v926_v27 = vld [vmem:[%s1046_s3 + $0x70] sm:$0xff]   ;;  %v929_v30 = vld [vmem:[%s1046_s3 + $0x78] sm:$0xff]   ;;  %v272_v45 = vld [vmem:[#allocation2] sm:$0xff] }
  0x30   : > { %811 = vmatprep.subr.bf16.mxu0 %v914_v15  ;;  %v927_v28 = vld [vmem:[%s1046_s3 + $0x30] sm:$0xff]   ;;  %v931_v31 = vld [vmem:[%s1046_s3 + $0xb8] sm:$0xff]   ;;  %v273_v50 = vld [vmem:[#allocation2 + $0x8] sm:$0xff] }
  0x31   : > { %848 = vmatpush3.bf16.msra.mxu1 %v913_v14  ;;  %v928_v29 = vld [vmem:[%s1046_s3 + $0xb0] sm:$0xff]   ;;  %v930_v34 = vld [vmem:[%s1046_s3 + $0x38] sm:$0xff]  }
  0x32   : > { %849 = vmatprep.subr.bf16.mxu1 %v916_v17  ;;  %v934_v32 = vld [vmem:[%s1048_s4 + $0x4] ss:$12 sps:$4 sm:$0xff]   ;;  %v935_v33 = vld [vmem:[%s1048_s4 + $0x8] ss:$12 sps:$4 sm:$0xff]   ;;  %v932_v35 = vld [vmem:[%s1048_s4] ss:$12 sps:$4 sm:$0xff]  }
  0x33   : > { %812 = vmatpush3.bf16.msra.mxu0 %v915_v16  ;;  %532 = vmatprep.mubr.bf16.mxu0 %v934_v32  ;;  %v937_v36 = vld [vmem:[%s1048_s4 + $0x1c] ss:$12 sps:$4 sm:$0xff]   ;;  %v936_v37 = vld [vmem:[%s1048_s4 + $0x20] ss:$12 sps:$4 sm:$0xff]   ;;  %v939_v38 = vld [vmem:[%s1048_s4 + $0x18] ss:$12 sps:$4 sm:$0xff]  }
  0x34   : > { %813 = vmatprep.subr.bf16.mxu0 %v917_v18  ;;  %861 = vmatprep.mubr.bf16.mxu1 %v935_v33  ;;  %v274_v59 = vld [vmem:[#allocation2 + $0x10] sm:$0xff]  ;;  %v275_v63 = vld [vmem:[#allocation2 + $0x18] sm:$0xff] }
  0x35   : > { %850 = vmatpush3.bf16.msra.mxu1 %v916_v17 }
  0x36   : > { %851 = vmatprep.subr.bf16.mxu1 %v919_v20 }
  0x37   : > { %814 = vmatpush3.bf16.msra.mxu0 %v918_v19 }
  0x38   : > { %815 = vmatprep.subr.bf16.mxu0 %v920_v21 }
  0x39   : > { %852 = vmatpush3.bf16.msra.mxu1 %v919_v20 }
  0x3a   : > { %853 = vmatprep.subr.bf16.mxu1 %v922_v22 }
  0x3b   : > { %816 = vmatpush3.bf16.msra.mxu0 %v921_v23 }
  0x3c   : > { %817 = vmatprep.subr.bf16.mxu0 %v923_v24 }
  0x3d   : > { %854 = vmatpush3.bf16.msra.mxu1 %v922_v22 }
  0x3e   : > { %855 = vmatprep.subr.bf16.mxu1 %v925_v25 }
  0x3f   : > { %818 = vmatpush3.bf16.msra.mxu0 %v924_v26 }
  0x40   : > { %819 = vmatprep.subr.bf16.mxu0 %v926_v27 }
  0x41   : > { %856 = vmatpush3.bf16.msra.mxu1 %v925_v25 }
  0x42   : > { %857 = vmatprep.subr.bf16.mxu1 %v928_v29 }
  0x43   : > { %820 = vmatpush3.bf16.msra.mxu0 %v927_v28 }
  0x44   : > { %821 = vmatprep.subr.bf16.mxu0 %v929_v30 }
  0x45   : > { %858 = vmatpush3.bf16.msra.mxu1 %v928_v29 }
  0x46   : > { %859 = vmatprep.subr.bf16.mxu1 %v931_v31 }
  0x47   : > { %822 = vmatpush3.bf16.msra.mxu0 %v930_v34 }
  0x49   : > { %860 = vmatpush3.bf16.msra.mxu1 %v931_v31 }
  0x4a   : > { %533 = vmatmul.mubr.bf16.vlgmr.msra.gmra.mrb[0].mxu0 %v932_v35 }
  0x4b   : > { %540 = vmatprep.mubr.bf16.mxu0 %v937_v36 }
  0x4c   : > { %862 = vmatmul.mubr.bf16.vlgmr.msra.gmra.mrb[0].mxu1 %v936_v37 }
  0x52   : > { %541 = vmatmul.mubr.bf16.gmra.mrb[4].mxu0 %v939_v38 }
 0x11d   : > { %v823_v39 = vpop.f32.mrb[0].mxu0 }
 0x11e   : > { %v824_v40 = vpop.f32.mrb[1].mxu0 }
 0x11f   : > { %v825_v41 = vadd.f32 %v824_v40, %v823_v39  ;;  %v826_v42 = vpop.f32.mrb[2].mxu0  ;;  %v863_v43 = vpop.f32.mrb[0].mxu1 }
 0x120   : > { %v827_v44 = vpop.f32.mrb[3].mxu0  ;;  %v583_v46 = vpop.f32.mrb[1].mxu1 }
 0x121   : > { %v828_v47 = vadd.f32 %v827_v44, %v826_v42  ;;  %v584_v48 = vadd.f32 %v825_v41, %v583_v46  ;;  %v864_v49 = vpop.f32.mrb[2].mxu1 }
 0x122   : > { %v586_v51 = vpop.f32.mrb[3].mxu1 }
 0x123   : > { %v598_v52 = vadd.f32 %v584_v48, %v272_v45  ;;  %v587_v53 = vadd.f32 %v828_v47, %v586_v51 }
 0x125   : > { %602 = vst [vmem:[#allocation2] sm:$0xff] %v598_v52  ;;  %v599_v54 = vadd.f32 %v587_v53, %v273_v50  ;;  %v829_v55 = vpop.f32.mrb[4].mxu0 }
 0x126   : > { %v830_v56 = vpop.f32.mrb[5].mxu0 }
 0x127   : > { %603 = vst [vmem:[#allocation2 + $0x8] sm:$0xff] %v599_v54  ;;  %v831_v57 = vadd.f32 %v830_v56, %v829_v55  ;;  %v832_v58 = vpop.f32.mrb[6].mxu0 }
 0x128   : > { %v833_v60 = vpop.f32.mrb[7].mxu0 }
 0x129   : > { %v592_v61 = vadd.f32 %v863_v43, %v831_v57  ;;  %v834_v62 = vadd.f32 %v833_v60, %v832_v58  ;;  %609 = sbr.rel (%p782_p11) target bundleno = 314 (0x13a), region = 62 }
 0x12b   : > { %v600_v0 = vadd.f32 %v592_v61, %v274_v59  ;;  %v595_v1 = vadd.f32 %v864_v49, %v834_v62 }
 0x12c   : > { %v610_v3 = vld [vmem:[#allocation2] sm:$0xff] (!%p782_p11) }
 0x12d   : > { %604 = vst [vmem:[#allocation2 + $0x10] sm:$0xff] %v600_v0  ;;  %v601_v2 = vadd.f32 %v595_v1, %v275_v63 }
 0x12e   : > { %v611_v4 = vld [vmem:[#allocation2 + $0x8] sm:$0xff] (!%p782_p11) }
 0x12f   : > { %605 = vst [vmem:[#allocation2 + $0x18] sm:$0xff] %v601_v2  ;;  %v799_v6 = vpack.c.bf16 (!%p782_p11), %v611_v4, %v610_v3 }
 0x131   : > { %800 = vst [vmem:[%s1105_s2] sm:$0xff] %v799_v6  }
 0x134   : > { %v612_v5 = vld [vmem:[#allocation2 + $0x10] sm:$0xff] }
 0x136   : > { %v613_v7 = vld [vmem:[#allocation2 + $0x18] sm:$0xff] }
 0x137   : > { %v804_v8 = vpack.c.bf16 %v613_v7, %v612_v5 }
 0x139   : > { %806 = vst [vmem:[%s1105_s2 + $0x8] sm:$0xff] %v804_v8  }
 0x13a PF: > { %s12_s13 = sadd.s32 1, %s978_s13   ;;  %s1106_s9 = smov %s966_s10 }
 0x13b   : > { %p9_p12 = scmp.ge.s32.totalorder %s12_s13, 5   ;;  %s1107_s10 = smov %s1031_s17 }
 0x13c   : > { %s1108_s11 = smov %s974_s12  ;;  %s1109_s12 = smov %s1111_s14 }
 0x13d   :  { %11 = sbr.rel (!%p9_p12) target bundleno = 3 (0x3), region = 106 }

// kernel: tile.148
= control target key start
LH: loop header
LB: loop body
LE: loop exit
PB: predicated region body
PF: predicated region fallthrough
CT: control target
= control target key end

     0   :  { %s46_s0 = inlined_call_operand.vmem [shape: f32[320], index: 0, kind: input, shape index: {}]   ;;  %s47_s1 = inlined_call_operand.vmem [shape: f32[1,320], index: 1, kind: output, shape index: {}]  }
   0x1   :  { %v4_v0 = vld [vmem:[%s46_s0] ss:$0 sm:$0xff]  ;;  %v14_v1 = vld [vmem:[%s46_s0 + $0x1] ss:$0 sm:$0xff]  ;;  %v16_v2 = vld [vmem:[%s46_s0 + $0x2] ss:$0 sm:$0xff] }
   0x2   :  { %5 = vst [vmem:[%s47_s1] sm:$0x1] %v4_v0  ;;  %15 = vst [vmem:[%s47_s1 + $0x1] sm:$0x1] %v14_v1 }
   0x3   :  { %17 = vst [vmem:[%s47_s1 + $0x2] sm:$0x1] %v16_v2 }

// kernel: tile.150
= control target key start
LH: loop header
LB: loop body
LE: loop exit
PB: predicated region body
PF: predicated region fallthrough
CT: control target
= control target key end

     0   :  { %s46_s0 = inlined_call_operand.vmem [shape: f32[352], index: 0, kind: input, shape index: {}]   ;;  %s47_s1 = inlined_call_operand.vmem [shape: f32[1,352], index: 1, kind: output, shape index: {}]  }
   0x1   :  { %v4_v0 = vld [vmem:[%s46_s0] ss:$0 sm:$0xff]  ;;  %v14_v1 = vld [vmem:[%s46_s0 + $0x1] ss:$0 sm:$0xff]  ;;  %v16_v2 = vld [vmem:[%s46_s0 + $0x2] ss:$0 sm:$0xff] }
   0x2   :  { %5 = vst [vmem:[%s47_s1] sm:$0x1] %v4_v0  ;;  %15 = vst [vmem:[%s47_s1 + $0x1] sm:$0x1] %v14_v1 }
   0x3   :  { %17 = vst [vmem:[%s47_s1 + $0x2] sm:$0x1] %v16_v2 }

// kernel: densenet121_forward.136
= control target key start
LH: loop header
LB: loop body
LE: loop exit
PB: predicated region body
PF: predicated region fallthrough
CT: control target
= control target key end

     0   :  { %v46_v5 = vlaneseq  ;;  %s552_s1 = inlined_call_operand.vmem [shape: bf16[256,128], index: 1, kind: input, shape index: {}]   ;;  %s553_s0 = inlined_call_operand.vmem [shape: bf16[32,256], index: 0, kind: input, shape index: {}]   ;;  %s554_s2 = inlined_call_operand.vmem [shape: f32[1,256], index: 2, kind: input, shape index: {}]   ;;  %s555_s3 = inlined_call_operand.vmem [shape: f32[1,256], index: 3, kind: input, shape index: {}]   ;;  %s556_s4 = inlined_call_operand.vmem [shape: f32[1,128], index: 4, kind: input, shape index: {}]   ;;  %s557_s5 = inlined_call_operand.vmem [shape: f32[1,128], index: 5, kind: input, shape index: {}]   ;;  %s558_s6 = inlined_call_operand.vmem [shape: bf16[32,128], index: 6, kind: output, shape index: {}]  }
   0x1   :  { %v423_v0 = vld [vmem:[%s552_s1 + $0x40] sm:$0xff]   ;;  %v425_v2 = vld [vmem:[%s552_s1 + $0x48] sm:$0xff]   ;;  %v427_v4 = vld [vmem:[%s552_s1 + $0x50] sm:$0xff]  }
   0x2   :  { %v424_v1 = vld [vmem:[%s552_s1] sm:$0xff]   ;;  %379 = vmatprep.subr.bf16.mxu0 %v423_v0  ;;  %407 = vmatprep.subr.bf16.mxu1 %v423_v0  ;;  %v426_v3 = vld [vmem:[%s552_s1 + $0x8] sm:$0xff]   ;;  %v428_v6 = vld [vmem:[%s552_s1 + $0x10] sm:$0xff]   ;;  %v47_v8 = vshrl.u32 %v46_v5, 7 }
   0x3   :  { %380 = vmatpush3.bf16.msra.mxu0 %v424_v1  ;;  %415 = vmatpush3.bf16.msra.mxu1 %v424_v1  ;;  %v429_v7 = vld [vmem:[%s552_s1 + $0x58] sm:$0xff]   ;;  %v431_v10 = vld [vmem:[%s552_s1 + $0x60] sm:$0xff]   ;;  %v433_v14 = vld [vmem:[%s552_s1 + $0x68] sm:$0xff]  }
   0x4   :  { %381 = vmatprep.subr.bf16.mxu0 %v425_v2  ;;  %408 = vmatprep.subr.bf16.mxu1 %v425_v2  ;;  %v430_v9 = vld [vmem:[%s552_s1 + $0x18] sm:$0xff]   ;;  %v48_v11 = vsub.s32 0, %v47_v8  ;;  %v432_v12 = vld [vmem:[%s552_s1 + $0x20] sm:$0xff]   ;;  %v52_v13 = vsub.s32 1, %v47_v8  ;;  %v33_v16 = vld [vmem:[%s553_s0 + $0x8] sm:$0xff] }
   0x5   :  { %v32_v15 = vld [vmem:[%s553_s0] sm:$0xff]  ;;  %v38_v20 = vunpack.c.l.bf16 %v33_v16  ;;  %v39_v21 = vunpack.c.h.bf16 %v33_v16  ;;  %v34_v23 = vld [vmem:[%s553_s0 + $0x10] sm:$0xff]  ;;  %v35_v24 = vld [vmem:[%s553_s0 + $0x18] sm:$0xff] }
   0x6   :  { %v44_v17 = vld [vmem:[%s554_s2] sm:$0x3]  ;;  %v36_v18 = vunpack.c.l.bf16 %v32_v15  ;;  %v37_v19 = vunpack.c.h.bf16 %v32_v15  ;;  %v434_v29 = vld [vmem:[%s552_s1 + $0x28] sm:$0xff]   ;;  %v40_v30 = vunpack.c.l.bf16 %v34_v23  ;;  %v41_v31 = vunpack.c.h.bf16 %v34_v23  ;;  %v435_v34 = vld [vmem:[%s552_s1 + $0x70] sm:$0xff]  }
   0x7   :  { %382 = vmatpush3.bf16.msra.mxu0 %v426_v3  ;;  %416 = vmatpush3.bf16.msra.mxu1 %v426_v3  ;;  %v64_v22 = vld [vmem:[%s555_s3] sm:$0x3]  ;;  %v49_v25 = vrot.slane %v44_v17, %v48_v11  ;;  %v53_v26 = vrot.slane %v44_v17, %v52_v13  ;;  %v42_v32 = vunpack.c.l.bf16 %v35_v24  ;;  %v43_v33 = vunpack.c.h.bf16 %v35_v24  ;;  %v436_v46 = vld [vmem:[%s552_s1 + $0x30] sm:$0xff]   ;;  %v437_v50 = vld [vmem:[%s552_s1 + $0x78] sm:$0xff]  }
   0x8   :  { %383 = vmatprep.subr.bf16.mxu0 %v427_v4  ;;  %409 = vmatprep.subr.bf16.mxu1 %v427_v4  ;;  %v69_v27 = vrot.slane %v64_v22, %v48_v11  ;;  %v73_v28 = vrot.slane %v64_v22, %v52_v13  ;;  %v438_v61 = vld [vmem:[%s552_s1 + $0x38] sm:$0xff]   ;;  %v358_v5 = vld [vmem:[%s556_s4] ss:$0 sm:$0xff] }
   0x9   :  { %v57_v35 = vmul.f32 %v53_v26, %v37_v19  ;;  %v59_v36 = vmul.f32 %v53_v26, %v39_v21  ;;  %v56_v37 = vmul.f32 %v49_v25, %v36_v18  ;;  %v61_v38 = vmul.f32 %v53_v26, %v41_v31  ;;  %v359_v11 = vld [vmem:[%s557_s5] ss:$0 sm:$0xff] }
   0xa   :  { %v63_v39 = vmul.f32 %v53_v26, %v43_v33  ;;  %v58_v40 = vmul.f32 %v49_v25, %v38_v20  ;;  %v60_v41 = vmul.f32 %v49_v25, %v40_v30  ;;  %v62_v45 = vmul.f32 %v49_v25, %v42_v32 }
   0xb   :  { %384 = vmatpush3.bf16.msra.mxu0 %v428_v6  ;;  %417 = vmatpush3.bf16.msra.mxu1 %v428_v6  ;;  %v77_v42 = vadd.f32 %v73_v28, %v57_v35  ;;  %v79_v43 = vadd.f32 %v73_v28, %v59_v36  ;;  %v76_v44 = vadd.f32 %v69_v27, %v56_v37 }
   0xc   :  { %385 = vmatprep.subr.bf16.mxu0 %v429_v7  ;;  %410 = vmatprep.subr.bf16.mxu1 %v429_v7  ;;  %v81_v47 = vadd.f32 %v73_v28, %v61_v38  ;;  %v83_v48 = vadd.f32 %v73_v28, %v63_v39  ;;  %v78_v49 = vadd.f32 %v69_v27, %v58_v40 }
   0xd   :  { %v85_v51 = vmax.f32 %v77_v42, 0.0  ;;  %v87_v52 = vmax.f32 %v79_v43, 0.0  ;;  %v80_v53 = vadd.f32 %v69_v27, %v60_v41  ;;  %v82_v56 = vadd.f32 %v69_v27, %v62_v45 }
   0xe   :  { %v89_v54 = vmax.f32 %v81_v47, 0.0  ;;  %v91_v55 = vmax.f32 %v83_v48, 0.0  ;;  %v84_v58 = vmax.f32 %v76_v44, 0.0  ;;  %v86_v59 = vmax.f32 %v78_v49, 0.0 }
   0xf   :  { %386 = vmatpush3.bf16.msra.mxu0 %v430_v9  ;;  %418 = vmatpush3.bf16.msra.mxu1 %v430_v9  ;;  %v93_v57 = vpack.c.bf16 %v87_v52, %v85_v51  ;;  %v88_v60 = vmax.f32 %v80_v53, 0.0  ;;  %v90_v63 = vmax.f32 %v82_v56, 0.0 }
  0x10   :  { %387 = vmatprep.subr.bf16.mxu0 %v431_v10  ;;  %411 = vmatprep.subr.bf16.mxu1 %v431_v10  ;;  %v95_v62 = vpack.c.bf16 %v91_v55, %v89_v54  ;;  %v92_v0 = vpack.c.bf16 %v86_v59, %v84_v58 }
  0x11   :  { %260 = vmatprep.mubr.bf16.mxu0 %v93_v57  ;;  %v94_v1 = vpack.c.bf16 %v90_v63, %v88_v60 }
  0x12   :  { %268 = vmatprep.mubr.bf16.mxu1 %v95_v62 }
  0x13   :  { %388 = vmatpush3.bf16.msra.mxu0 %v432_v12  ;;  %419 = vmatpush3.bf16.msra.mxu1 %v432_v12 }
  0x14   :  { %389 = vmatprep.subr.bf16.mxu0 %v433_v14  ;;  %412 = vmatprep.subr.bf16.mxu1 %v433_v14 }
  0x17   :  { %390 = vmatpush3.bf16.msra.mxu0 %v434_v29  ;;  %420 = vmatpush3.bf16.msra.mxu1 %v434_v29 }
  0x18   :  { %391 = vmatprep.subr.bf16.mxu0 %v435_v34  ;;  %413 = vmatprep.subr.bf16.mxu1 %v435_v34 }
  0x1b   :  { %392 = vmatpush3.bf16.msra.mxu0 %v436_v46  ;;  %421 = vmatpush3.bf16.msra.mxu1 %v436_v46 }
  0x1c   :  { %393 = vmatprep.subr.bf16.mxu0 %v437_v50  ;;  %414 = vmatprep.subr.bf16.mxu1 %v437_v50 }
  0x1f   :  { %394 = vmatpush3.bf16.msra.mxu0 %v438_v61  ;;  %422 = vmatpush3.bf16.msra.mxu1 %v438_v61 }
  0x22   :  { %261 = vmatmul.mubr.bf16.vlgmr.msra.gmra.mrb[0].mxu0 %v92_v0  ;;  %269 = vmatmul.mubr.bf16.vlgmr.msra.gmra.mrb[0].mxu1 %v94_v1 }
  0xf5   :  { %v395_v2 = vpop.f32.mrb[0].mxu0  ;;  %v401_v3 = vpop.f32.mrb[0].mxu1 }
  0xf6   :  { %v396_v4 = vpop.f32.mrb[1].mxu0  ;;  %v402_v6 = vpop.f32.mrb[1].mxu1 }
  0xf7   :  { %v397_v7 = vadd.f32 %v396_v4, %v395_v2  ;;  %v403_v8 = vadd.f32 %v402_v6, %v401_v3  ;;  %v398_v9 = vpop.f32.mrb[2].mxu0  ;;  %v404_v10 = vpop.f32.mrb[2].mxu1 }
  0xf8   :  { %v399_v12 = vpop.f32.mrb[3].mxu0  ;;  %v405_v13 = vpop.f32.mrb[3].mxu1 }
  0xf9   :  { %v299_v14 = vmul.f32 %v397_v7, %v358_v5  ;;  %v301_v15 = vmul.f32 %v403_v8, %v358_v5  ;;  %v400_v16 = vadd.f32 %v399_v12, %v398_v9  ;;  %v406_v17 = vadd.f32 %v405_v13, %v404_v10 }
  0xfb   :  { %v310_v18 = vadd.f32 %v359_v11, %v299_v14  ;;  %v312_v19 = vadd.f32 %v359_v11, %v301_v15  ;;  %v300_v20 = vmul.f32 %v400_v16, %v358_v5  ;;  %v302_v21 = vmul.f32 %v406_v17, %v358_v5 }
  0xfd   :  { %v311_v22 = vadd.f32 %v359_v11, %v300_v20  ;;  %v313_v23 = vadd.f32 %v359_v11, %v302_v21  ;;  %v314_v24 = vmax.f32 %v310_v18, 0.0  ;;  %v316_v25 = vmax.f32 %v312_v19, 0.0 }
  0xff   :  { %v315_v26 = vmax.f32 %v311_v22, 0.0  ;;  %v317_v27 = vmax.f32 %v313_v23, 0.0 }
 0x101   :  { %v371_v28 = vpack.c.bf16 %v315_v26, %v314_v24  ;;  %v376_v29 = vpack.c.bf16 %v317_v27, %v316_v25 }
 0x103   :  { %372 = vst [vmem:[%s558_s6] sm:$0xff] %v371_v28   ;;  %378 = vst [vmem:[%s558_s6 + $0x8] sm:$0xff] %v376_v29  }

// kernel: tile.152
= control target key start
LH: loop header
LB: loop body
LE: loop exit
PB: predicated region body
PF: predicated region fallthrough
CT: control target
= control target key end

     0   :  { %s46_s0 = inlined_call_operand.vmem [shape: f32[384], index: 0, kind: input, shape index: {}]   ;;  %s47_s1 = inlined_call_operand.vmem [shape: f32[1,384], index: 1, kind: output, shape index: {}]  }
   0x1   :  { %v4_v0 = vld [vmem:[%s46_s0] ss:$0 sm:$0xff]  ;;  %v14_v1 = vld [vmem:[%s46_s0 + $0x1] ss:$0 sm:$0xff]  ;;  %v16_v2 = vld [vmem:[%s46_s0 + $0x2] ss:$0 sm:$0xff] }
   0x2   :  { %5 = vst [vmem:[%s47_s1] sm:$0x1] %v4_v0  ;;  %15 = vst [vmem:[%s47_s1 + $0x1] sm:$0x1] %v14_v1 }
   0x3   :  { %17 = vst [vmem:[%s47_s1 + $0x2] sm:$0x1] %v16_v2 }

// kernel: densenet121_forward.144
= control target key start
LH: loop header
LB: loop body
LE: loop exit
PB: predicated region body
PF: predicated region fallthrough
CT: control target
= control target key end

     0   :  { %v54_v13 = vlaneseq  ;;  %s757_s1 = inlined_call_operand.vmem [shape: bf16[384,128], index: 1, kind: input, shape index: {}]   ;;  %s758_s0 = inlined_call_operand.vmem [shape: bf16[32,384], index: 0, kind: input, shape index: {}]   ;;  %s759_s2 = inlined_call_operand.vmem [shape: f32[1,384], index: 2, kind: input, shape index: {}]   ;;  %s760_s3 = inlined_call_operand.vmem [shape: f32[1,384], index: 3, kind: input, shape index: {}]   ;;  %s761_s4 = inlined_call_operand.vmem [shape: f32[1,128], index: 4, kind: input, shape index: {}]   ;;  %s762_s5 = inlined_call_operand.vmem [shape: f32[1,128], index: 5, kind: input, shape index: {}]   ;;  %s763_s6 = inlined_call_operand.vmem [shape: bf16[32,128], index: 6, kind: output, shape index: {}]  }
   0x1   :  { %v590_v0 = vld [vmem:[%s757_s1 + $0x40] sm:$0xff]   ;;  %v593_v3 = vld [vmem:[%s757_s1 + $0x48] sm:$0xff]   ;;  %v596_v6 = vld [vmem:[%s757_s1 + $0x50] sm:$0xff]  }
   0x2   :  { %v591_v1 = vld [vmem:[%s757_s1] sm:$0xff]   ;;  %532 = vmatprep.subr.bf16.mxu0 %v590_v0  ;;  %v594_v4 = vld [vmem:[%s757_s1 + $0x8] sm:$0xff]   ;;  %v597_v7 = vld [vmem:[%s757_s1 + $0x10] sm:$0xff]   ;;  %v55_v17 = vshrl.u32 %v54_v13, 7 }
   0x3   :  { %v592_v2 = vld [vmem:[%s757_s1 + $0x80] sm:$0xff]   ;;  %533 = vmatpush3.bf16.msra.mxu0 %v591_v1  ;;  %v595_v5 = vld [vmem:[%s757_s1 + $0x88] sm:$0xff]   ;;  %v598_v8 = vld [vmem:[%s757_s1 + $0x90] sm:$0xff]  }
   0x4   :  { %570 = vmatprep.subr.bf16.mxu1 %v592_v2  ;;  %534 = vmatprep.subr.bf16.mxu0 %v593_v3  ;;  %v599_v9 = vld [vmem:[%s757_s1 + $0x58] sm:$0xff]   ;;  %v602_v12 = vld [vmem:[%s757_s1 + $0x60] sm:$0xff]   ;;  %v605_v16 = vld [vmem:[%s757_s1 + $0x68] sm:$0xff]   ;;  %v60_v22 = vsub.s32 1, %v55_v17  ;;  %v56_v24 = vsub.s32 0, %v55_v17  ;;  %v64_v26 = vsub.s32 2, %v55_v17 }
   0x5   :  { %571 = vmatpush3.bf16.msra.mxu1 %v592_v2  ;;  %v600_v10 = vld [vmem:[%s757_s1 + $0x18] sm:$0xff]   ;;  %v604_v14 = vld [vmem:[%s757_s1 + $0xa0] sm:$0xff]   ;;  %v607_v18 = vld [vmem:[%s757_s1 + $0xa8] sm:$0xff]  }
   0x6   :  { %572 = vmatprep.subr.bf16.mxu1 %v595_v5  ;;  %v601_v11 = vld [vmem:[%s757_s1 + $0x98] sm:$0xff]   ;;  %v603_v15 = vld [vmem:[%s757_s1 + $0x20] sm:$0xff]   ;;  %v606_v19 = vld [vmem:[%s757_s1 + $0x28] sm:$0xff]  }
   0x7   :  { %535 = vmatpush3.bf16.msra.mxu0 %v594_v4  ;;  %v608_v20 = vld [vmem:[%s757_s1 + $0x70] sm:$0xff]   ;;  %v611_v25 = vld [vmem:[%s757_s1 + $0x78] sm:$0xff]   ;;  %v32_v27 = vld [vmem:[%s758_s0] sm:$0xff] }
   0x8   :  { %536 = vmatprep.subr.bf16.mxu0 %v596_v6  ;;  %v609_v21 = vld [vmem:[%s757_s1 + $0x30] sm:$0xff]   ;;  %v52_v29 = vld [vmem:[%s759_s2] sm:$0x7]  ;;  %v40_v30 = vunpack.c.l.bf16 %v32_v27  ;;  %v41_v31 = vunpack.c.h.bf16 %v32_v27  ;;  %v613_v36 = vld [vmem:[%s757_s1 + $0xb8] sm:$0xff]  }
   0x9   :  { %573 = vmatpush3.bf16.msra.mxu1 %v595_v5  ;;  %v610_v23 = vld [vmem:[%s757_s1 + $0xb0] sm:$0xff]   ;;  %v81_v34 = vld [vmem:[%s760_s3] sm:$0x7]  ;;  %v61_v37 = vrot.slane %v52_v29, %v60_v22  ;;  %v57_v39 = vrot.slane %v52_v29, %v56_v24  ;;  %v612_v42 = vld [vmem:[%s757_s1 + $0x38] sm:$0xff]   ;;  %v65_v45 = vrot.slane %v52_v29, %v64_v26 }
   0xa   :  { %574 = vmatprep.subr.bf16.mxu1 %v598_v8  ;;  %v34_v28 = vld [vmem:[%s758_s0 + $0xc] sm:$0xff]  ;;  %v33_v35 = vld [vmem:[%s758_s0 + $0x8] ss:$12 sps:$4 sm:$0xff]   ;;  %v90_v38 = vrot.slane %v81_v34, %v60_v22  ;;  %v86_v40 = vrot.slane %v81_v34, %v56_v24  ;;  %v94_v46 = vrot.slane %v81_v34, %v64_v26  ;;  %v36_v63 = vld [vmem:[%s758_s0 + $0x18] sm:$0xff] }
   0xb   :  { %537 = vmatpush3.bf16.msra.mxu0 %v597_v7  ;;  %v43_v32 = vunpack.c.l.bf16 %v34_v28  ;;  %v44_v33 = vunpack.c.h.bf16 %v34_v28  ;;  %v37_v41 = vld [vmem:[%s758_s0 + $0x20] ss:$12 sps:$4 sm:$0xff]   ;;  %v42_v43 = vunpack.c.l.bf16 %v33_v35  ;;  %v45_v44 = vunpack.c.h.bf16 %v33_v35  ;;  %v38_v0 = vld [vmem:[%s758_s0 + $0x24] sm:$0xff] }
   0xc   :  { %538 = vmatprep.subr.bf16.mxu0 %v599_v9  ;;  %v70_v47 = vmul.f32 %v61_v37, %v41_v31  ;;  %v69_v49 = vmul.f32 %v57_v39, %v40_v30  ;;  %v48_v53 = vunpack.c.l.bf16 %v37_v41  ;;  %v51_v54 = vunpack.c.h.bf16 %v37_v41 }
   0xd   :  { %575 = vmatpush3.bf16.msra.mxu1 %v598_v8  ;;  %v73_v48 = vmul.f32 %v61_v37, %v44_v33  ;;  %v72_v50 = vmul.f32 %v57_v39, %v43_v32  ;;  %v71_v51 = vmul.f32 %v65_v45, %v42_v43  ;;  %v74_v52 = vmul.f32 %v65_v45, %v45_v44  ;;  %v512_v44 = vld [vmem:[%s762_s5] ss:$0 sm:$0xff] }
   0xe   :  { %576 = vmatprep.subr.bf16.mxu1 %v601_v11  ;;  %v99_v55 = vadd.f32 %v90_v38, %v70_v47  ;;  %v98_v57 = vadd.f32 %v86_v40, %v69_v49  ;;  %v77_v61 = vmul.f32 %v65_v45, %v48_v53  ;;  %v80_v62 = vmul.f32 %v65_v45, %v51_v54 }
   0xf   :  { %539 = vmatpush3.bf16.msra.mxu0 %v600_v10  ;;  %v102_v56 = vadd.f32 %v90_v38, %v73_v48  ;;  %v101_v58 = vadd.f32 %v86_v40, %v72_v50  ;;  %v100_v59 = vadd.f32 %v94_v46, %v71_v51  ;;  %v103_v60 = vadd.f32 %v94_v46, %v74_v52 }
  0x10   :  { %540 = vmatprep.subr.bf16.mxu0 %v602_v12  ;;  %v111_v1 = vmax.f32 %v99_v55, 0.0  ;;  %v110_v3 = vmax.f32 %v98_v57, 0.0  ;;  %v106_v7 = vadd.f32 %v94_v46, %v77_v61  ;;  %v109_v8 = vadd.f32 %v94_v46, %v80_v62 }
  0x11   :  { %577 = vmatpush3.bf16.msra.mxu1 %v601_v11  ;;  %v114_v2 = vmax.f32 %v102_v56, 0.0  ;;  %v113_v4 = vmax.f32 %v101_v58, 0.0  ;;  %v112_v5 = vmax.f32 %v100_v59, 0.0  ;;  %v115_v6 = vmax.f32 %v103_v60, 0.0 }
  0x12   :  { %578 = vmatprep.subr.bf16.mxu1 %v604_v14  ;;  %v47_v11 = vunpack.c.h.bf16 %v36_v63  ;;  %v50_v12 = vunpack.c.h.bf16 %v38_v0 }
  0x13   :  { %541 = vmatpush3.bf16.msra.mxu0 %v603_v15  ;;  %v123_v9 = vpack.c.bf16 %v114_v2, %v111_v1  ;;  %v122_v10 = vpack.c.bf16 %v113_v4, %v110_v3  ;;  %v124_v13 = vpack.c.bf16 %v115_v6, %v112_v5  ;;  %v121_v15 = vmax.f32 %v109_v8, 0.0 }
  0x14   :  { %542 = vmatprep.subr.bf16.mxu0 %v605_v16  ;;  %v46_v16 = vunpack.c.l.bf16 %v36_v63  ;;  %v76_v17 = vmul.f32 %v61_v37, %v47_v11 }
  0x15   :  { %579 = vmatpush3.bf16.msra.mxu1 %v604_v14  ;;  %v118_v14 = vmax.f32 %v106_v7, 0.0  ;;  %356 = vmatprep.mubr.bf16.mxu0 %v123_v9 }
  0x16   :  { %580 = vmatprep.subr.bf16.mxu1 %v607_v18  ;;  %586 = vmatprep.mubr.bf16.mxu1 %v124_v13  ;;  %v105_v22 = vadd.f32 %v90_v38, %v76_v17 }
  0x17   :  { %543 = vmatpush3.bf16.msra.mxu0 %v606_v19  ;;  %v49_v19 = vunpack.c.l.bf16 %v38_v0 }
  0x18   :  { %544 = vmatprep.subr.bf16.mxu0 %v608_v20  ;;  %v127_v20 = vpack.c.bf16 %v121_v15, %v118_v14  ;;  %v117_v26 = vmax.f32 %v105_v22, 0.0 }
  0x19   :  { %581 = vmatpush3.bf16.msra.mxu1 %v607_v18  ;;  %v79_v18 = vmul.f32 %v61_v37, %v50_v12  ;;  %v78_v24 = vmul.f32 %v57_v39, %v49_v19 }
  0x1a   :  { %582 = vmatprep.subr.bf16.mxu1 %v610_v23 }
  0x1b   :  { %545 = vmatpush3.bf16.msra.mxu0 %v609_v21  ;;  %v75_v21 = vmul.f32 %v57_v39, %v46_v16  ;;  %v107_v28 = vadd.f32 %v86_v40, %v78_v24 }
  0x1c   :  { %546 = vmatprep.subr.bf16.mxu0 %v611_v25 }
  0x1d   :  { %583 = vmatpush3.bf16.msra.mxu1 %v610_v23  ;;  %v108_v23 = vadd.f32 %v90_v38, %v79_v18  ;;  %v104_v25 = vadd.f32 %v86_v40, %v75_v21  ;;  %v119_v31 = vmax.f32 %v107_v28, 0.0  ;;  %v511_v38 = vld [vmem:[%s761_s4] ss:$0 sm:$0xff] }
  0x1e   :  { %584 = vmatprep.subr.bf16.mxu1 %v613_v36 }
  0x1f   :  { %547 = vmatpush3.bf16.msra.mxu0 %v612_v42  ;;  %v120_v27 = vmax.f32 %v108_v23, 0.0  ;;  %v116_v29 = vmax.f32 %v104_v25, 0.0 }
  0x21   :  { %585 = vmatpush3.bf16.msra.mxu1 %v613_v36  ;;  %v126_v30 = vpack.c.bf16 %v120_v27, %v117_v26  ;;  %v125_v32 = vpack.c.bf16 %v119_v31, %v116_v29 }
  0x22   :  { %357 = vmatmul.mubr.bf16.vlgmr.msra.gmra.mrb[0].mxu0 %v122_v10 }
  0x23   :  { %364 = vmatprep.mubr.bf16.mxu0 %v126_v30 }
  0x24   :  { %587 = vmatmul.mubr.bf16.vlgmr.msra.gmra.mrb[0].mxu1 %v127_v20 }
  0x2a   :  { %365 = vmatmul.mubr.bf16.gmra.mrb[4].mxu0 %v125_v32 }
  0xf5   :  { %v548_v33 = vpop.f32.mrb[0].mxu0 }
  0xf6   :  { %v549_v34 = vpop.f32.mrb[1].mxu0 }
  0xf7   :  { %v550_v35 = vadd.f32 %v549_v34, %v548_v33  ;;  %v551_v36 = vpop.f32.mrb[2].mxu0  ;;  %v588_v37 = vpop.f32.mrb[0].mxu1 }
  0xf8   :  { %v552_v41 = vpop.f32.mrb[3].mxu0  ;;  %v407_v42 = vpop.f32.mrb[1].mxu1 }
  0xf9   :  { %v553_v39 = vadd.f32 %v552_v41, %v551_v36  ;;  %v408_v43 = vadd.f32 %v550_v35, %v407_v42  ;;  %v589_v40 = vpop.f32.mrb[2].mxu1 }
  0xfa   :  { %v410_v45 = vpop.f32.mrb[3].mxu1 }
  0xfb   :  { %v444_v46 = vmul.f32 %v511_v38, %v408_v43  ;;  %v411_v47 = vadd.f32 %v553_v39, %v410_v45 }
  0xfd   :  { %v455_v48 = vadd.f32 %v512_v44, %v444_v46  ;;  %v445_v49 = vmul.f32 %v511_v38, %v411_v47  ;;  %v554_v50 = vpop.f32.mrb[4].mxu0 }
  0xfe   :  { %v555_v52 = vpop.f32.mrb[5].mxu0 }
  0xff   :  { %v456_v51 = vadd.f32 %v512_v44, %v445_v49  ;;  %v556_v53 = vadd.f32 %v555_v52, %v554_v50  ;;  %v557_v54 = vpop.f32.mrb[6].mxu0  ;;  %v459_v55 = vmax.f32 %v455_v48, 0.0 }
 0x100   :  { %v558_v57 = vpop.f32.mrb[7].mxu0 }
 0x101   :  { %v460_v56 = vmax.f32 %v456_v51, 0.0  ;;  %v416_v58 = vadd.f32 %v588_v37, %v556_v53  ;;  %v559_v59 = vadd.f32 %v558_v57, %v557_v54 }
 0x103   :  { %v524_v60 = vpack.c.bf16 %v460_v56, %v459_v55  ;;  %v446_v61 = vmul.f32 %v511_v38, %v416_v58  ;;  %v419_v62 = vadd.f32 %v589_v40, %v559_v59 }
 0x105   :  { %525 = vst [vmem:[%s763_s6] sm:$0xff] %v524_v60   ;;  %v457_v63 = vadd.f32 %v512_v44, %v446_v61  ;;  %v447_v0 = vmul.f32 %v511_v38, %v419_v62 }
 0x107   :  { %v458_v1 = vadd.f32 %v512_v44, %v447_v0  ;;  %v461_v2 = vmax.f32 %v457_v63, 0.0 }
 0x109   :  { %v462_v3 = vmax.f32 %v458_v1, 0.0 }
 0x10b   :  { %v529_v4 = vpack.c.bf16 %v462_v3, %v461_v2 }
 0x10d   :  { %531 = vst [vmem:[%s763_s6 + $0x8] sm:$0xff] %v529_v4  }

// kernel: densenet121_forward.152
= control target key start
LH: loop header
LB: loop body
LE: loop exit
PB: predicated region body
PF: predicated region fallthrough
CT: control target
= control target key end

     0   :  { %v58_v23 = vlaneseq  ;;  %s899_s1 = inlined_call_operand.vmem [shape: bf16[512,128], index: 1, kind: input, shape index: {}]   ;;  %s900_s0 = inlined_call_operand.vmem [shape: bf16[32,512], index: 0, kind: input, shape index: {}]   ;;  %s901_s2 = inlined_call_operand.vmem [shape: f32[1,512], index: 2, kind: input, shape index: {}]   ;;  %s902_s3 = inlined_call_operand.vmem [shape: f32[1,512], index: 3, kind: input, shape index: {}]   ;;  %s903_s4 = inlined_call_operand.vmem [shape: f32[1,128], index: 4, kind: input, shape index: {}]   ;;  %s904_s5 = inlined_call_operand.vmem [shape: f32[1,128], index: 5, kind: input, shape index: {}]   ;;  %s905_s6 = inlined_call_operand.vmem [shape: bf16[32,128], index: 6, kind: output, shape index: {}]  }
   0x1   :  { %v688_v0 = vld [vmem:[%s899_s1 + $0x40] sm:$0xff]   ;;  %v692_v4 = vld [vmem:[%s899_s1 + $0x48] sm:$0xff]   ;;  %v696_v8 = vld [vmem:[%s899_s1 + $0x50] sm:$0xff]  }
   0x2   :  { %v689_v1 = vld [vmem:[%s899_s1 + $0xc0] sm:$0xff]   ;;  %632 = vmatprep.subr.bf16.mxu0 %v688_v0  ;;  %v693_v5 = vld [vmem:[%s899_s1 + $0xc8] sm:$0xff]   ;;  %v697_v9 = vld [vmem:[%s899_s1 + $0xd0] sm:$0xff]   ;;  %v59_v28 = vshrl.u32 %v58_v23, 7 }
   0x3   :  { %v690_v2 = vld [vmem:[%s899_s1] sm:$0xff]   ;;  %660 = vmatprep.subr.bf16.mxu1 %v689_v1  ;;  %v694_v6 = vld [vmem:[%s899_s1 + $0x8] sm:$0xff]   ;;  %v698_v10 = vld [vmem:[%s899_s1 + $0x10] sm:$0xff]  }
   0x4   :  { %v691_v3 = vld [vmem:[%s899_s1 + $0x80] sm:$0xff]   ;;  %633 = vmatpush3.bf16.msra.mxu0 %v690_v2  ;;  %v695_v7 = vld [vmem:[%s899_s1 + $0x88] sm:$0xff]   ;;  %v699_v11 = vld [vmem:[%s899_s1 + $0x90] sm:$0xff]   ;;  %v64_v33 = vsub.s32 1, %v59_v28  ;;  %v72_v35 = vsub.s32 3, %v59_v28  ;;  %v60_v39 = vsub.s32 0, %v59_v28 }
   0x5   :  { %661 = vmatpush3.bf16.msra.mxu1 %v691_v3  ;;  %634 = vmatprep.subr.bf16.mxu0 %v692_v4  ;;  %v700_v12 = vld [vmem:[%s899_s1 + $0x58] sm:$0xff]   ;;  %v704_v16 = vld [vmem:[%s899_s1 + $0x60] sm:$0xff]   ;;  %v708_v20 = vld [vmem:[%s899_s1 + $0x68] sm:$0xff]   ;;  %v68_v40 = vsub.s32 2, %v59_v28 }
   0x6   :  { %662 = vmatprep.subr.bf16.mxu1 %v693_v5  ;;  %v701_v13 = vld [vmem:[%s899_s1 + $0xd8] sm:$0xff]   ;;  %v705_v17 = vld [vmem:[%s899_s1 + $0xe0] sm:$0xff]   ;;  %v709_v21 = vld [vmem:[%s899_s1 + $0xe8] sm:$0xff]  }
   0x7   :  { %v702_v14 = vld [vmem:[%s899_s1 + $0x18] sm:$0xff]   ;;  %v706_v18 = vld [vmem:[%s899_s1 + $0x20] sm:$0xff]   ;;  %v710_v22 = vld [vmem:[%s899_s1 + $0x28] sm:$0xff]  }
   0x8   :  { %635 = vmatpush3.bf16.msra.mxu0 %v694_v6  ;;  %v703_v15 = vld [vmem:[%s899_s1 + $0x98] sm:$0xff]   ;;  %v707_v19 = vld [vmem:[%s899_s1 + $0xa0] sm:$0xff]   ;;  %v711_v24 = vld [vmem:[%s899_s1 + $0xa8] sm:$0xff]  }
   0x9   :  { %663 = vmatpush3.bf16.msra.mxu1 %v695_v7  ;;  %636 = vmatprep.subr.bf16.mxu0 %v696_v8  ;;  %v712_v25 = vld [vmem:[%s899_s1 + $0x70] sm:$0xff]   ;;  %v716_v30 = vld [vmem:[%s899_s1 + $0x78] sm:$0xff]   ;;  %v32_v36 = vld [vmem:[%s900_s0] sm:$0xff] }
   0xa   :  { %664 = vmatprep.subr.bf16.mxu1 %v697_v9  ;;  %v713_v26 = vld [vmem:[%s899_s1 + $0xf0] sm:$0xff]   ;;  %v717_v31 = vld [vmem:[%s899_s1 + $0xf8] sm:$0xff]   ;;  %v56_v38 = vld [vmem:[%s901_s2] sm:$0xf]  ;;  %v40_v41 = vunpack.c.l.bf16 %v32_v36  ;;  %v41_v42 = vunpack.c.h.bf16 %v32_v36 }
   0xb   :  { %v714_v27 = vld [vmem:[%s899_s1 + $0x30] sm:$0xff]   ;;  %v718_v32 = vld [vmem:[%s899_s1 + $0x38] sm:$0xff]   ;;  %v94_v45 = vld [vmem:[%s902_s3] sm:$0xf]  ;;  %v65_v48 = vrot.slane %v56_v38, %v64_v33  ;;  %v73_v54 = vrot.slane %v56_v38, %v72_v35  ;;  %v61_v58 = vrot.slane %v56_v38, %v60_v39  ;;  %v69_v62 = vrot.slane %v56_v38, %v68_v40 }
   0xc   :  { %637 = vmatpush3.bf16.msra.mxu0 %v698_v10  ;;  %v715_v29 = vld [vmem:[%s899_s1 + $0xb0] sm:$0xff]   ;;  %v719_v34 = vld [vmem:[%s899_s1 + $0xb8] sm:$0xff]   ;;  %v33_v46 = vld [vmem:[%s900_s0 + $0x8] sm:$0xff]  ;;  %v103_v49 = vrot.slane %v94_v45, %v64_v33  ;;  %v111_v55 = vrot.slane %v94_v45, %v72_v35  ;;  %v99_v59 = vrot.slane %v94_v45, %v60_v39  ;;  %v869_v63 = vrot.slane %v94_v45, %v68_v40 }
   0xd   :  { %665 = vmatpush3.bf16.msra.mxu1 %v699_v11  ;;  %638 = vmatprep.subr.bf16.mxu0 %v700_v12  ;;  %v34_v37 = vld [vmem:[%s900_s0 + $0x10] sm:$0xff]  ;;  %v35_v47 = vld [vmem:[%s900_s0 + $0x18] sm:$0xff]  ;;  %v42_v50 = vunpack.c.l.bf16 %v33_v46  ;;  %v43_v51 = vunpack.c.h.bf16 %v33_v46  ;;  %v79_v56 = vmul.f32 %v65_v48, %v41_v42  ;;  %v78_v2 = vmul.f32 %v61_v58, %v40_v41  ;;  %v36_v8 = vld [vmem:[%s900_s0 + $0x20] sm:$0xff] }
   0xe   :  { %666 = vmatprep.subr.bf16.mxu1 %v701_v13  ;;  %v44_v43 = vunpack.c.l.bf16 %v34_v37  ;;  %v45_v44 = vunpack.c.h.bf16 %v34_v37  ;;  %v46_v52 = vunpack.c.l.bf16 %v35_v47  ;;  %v47_v53 = vunpack.c.h.bf16 %v35_v47  ;;  %v38_v13 = vld [vmem:[%s900_s0 + $0x30] sm:$0xff] }
   0xf   :  { %v81_v60 = vmul.f32 %v73_v54, %v43_v51  ;;  %v117_v0 = vadd.f32 %v103_v49, %v79_v56  ;;  %v80_v6 = vmul.f32 %v69_v62, %v42_v50  ;;  %v116_v11 = vadd.f32 %v99_v59, %v78_v2 }
  0x10   :  { %639 = vmatpush3.bf16.msra.mxu0 %v702_v14  ;;  %v83_v57 = vmul.f32 %v65_v48, %v45_v44  ;;  %v85_v61 = vmul.f32 %v73_v54, %v47_v53  ;;  %v82_v3 = vmul.f32 %v61_v58, %v44_v43  ;;  %v84_v7 = vmul.f32 %v69_v62, %v46_v52 }
  0x11   :  { %667 = vmatpush3.bf16.msra.mxu1 %v703_v15  ;;  %640 = vmatprep.subr.bf16.mxu0 %v704_v16  ;;  %v119_v4 = vadd.f32 %v111_v55, %v81_v60  ;;  %v133_v9 = vmax.f32 %v117_v0, 0.0  ;;  %v118_v16 = vadd.f32 %v869_v63, %v80_v6  ;;  %v49_v23 = vunpack.c.h.bf16 %v36_v8 }
  0x12   :  { %668 = vmatprep.subr.bf16.mxu1 %v705_v17  ;;  %v121_v1 = vadd.f32 %v103_v49, %v83_v57  ;;  %v123_v5 = vadd.f32 %v111_v55, %v85_v61  ;;  %v120_v12 = vadd.f32 %v99_v59, %v82_v3  ;;  %v122_v17 = vadd.f32 %v869_v63, %v84_v7 }
  0x13   :  { %v135_v14 = vmax.f32 %v119_v4, 0.0  ;;  %v52_v35 = vunpack.c.l.bf16 %v38_v13 }
  0x14   :  { %641 = vmatpush3.bf16.msra.mxu0 %v706_v18  ;;  %v137_v10 = vmax.f32 %v121_v1, 0.0  ;;  %v139_v15 = vmax.f32 %v123_v5, 0.0  ;;  %v37_v18 = vld [vmem:[%s900_s0 + $0x28] sm:$0xff] }
  0x15   :  { %669 = vmatpush3.bf16.msra.mxu1 %v707_v19  ;;  %642 = vmatprep.subr.bf16.mxu0 %v708_v20  ;;  %v39_v19 = vld [vmem:[%s900_s0 + $0x38] sm:$0xff]  ;;  %v50_v39 = vunpack.c.l.bf16 %v37_v18  ;;  %v90_v42 = vmul.f32 %v61_v58, %v52_v35 }
  0x16   :  { %670 = vmatprep.subr.bf16.mxu1 %v709_v21  ;;  %v149_v20 = vpack.c.bf16 %v137_v10, %v133_v9  ;;  %v132_v21 = vmax.f32 %v116_v11, 0.0  ;;  %v54_v43 = vunpack.c.l.bf16 %v39_v19 }
  0x17   :  { %v88_v47 = vmul.f32 %v69_v62, %v50_v39  ;;  %v128_v52 = vadd.f32 %v99_v59, %v90_v42 }
  0x18   :  { %643 = vmatpush3.bf16.msra.mxu0 %v710_v22  ;;  %v136_v22 = vmax.f32 %v120_v12, 0.0  ;;  %448 = vmatprep.mubr.bf16.mxu0 %v149_v20 }
  0x19   :  { %671 = vmatpush3.bf16.msra.mxu1 %v711_v24  ;;  %644 = vmatprep.subr.bf16.mxu0 %v712_v25  ;;  %v151_v24 = vpack.c.bf16 %v139_v15, %v135_v14  ;;  %v134_v25 = vmax.f32 %v118_v16, 0.0  ;;  %v126_v57 = vadd.f32 %v869_v63, %v88_v47  ;;  %v144_v61 = vmax.f32 %v128_v52, 0.0  ;;  %v612_v14 = vld [vmem:[%s904_s5] ss:$0 sm:$0xff] }
  0x1a   :  { %672 = vmatprep.subr.bf16.mxu1 %v713_v26  ;;  %v138_v26 = vmax.f32 %v122_v17, 0.0  ;;  %v148_v28 = vpack.c.bf16 %v136_v22, %v132_v21 }
  0x1b   :  { %497 = vmatprep.mubr.bf16.mxu1 %v151_v24 }
  0x1c   :  { %645 = vmatpush3.bf16.msra.mxu0 %v714_v27  ;;  %v53_v27 = vunpack.c.h.bf16 %v38_v13 }
  0x1d   :  { %673 = vmatpush3.bf16.msra.mxu1 %v715_v29  ;;  %646 = vmatprep.subr.bf16.mxu0 %v716_v30  ;;  %v87_v29 = vmul.f32 %v65_v48, %v49_v23  ;;  %v51_v30 = vunpack.c.h.bf16 %v37_v18 }
  0x1e   :  { %674 = vmatprep.subr.bf16.mxu1 %v717_v31  ;;  %v55_v31 = vunpack.c.h.bf16 %v39_v19  ;;  %v91_v33 = vmul.f32 %v65_v48, %v53_v27  ;;  %v92_v48 = vmul.f32 %v69_v62, %v54_v43 }
  0x1f   :  { %v125_v36 = vadd.f32 %v103_v49, %v87_v29  ;;  %v89_v37 = vmul.f32 %v73_v54, %v51_v30 }
  0x20   :  { %647 = vmatpush3.bf16.msra.mxu0 %v718_v32  ;;  %v150_v32 = vpack.c.bf16 %v138_v26, %v134_v25  ;;  %v93_v38 = vmul.f32 %v73_v54, %v55_v31  ;;  %v129_v40 = vadd.f32 %v103_v49, %v91_v33  ;;  %v130_v49 = vadd.f32 %v869_v63, %v92_v48  ;;  %v611_v63 = vld [vmem:[%s903_s4] ss:$0 sm:$0xff] }
  0x21   :  { %675 = vmatpush3.bf16.msra.mxu1 %v719_v34  ;;  %v48_v34 = vunpack.c.l.bf16 %v36_v8  ;;  %v141_v44 = vmax.f32 %v125_v36, 0.0  ;;  %v127_v45 = vadd.f32 %v111_v55, %v89_v37 }
  0x22   :  { %v131_v46 = vadd.f32 %v111_v55, %v93_v38  ;;  %v145_v50 = vmax.f32 %v129_v40, 0.0  ;;  %v146_v2 = vmax.f32 %v130_v49, 0.0 }
  0x23   :  { %449 = vmatmul.mubr.bf16.vlgmr.msra.gmra.mrb[0].mxu0 %v148_v28  ;;  %v86_v41 = vmul.f32 %v61_v58, %v48_v34  ;;  %v143_v53 = vmax.f32 %v127_v45, 0.0  ;;  %v142_v58 = vmax.f32 %v126_v57, 0.0 }
  0x24   :  { %498 = vmatmul.mubr.bf16.vlgmr.msra.gmra.mrb[0].mxu1 %v150_v32  ;;  %v147_v56 = vmax.f32 %v131_v46, 0.0  ;;  %v153_v60 = vpack.c.bf16 %v145_v50, %v141_v44 }
  0x25   :  { %v124_v51 = vadd.f32 %v99_v59, %v86_v41  ;;  %v154_v55 = vpack.c.bf16 %v146_v2, %v142_v58 }
  0x26   :  { %v155_v0 = vpack.c.bf16 %v147_v56, %v143_v53  ;;  %456 = vmatprep.mubr.bf16.mxu0 %v153_v60 }
  0x27   :  { %v140_v54 = vmax.f32 %v124_v51, 0.0 }
  0x28   :  { %505 = vmatprep.mubr.bf16.mxu1 %v155_v0 }
  0x29   :  { %v152_v1 = vpack.c.bf16 %v144_v61, %v140_v54 }
  0x2b   :  { %457 = vmatmul.mubr.bf16.gmra.mrb[4].mxu0 %v152_v1 }
  0x2c   :  { %506 = vmatmul.mubr.bf16.gmra.mrb[4].mxu1 %v154_v55 }
  0xf6   :  { %v648_v59 = vpop.f32.mrb[0].mxu0 }
  0xf7   :  { %v676_v62 = vpop.f32.mrb[0].mxu1  ;;  %v649_v3 = vpop.f32.mrb[1].mxu0 }
  0xf8   :  { %v650_v4 = vadd.f32 %v649_v3, %v648_v59  ;;  %v677_v5 = vpop.f32.mrb[1].mxu1  ;;  %v651_v6 = vpop.f32.mrb[2].mxu0 }
  0xf9   :  { %v678_v7 = vadd.f32 %v677_v5, %v676_v62  ;;  %v679_v8 = vpop.f32.mrb[2].mxu1  ;;  %v652_v9 = vpop.f32.mrb[3].mxu0 }
  0xfa   :  { %v653_v10 = vadd.f32 %v652_v9, %v651_v6  ;;  %v680_v11 = vpop.f32.mrb[3].mxu1 }
  0xfb   :  { %v500_v12 = vadd.f32 %v678_v7, %v650_v4  ;;  %v681_v13 = vadd.f32 %v680_v11, %v679_v8 }
  0xfd   :  { %v536_v15 = vmul.f32 %v611_v63, %v500_v12  ;;  %v503_v16 = vadd.f32 %v681_v13, %v653_v10 }
  0xfe   :  { %v654_v19 = vpop.f32.mrb[4].mxu0 }
  0xff   :  { %v547_v17 = vadd.f32 %v612_v14, %v536_v15  ;;  %v537_v18 = vmul.f32 %v611_v63, %v503_v16  ;;  %v655_v20 = vpop.f32.mrb[5].mxu0  ;;  %v682_v22 = vpop.f32.mrb[4].mxu1 }
 0x100   :  { %v656_v23 = vadd.f32 %v655_v20, %v654_v19  ;;  %v657_v24 = vpop.f32.mrb[6].mxu0  ;;  %v683_v25 = vpop.f32.mrb[5].mxu1 }
 0x101   :  { %v548_v21 = vadd.f32 %v612_v14, %v537_v18  ;;  %v658_v26 = vpop.f32.mrb[7].mxu0  ;;  %v551_v27 = vmax.f32 %v547_v17, 0.0  ;;  %v684_v29 = vadd.f32 %v683_v25, %v682_v22  ;;  %v685_v30 = vpop.f32.mrb[6].mxu1 }
 0x102   :  { %v659_v31 = vadd.f32 %v658_v26, %v657_v24  ;;  %v686_v32 = vpop.f32.mrb[7].mxu1 }
 0x103   :  { %v552_v28 = vmax.f32 %v548_v21, 0.0  ;;  %v508_v34 = vadd.f32 %v684_v29, %v656_v23  ;;  %v687_v35 = vadd.f32 %v686_v32, %v685_v30 }
 0x105   :  { %v624_v33 = vpack.c.bf16 %v552_v28, %v551_v27  ;;  %v538_v36 = vmul.f32 %v611_v63, %v508_v34  ;;  %v511_v37 = vadd.f32 %v687_v35, %v659_v31 }
 0x107   :  { %625 = vst [vmem:[%s905_s6] sm:$0xff] %v624_v33   ;;  %v549_v38 = vadd.f32 %v612_v14, %v538_v36  ;;  %v539_v39 = vmul.f32 %v611_v63, %v511_v37 }
 0x109   :  { %v550_v40 = vadd.f32 %v612_v14, %v539_v39  ;;  %v553_v41 = vmax.f32 %v549_v38, 0.0 }
 0x10b   :  { %v554_v42 = vmax.f32 %v550_v40, 0.0 }
 0x10d   :  { %v629_v43 = vpack.c.bf16 %v554_v42, %v553_v41 }
 0x10f   :  { %631 = vst [vmem:[%s905_s6 + $0x8] sm:$0xff] %v629_v43  }

// kernel: densenet121_forward.158
= control target key start
LH: loop header
LB: loop body
LE: loop exit
PB: predicated region body
PF: predicated region fallthrough
CT: control target
= control target key end

     0   :  { %v55_v37 = vlaneseq  ;;  %s1201_s1 = inlined_call_operand.vmem [shape: bf16[512,256], index: 1, kind: input, shape index: {}]   ;;  %s1202_s0 = inlined_call_operand.vmem [shape: bf16[32,512], index: 0, kind: input, shape index: {}]   ;;  %s1203_s2 = inlined_call_operand.vmem [shape: f32[1,512], index: 2, kind: input, shape index: {}]   ;;  %s1204_s3 = inlined_call_operand.vmem [shape: f32[1,512], index: 3, kind: input, shape index: {}]   ;;  %s1205_s4 = inlined_call_operand.vmem [shape: bf16[32,256], index: 4, kind: output, shape index: {}]  }
   0x1   :  { %v790_v0 = vld [vmem:[%s1201_s1 + $0x4] ss:$8 sps:$4 sm:$0xff]   ;;  %v794_v2 = vld [vmem:[%s1201_s1] ss:$8 sps:$4 sm:$0xff]   ;;  %v796_v4 = vld [vmem:[%s1201_s1 + $0x14] ss:$8 sps:$4 sm:$0xff]  }
   0x2   :  { %v792_v1 = vld [vmem:[%s1201_s1 + $0x104] ss:$8 sps:$4 sm:$0xff]   ;;  %545 = vmatprep.subr.bf16.mxu1 %v790_v0  ;;  %v795_v3 = vld [vmem:[%s1201_s1 + $0x100] ss:$8 sps:$4 sm:$0xff]   ;;  %v798_v5 = vld [vmem:[%s1201_s1 + $0x114] ss:$8 sps:$4 sm:$0xff]  }
   0x3   :  { %598 = vmatprep.subr.bf16.mxu0 %v792_v1  ;;  %546 = vmatpush1.bf16.msra.mxu1 %v794_v2  ;;  %v800_v6 = vld [vmem:[%s1201_s1 + $0x10] ss:$8 sps:$4 sm:$0xff]   ;;  %v802_v8 = vld [vmem:[%s1201_s1 + $0x24] ss:$8 sps:$4 sm:$0xff]   ;;  %v806_v10 = vld [vmem:[%s1201_s1 + $0x20] ss:$8 sps:$4 sm:$0xff]  }
   0x4   :  { %599 = vmatpush1.bf16.msra.mxu0 %v795_v3  ;;  %547 = vmatprep.subr.bf16.mxu1 %v796_v4  ;;  %v801_v7 = vld [vmem:[%s1201_s1 + $0x110] ss:$8 sps:$4 sm:$0xff]   ;;  %v804_v9 = vld [vmem:[%s1201_s1 + $0x124] ss:$8 sps:$4 sm:$0xff]   ;;  %v807_v11 = vld [vmem:[%s1201_s1 + $0x120] ss:$8 sps:$4 sm:$0xff]  }
   0x5   :  { %600 = vmatprep.subr.bf16.mxu0 %v798_v5  ;;  %v808_v12 = vld [vmem:[%s1201_s1 + $0x34] ss:$8 sps:$4 sm:$0xff]   ;;  %v812_v14 = vld [vmem:[%s1201_s1 + $0x30] ss:$8 sps:$4 sm:$0xff]   ;;  %v814_v16 = vld [vmem:[%s1201_s1 + $0x44] ss:$8 sps:$4 sm:$0xff]  }
   0x6   :  { %v810_v13 = vld [vmem:[%s1201_s1 + $0x134] ss:$8 sps:$4 sm:$0xff]   ;;  %v813_v15 = vld [vmem:[%s1201_s1 + $0x130] ss:$8 sps:$4 sm:$0xff]   ;;  %v816_v17 = vld [vmem:[%s1201_s1 + $0x144] ss:$8 sps:$4 sm:$0xff]  }
   0x7   :  { %548 = vmatpush1.bf16.msra.mxu1 %v800_v6  ;;  %v818_v18 = vld [vmem:[%s1201_s1 + $0x40] ss:$8 sps:$4 sm:$0xff]   ;;  %v820_v20 = vld [vmem:[%s1201_s1 + $0x54] ss:$8 sps:$4 sm:$0xff]   ;;  %v824_v22 = vld [vmem:[%s1201_s1 + $0x50] ss:$8 sps:$4 sm:$0xff]  }
   0x8   :  { %601 = vmatpush1.bf16.msra.mxu0 %v801_v7  ;;  %549 = vmatprep.subr.bf16.mxu1 %v802_v8  ;;  %v819_v19 = vld [vmem:[%s1201_s1 + $0x140] ss:$8 sps:$4 sm:$0xff]   ;;  %v822_v21 = vld [vmem:[%s1201_s1 + $0x154] ss:$8 sps:$4 sm:$0xff]   ;;  %v825_v23 = vld [vmem:[%s1201_s1 + $0x150] ss:$8 sps:$4 sm:$0xff]  }
   0x9   :  { %602 = vmatprep.subr.bf16.mxu0 %v804_v9  ;;  %v826_v24 = vld [vmem:[%s1201_s1 + $0x64] ss:$8 sps:$4 sm:$0xff]   ;;  %v830_v26 = vld [vmem:[%s1201_s1 + $0x60] ss:$8 sps:$4 sm:$0xff]   ;;  %v832_v28 = vld [vmem:[%s1201_s1 + $0x74] ss:$8 sps:$4 sm:$0xff]  }
   0xa   :  { %v828_v25 = vld [vmem:[%s1201_s1 + $0x164] ss:$8 sps:$4 sm:$0xff]   ;;  %v831_v27 = vld [vmem:[%s1201_s1 + $0x160] ss:$8 sps:$4 sm:$0xff]   ;;  %v834_v29 = vld [vmem:[%s1201_s1 + $0x174] ss:$8 sps:$4 sm:$0xff]  }
   0xb   :  { %550 = vmatpush1.bf16.msra.mxu1 %v806_v10  ;;  %v836_v30 = vld [vmem:[%s1201_s1 + $0x70] ss:$8 sps:$4 sm:$0xff]   ;;  %v838_v32 = vld [vmem:[%s1201_s1 + $0x84] ss:$8 sps:$4 sm:$0xff]   ;;  %v842_v34 = vld [vmem:[%s1201_s1 + $0x80] ss:$8 sps:$4 sm:$0xff]  }
   0xc   :  { %603 = vmatpush1.bf16.msra.mxu0 %v807_v11  ;;  %551 = vmatprep.subr.bf16.mxu1 %v808_v12  ;;  %v837_v31 = vld [vmem:[%s1201_s1 + $0x170] ss:$8 sps:$4 sm:$0xff]   ;;  %v840_v33 = vld [vmem:[%s1201_s1 + $0x184] ss:$8 sps:$4 sm:$0xff]   ;;  %v843_v35 = vld [vmem:[%s1201_s1 + $0x180] ss:$8 sps:$4 sm:$0xff]  }
   0xd   :  { %604 = vmatprep.subr.bf16.mxu0 %v810_v13  ;;  %v844_v36 = vld [vmem:[%s1201_s1 + $0x94] ss:$8 sps:$4 sm:$0xff]   ;;  %v848_v39 = vld [vmem:[%s1201_s1 + $0x90] ss:$8 sps:$4 sm:$0xff]   ;;  %v850_v41 = vld [vmem:[%s1201_s1 + $0xa4] ss:$8 sps:$4 sm:$0xff]  }
   0xe   :  { %v846_v38 = vld [vmem:[%s1201_s1 + $0x194] ss:$8 sps:$4 sm:$0xff]   ;;  %v849_v40 = vld [vmem:[%s1201_s1 + $0x190] ss:$8 sps:$4 sm:$0xff]   ;;  %v56_v42 = vshrl.u32 %v55_v37, 7  ;;  %v29_v50 = vld [vmem:[%s1202_s0] sm:$0xff] }
   0xf   :  { %552 = vmatpush1.bf16.msra.mxu1 %v812_v14  ;;  %v852_v43 = vld [vmem:[%s1201_s1 + $0x1a4] ss:$8 sps:$4 sm:$0xff]   ;;  %v854_v44 = vld [vmem:[%s1201_s1 + $0xa0] ss:$8 sps:$4 sm:$0xff]   ;;  %v856_v46 = vld [vmem:[%s1201_s1 + $0xb4] ss:$8 sps:$4 sm:$0xff]   ;;  %v37_v54 = vunpack.c.l.bf16 %v29_v50  ;;  %v38_v55 = vunpack.c.h.bf16 %v29_v50 }
  0x10   :  { %605 = vmatpush1.bf16.msra.mxu0 %v813_v15  ;;  %553 = vmatprep.subr.bf16.mxu1 %v814_v16  ;;  %v855_v45 = vld [vmem:[%s1201_s1 + $0x1a0] ss:$8 sps:$4 sm:$0xff]   ;;  %v61_v47 = vsub.s32 1, %v56_v42  ;;  %v858_v48 = vld [vmem:[%s1201_s1 + $0x1b4] ss:$8 sps:$4 sm:$0xff]   ;;  %v69_v51 = vsub.s32 3, %v56_v42 }
  0x11   :  { %606 = vmatprep.subr.bf16.mxu0 %v816_v17  ;;  %v860_v49 = vld [vmem:[%s1201_s1 + $0xb0] ss:$8 sps:$4 sm:$0xff]   ;;  %v57_v52 = vsub.s32 0, %v56_v42  ;;  %v53_v56 = vld [vmem:[%s1203_s2] sm:$0xf]  ;;  %v65_v58 = vsub.s32 2, %v56_v42 }
  0x12   :  { %v31_v53 = vld [vmem:[%s1202_s0 + $0x10] sm:$0xff]  ;;  %v91_v57 = vld [vmem:[%s1204_s3] sm:$0xf]  ;;  %v1067_v62 = vrot.slane %v53_v56, %v61_v47  ;;  %v30_v0 = vld [vmem:[%s1202_s0 + $0x8] sm:$0xff]  ;;  %v1090_v11 = vrot.slane %v53_v56, %v69_v51 }
  0x13   :  { %554 = vmatpush1.bf16.msra.mxu1 %v818_v18  ;;  %v861_v59 = vld [vmem:[%s1201_s1 + $0x1b0] ss:$8 sps:$4 sm:$0xff]   ;;  %v41_v60 = vunpack.c.l.bf16 %v31_v53  ;;  %v42_v61 = vunpack.c.h.bf16 %v31_v53  ;;  %v1069_v63 = vrot.slane %v91_v57, %v61_v47  ;;  %v862_v2 = vld [vmem:[%s1201_s1 + $0xc4] ss:$8 sps:$4 sm:$0xff]   ;;  %v39_v4 = vunpack.c.l.bf16 %v30_v0  ;;  %v866_v18 = vld [vmem:[%s1201_s1 + $0xc0] ss:$8 sps:$4 sm:$0xff]  }
  0x14   :  { %607 = vmatpush1.bf16.msra.mxu0 %v819_v19  ;;  %555 = vmatprep.subr.bf16.mxu1 %v820_v20  ;;  %v32_v1 = vld [vmem:[%s1202_s0 + $0x18] sm:$0xff]  ;;  %v864_v3 = vld [vmem:[%s1201_s1 + $0x1c4] ss:$8 sps:$4 sm:$0xff]   ;;  %v40_v5 = vunpack.c.h.bf16 %v30_v0  ;;  %v76_v9 = vmul.f32 %v1067_v62, %v38_v55  ;;  %v1092_v12 = vrot.slane %v91_v57, %v69_v51  ;;  %v1097_v13 = vld [vmem:[%s1202_s0 + $0x30] sm:$0xff]  ;;  %v1099_v14 = vrot.slane %v53_v56, %v57_v52 }
  0x15   :  { %608 = vmatprep.subr.bf16.mxu0 %v822_v21  ;;  %v43_v6 = vunpack.c.l.bf16 %v32_v1  ;;  %v44_v7 = vunpack.c.h.bf16 %v32_v1  ;;  %v1086_v8 = vld [vmem:[%s1202_s0 + $0x20] sm:$0xff]  ;;  %v80_v10 = vmul.f32 %v1067_v62, %v42_v61  ;;  %v1101_v15 = vrot.slane %v91_v57, %v57_v52  ;;  %v34_v37 = vld [vmem:[%s1202_s0 + $0x28] sm:$0xff]  ;;  %v880_v61 = vld [vmem:[%s1201_s1 + $0xf4] ss:$8 sps:$4 sm:$0xff]  }
  0x16   :  { %v1103_v16 = vrot.slane %v53_v56, %v65_v58  ;;  %v1105_v17 = vrot.slane %v91_v57, %v65_v58  ;;  %v867_v19 = vld [vmem:[%s1201_s1 + $0x1c0] ss:$8 sps:$4 sm:$0xff]   ;;  %v114_v20 = vadd.f32 %v1069_v63, %v76_v9  ;;  %v48_v51 = vunpack.c.h.bf16 %v34_v37 }
  0x17   :  { %556 = vmatpush1.bf16.msra.mxu1 %v824_v22  ;;  %v118_v21 = vadd.f32 %v1069_v63, %v80_v10  ;;  %v78_v22 = vmul.f32 %v1090_v11, %v40_v5  ;;  %v878_v55 = vld [vmem:[%s1201_s1 + $0xe0] ss:$8 sps:$4 sm:$0xff]  }
  0x18   :  { %609 = vmatpush1.bf16.msra.mxu0 %v825_v23  ;;  %557 = vmatprep.subr.bf16.mxu1 %v826_v24  ;;  %v46_v23 = vunpack.c.h.bf16 %v1086_v8  ;;  %v868_v24 = vld [vmem:[%s1201_s1 + $0xd4] ss:$8 sps:$4 sm:$0xff]   ;;  %v879_v56 = vld [vmem:[%s1201_s1 + $0x1e0] ss:$8 sps:$4 sm:$0xff]  }
  0x19   :  { %610 = vmatprep.subr.bf16.mxu0 %v828_v25  ;;  %v870_v25 = vld [vmem:[%s1201_s1 + $0x1d4] ss:$8 sps:$4 sm:$0xff]  }
  0x1a   :  { %v84_v42 = vmul.f32 %v1067_v62, %v46_v23 }
  0x1b   :  { %558 = vmatpush1.bf16.msra.mxu1 %v830_v26  ;;  %v82_v26 = vmul.f32 %v1090_v11, %v44_v7  ;;  %v884_v7 = vld [vmem:[%s1201_s1 + $0xf0] ss:$8 sps:$4 sm:$0xff]  }
  0x1c   :  { %611 = vmatpush1.bf16.msra.mxu0 %v831_v27  ;;  %559 = vmatprep.subr.bf16.mxu1 %v832_v28  ;;  %v75_v27 = vmul.f32 %v1099_v14, %v37_v54  ;;  %v79_v28 = vmul.f32 %v1099_v14, %v41_v60  ;;  %v122_v57 = vadd.f32 %v1069_v63, %v84_v42  ;;  %v45_v60 = vunpack.c.l.bf16 %v1086_v8 }
  0x1d   :  { %612 = vmatprep.subr.bf16.mxu0 %v834_v29  ;;  %v50_v29 = vunpack.c.h.bf16 %v1097_v13 }
  0x1e   :  { %v117_v47 = vadd.f32 %v1101_v15, %v79_v28  ;;  %v83_v9 = vmul.f32 %v1099_v14, %v45_v60 }
  0x1f   :  { %560 = vmatpush1.bf16.msra.mxu1 %v836_v30  ;;  %v130_v30 = vmax.f32 %v114_v20, 0.0  ;;  %v88_v50 = vmul.f32 %v1067_v62, %v50_v29  ;;  %v882_v62 = vld [vmem:[%s1201_s1 + $0x1f4] ss:$8 sps:$4 sm:$0xff]  }
  0x20   :  { %613 = vmatpush1.bf16.msra.mxu0 %v837_v31  ;;  %561 = vmatprep.subr.bf16.mxu1 %v838_v32  ;;  %v134_v31 = vmax.f32 %v118_v21, 0.0  ;;  %v116_v32 = vadd.f32 %v1092_v12, %v78_v22  ;;  %v133_v0 = vmax.f32 %v117_v47, 0.0 }
  0x21   :  { %614 = vmatprep.subr.bf16.mxu0 %v840_v33  ;;  %v77_v33 = vmul.f32 %v1103_v16, %v39_v4  ;;  %v126_v58 = vadd.f32 %v1069_v63, %v88_v50  ;;  %v47_v63 = vunpack.c.l.bf16 %v34_v37 }
  0x23   :  { %562 = vmatpush1.bf16.msra.mxu1 %v842_v34  ;;  %v120_v34 = vadd.f32 %v1092_v12, %v82_v26 }
  0x24   :  { %615 = vmatpush1.bf16.msra.mxu0 %v843_v35  ;;  %563 = vmatprep.subr.bf16.mxu1 %v844_v36  ;;  %v113_v35 = vadd.f32 %v1101_v15, %v75_v27  ;;  %v81_v36 = vmul.f32 %v1103_v16, %v43_v6 }
  0x25   :  { %616 = vmatprep.subr.bf16.mxu0 %v846_v38  ;;  %v872_v38 = vld [vmem:[%s1201_s1 + $0xd0] ss:$8 sps:$4 sm:$0xff]  }
  0x26   :  { %v129_v53 = vmax.f32 %v113_v35, 0.0 }
  0x27   :  { %564 = vmatpush1.bf16.msra.mxu1 %v848_v39  ;;  %v873_v39 = vld [vmem:[%s1201_s1 + $0x1d0] ss:$8 sps:$4 sm:$0xff]  }
  0x28   :  { %617 = vmatpush1.bf16.msra.mxu0 %v849_v40  ;;  %565 = vmatprep.subr.bf16.mxu1 %v850_v41  ;;  %v146_v40 = vpack.c.bf16 %v134_v31, %v130_v30  ;;  %v132_v41 = vmax.f32 %v116_v32, 0.0  ;;  %v145_v22 = vpack.c.bf16 %v133_v0, %v129_v53 }
  0x29   :  { %618 = vmatprep.subr.bf16.mxu0 %v852_v43  ;;  %v36_v43 = vld [vmem:[%s1202_s0 + $0x38] sm:$0xff] }
  0x2a   :  { %577 = vmatprep.mubr.bf16.mxu1 %v146_v40  ;;  %v52_v54 = vunpack.c.h.bf16 %v36_v43  ;;  %v51_v6 = vunpack.c.l.bf16 %v36_v43 }
  0x2b   :  { %566 = vmatpush1.bf16.msra.mxu1 %v854_v44  ;;  %v874_v44 = vld [vmem:[%s1201_s1 + $0xe4] ss:$8 sps:$4 sm:$0xff]  }
  0x2c   :  { %619 = vmatpush1.bf16.msra.mxu0 %v855_v45  ;;  %567 = vmatprep.subr.bf16.mxu1 %v856_v46  ;;  %v876_v45 = vld [vmem:[%s1201_s1 + $0x1e4] ss:$8 sps:$4 sm:$0xff]   ;;  %v136_v46 = vmax.f32 %v120_v34, 0.0  ;;  %v90_v1 = vmul.f32 %v1090_v11, %v52_v54  ;;  %v89_v21 = vmul.f32 %v1103_v16, %v51_v6 }
  0x2d   :  { %620 = vmatprep.subr.bf16.mxu0 %v858_v48  ;;  %v115_v48 = vadd.f32 %v1105_v17, %v77_v33 }
  0x2e   :  { %v148_v52 = vpack.c.bf16 %v136_v46, %v132_v41  ;;  %v128_v8 = vadd.f32 %v1092_v12, %v90_v1  ;;  %v127_v26 = vadd.f32 %v1105_v17, %v89_v21 }
  0x2f   :  { %568 = vmatpush1.bf16.msra.mxu1 %v860_v49  ;;  %v119_v49 = vadd.f32 %v1105_v17, %v81_v36 }
  0x30   :  { %621 = vmatpush1.bf16.msra.mxu0 %v861_v59  ;;  %569 = vmatprep.subr.bf16.mxu1 %v862_v2  ;;  %v86_v59 = vmul.f32 %v1090_v11, %v48_v51  ;;  %v49_v2 = vunpack.c.l.bf16 %v1097_v13  ;;  %v85_v11 = vmul.f32 %v1103_v16, %v47_v63  ;;  %v885_v13 = vld [vmem:[%s1201_s1 + $0x1f0] ss:$8 sps:$4 sm:$0xff]   ;;  %v143_v31 = vmax.f32 %v127_v26, 0.0 }
  0x31   :  { %622 = vmatprep.subr.bf16.mxu0 %v864_v3  ;;  %630 = vmatprep.mubr.bf16.mxu0 %v148_v52  ;;  %v131_v3 = vmax.f32 %v115_v48, 0.0  ;;  %v135_v4 = vmax.f32 %v119_v49, 0.0 }
  0x32   :  { %v124_v5 = vadd.f32 %v1092_v12, %v86_v59  ;;  %v87_v10 = vmul.f32 %v1099_v14, %v49_v2  ;;  %v144_v12 = vmax.f32 %v128_v8, 0.0  ;;  %v121_v14 = vadd.f32 %v1101_v15, %v83_v9 }
  0x33   :  { %570 = vmatpush1.bf16.msra.mxu1 %v866_v18  ;;  %v138_v18 = vmax.f32 %v122_v57, 0.0  ;;  %v147_v23 = vpack.c.bf16 %v135_v4, %v131_v3 }
  0x34   :  { %623 = vmatpush1.bf16.msra.mxu0 %v867_v19  ;;  %571 = vmatprep.subr.bf16.mxu1 %v868_v24  ;;  %v142_v19 = vmax.f32 %v126_v58, 0.0  ;;  %v140_v20 = vmax.f32 %v124_v5, 0.0  ;;  %v125_v24 = vadd.f32 %v1101_v15, %v87_v10  ;;  %v137_v16 = vmax.f32 %v121_v14, 0.0 }
  0x35   :  { %624 = vmatprep.subr.bf16.mxu0 %v870_v25  ;;  %v123_v25 = vadd.f32 %v1105_v17, %v85_v11 }
  0x36   :  { %v150_v27 = vpack.c.bf16 %v142_v19, %v138_v18  ;;  %v152_v28 = vpack.c.bf16 %v144_v12, %v140_v20  ;;  %v141_v29 = vmax.f32 %v125_v24, 0.0 }
  0x37   :  { %572 = vmatpush1.bf16.msra.mxu1 %v872_v38  ;;  %v139_v30 = vmax.f32 %v123_v25, 0.0 }
  0x38   :  { %625 = vmatpush1.bf16.msra.mxu0 %v873_v39  ;;  %573 = vmatprep.subr.bf16.mxu1 %v874_v44  ;;  %v149_v32 = vpack.c.bf16 %v141_v29, %v137_v16 }
  0x39   :  { %626 = vmatprep.subr.bf16.mxu0 %v876_v45  ;;  %v151_v33 = vpack.c.bf16 %v143_v31, %v139_v30 }
  0x3b   :  { %574 = vmatpush1.bf16.msra.mxu1 %v878_v55 }
  0x3c   :  { %627 = vmatpush1.bf16.msra.mxu0 %v879_v56  ;;  %575 = vmatprep.subr.bf16.mxu1 %v880_v61 }
  0x3d   :  { %628 = vmatprep.subr.bf16.mxu0 %v882_v62 }
  0x3f   :  { %576 = vmatpush1.bf16.msra.mxu1 %v884_v7 }
  0x40   :  { %629 = vmatpush1.bf16.msra.mxu0 %v885_v13 }
  0x42   :  { %578 = vmatmul.mubr.bf16.vlgmr.msra.gmra.mrb[0].mxu1 %v145_v22 }
  0x43   :  { %631 = vmatmul.mubr.bf16.vlgmr.msra.gmra.mrb[0].mxu0 %v147_v23  ;;  %587 = vmatprep.mubr.bf16.mxu1 %v150_v27 }
  0x44   :  { %640 = vmatprep.mubr.bf16.mxu0 %v152_v28 }
  0x4a   :  { %588 = vmatmul.mubr.bf16.gmra.mrb[4].mxu1 %v149_v32 }
  0x4b   :  { %641 = vmatmul.mubr.bf16.gmra.mrb[4].mxu0 %v151_v33 }
 0x115   :  { %v579_v15 = vpop.f32.mrb[0].mxu1 }
 0x116   :  { %v632_v34 = vpop.f32.mrb[0].mxu0  ;;  %v581_v17 = vpop.f32.mrb[1].mxu1 }
 0x117   :  { %v633_v35 = vadd.f32 %v632_v34, %v579_v15  ;;  %v634_v36 = vpop.f32.mrb[1].mxu0  ;;  %v583_v38 = vpop.f32.mrb[2].mxu1 }
 0x118   :  { %v635_v37 = vadd.f32 %v634_v36, %v581_v17  ;;  %v636_v39 = vpop.f32.mrb[2].mxu0  ;;  %v585_v41 = vpop.f32.mrb[3].mxu1 }
 0x119   :  { %v637_v40 = vadd.f32 %v636_v39, %v583_v38  ;;  %v638_v42 = vpop.f32.mrb[3].mxu0 }
 0x11a   :  { %v778_v43 = vpack.c.bf16 %v635_v37, %v633_v35  ;;  %v639_v44 = vadd.f32 %v638_v42, %v585_v41 }
 0x11c   :  { %702 = vst [vmem:[%s1205_s4] sm:$0xff] %v778_v43  ;;  %v779_v45 = vpack.c.bf16 %v639_v44, %v637_v40 }
 0x11d   :  { %v589_v46 = vpop.f32.mrb[4].mxu1 }
 0x11e   :  { %703 = vst [vmem:[%s1205_s4 + $0x8] sm:$0xff] %v779_v45  ;;  %v642_v47 = vpop.f32.mrb[4].mxu0  ;;  %v591_v49 = vpop.f32.mrb[5].mxu1 }
 0x11f   :  { %v643_v48 = vadd.f32 %v642_v47, %v589_v46  ;;  %v644_v50 = vpop.f32.mrb[5].mxu0  ;;  %v593_v52 = vpop.f32.mrb[6].mxu1 }
 0x120   :  { %v645_v51 = vadd.f32 %v644_v50, %v591_v49  ;;  %v646_v53 = vpop.f32.mrb[6].mxu0  ;;  %v595_v55 = vpop.f32.mrb[7].mxu1 }
 0x121   :  { %v647_v54 = vadd.f32 %v646_v53, %v593_v52  ;;  %v648_v56 = vpop.f32.mrb[7].mxu0 }
 0x122   :  { %v780_v57 = vpack.c.bf16 %v645_v51, %v643_v48  ;;  %v649_v58 = vadd.f32 %v648_v56, %v595_v55 }
 0x124   :  { %704 = vst [vmem:[%s1205_s4 + $0x10] sm:$0xff] %v780_v57  ;;  %v781_v59 = vpack.c.bf16 %v649_v58, %v647_v54 }
 0x126   :  { %705 = vst [vmem:[%s1205_s4 + $0x18] sm:$0xff] %v781_v59 }

// kernel: densenet121_forward.159
= control target key start
LH: loop header
LB: loop body
LE: loop exit
PB: predicated region body
PF: predicated region fallthrough
CT: control target
= control target key end

     0   :  { %v34_v5 = vlaneseq  ;;  %s419_s1 = inlined_call_operand.vmem [shape: bf16[256,128], index: 1, kind: input, shape index: {}]   ;;  %s420_s0 = inlined_call_operand.vmem [shape: bf16[8,256], index: 0, kind: input, shape index: {}]   ;;  %s421_s2 = inlined_call_operand.vmem [shape: f32[1,256], index: 2, kind: input, shape index: {}]   ;;  %s422_s3 = inlined_call_operand.vmem [shape: f32[1,256], index: 3, kind: input, shape index: {}]   ;;  %s423_s4 = inlined_call_operand.vmem [shape: f32[1,128], index: 4, kind: input, shape index: {}]   ;;  %s424_s5 = inlined_call_operand.vmem [shape: f32[1,128], index: 5, kind: input, shape index: {}]   ;;  %s425_s6 = inlined_call_operand.vmem [shape: bf16[8,128], index: 6, kind: output, shape index: {}]  }
   0x1   :  { %v302_v0 = vld [vmem:[%s419_s1 + $0x40] sm:$0xff]   ;;  %v304_v2 = vld [vmem:[%s419_s1 + $0x48] sm:$0xff]   ;;  %v306_v4 = vld [vmem:[%s419_s1 + $0x50] sm:$0xff]  }
   0x2   :  { %v303_v1 = vld [vmem:[%s419_s1] sm:$0xff]   ;;  %280 = vmatprep.subr.bf16.mxu0 %v302_v0  ;;  %v305_v3 = vld [vmem:[%s419_s1 + $0x8] sm:$0xff]   ;;  %v307_v6 = vld [vmem:[%s419_s1 + $0x10] sm:$0xff]   ;;  %v35_v8 = vshrl.u32 %v34_v5, 7 }
   0x3   :  { %281 = vmatpush3.bf16.msra.mxu0 %v303_v1  ;;  %v308_v7 = vld [vmem:[%s419_s1 + $0x58] sm:$0xff]   ;;  %v310_v10 = vld [vmem:[%s419_s1 + $0x60] sm:$0xff]   ;;  %v312_v14 = vld [vmem:[%s419_s1 + $0x68] sm:$0xff]  }
   0x4   :  { %282 = vmatprep.subr.bf16.mxu0 %v304_v2  ;;  %v309_v9 = vld [vmem:[%s419_s1 + $0x18] sm:$0xff]   ;;  %v36_v11 = vsub.s32 0, %v35_v8  ;;  %v40_v12 = vsub.s32 1, %v35_v8  ;;  %v311_v13 = vld [vmem:[%s419_s1 + $0x20] sm:$0xff]   ;;  %v313_v24 = vld [vmem:[%s419_s1 + $0x28] sm:$0xff]  }
   0x5   :  { %v29_v15 = vld [vmem:[%s420_s0] sm:$0xff]  ;;  %v314_v27 = vld [vmem:[%s419_s1 + $0x70] sm:$0xff]   ;;  %v316_v32 = vld [vmem:[%s419_s1 + $0x78] sm:$0xff]  }
   0x6   :  { %v32_v16 = vld [vmem:[%s421_s2] sm:$0x3]  ;;  %v30_v18 = vunpack.c.l.bf16 %v29_v15  ;;  %v31_v19 = vunpack.c.h.bf16 %v29_v15  ;;  %v315_v30 = vld [vmem:[%s419_s1 + $0x30] sm:$0xff]   ;;  %v317_v35 = vld [vmem:[%s419_s1 + $0x38] sm:$0xff]  }
   0x7   :  { %283 = vmatpush3.bf16.msra.mxu0 %v305_v3  ;;  %v46_v17 = vld [vmem:[%s422_s3] sm:$0x3]  ;;  %v37_v20 = vrot.slane %v32_v16, %v36_v11  ;;  %v41_v21 = vrot.slane %v32_v16, %v40_v12 }
   0x8   :  { %284 = vmatprep.subr.bf16.mxu0 %v306_v4  ;;  %v51_v22 = vrot.slane %v46_v17, %v36_v11  ;;  %v55_v23 = vrot.slane %v46_v17, %v40_v12  ;;  %v278_v39 = vld [vmem:[%s423_s4] ss:$0 sm:$0xff] }
   0x9   :  { %v45_v25 = vmul.f32 %v41_v21, %v31_v19  ;;  %v44_v26 = vmul.f32 %v37_v20, %v30_v18  ;;  %v279_v42 = vld [vmem:[%s424_s5] ss:$0 sm:$0xff] }
   0xb   :  { %285 = vmatpush3.bf16.msra.mxu0 %v307_v6  ;;  %v59_v28 = vadd.f32 %v55_v23, %v45_v25  ;;  %v58_v29 = vadd.f32 %v51_v22, %v44_v26 }
   0xc   :  { %286 = vmatprep.subr.bf16.mxu0 %v308_v7 }
   0xd   :  { %v61_v31 = vmax.f32 %v59_v28, 0.0  ;;  %v60_v34 = vmax.f32 %v58_v29, 0.0 }
   0xf   :  { %287 = vmatpush3.bf16.msra.mxu0 %v309_v9  ;;  %v63_v33 = vpack.c.bf16 %v61_v31, %v61_v31  ;;  %v62_v36 = vpack.c.bf16 %v60_v34, %v60_v34 }
  0x10   :  { %288 = vmatprep.subr.bf16.mxu0 %v310_v10 }
  0x11   :  { %225 = vmatprep.mubr.bf16.mxu0 %v63_v33 }
  0x13   :  { %289 = vmatpush3.bf16.msra.mxu0 %v311_v13 }
  0x14   :  { %290 = vmatprep.subr.bf16.mxu0 %v312_v14 }
  0x17   :  { %291 = vmatpush3.bf16.msra.mxu0 %v313_v24 }
  0x18   :  { %292 = vmatprep.subr.bf16.mxu0 %v314_v27 }
  0x1b   :  { %293 = vmatpush3.bf16.msra.mxu0 %v315_v30 }
  0x1c   :  { %294 = vmatprep.subr.bf16.mxu0 %v316_v32 }
  0x1f   :  { %295 = vmatpush3.bf16.msra.mxu0 %v317_v35 }
  0x22   :  { %226 = vmatmul.mubr.bf16.vlgmr.msra.gmra.mrb[0].mxu0 %v62_v36 }
  0xf5   :  { %v296_v37 = vpop.f32.mrb[0].mxu0 }
  0xf6   :  { %v297_v38 = vpop.f32.mrb[1].mxu0 }
  0xf7   :  { %v298_v40 = vadd.f32 %v297_v38, %v296_v37  ;;  %v299_v41 = vpop.f32.mrb[2].mxu0 }
  0xf8   :  { %v300_v43 = vpop.f32.mrb[3].mxu0 }
  0xf9   :  { %v246_v44 = vmul.f32 %v298_v40, %v278_v39 }
  0xfb   :  { %v254_v45 = vadd.f32 %v279_v42, %v246_v44 }
  0xfd   :  { %v255_v46 = vmax.f32 %v254_v45, 0.0 }
  0xff   :  { %v256_v47 = vpack.c.bf16 %v255_v46, %v255_v46 }
 0x101   :  { %257 = vst [vmem:[%s425_s6] sm:$0xf] %v256_v47 }

// kernel: densenet121_forward.160
= control target key start
LH: loop header
LB: loop body
LE: loop exit
PB: predicated region body
PF: predicated region fallthrough
CT: control target
= control target key end

     0   :  { %s797_s9 = smov 0   ;;  %s799_s10 = smov 0   ;;  %s869_s0 = inlined_call_operand.vmem [shape: bf16[8,1152], index: 0, kind: input, shape index: {}]   ;;  %s870_s1 = inlined_call_operand.vmem [shape: bf16[1152,128], index: 1, kind: input, shape index: {}]   ;;  %s871_s2 = inlined_call_operand.vmem [shape: bf16[8,128], index: 2, kind: output, shape index: {}]  }
   0x1   :  { %s801_s11 = smov 0  }
   0x2 LB: > { %s24_s12 = sadd.s32 1, %s773_s10  ;;  %p615_p0 = scmp.ge.s32.totalorder %s777_s11, 1  ;;  %s777_s11 = sphi %s801_s11, %s12_s11   ;;  %s773_s10 = sphi %s799_s10, %s873_s10   ;;  %s769_s9 = sphi %s797_s9, %s872_s9  }
   0x3   : > { %p25_p1 = scmp.ge.s32.totalorder %s24_s12, 3  ;;  %p156_p2 = scmp.lt.s32.totalorder %s777_s11, 4 }
   0x5   : > { %s875_s12 = smov (%p25_p1, %s24_s12), 0  ;;  %p157_p3 = pnand %p615_p0, %p156_p2 }
   0x6   : > { %s192_s13 = smul.u32 (!%p157_p3), 3, %s769_s9  ;;  %p618_p6 = scmp.ne.s32.totalorder (!%p157_p3), %s769_s9, 0 }
   0x7   : > { %160 = sbr.rel (%p157_p3) target bundleno = 287 (0x11f), region = 28 }
   0x8   : > { %s202_s14 = smul.u32 (!%p157_p3), 48, %s769_s9  ;;  %p195_p4 = scmp.lt.s32.totalorder (!%p157_p3), %s192_s13, 8 }
   0xa   : > { %p203_p5 = scmp.lt.s32.totalorder (!%p157_p3), %s202_s14, 143 }
   0xe   : > { %s877_s13 = smov (!%p195_p4, %s192_s13), 8  ;;  %s879_s14 = smov (!%p203_p5, %s202_s14), 143 }
   0xf   : > { %s616_s15 = sshll.u32 %s877_s13, 2  ;;  %s617_s19 = sshll.u32 %s879_s14, 2  ;;  %v779_v0 = vmov (!%p618_p6), 0.0  }
  0x10   : > { %s822_s18 = scalar_lea.vmem %s869_s0, %s616_s15  ;;  %s827_s22 = scalar_lea.vmem %s870_s1, %s617_s19  ;;  %223 = vst [vmem:[#allocation2] sm:$0xff] (!%p618_p6), %v779_v0 }
  0x11   : > { %222 = sbr.rel (%p618_p6) target bundleno = 24 (0x18), region = 32 }
  0x18 PF: > { %v728_v1 = vld [vmem:[%s827_s22 + $0x40] sm:$0xff]   ;;  %v780_v2 = vmov 0.0   ;;  %vm781_vm0 = vmmov 0   ;;  %v731_v5 = vld [vmem:[%s827_s22 + $0x48] sm:$0xff]   ;;  %v734_v8 = vld [vmem:[%s827_s22 + $0x50] sm:$0xff]   ;;  %p646_p7 = scmp.ne.s32.totalorder %s769_s9, 2 }
  0x19   : > { %681 = vmatprep.subr.bf16.mxu1 %v780_v2  ;;  %v729_v3 = vld [vmem:[%s827_s22] sm:$0xff]   ;;  %650 = vmatprep.subr.bf16.mxu0 %v728_v1  ;;  %v732_v6 = vld [vmem:[%s827_s22 + $0x8] sm:$0xff]   ;;  %v735_v9 = vld [vmem:[%s827_s22 + $0x10] sm:$0xff]  }
  0x1a   : > { %v730_v4 = vld [vmem:[%s827_s22 + $0x80] sm:$0xff]   ;;  %697 = vmatprep.mubr.msk.bf16.mxu1 %vm781_vm0, %v780_v2  ;;  %651 = vmatpush3.bf16.msra.mxu0 %v729_v3  ;;  %v733_v7 = vld [vmem:[%s827_s22 + $0x88] sm:$0xff]   ;;  %v736_v10 = vld [vmem:[%s827_s22 + $0x90] sm:$0xff]  }
  0x1b   : > { %682 = vmatpush3.bf16.msra.mxu1 %v730_v4  ;;  %652 = vmatprep.subr.bf16.mxu0 %v731_v5  ;;  %v737_v11 = vld [vmem:[%s827_s22 + $0x58] sm:$0xff]   ;;  %v740_v14 = vld [vmem:[%s827_s22 + $0x60] sm:$0xff]   ;;  %v743_v17 = vld [vmem:[%s827_s22 + $0x68] sm:$0xff]  }
  0x1c   : > { %683 = vmatprep.subr.bf16.mxu1 %v780_v2  ;;  %v738_v12 = vld [vmem:[%s827_s22 + $0x18] sm:$0xff]   ;;  %v741_v15 = vld [vmem:[%s827_s22 + $0x20] sm:$0xff]   ;;  %v744_v18 = vld [vmem:[%s827_s22 + $0x28] sm:$0xff]  }
  0x1d   : > { %v739_v13 = vld [vmem:[%s827_s22 + $0x98] sm:$0xff]   ;;  %v742_v16 = vld [vmem:[%s827_s22 + $0xa0] sm:$0xff]   ;;  %v745_v19 = vld [vmem:[%s827_s22 + $0xa8] sm:$0xff]  }
  0x1e   : > { %653 = vmatpush3.bf16.msra.mxu0 %v732_v6  ;;  %v746_v20 = vld [vmem:[%s827_s22 + $0x70] sm:$0xff]   ;;  %v749_v23 = vld [vmem:[%s827_s22 + $0x78] sm:$0xff]   ;;  %v224_v24 = vld [vmem:[%s822_s18] sm:$0xff] }
  0x1f   : > { %684 = vmatpush3.bf16.msra.mxu1 %v733_v7  ;;  %654 = vmatprep.subr.bf16.mxu0 %v734_v8  ;;  %v747_v21 = vld [vmem:[%s827_s22 + $0x30] sm:$0xff]   ;;  %v620_v25 = vcombine.high %v224_v24, %v224_v24  ;;  %v750_v26 = vld [vmem:[%s827_s22 + $0x38] sm:$0xff]   ;;  %v619_v28 = vcombine.low %v224_v24, %v224_v24  ;;  %v754_v29 = vld [vmem:[%s822_s18 + $0x8] ss:$0 sps:$4 sm:$0xff]  }
  0x20   : > { %685 = vmatprep.subr.bf16.mxu1 %v780_v2  ;;  %v748_v22 = vld [vmem:[%s827_s22 + $0xb0] sm:$0xff]   ;;  %v751_v27 = vld [vmem:[%s827_s22 + $0xb8] sm:$0xff]   ;;  %v226_v36 = vld [vmem:[#allocation2] sm:$0xff] }
  0x21   : > { %462 = vmatprep.mubr.bf16.mxu0 %v620_v25 }
  0x22   : > { %655 = vmatpush3.bf16.msra.mxu0 %v735_v9 }
  0x23   : > { %686 = vmatpush3.bf16.msra.mxu1 %v736_v10  ;;  %656 = vmatprep.subr.bf16.mxu0 %v737_v11 }
  0x24   : > { %687 = vmatprep.subr.bf16.mxu1 %v780_v2 }
  0x26   : > { %657 = vmatpush3.bf16.msra.mxu0 %v738_v12 }
  0x27   : > { %688 = vmatpush3.bf16.msra.mxu1 %v739_v13  ;;  %658 = vmatprep.subr.bf16.mxu0 %v740_v14 }
  0x28   : > { %689 = vmatprep.subr.bf16.mxu1 %v780_v2 }
  0x2a   : > { %659 = vmatpush3.bf16.msra.mxu0 %v741_v15 }
  0x2b   : > { %690 = vmatpush3.bf16.msra.mxu1 %v742_v16  ;;  %660 = vmatprep.subr.bf16.mxu0 %v743_v17 }
  0x2c   : > { %691 = vmatprep.subr.bf16.mxu1 %v780_v2 }
  0x2e   : > { %661 = vmatpush3.bf16.msra.mxu0 %v744_v18 }
  0x2f   : > { %692 = vmatpush3.bf16.msra.mxu1 %v745_v19  ;;  %662 = vmatprep.subr.bf16.mxu0 %v746_v20 }
  0x30   : > { %693 = vmatprep.subr.bf16.mxu1 %v780_v2 }
  0x32   : > { %663 = vmatpush3.bf16.msra.mxu0 %v747_v21 }
  0x33   : > { %694 = vmatpush3.bf16.msra.mxu1 %v748_v22  ;;  %664 = vmatprep.subr.bf16.mxu0 %v749_v23 }
  0x34   : > { %695 = vmatprep.subr.bf16.mxu1 %v780_v2 }
  0x36   : > { %665 = vmatpush3.bf16.msra.mxu0 %v750_v26 }
  0x37   : > { %696 = vmatpush3.bf16.msra.mxu1 %v751_v27 }
  0x39   : > { %463 = vmatmul.mubr.bf16.vlgmr.msra.gmra.mrb[0].mxu0 %v619_v28 }
  0x3a   : > { %698 = vmatmul.mubr.bf16.vlgmr.msra.gmra.mrb[0].mxu1 %v754_v29 }
 0x10c   : > { %v666_v30 = vpop.f32.mrb[0].mxu0 }
 0x10d   : > { %v504_v31 = vpop.f32.mrb[0].mxu1  ;;  %v667_v32 = vpop.f32.mrb[1].mxu0 }
 0x10e   : > { %v668_v33 = vadd.f32 %v667_v32, %v666_v30  ;;  %v699_v34 = vpop.f32.mrb[1].mxu1  ;;  %v669_v35 = vpop.f32.mrb[2].mxu0  ;;  %515 = sbr.rel (%p646_p7) target bundleno = 287 (0x11f), region = 36 }
 0x10f   : > { %v507_v37 = vpop.f32.mrb[2].mxu1  ;;  %v670_v38 = vpop.f32.mrb[3].mxu0 }
 0x110   : > { %v505_v39 = vadd.f32 %v668_v33, %v504_v31  ;;  %v700_v40 = vpop.f32.mrb[3].mxu1 }
 0x112   : > { %v510_v41 = vadd.f32 %v505_v39, %v226_v36 }
 0x114   : > { %511 = vst [vmem:[#allocation2] sm:$0xff] %v510_v41 }
 0x11b   : > { %v516_v42 = vld [vmem:[#allocation2] sm:$0xff] }
 0x11c   : > { %v517_v43 = vpack.c.bf16 %v516_v42, %v516_v42 }
 0x11e   : > { %518 = vst [vmem:[%s871_s2] sm:$0xf] %v517_v43 }
 0x11f PF: > { %s12_s11 = sadd.s32 1, %s777_s11   ;;  %s872_s9 = smov %s773_s10 }
 0x120   : > { %p9_p8 = scmp.ge.s32.totalorder %s12_s11, 5   ;;  %s873_s10 = smov %s875_s12 }
 0x122   :  { %11 = sbr.rel (!%p9_p8) target bundleno = 2 (0x2), region = 69 }

// kernel: densenet121_forward.161
= control target key start
LH: loop header
LB: loop body
LE: loop exit
PB: predicated region body
PF: predicated region fallthrough
CT: control target
= control target key end

     0   :  { %v485_v1 = vmov 0.0   ;;  %vm486_vm0 = vmmov 0   ;;  %v36_v14 = vlaneseq  ;;  %s624_s1 = inlined_call_operand.vmem [shape: bf16[384,128], index: 1, kind: input, shape index: {}]   ;;  %s625_s0 = inlined_call_operand.vmem [shape: bf16[8,384], index: 0, kind: input, shape index: {}]   ;;  %s626_s2 = inlined_call_operand.vmem [shape: f32[1,384], index: 2, kind: input, shape index: {}]   ;;  %s627_s3 = inlined_call_operand.vmem [shape: f32[1,384], index: 3, kind: input, shape index: {}]   ;;  %s628_s4 = inlined_call_operand.vmem [shape: f32[1,128], index: 4, kind: input, shape index: {}]   ;;  %s629_s5 = inlined_call_operand.vmem [shape: f32[1,128], index: 5, kind: input, shape index: {}]   ;;  %s630_s6 = inlined_call_operand.vmem [shape: bf16[8,128], index: 6, kind: output, shape index: {}]  }
   0x1   :  { %v461_v0 = vld [vmem:[%s624_s1 + $0x40] sm:$0xff]   ;;  %439 = vmatprep.subr.bf16.mxu1 %v485_v1  ;;  %455 = vmatprep.mubr.msk.bf16.mxu1 %vm486_vm0, %v485_v1  ;;  %v464_v4 = vld [vmem:[%s624_s1 + $0x48] sm:$0xff]   ;;  %v467_v7 = vld [vmem:[%s624_s1 + $0x50] sm:$0xff]  }
   0x2   :  { %v462_v2 = vld [vmem:[%s624_s1] sm:$0xff]   ;;  %408 = vmatprep.subr.bf16.mxu0 %v461_v0  ;;  %v465_v5 = vld [vmem:[%s624_s1 + $0x8] sm:$0xff]   ;;  %v468_v8 = vld [vmem:[%s624_s1 + $0x10] sm:$0xff]   ;;  %v37_v18 = vshrl.u32 %v36_v14, 7 }
   0x3   :  { %v463_v3 = vld [vmem:[%s624_s1 + $0x80] sm:$0xff]   ;;  %409 = vmatpush3.bf16.msra.mxu0 %v462_v2  ;;  %v466_v6 = vld [vmem:[%s624_s1 + $0x88] sm:$0xff]   ;;  %v469_v9 = vld [vmem:[%s624_s1 + $0x90] sm:$0xff]  }
   0x4   :  { %440 = vmatpush3.bf16.msra.mxu1 %v463_v3  ;;  %410 = vmatprep.subr.bf16.mxu0 %v464_v4  ;;  %v470_v10 = vld [vmem:[%s624_s1 + $0x58] sm:$0xff]   ;;  %v473_v13 = vld [vmem:[%s624_s1 + $0x60] sm:$0xff]   ;;  %v476_v17 = vld [vmem:[%s624_s1 + $0x68] sm:$0xff]   ;;  %v42_v22 = vsub.s32 1, %v37_v18  ;;  %v38_v24 = vsub.s32 0, %v37_v18  ;;  %v46_v26 = vsub.s32 2, %v37_v18 }
   0x5   :  { %441 = vmatprep.subr.bf16.mxu1 %v485_v1  ;;  %v471_v11 = vld [vmem:[%s624_s1 + $0x18] sm:$0xff]   ;;  %v474_v15 = vld [vmem:[%s624_s1 + $0x20] sm:$0xff]   ;;  %v477_v19 = vld [vmem:[%s624_s1 + $0x28] sm:$0xff]  }
   0x6   :  { %v472_v12 = vld [vmem:[%s624_s1 + $0x98] sm:$0xff]   ;;  %v475_v16 = vld [vmem:[%s624_s1 + $0xa0] sm:$0xff]   ;;  %v478_v20 = vld [vmem:[%s624_s1 + $0xa8] sm:$0xff]  }
   0x7   :  { %411 = vmatpush3.bf16.msra.mxu0 %v465_v5  ;;  %v479_v21 = vld [vmem:[%s624_s1 + $0x70] sm:$0xff]   ;;  %v482_v27 = vld [vmem:[%s624_s1 + $0x78] sm:$0xff]   ;;  %v29_v28 = vld [vmem:[%s625_s0] sm:$0xff] }
   0x8   :  { %442 = vmatpush3.bf16.msra.mxu1 %v466_v6  ;;  %412 = vmatprep.subr.bf16.mxu0 %v467_v7  ;;  %v480_v23 = vld [vmem:[%s624_s1 + $0x30] sm:$0xff]   ;;  %v30_v29 = vld [vmem:[%s625_s0 + $0x8] sm:$0xf]  ;;  %v34_v30 = vld [vmem:[%s626_s2] sm:$0x7]  ;;  %v31_v31 = vunpack.c.l.bf16 %v29_v28  ;;  %v32_v32 = vunpack.c.h.bf16 %v29_v28 }
   0x9   :  { %443 = vmatprep.subr.bf16.mxu1 %v485_v1  ;;  %v481_v25 = vld [vmem:[%s624_s1 + $0xb0] sm:$0xff]   ;;  %v33_v33 = vunpack.c.l.bf16 %v30_v29  ;;  %v43_v34 = vrot.slane %v34_v30, %v42_v22  ;;  %v54_v35 = vld [vmem:[%s627_s3] sm:$0x7]  ;;  %v39_v37 = vrot.slane %v34_v30, %v38_v24  ;;  %v47_v39 = vrot.slane %v34_v30, %v46_v26  ;;  %v483_v40 = vld [vmem:[%s624_s1 + $0x38] sm:$0xff]  }
   0xa   :  { %v63_v36 = vrot.slane %v54_v35, %v42_v22  ;;  %v59_v38 = vrot.slane %v54_v35, %v38_v24  ;;  %v67_v42 = vrot.slane %v54_v35, %v46_v26  ;;  %v484_v43 = vld [vmem:[%s624_s1 + $0xb8] sm:$0xff]   ;;  %v406_v62 = vld [vmem:[%s628_s4] ss:$0 sm:$0xff] }
   0xb   :  { %413 = vmatpush3.bf16.msra.mxu0 %v468_v8  ;;  %v52_v41 = vmul.f32 %v43_v34, %v32_v32  ;;  %v51_v44 = vmul.f32 %v39_v37, %v31_v31  ;;  %v53_v45 = vmul.f32 %v47_v39, %v33_v33  ;;  %v407_v2 = vld [vmem:[%s629_s5] ss:$0 sm:$0xff] }
   0xc   :  { %444 = vmatpush3.bf16.msra.mxu1 %v469_v9  ;;  %414 = vmatprep.subr.bf16.mxu0 %v470_v10 }
   0xd   :  { %445 = vmatprep.subr.bf16.mxu1 %v485_v1  ;;  %v72_v46 = vadd.f32 %v63_v36, %v52_v41  ;;  %v71_v47 = vadd.f32 %v59_v38, %v51_v44  ;;  %v73_v48 = vadd.f32 %v67_v42, %v53_v45 }
   0xf   :  { %415 = vmatpush3.bf16.msra.mxu0 %v471_v11  ;;  %v75_v49 = vmax.f32 %v72_v46, 0.0  ;;  %v74_v50 = vmax.f32 %v71_v47, 0.0  ;;  %v76_v51 = vmax.f32 %v73_v48, 0.0 }
  0x10   :  { %446 = vmatpush3.bf16.msra.mxu1 %v472_v12  ;;  %416 = vmatprep.subr.bf16.mxu0 %v473_v13 }
  0x11   :  { %447 = vmatprep.subr.bf16.mxu1 %v485_v1  ;;  %v78_v52 = vpack.c.bf16 %v75_v49, %v75_v49  ;;  %v77_v53 = vpack.c.bf16 %v74_v50, %v74_v50  ;;  %v79_v54 = vpack.c.bf16 %v76_v51, %v76_v51 }
  0x13   :  { %417 = vmatpush3.bf16.msra.mxu0 %v474_v15  ;;  %305 = vmatprep.mubr.bf16.mxu0 %v78_v52 }
  0x14   :  { %448 = vmatpush3.bf16.msra.mxu1 %v475_v16  ;;  %418 = vmatprep.subr.bf16.mxu0 %v476_v17 }
  0x15   :  { %449 = vmatprep.subr.bf16.mxu1 %v485_v1 }
  0x17   :  { %419 = vmatpush3.bf16.msra.mxu0 %v477_v19 }
  0x18   :  { %450 = vmatpush3.bf16.msra.mxu1 %v478_v20  ;;  %420 = vmatprep.subr.bf16.mxu0 %v479_v21 }
  0x19   :  { %451 = vmatprep.subr.bf16.mxu1 %v485_v1 }
  0x1b   :  { %421 = vmatpush3.bf16.msra.mxu0 %v480_v23 }
  0x1c   :  { %452 = vmatpush3.bf16.msra.mxu1 %v481_v25  ;;  %422 = vmatprep.subr.bf16.mxu0 %v482_v27 }
  0x1d   :  { %453 = vmatprep.subr.bf16.mxu1 %v485_v1 }
  0x1f   :  { %423 = vmatpush3.bf16.msra.mxu0 %v483_v40 }
  0x20   :  { %454 = vmatpush3.bf16.msra.mxu1 %v484_v43 }
  0x22   :  { %306 = vmatmul.mubr.bf16.vlgmr.msra.gmra.mrb[0].mxu0 %v77_v53 }
  0x23   :  { %456 = vmatmul.mubr.bf16.vlgmr.msra.gmra.mrb[0].mxu1 %v79_v54 }
  0xf5   :  { %v424_v55 = vpop.f32.mrb[0].mxu0 }
  0xf6   :  { %v347_v56 = vpop.f32.mrb[0].mxu1  ;;  %v425_v57 = vpop.f32.mrb[1].mxu0 }
  0xf7   :  { %v457_v58 = vpop.f32.mrb[1].mxu1  ;;  %v426_v59 = vadd.f32 %v425_v57, %v424_v55  ;;  %v427_v60 = vpop.f32.mrb[2].mxu0 }
  0xf8   :  { %v350_v61 = vpop.f32.mrb[2].mxu1  ;;  %v428_v63 = vpop.f32.mrb[3].mxu0 }
  0xf9   :  { %v458_v0 = vpop.f32.mrb[3].mxu1  ;;  %v348_v1 = vadd.f32 %v426_v59, %v347_v56 }
  0xfb   :  { %v366_v3 = vmul.f32 %v406_v62, %v348_v1 }
  0xfd   :  { %v374_v4 = vadd.f32 %v407_v2, %v366_v3 }
  0xff   :  { %v375_v5 = vmax.f32 %v374_v4, 0.0 }
 0x101   :  { %v376_v6 = vpack.c.bf16 %v375_v5, %v375_v5 }
 0x103   :  { %377 = vst [vmem:[%s630_s6] sm:$0xf] %v376_v6 }

// kernel: tile.180
= control target key start
LH: loop header
LB: loop body
LE: loop exit
PB: predicated region body
PF: predicated region fallthrough
CT: control target
= control target key end

     0   :  { %s70_s0 = inlined_call_operand.vmem [shape: f32[544], index: 0, kind: input, shape index: {}]   ;;  %s71_s1 = inlined_call_operand.vmem [shape: f32[1,544], index: 1, kind: output, shape index: {}]  }
   0x1   :  { %v4_v0 = vld [vmem:[%s70_s0] ss:$0 sm:$0xff]  ;;  %v22_v1 = vld [vmem:[%s70_s0 + $0x1] ss:$0 sm:$0xff]  ;;  %v24_v2 = vld [vmem:[%s70_s0 + $0x2] ss:$0 sm:$0xff] }
   0x2   :  { %5 = vst [vmem:[%s71_s1] sm:$0x1] %v4_v0  ;;  %23 = vst [vmem:[%s71_s1 + $0x1] sm:$0x1] %v22_v1  ;;  %v26_v3 = vld [vmem:[%s70_s0 + $0x3] ss:$0 sm:$0xff] }
   0x3   :  { %25 = vst [vmem:[%s71_s1 + $0x2] sm:$0x1] %v24_v2  ;;  %v28_v4 = vld [vmem:[%s70_s0 + $0x4] ss:$0 sm:$0xff]  ;;  %27 = vst [vmem:[%s71_s1 + $0x3] sm:$0x1] %v26_v3 }
   0x4   :  { %29 = vst [vmem:[%s71_s1 + $0x4] sm:$0x1] %v28_v4 }

// kernel: tile.182
= control target key start
LH: loop header
LB: loop body
LE: loop exit
PB: predicated region body
PF: predicated region fallthrough
CT: control target
= control target key end

     0   :  { %s70_s0 = inlined_call_operand.vmem [shape: f32[576], index: 0, kind: input, shape index: {}]   ;;  %s71_s1 = inlined_call_operand.vmem [shape: f32[1,576], index: 1, kind: output, shape index: {}]  }
   0x1   :  { %v4_v0 = vld [vmem:[%s70_s0] ss:$0 sm:$0xff]  ;;  %v22_v1 = vld [vmem:[%s70_s0 + $0x1] ss:$0 sm:$0xff]  ;;  %v24_v2 = vld [vmem:[%s70_s0 + $0x2] ss:$0 sm:$0xff] }
   0x2   :  { %5 = vst [vmem:[%s71_s1] sm:$0x1] %v4_v0  ;;  %23 = vst [vmem:[%s71_s1 + $0x1] sm:$0x1] %v22_v1  ;;  %v26_v3 = vld [vmem:[%s70_s0 + $0x3] ss:$0 sm:$0xff] }
   0x3   :  { %25 = vst [vmem:[%s71_s1 + $0x2] sm:$0x1] %v24_v2  ;;  %v28_v4 = vld [vmem:[%s70_s0 + $0x4] ss:$0 sm:$0xff]  ;;  %27 = vst [vmem:[%s71_s1 + $0x3] sm:$0x1] %v26_v3 }
   0x4   :  { %29 = vst [vmem:[%s71_s1 + $0x4] sm:$0x1] %v28_v4 }

// kernel: densenet121_forward.169
= control target key start
LH: loop header
LB: loop body
LE: loop exit
PB: predicated region body
PF: predicated region fallthrough
CT: control target
= control target key end

     0   :  { %v37_v21 = vlaneseq  ;;  %s723_s1 = inlined_call_operand.vmem [shape: bf16[512,128], index: 1, kind: input, shape index: {}]   ;;  %s724_s0 = inlined_call_operand.vmem [shape: bf16[8,512], index: 0, kind: input, shape index: {}]   ;;  %s725_s2 = inlined_call_operand.vmem [shape: f32[1,512], index: 2, kind: input, shape index: {}]   ;;  %s726_s3 = inlined_call_operand.vmem [shape: f32[1,512], index: 3, kind: input, shape index: {}]   ;;  %s727_s4 = inlined_call_operand.vmem [shape: f32[1,128], index: 4, kind: input, shape index: {}]   ;;  %s728_s5 = inlined_call_operand.vmem [shape: f32[1,128], index: 5, kind: input, shape index: {}]   ;;  %s729_s6 = inlined_call_operand.vmem [shape: bf16[8,128], index: 6, kind: output, shape index: {}]  }
   0x1   :  { %v539_v0 = vld [vmem:[%s723_s1 + $0x40] sm:$0xff]   ;;  %v543_v4 = vld [vmem:[%s723_s1 + $0x48] sm:$0xff]   ;;  %v547_v8 = vld [vmem:[%s723_s1 + $0x50] sm:$0xff]  }
   0x2   :  { %v540_v1 = vld [vmem:[%s723_s1 + $0xc0] sm:$0xff]   ;;  %495 = vmatprep.subr.bf16.mxu0 %v539_v0  ;;  %v544_v5 = vld [vmem:[%s723_s1 + $0xc8] sm:$0xff]   ;;  %v548_v9 = vld [vmem:[%s723_s1 + $0xd0] sm:$0xff]   ;;  %v38_v26 = vshrl.u32 %v37_v21, 7 }
   0x3   :  { %v541_v2 = vld [vmem:[%s723_s1] sm:$0xff]   ;;  %517 = vmatprep.subr.bf16.mxu1 %v540_v1  ;;  %v545_v6 = vld [vmem:[%s723_s1 + $0x8] sm:$0xff]   ;;  %v549_v10 = vld [vmem:[%s723_s1 + $0x10] sm:$0xff]  }
   0x4   :  { %v542_v3 = vld [vmem:[%s723_s1 + $0x80] sm:$0xff]   ;;  %496 = vmatpush3.bf16.msra.mxu0 %v541_v2  ;;  %v546_v7 = vld [vmem:[%s723_s1 + $0x88] sm:$0xff]   ;;  %v550_v11 = vld [vmem:[%s723_s1 + $0x90] sm:$0xff]   ;;  %v43_v31 = vsub.s32 1, %v38_v26  ;;  %v51_v33 = vsub.s32 3, %v38_v26  ;;  %v39_v35 = vsub.s32 0, %v38_v26 }
   0x5   :  { %518 = vmatpush3.bf16.msra.mxu1 %v542_v3  ;;  %497 = vmatprep.subr.bf16.mxu0 %v543_v4  ;;  %v551_v12 = vld [vmem:[%s723_s1 + $0x58] sm:$0xff]   ;;  %v555_v16 = vld [vmem:[%s723_s1 + $0x60] sm:$0xff]   ;;  %v559_v20 = vld [vmem:[%s723_s1 + $0x68] sm:$0xff]   ;;  %v47_v37 = vsub.s32 2, %v38_v26 }
   0x6   :  { %519 = vmatprep.subr.bf16.mxu1 %v544_v5  ;;  %v552_v13 = vld [vmem:[%s723_s1 + $0xd8] sm:$0xff]   ;;  %v556_v17 = vld [vmem:[%s723_s1 + $0xe0] sm:$0xff]   ;;  %v560_v22 = vld [vmem:[%s723_s1 + $0xe8] sm:$0xff]  }
   0x7   :  { %v553_v14 = vld [vmem:[%s723_s1 + $0x18] sm:$0xff]   ;;  %v557_v18 = vld [vmem:[%s723_s1 + $0x20] sm:$0xff]   ;;  %v561_v23 = vld [vmem:[%s723_s1 + $0x28] sm:$0xff]  }
   0x8   :  { %498 = vmatpush3.bf16.msra.mxu0 %v545_v6  ;;  %v554_v15 = vld [vmem:[%s723_s1 + $0x98] sm:$0xff]   ;;  %v558_v19 = vld [vmem:[%s723_s1 + $0xa0] sm:$0xff]   ;;  %v562_v24 = vld [vmem:[%s723_s1 + $0xa8] sm:$0xff]  }
   0x9   :  { %520 = vmatpush3.bf16.msra.mxu1 %v546_v7  ;;  %499 = vmatprep.subr.bf16.mxu0 %v547_v8  ;;  %v563_v25 = vld [vmem:[%s723_s1 + $0x70] sm:$0xff]   ;;  %v567_v30 = vld [vmem:[%s723_s1 + $0x78] sm:$0xff]   ;;  %v29_v38 = vld [vmem:[%s724_s0] sm:$0xff] }
   0xa   :  { %521 = vmatprep.subr.bf16.mxu1 %v548_v9  ;;  %v564_v27 = vld [vmem:[%s723_s1 + $0xf0] sm:$0xff]   ;;  %v568_v32 = vld [vmem:[%s723_s1 + $0xf8] sm:$0xff]   ;;  %v35_v39 = vld [vmem:[%s725_s2] sm:$0xf]  ;;  %v31_v41 = vunpack.c.l.bf16 %v29_v38  ;;  %v32_v42 = vunpack.c.h.bf16 %v29_v38 }
   0xb   :  { %v565_v28 = vld [vmem:[%s723_s1 + $0x30] sm:$0xff]   ;;  %v569_v34 = vld [vmem:[%s723_s1 + $0x38] sm:$0xff]   ;;  %v61_v40 = vld [vmem:[%s726_s3] sm:$0xf]  ;;  %v44_v43 = vrot.slane %v35_v39, %v43_v31  ;;  %v52_v48 = vrot.slane %v35_v39, %v51_v33  ;;  %v40_v51 = vrot.slane %v35_v39, %v39_v35  ;;  %v48_v53 = vrot.slane %v35_v39, %v47_v37 }
   0xc   :  { %500 = vmatpush3.bf16.msra.mxu0 %v549_v10  ;;  %v566_v29 = vld [vmem:[%s723_s1 + $0xb0] sm:$0xff]   ;;  %v570_v36 = vld [vmem:[%s723_s1 + $0xb8] sm:$0xff]   ;;  %v70_v44 = vrot.slane %v61_v40, %v43_v31  ;;  %v30_v45 = vld [vmem:[%s724_s0 + $0x8] sm:$0xff]  ;;  %v78_v49 = vrot.slane %v61_v40, %v51_v33  ;;  %v66_v52 = vrot.slane %v61_v40, %v39_v35  ;;  %v74_v55 = vrot.slane %v61_v40, %v47_v37 }
   0xd   :  { %522 = vmatpush3.bf16.msra.mxu1 %v550_v11  ;;  %501 = vmatprep.subr.bf16.mxu0 %v551_v12  ;;  %v33_v46 = vunpack.c.l.bf16 %v30_v45  ;;  %v34_v47 = vunpack.c.h.bf16 %v30_v45  ;;  %v58_v50 = vmul.f32 %v44_v43, %v32_v42  ;;  %v57_v57 = vmul.f32 %v40_v51, %v31_v41 }
   0xe   :  { %523 = vmatprep.subr.bf16.mxu1 %v552_v13 }
   0xf   :  { %v60_v54 = vmul.f32 %v52_v48, %v34_v47  ;;  %v84_v56 = vadd.f32 %v70_v44, %v58_v50  ;;  %v59_v58 = vmul.f32 %v48_v53, %v33_v46  ;;  %v83_v61 = vadd.f32 %v66_v52, %v57_v57 }
  0x10   :  { %502 = vmatpush3.bf16.msra.mxu0 %v553_v14  ;;  %v493_v14 = vld [vmem:[%s727_s4] ss:$0 sm:$0xff] }
  0x11   :  { %524 = vmatpush3.bf16.msra.mxu1 %v554_v15  ;;  %503 = vmatprep.subr.bf16.mxu0 %v555_v16  ;;  %v86_v59 = vadd.f32 %v78_v49, %v60_v54  ;;  %v88_v60 = vmax.f32 %v84_v56, 0.0  ;;  %v85_v62 = vadd.f32 %v74_v55, %v59_v58  ;;  %v87_v1 = vmax.f32 %v83_v61, 0.0 }
  0x12   :  { %525 = vmatprep.subr.bf16.mxu1 %v556_v17 }
  0x13   :  { %v90_v63 = vmax.f32 %v86_v59, 0.0  ;;  %v92_v0 = vpack.c.bf16 %v88_v60, %v88_v60  ;;  %v89_v2 = vmax.f32 %v85_v62, 0.0  ;;  %v91_v4 = vpack.c.bf16 %v87_v1, %v87_v1 }
  0x14   :  { %504 = vmatpush3.bf16.msra.mxu0 %v557_v18  ;;  %v494_v18 = vld [vmem:[%s728_s5] ss:$0 sm:$0xff] }
  0x15   :  { %526 = vmatpush3.bf16.msra.mxu1 %v558_v19  ;;  %505 = vmatprep.subr.bf16.mxu0 %v559_v20  ;;  %v94_v3 = vpack.c.bf16 %v90_v63, %v90_v63  ;;  %v93_v5 = vpack.c.bf16 %v89_v2, %v89_v2 }
  0x16   :  { %527 = vmatprep.subr.bf16.mxu1 %v560_v22  ;;  %384 = vmatprep.mubr.bf16.mxu0 %v92_v0 }
  0x17   :  { %424 = vmatprep.mubr.bf16.mxu1 %v94_v3 }
  0x18   :  { %506 = vmatpush3.bf16.msra.mxu0 %v561_v23 }
  0x19   :  { %528 = vmatpush3.bf16.msra.mxu1 %v562_v24  ;;  %507 = vmatprep.subr.bf16.mxu0 %v563_v25 }
  0x1a   :  { %529 = vmatprep.subr.bf16.mxu1 %v564_v27 }
  0x1c   :  { %508 = vmatpush3.bf16.msra.mxu0 %v565_v28 }
  0x1d   :  { %530 = vmatpush3.bf16.msra.mxu1 %v566_v29  ;;  %509 = vmatprep.subr.bf16.mxu0 %v567_v30 }
  0x1e   :  { %531 = vmatprep.subr.bf16.mxu1 %v568_v32 }
  0x20   :  { %510 = vmatpush3.bf16.msra.mxu0 %v569_v34 }
  0x21   :  { %532 = vmatpush3.bf16.msra.mxu1 %v570_v36 }
  0x23   :  { %385 = vmatmul.mubr.bf16.vlgmr.msra.gmra.mrb[0].mxu0 %v91_v4 }
  0x24   :  { %425 = vmatmul.mubr.bf16.vlgmr.msra.gmra.mrb[0].mxu1 %v93_v5 }
  0xf6   :  { %v511_v6 = vpop.f32.mrb[0].mxu0 }
  0xf7   :  { %v533_v7 = vpop.f32.mrb[0].mxu1  ;;  %v512_v8 = vpop.f32.mrb[1].mxu0 }
  0xf8   :  { %v534_v9 = vpop.f32.mrb[1].mxu1  ;;  %v513_v10 = vadd.f32 %v512_v8, %v511_v6  ;;  %v514_v12 = vpop.f32.mrb[2].mxu0 }
  0xf9   :  { %v535_v11 = vadd.f32 %v534_v9, %v533_v7  ;;  %v536_v13 = vpop.f32.mrb[2].mxu1  ;;  %v515_v15 = vpop.f32.mrb[3].mxu0 }
  0xfa   :  { %v537_v16 = vpop.f32.mrb[3].mxu1 }
  0xfb   :  { %v427_v17 = vadd.f32 %v535_v11, %v513_v10 }
  0xfd   :  { %v445_v19 = vmul.f32 %v493_v14, %v427_v17 }
  0xff   :  { %v453_v20 = vadd.f32 %v494_v18, %v445_v19 }
 0x101   :  { %v454_v21 = vmax.f32 %v453_v20, 0.0 }
 0x103   :  { %v455_v22 = vpack.c.bf16 %v454_v21, %v454_v21 }
 0x105   :  { %456 = vst [vmem:[%s729_s6] sm:$0xf] %v455_v22 }

// kernel: tile.184
= control target key start
LH: loop header
LB: loop body
LE: loop exit
PB: predicated region body
PF: predicated region fallthrough
CT: control target
= control target key end

     0   :  { %s70_s0 = inlined_call_operand.vmem [shape: f32[608], index: 0, kind: input, shape index: {}]   ;;  %s71_s1 = inlined_call_operand.vmem [shape: f32[1,608], index: 1, kind: output, shape index: {}]  }
   0x1   :  { %v4_v0 = vld [vmem:[%s70_s0] ss:$0 sm:$0xff]  ;;  %v22_v1 = vld [vmem:[%s70_s0 + $0x1] ss:$0 sm:$0xff]  ;;  %v24_v2 = vld [vmem:[%s70_s0 + $0x2] ss:$0 sm:$0xff] }
   0x2   :  { %5 = vst [vmem:[%s71_s1] sm:$0x1] %v4_v0  ;;  %23 = vst [vmem:[%s71_s1 + $0x1] sm:$0x1] %v22_v1  ;;  %v26_v3 = vld [vmem:[%s70_s0 + $0x3] ss:$0 sm:$0xff] }
   0x3   :  { %25 = vst [vmem:[%s71_s1 + $0x2] sm:$0x1] %v24_v2  ;;  %v28_v4 = vld [vmem:[%s70_s0 + $0x4] ss:$0 sm:$0xff]  ;;  %27 = vst [vmem:[%s71_s1 + $0x3] sm:$0x1] %v26_v3 }
   0x4   :  { %29 = vst [vmem:[%s71_s1 + $0x4] sm:$0x1] %v28_v4 }

// kernel: tile.186
= control target key start
LH: loop header
LB: loop body
LE: loop exit
PB: predicated region body
PF: predicated region fallthrough
CT: control target
= control target key end

     0   :  { %s70_s0 = inlined_call_operand.vmem [shape: f32[640], index: 0, kind: input, shape index: {}]   ;;  %s71_s1 = inlined_call_operand.vmem [shape: f32[1,640], index: 1, kind: output, shape index: {}]  }
   0x1   :  { %v4_v0 = vld [vmem:[%s70_s0] ss:$0 sm:$0xff]  ;;  %v22_v1 = vld [vmem:[%s70_s0 + $0x1] ss:$0 sm:$0xff]  ;;  %v24_v2 = vld [vmem:[%s70_s0 + $0x2] ss:$0 sm:$0xff] }
   0x2   :  { %5 = vst [vmem:[%s71_s1] sm:$0x1] %v4_v0  ;;  %23 = vst [vmem:[%s71_s1 + $0x1] sm:$0x1] %v22_v1  ;;  %v26_v3 = vld [vmem:[%s70_s0 + $0x3] ss:$0 sm:$0xff] }
   0x3   :  { %25 = vst [vmem:[%s71_s1 + $0x2] sm:$0x1] %v24_v2  ;;  %v28_v4 = vld [vmem:[%s70_s0 + $0x4] ss:$0 sm:$0xff]  ;;  %27 = vst [vmem:[%s71_s1 + $0x3] sm:$0x1] %v26_v3 }
   0x4   :  { %29 = vst [vmem:[%s71_s1 + $0x4] sm:$0x1] %v28_v4 }

// kernel: tile.188
= control target key start
LH: loop header
LB: loop body
LE: loop exit
PB: predicated region body
PF: predicated region fallthrough
CT: control target
= control target key end

     0   :  { %s82_s0 = inlined_call_operand.vmem [shape: f32[672], index: 0, kind: input, shape index: {}]   ;;  %s83_s1 = inlined_call_operand.vmem [shape: f32[1,672], index: 1, kind: output, shape index: {}]  }
   0x1   :  { %v4_v0 = vld [vmem:[%s82_s0] ss:$0 sm:$0xff]  ;;  %v26_v1 = vld [vmem:[%s82_s0 + $0x1] ss:$0 sm:$0xff]  ;;  %v28_v2 = vld [vmem:[%s82_s0 + $0x2] ss:$0 sm:$0xff] }
   0x2   :  { %5 = vst [vmem:[%s83_s1] sm:$0x1] %v4_v0  ;;  %27 = vst [vmem:[%s83_s1 + $0x1] sm:$0x1] %v26_v1  ;;  %v30_v3 = vld [vmem:[%s82_s0 + $0x3] ss:$0 sm:$0xff] }
   0x3   :  { %29 = vst [vmem:[%s83_s1 + $0x2] sm:$0x1] %v28_v2  ;;  %v32_v4 = vld [vmem:[%s82_s0 + $0x4] ss:$0 sm:$0xff]  ;;  %v34_v5 = vld [vmem:[%s82_s0 + $0x5] ss:$0 sm:$0xff] }
   0x4   :  { %31 = vst [vmem:[%s83_s1 + $0x3] sm:$0x1] %v30_v3  ;;  %33 = vst [vmem:[%s83_s1 + $0x4] sm:$0x1] %v32_v4 }
   0x5   :  { %35 = vst [vmem:[%s83_s1 + $0x5] sm:$0x1] %v34_v5 }

// kernel: densenet121_forward.177
= control target key start
LH: loop header
LB: loop body
LE: loop exit
PB: predicated region body
PF: predicated region fallthrough
CT: control target
= control target key end

     0   :  { %s821_s21 = smov 0   ;;  %s823_s22 = smov 0   ;;  %s891_s0 = inlined_call_operand.vmem [shape: bf16[8,640], index: 0, kind: input, shape index: {}]   ;;  %s892_s1 = inlined_call_operand.vmem [shape: bf16[640,128], index: 1, kind: input, shape index: {}]   ;;  %s893_s2 = inlined_call_operand.vmem [shape: f32[1,640], index: 2, kind: input, shape index: {}]   ;;  %s894_s3 = inlined_call_operand.vmem [shape: f32[1,640], index: 3, kind: input, shape index: {}]   ;;  %s895_s4 = inlined_call_operand.vmem [shape: f32[1,128], index: 4, kind: input, shape index: {}]   ;;  %s896_s5 = inlined_call_operand.vmem [shape: f32[1,128], index: 5, kind: input, shape index: {}]   ;;  %s897_s6 = inlined_call_operand.vmem [shape: bf16[8,128], index: 6, kind: output, shape index: {}]  }
   0x1   :  { %s825_s23 = smov 0  }
   0x2 LB: > { %s28_s24 = sadd.s32 1, %s777_s22  ;;  %p674_p0 = scmp.ge.s32.totalorder %s781_s23, 1  ;;  %s781_s23 = sphi %s825_s23, %s16_s23   ;;  %s777_s22 = sphi %s823_s22, %s899_s22   ;;  %s773_s21 = sphi %s821_s21, %s898_s21  }
   0x3   : > { %p29_p1 = scmp.ge.s32.totalorder %s28_s24, 5  ;;  %p286_p2 = scmp.lt.s32.totalorder %s781_s23, 6 }
   0x5   : > { %s901_s24 = smov (%p29_p1, %s28_s24), 0  ;;  %p287_p3 = pnand %p674_p0, %p286_p2 }
   0x6   : > { %p343_p4 = scmp.lt.s32.totalorder (!%p287_p3), %s773_s21, 4  ;;  %s676_s25 = sshll.u32 (!%p287_p3), %s773_s21, 4 }
   0x7   : > { %290 = sbr.rel (%p287_p3) target bundleno = 286 (0x11e), region = 44  ;;  %p350_p5 = scmp.lt.s32.totalorder (!%p287_p3), %s676_s25, 79 }
   0x8   : > { %p678_p6 = scmp.ne.s32.totalorder (!%p287_p3), %s773_s21, 0 }
   0xe   : > { %s844_s26 = scalar_select %p343_p4, %s773_s21, 4 }
   0xf   : > { %s903_s25 = smov (!%p350_p5, %s676_s25), 79  ;;  %381 = sbr.rel (%p678_p6) target bundleno = 22 (0x16), region = 48 }
  0x10   : > { %s675_s27 = sshll.u32 %s844_s26, 2  ;;  %s360_s30 = scalar_lea.vmem %s893_s2, %s844_s26  ;;  %v783_v0 = vmov (!%p678_p6), 0.0  }
  0x11   : > { %s348_s9 = scalar_lea.vmem %s891_s0, %s675_s27  ;;  %s677_s10 = sshll.u32 %s903_s25, 2  ;;  %382 = vst [vmem:[#allocation2] sm:$0xff] (!%p678_p6), %v783_v0 }
  0x12   : > { %s857_s13 = scalar_lea.vmem %s892_s1, %s677_s10  ;;  %s363_s16 = scalar_lea.vmem %s894_s3, %s844_s26 }
  0x16 PF: > { %v751_v1 = vld [vmem:[%s857_s13] sm:$0xff]   ;;  %v784_v2 = vmov 0.0   ;;  %v752_v3 = vld [vmem:[%s857_s13 + $0x8] sm:$0xff]   ;;  %vm785_vm0 = vmmov 0   ;;  %v753_v4 = vld [vmem:[%s857_s13 + $0x10] sm:$0xff]   ;;  %p689_p7 = scmp.ne.s32.totalorder %s773_s21, 4 }
  0x17   : > { %704 = vmatprep.subr.bf16.mxu0 %v784_v2  ;;  %720 = vmatprep.mubr.msk.bf16.mxu0 %vm785_vm0, %v784_v2  ;;  %v754_v5 = vld [vmem:[%s857_s13 + $0x18] sm:$0xff]   ;;  %v383_v6 = vld [vmem:[%s348_s9] sm:$0xf]  ;;  %v756_v11 = vld [vmem:[%s857_s13 + $0x28] sm:$0xff]  }
  0x18   : > { %705 = vmatpush3.bf16.msra.mxu0 %v751_v1  ;;  %v384_v7 = vunpack.c.l.bf16 %v383_v6  ;;  %v755_v8 = vld [vmem:[%s857_s13 + $0x20] sm:$0xff]   ;;  %v757_v14 = vld [vmem:[%s857_s13 + $0x30] sm:$0xff]   ;;  %v758_v16 = vld [vmem:[%s857_s13 + $0x38] sm:$0xff]  }
  0x19   : > { %706 = vmatprep.subr.bf16.mxu0 %v784_v2  ;;  %v679_v9 = vld [vmem:[%s360_s30] ss:$0 sm:$0xff] }
  0x1a   : > { %v392_v10 = vmul.f32 %v679_v9, %v384_v7  ;;  %v680_v12 = vld [vmem:[%s363_s16] ss:$0 sm:$0xff] }
  0x1b   : > { %v403_v18 = vld [vmem:[#allocation2] sm:$0xff] }
  0x1c   : > { %707 = vmatpush3.bf16.msra.mxu0 %v752_v3  ;;  %v400_v13 = vadd.f32 %v680_v12, %v392_v10  ;;  %v690_v25 = vld [vmem:[%s895_s4] ss:$0 sm:$0xff] (!%p689_p7) }
  0x1d   : > { %708 = vmatprep.subr.bf16.mxu0 %v784_v2  ;;  %v691_v26 = vld [vmem:[%s896_s5] ss:$0 sm:$0xff] (!%p689_p7) }
  0x1e   : > { %v401_v15 = vmax.f32 %v400_v13, 0.0 }
  0x20   : > { %709 = vmatpush3.bf16.msra.mxu0 %v753_v4  ;;  %v402_v17 = vpack.c.bf16 %v401_v15, %v401_v15 }
  0x21   : > { %710 = vmatprep.subr.bf16.mxu0 %v784_v2 }
  0x24   : > { %711 = vmatpush3.bf16.msra.mxu0 %v754_v5 }
  0x25   : > { %712 = vmatprep.subr.bf16.mxu0 %v784_v2 }
  0x28   : > { %713 = vmatpush3.bf16.msra.mxu0 %v755_v8 }
  0x29   : > { %714 = vmatprep.subr.bf16.mxu0 %v784_v2 }
  0x2c   : > { %715 = vmatpush3.bf16.msra.mxu0 %v756_v11 }
  0x2d   : > { %716 = vmatprep.subr.bf16.mxu0 %v784_v2 }
  0x30   : > { %717 = vmatpush3.bf16.msra.mxu0 %v757_v14 }
  0x31   : > { %718 = vmatprep.subr.bf16.mxu0 %v784_v2 }
  0x34   : > { %719 = vmatpush3.bf16.msra.mxu0 %v758_v16 }
  0x37   : > { %721 = vmatmul.mubr.bf16.vlgmr.msra.gmra.mrb[0].mxu0 %v402_v17 }
 0x107   : > { %513 = sbr.rel (%p689_p7) target bundleno = 286 (0x11e), region = 52 }
 0x10a   : > { %v502_v19 = vpop.f32.mrb[0].mxu0 }
 0x10b   : > { %v508_v20 = vadd.f32 %v502_v19, %v403_v18  ;;  %v722_v21 = vpop.f32.mrb[1].mxu0 }
 0x10c   : > { %v505_v22 = vpop.f32.mrb[2].mxu0 }
 0x10d   : > { %509 = vst [vmem:[#allocation2] sm:$0xff] %v508_v20  ;;  %v723_v23 = vpop.f32.mrb[3].mxu0 }
 0x114   : > { %v514_v24 = vld [vmem:[#allocation2] sm:$0xff] }
 0x115   : > { %v522_v27 = vmul.f32 %v690_v25, %v514_v24 }
 0x117   : > { %v530_v28 = vadd.f32 %v691_v26, %v522_v27 }
 0x119   : > { %v531_v29 = vmax.f32 %v530_v28, 0.0 }
 0x11b   : > { %v532_v30 = vpack.c.bf16 %v531_v29, %v531_v29 }
 0x11d   : > { %533 = vst [vmem:[%s897_s6] sm:$0xf] %v532_v30 }
 0x11e PF: > { %s16_s23 = sadd.s32 1, %s781_s23   ;;  %s898_s21 = smov %s777_s22 }
 0x11f   : > { %p13_p8 = scmp.ge.s32.totalorder %s16_s23, 7   ;;  %s899_s22 = smov %s901_s24 }
 0x121   :  { %15 = sbr.rel (!%p13_p8) target bundleno = 2 (0x2), region = 97 }

// kernel: tile.190
= control target key start
LH: loop header
LB: loop body
LE: loop exit
PB: predicated region body
PF: predicated region fallthrough
CT: control target
= control target key end

     0   :  { %s82_s0 = inlined_call_operand.vmem [shape: f32[704], index: 0, kind: input, shape index: {}]   ;;  %s83_s1 = inlined_call_operand.vmem [shape: f32[1,704], index: 1, kind: output, shape index: {}]  }
   0x1   :  { %v4_v0 = vld [vmem:[%s82_s0] ss:$0 sm:$0xff]  ;;  %v26_v1 = vld [vmem:[%s82_s0 + $0x1] ss:$0 sm:$0xff]  ;;  %v28_v2 = vld [vmem:[%s82_s0 + $0x2] ss:$0 sm:$0xff] }
   0x2   :  { %5 = vst [vmem:[%s83_s1] sm:$0x1] %v4_v0  ;;  %27 = vst [vmem:[%s83_s1 + $0x1] sm:$0x1] %v26_v1  ;;  %v30_v3 = vld [vmem:[%s82_s0 + $0x3] ss:$0 sm:$0xff] }
   0x3   :  { %29 = vst [vmem:[%s83_s1 + $0x2] sm:$0x1] %v28_v2  ;;  %v32_v4 = vld [vmem:[%s82_s0 + $0x4] ss:$0 sm:$0xff]  ;;  %v34_v5 = vld [vmem:[%s82_s0 + $0x5] ss:$0 sm:$0xff] }
   0x4   :  { %31 = vst [vmem:[%s83_s1 + $0x3] sm:$0x1] %v30_v3  ;;  %33 = vst [vmem:[%s83_s1 + $0x4] sm:$0x1] %v32_v4 }
   0x5   :  { %35 = vst [vmem:[%s83_s1 + $0x5] sm:$0x1] %v34_v5 }

// kernel: tile.192
= control target key start
LH: loop header
LB: loop body
LE: loop exit
PB: predicated region body
PF: predicated region fallthrough
CT: control target
= control target key end

     0   :  { %s82_s0 = inlined_call_operand.vmem [shape: f32[736], index: 0, kind: input, shape index: {}]   ;;  %s83_s1 = inlined_call_operand.vmem [shape: f32[1,736], index: 1, kind: output, shape index: {}]  }
   0x1   :  { %v4_v0 = vld [vmem:[%s82_s0] ss:$0 sm:$0xff]  ;;  %v26_v1 = vld [vmem:[%s82_s0 + $0x1] ss:$0 sm:$0xff]  ;;  %v28_v2 = vld [vmem:[%s82_s0 + $0x2] ss:$0 sm:$0xff] }
   0x2   :  { %5 = vst [vmem:[%s83_s1] sm:$0x1] %v4_v0  ;;  %27 = vst [vmem:[%s83_s1 + $0x1] sm:$0x1] %v26_v1  ;;  %v30_v3 = vld [vmem:[%s82_s0 + $0x3] ss:$0 sm:$0xff] }
   0x3   :  { %29 = vst [vmem:[%s83_s1 + $0x2] sm:$0x1] %v28_v2  ;;  %v32_v4 = vld [vmem:[%s82_s0 + $0x4] ss:$0 sm:$0xff]  ;;  %v34_v5 = vld [vmem:[%s82_s0 + $0x5] ss:$0 sm:$0xff] }
   0x4   :  { %31 = vst [vmem:[%s83_s1 + $0x3] sm:$0x1] %v30_v3  ;;  %33 = vst [vmem:[%s83_s1 + $0x4] sm:$0x1] %v32_v4 }
   0x5   :  { %35 = vst [vmem:[%s83_s1 + $0x5] sm:$0x1] %v34_v5 }

// kernel: tile.194
= control target key start
LH: loop header
LB: loop body
LE: loop exit
PB: predicated region body
PF: predicated region fallthrough
CT: control target
= control target key end

     0   :  { %s82_s0 = inlined_call_operand.vmem [shape: f32[768], index: 0, kind: input, shape index: {}]   ;;  %s83_s1 = inlined_call_operand.vmem [shape: f32[1,768], index: 1, kind: output, shape index: {}]  }
   0x1   :  { %v4_v0 = vld [vmem:[%s82_s0] ss:$0 sm:$0xff]  ;;  %v26_v1 = vld [vmem:[%s82_s0 + $0x1] ss:$0 sm:$0xff]  ;;  %v28_v2 = vld [vmem:[%s82_s0 + $0x2] ss:$0 sm:$0xff] }
   0x2   :  { %5 = vst [vmem:[%s83_s1] sm:$0x1] %v4_v0  ;;  %27 = vst [vmem:[%s83_s1 + $0x1] sm:$0x1] %v26_v1  ;;  %v30_v3 = vld [vmem:[%s82_s0 + $0x3] ss:$0 sm:$0xff] }
   0x3   :  { %29 = vst [vmem:[%s83_s1 + $0x2] sm:$0x1] %v28_v2  ;;  %v32_v4 = vld [vmem:[%s82_s0 + $0x4] ss:$0 sm:$0xff]  ;;  %v34_v5 = vld [vmem:[%s82_s0 + $0x5] ss:$0 sm:$0xff] }
   0x4   :  { %31 = vst [vmem:[%s83_s1 + $0x3] sm:$0x1] %v30_v3  ;;  %33 = vst [vmem:[%s83_s1 + $0x4] sm:$0x1] %v32_v4 }
   0x5   :  { %35 = vst [vmem:[%s83_s1 + $0x5] sm:$0x1] %v34_v5 }

// kernel: tile.196
= control target key start
LH: loop header
LB: loop body
LE: loop exit
PB: predicated region body
PF: predicated region fallthrough
CT: control target
= control target key end

     0   :  { %s94_s0 = inlined_call_operand.vmem [shape: f32[800], index: 0, kind: input, shape index: {}]   ;;  %s95_s1 = inlined_call_operand.vmem [shape: f32[1,800], index: 1, kind: output, shape index: {}]  }
   0x1   :  { %v4_v0 = vld [vmem:[%s94_s0] ss:$0 sm:$0xff]  ;;  %v30_v1 = vld [vmem:[%s94_s0 + $0x1] ss:$0 sm:$0xff]  ;;  %v32_v2 = vld [vmem:[%s94_s0 + $0x2] ss:$0 sm:$0xff] }
   0x2   :  { %5 = vst [vmem:[%s95_s1] sm:$0x1] %v4_v0  ;;  %31 = vst [vmem:[%s95_s1 + $0x1] sm:$0x1] %v30_v1  ;;  %v34_v3 = vld [vmem:[%s94_s0 + $0x3] ss:$0 sm:$0xff] }
   0x3   :  { %33 = vst [vmem:[%s95_s1 + $0x2] sm:$0x1] %v32_v2  ;;  %v36_v4 = vld [vmem:[%s94_s0 + $0x4] ss:$0 sm:$0xff]  ;;  %v38_v5 = vld [vmem:[%s94_s0 + $0x5] ss:$0 sm:$0xff] }
   0x4   :  { %35 = vst [vmem:[%s95_s1 + $0x3] sm:$0x1] %v34_v3  ;;  %37 = vst [vmem:[%s95_s1 + $0x4] sm:$0x1] %v36_v4  ;;  %v40_v6 = vld [vmem:[%s94_s0 + $0x6] ss:$0 sm:$0xff] }
   0x5   :  { %39 = vst [vmem:[%s95_s1 + $0x5] sm:$0x1] %v38_v5  ;;  %41 = vst [vmem:[%s95_s1 + $0x6] sm:$0x1] %v40_v6 }

// kernel: densenet121_forward.185
= control target key start
LH: loop header
LB: loop body
LE: loop exit
PB: predicated region body
PF: predicated region fallthrough
CT: control target
= control target key end

     0   :  { %s1086_s21 = smov 0   ;;  %s1088_s22 = smov 0   ;;  %s1194_s0 = inlined_call_operand.vmem [shape: bf16[8,768], index: 0, kind: input, shape index: {}]   ;;  %s1195_s1 = inlined_call_operand.vmem [shape: bf16[768,128], index: 1, kind: input, shape index: {}]   ;;  %s1196_s2 = inlined_call_operand.vmem [shape: f32[1,768], index: 2, kind: input, shape index: {}]   ;;  %s1197_s3 = inlined_call_operand.vmem [shape: f32[1,768], index: 3, kind: input, shape index: {}]   ;;  %s1198_s4 = inlined_call_operand.vmem [shape: f32[1,128], index: 4, kind: input, shape index: {}]   ;;  %s1199_s5 = inlined_call_operand.vmem [shape: f32[1,128], index: 5, kind: input, shape index: {}]   ;;  %s1200_s6 = inlined_call_operand.vmem [shape: bf16[8,128], index: 6, kind: output, shape index: {}]  }
   0x1   :  { %s1090_s23 = smov 0  }
   0x2 LB: > { %s28_s24 = sadd.s32 1, %s1042_s22  ;;  %p888_p0 = scmp.ge.s32.totalorder %s1046_s23, 1  ;;  %s1046_s23 = sphi %s1090_s23, %s16_s23   ;;  %s1042_s22 = sphi %s1088_s22, %s1202_s22   ;;  %s1038_s21 = sphi %s1086_s21, %s1201_s21  }
   0x3   : > { %p29_p1 = scmp.ge.s32.totalorder %s28_s24, 2  ;;  %p292_p2 = scmp.lt.s32.totalorder %s1046_s23, 3 }
   0x5   : > { %s1204_s24 = smov (%p29_p1, %s28_s24), 0  ;;  %p293_p3 = pnand %p888_p0, %p292_p2 }
   0x6   : > { %s350_s25 = smul.u32 (!%p293_p3), 3, %s1038_s21  ;;  %p891_p6 = scmp.ne.s32.totalorder (!%p293_p3), %s1038_s21, 0 }
   0x7   : > { %296 = sbr.rel (%p293_p3) target bundleno = 294 (0x126), region = 44 }
   0x8   : > { %s360_s26 = smul.u32 (!%p293_p3), 48, %s1038_s21  ;;  %p353_p4 = scmp.lt.s32.totalorder (!%p293_p3), %s350_s25, 5 }
   0xa   : > { %p361_p5 = scmp.lt.s32.totalorder (!%p293_p3), %s360_s26, 95 }
   0xe   : > { %s1206_s25 = smov (!%p353_p4, %s350_s25), 5  ;;  %s1208_s26 = smov (!%p361_p5, %s360_s26), 95 }
   0xf   : > { %s889_s27 = sshll.u32 %s1206_s25, 2  ;;  %s372_s30 = scalar_lea.vmem %s1196_s2, %s1206_s25  ;;  %v1048_v0 = vmov (!%p891_p6), 0.0  }
  0x10   : > { %s1118_s9 = scalar_lea.vmem %s1194_s0, %s889_s27  ;;  %s890_s10 = sshll.u32 %s1208_s26, 2  ;;  %397 = vst [vmem:[#allocation2] sm:$0xff] (!%p891_p6), %v1048_v0 }
  0x11   : > { %s1123_s13 = scalar_lea.vmem %s1195_s1, %s890_s10  ;;  %s377_s16 = scalar_lea.vmem %s1197_s3, %s1206_s25 }
  0x12   : > { %396 = sbr.rel (%p891_p6) target bundleno = 25 (0x19), region = 48 }
  0x19 PF: > { %v1000_v1 = vld [vmem:[%s1123_s13 + $0x40] sm:$0xff]   ;;  %v1049_v2 = vmov 0.0   ;;  %vm1050_vm0 = vmmov 0   ;;  %v1003_v5 = vld [vmem:[%s1123_s13 + $0x48] sm:$0xff]   ;;  %v1006_v8 = vld [vmem:[%s1123_s13 + $0x50] sm:$0xff]   ;;  %v405_v15 = vlaneseq  ;;  %p916_p7 = scmp.ne.s32.totalorder %s1038_s21, 1 }
  0x1a   : > { %953 = vmatprep.subr.bf16.mxu1 %v1049_v2  ;;  %v1001_v3 = vld [vmem:[%s1123_s13] sm:$0xff]   ;;  %922 = vmatprep.subr.bf16.mxu0 %v1000_v1  ;;  %v1004_v6 = vld [vmem:[%s1123_s13 + $0x8] sm:$0xff]   ;;  %v1007_v9 = vld [vmem:[%s1123_s13 + $0x10] sm:$0xff]  }
  0x1b   : > { %v1002_v4 = vld [vmem:[%s1123_s13 + $0x80] sm:$0xff]   ;;  %969 = vmatprep.mubr.msk.bf16.mxu1 %vm1050_vm0, %v1049_v2  ;;  %923 = vmatpush3.bf16.msra.mxu0 %v1001_v3  ;;  %v1005_v7 = vld [vmem:[%s1123_s13 + $0x88] sm:$0xff]   ;;  %v1008_v10 = vld [vmem:[%s1123_s13 + $0x90] sm:$0xff]   ;;  %v406_v19 = vshrl.u32 %v405_v15, 7 }
  0x1c   : > { %954 = vmatpush3.bf16.msra.mxu1 %v1002_v4  ;;  %924 = vmatprep.subr.bf16.mxu0 %v1003_v5  ;;  %v1009_v11 = vld [vmem:[%s1123_s13 + $0x58] sm:$0xff]   ;;  %v1012_v14 = vld [vmem:[%s1123_s13 + $0x60] sm:$0xff]   ;;  %v1015_v18 = vld [vmem:[%s1123_s13 + $0x68] sm:$0xff]  }
  0x1d   : > { %955 = vmatprep.subr.bf16.mxu1 %v1049_v2  ;;  %v1010_v12 = vld [vmem:[%s1123_s13 + $0x18] sm:$0xff]   ;;  %v1013_v16 = vld [vmem:[%s1123_s13 + $0x20] sm:$0xff]   ;;  %v1016_v20 = vld [vmem:[%s1123_s13 + $0x28] sm:$0xff]   ;;  %v411_v23 = vsub.s32 1, %v406_v19  ;;  %v407_v25 = vsub.s32 0, %v406_v19  ;;  %v415_v27 = vsub.s32 2, %v406_v19 }
  0x1e   : > { %v1011_v13 = vld [vmem:[%s1123_s13 + $0x98] sm:$0xff]   ;;  %v1014_v17 = vld [vmem:[%s1123_s13 + $0xa0] sm:$0xff]   ;;  %v1017_v21 = vld [vmem:[%s1123_s13 + $0xa8] sm:$0xff]  }
  0x1f   : > { %925 = vmatpush3.bf16.msra.mxu0 %v1004_v6  ;;  %v1018_v22 = vld [vmem:[%s1123_s13 + $0x70] sm:$0xff]   ;;  %v1021_v28 = vld [vmem:[%s1123_s13 + $0x78] sm:$0xff]   ;;  %v398_v29 = vld [vmem:[%s1118_s9] sm:$0xff] }
  0x20   : > { %956 = vmatpush3.bf16.msra.mxu1 %v1005_v7  ;;  %926 = vmatprep.subr.bf16.mxu0 %v1006_v8  ;;  %v1019_v24 = vld [vmem:[%s1123_s13 + $0x30] sm:$0xff]   ;;  %v403_v30 = vld [vmem:[%s372_s30] sm:$0x7]  ;;  %v400_v32 = vunpack.c.l.bf16 %v398_v29  ;;  %v401_v33 = vunpack.c.h.bf16 %v398_v29  ;;  %v399_v36 = vld [vmem:[%s1118_s9 + $0x8] sm:$0xf] }
  0x21   : > { %957 = vmatprep.subr.bf16.mxu1 %v1049_v2  ;;  %v1020_v26 = vld [vmem:[%s1123_s13 + $0xb0] sm:$0xff]   ;;  %v423_v31 = vld [vmem:[%s377_s16] sm:$0x7]  ;;  %v412_v34 = vrot.slane %v403_v30, %v411_v23  ;;  %v408_v37 = vrot.slane %v403_v30, %v407_v25  ;;  %v402_v39 = vunpack.c.l.bf16 %v399_v36  ;;  %v416_v40 = vrot.slane %v403_v30, %v415_v27  ;;  %v1022_v41 = vld [vmem:[%s1123_s13 + $0x38] sm:$0xff]  }
  0x22   : > { %v432_v35 = vrot.slane %v423_v31, %v411_v23  ;;  %v428_v38 = vrot.slane %v423_v31, %v407_v25  ;;  %v436_v43 = vrot.slane %v423_v31, %v415_v27  ;;  %v1023_v44 = vld [vmem:[%s1123_s13 + $0xb8] sm:$0xff]   ;;  %v449_v63 = vld [vmem:[#allocation2] sm:$0xff] }
  0x23   : > { %927 = vmatpush3.bf16.msra.mxu0 %v1007_v9  ;;  %v421_v42 = vmul.f32 %v412_v34, %v401_v33  ;;  %v420_v45 = vmul.f32 %v408_v37, %v400_v32  ;;  %v422_v46 = vmul.f32 %v416_v40, %v402_v39  ;;  %v917_v5 = vld [vmem:[%s1198_s4] ss:$0 sm:$0xff] (!%p916_p7) }
  0x24   : > { %958 = vmatpush3.bf16.msra.mxu1 %v1008_v10  ;;  %928 = vmatprep.subr.bf16.mxu0 %v1009_v11  ;;  %v918_v6 = vld [vmem:[%s1199_s5] ss:$0 sm:$0xff] (!%p916_p7) }
  0x25   : > { %959 = vmatprep.subr.bf16.mxu1 %v1049_v2  ;;  %v441_v47 = vadd.f32 %v432_v35, %v421_v42  ;;  %v440_v48 = vadd.f32 %v428_v38, %v420_v45  ;;  %v442_v49 = vadd.f32 %v436_v43, %v422_v46 }
  0x27   : > { %929 = vmatpush3.bf16.msra.mxu0 %v1010_v12  ;;  %v444_v50 = vmax.f32 %v441_v47, 0.0  ;;  %v443_v51 = vmax.f32 %v440_v48, 0.0  ;;  %v445_v52 = vmax.f32 %v442_v49, 0.0 }
  0x28   : > { %960 = vmatpush3.bf16.msra.mxu1 %v1011_v13  ;;  %930 = vmatprep.subr.bf16.mxu0 %v1012_v14 }
  0x29   : > { %961 = vmatprep.subr.bf16.mxu1 %v1049_v2  ;;  %v447_v53 = vpack.c.bf16 %v444_v50, %v444_v50  ;;  %v446_v54 = vpack.c.bf16 %v443_v51, %v443_v51  ;;  %v448_v55 = vpack.c.bf16 %v445_v52, %v445_v52 }
  0x2b   : > { %931 = vmatpush3.bf16.msra.mxu0 %v1013_v16  ;;  %674 = vmatprep.mubr.bf16.mxu0 %v447_v53 }
  0x2c   : > { %962 = vmatpush3.bf16.msra.mxu1 %v1014_v17  ;;  %932 = vmatprep.subr.bf16.mxu0 %v1015_v18 }
  0x2d   : > { %963 = vmatprep.subr.bf16.mxu1 %v1049_v2 }
  0x2f   : > { %933 = vmatpush3.bf16.msra.mxu0 %v1016_v20 }
  0x30   : > { %964 = vmatpush3.bf16.msra.mxu1 %v1017_v21  ;;  %934 = vmatprep.subr.bf16.mxu0 %v1018_v22 }
  0x31   : > { %965 = vmatprep.subr.bf16.mxu1 %v1049_v2 }
  0x33   : > { %935 = vmatpush3.bf16.msra.mxu0 %v1019_v24 }
  0x34   : > { %966 = vmatpush3.bf16.msra.mxu1 %v1020_v26  ;;  %936 = vmatprep.subr.bf16.mxu0 %v1021_v28 }
  0x35   : > { %967 = vmatprep.subr.bf16.mxu1 %v1049_v2 }
  0x37   : > { %937 = vmatpush3.bf16.msra.mxu0 %v1022_v41 }
  0x38   : > { %968 = vmatpush3.bf16.msra.mxu1 %v1023_v44 }
  0x3a   : > { %675 = vmatmul.mubr.bf16.vlgmr.msra.gmra.mrb[0].mxu0 %v446_v54 }
  0x3b   : > { %970 = vmatmul.mubr.bf16.vlgmr.msra.gmra.mrb[0].mxu1 %v448_v55 }
 0x10d   : > { %v938_v56 = vpop.f32.mrb[0].mxu0 }
 0x10e   : > { %v716_v57 = vpop.f32.mrb[0].mxu1  ;;  %v939_v58 = vpop.f32.mrb[1].mxu0 }
 0x10f   : > { %v971_v59 = vpop.f32.mrb[1].mxu1  ;;  %v940_v60 = vadd.f32 %v939_v58, %v938_v56  ;;  %v941_v61 = vpop.f32.mrb[2].mxu0  ;;  %727 = sbr.rel (%p916_p7) target bundleno = 294 (0x126), region = 52 }
 0x110   : > { %v719_v62 = vpop.f32.mrb[2].mxu1  ;;  %v942_v0 = vpop.f32.mrb[3].mxu0 }
 0x111   : > { %v972_v1 = vpop.f32.mrb[3].mxu1  ;;  %v717_v2 = vadd.f32 %v940_v60, %v716_v57 }
 0x113   : > { %v722_v3 = vadd.f32 %v717_v2, %v449_v63 }
 0x115   : > { %723 = vst [vmem:[#allocation2] sm:$0xff] %v722_v3 }
 0x11c   : > { %v728_v4 = vld [vmem:[#allocation2] sm:$0xff] }
 0x11d   : > { %v736_v7 = vmul.f32 %v917_v5, %v728_v4 }
 0x11f   : > { %v744_v8 = vadd.f32 %v918_v6, %v736_v7 }
 0x121   : > { %v745_v9 = vmax.f32 %v744_v8, 0.0 }
 0x123   : > { %v746_v10 = vpack.c.bf16 %v745_v9, %v745_v9 }
 0x125   : > { %747 = vst [vmem:[%s1200_s6] sm:$0xf] %v746_v10 }
 0x126 PF: > { %s16_s23 = sadd.s32 1, %s1046_s23   ;;  %s1201_s21 = smov %s1042_s22 }
 0x127   : > { %p13_p8 = scmp.ge.s32.totalorder %s16_s23, 4   ;;  %s1202_s22 = smov %s1204_s24 }
 0x129   :  { %15 = sbr.rel (!%p13_p8) target bundleno = 2 (0x2), region = 97 }

// kernel: tile.198
= control target key start
LH: loop header
LB: loop body
LE: loop exit
PB: predicated region body
PF: predicated region fallthrough
CT: control target
= control target key end

     0   :  { %s94_s0 = inlined_call_operand.vmem [shape: f32[832], index: 0, kind: input, shape index: {}]   ;;  %s95_s1 = inlined_call_operand.vmem [shape: f32[1,832], index: 1, kind: output, shape index: {}]  }
   0x1   :  { %v4_v0 = vld [vmem:[%s94_s0] ss:$0 sm:$0xff]  ;;  %v30_v1 = vld [vmem:[%s94_s0 + $0x1] ss:$0 sm:$0xff]  ;;  %v32_v2 = vld [vmem:[%s94_s0 + $0x2] ss:$0 sm:$0xff] }
   0x2   :  { %5 = vst [vmem:[%s95_s1] sm:$0x1] %v4_v0  ;;  %31 = vst [vmem:[%s95_s1 + $0x1] sm:$0x1] %v30_v1  ;;  %v34_v3 = vld [vmem:[%s94_s0 + $0x3] ss:$0 sm:$0xff] }
   0x3   :  { %33 = vst [vmem:[%s95_s1 + $0x2] sm:$0x1] %v32_v2  ;;  %v36_v4 = vld [vmem:[%s94_s0 + $0x4] ss:$0 sm:$0xff]  ;;  %v38_v5 = vld [vmem:[%s94_s0 + $0x5] ss:$0 sm:$0xff] }
   0x4   :  { %35 = vst [vmem:[%s95_s1 + $0x3] sm:$0x1] %v34_v3  ;;  %37 = vst [vmem:[%s95_s1 + $0x4] sm:$0x1] %v36_v4  ;;  %v40_v6 = vld [vmem:[%s94_s0 + $0x6] ss:$0 sm:$0xff] }
   0x5   :  { %39 = vst [vmem:[%s95_s1 + $0x5] sm:$0x1] %v38_v5  ;;  %41 = vst [vmem:[%s95_s1 + $0x6] sm:$0x1] %v40_v6 }

// kernel: tile.200
= control target key start
LH: loop header
LB: loop body
LE: loop exit
PB: predicated region body
PF: predicated region fallthrough
CT: control target
= control target key end

     0   :  { %s94_s0 = inlined_call_operand.vmem [shape: f32[864], index: 0, kind: input, shape index: {}]   ;;  %s95_s1 = inlined_call_operand.vmem [shape: f32[1,864], index: 1, kind: output, shape index: {}]  }
   0x1   :  { %v4_v0 = vld [vmem:[%s94_s0] ss:$0 sm:$0xff]  ;;  %v30_v1 = vld [vmem:[%s94_s0 + $0x1] ss:$0 sm:$0xff]  ;;  %v32_v2 = vld [vmem:[%s94_s0 + $0x2] ss:$0 sm:$0xff] }
   0x2   :  { %5 = vst [vmem:[%s95_s1] sm:$0x1] %v4_v0  ;;  %31 = vst [vmem:[%s95_s1 + $0x1] sm:$0x1] %v30_v1  ;;  %v34_v3 = vld [vmem:[%s94_s0 + $0x3] ss:$0 sm:$0xff] }
   0x3   :  { %33 = vst [vmem:[%s95_s1 + $0x2] sm:$0x1] %v32_v2  ;;  %v36_v4 = vld [vmem:[%s94_s0 + $0x4] ss:$0 sm:$0xff]  ;;  %v38_v5 = vld [vmem:[%s94_s0 + $0x5] ss:$0 sm:$0xff] }
   0x4   :  { %35 = vst [vmem:[%s95_s1 + $0x3] sm:$0x1] %v34_v3  ;;  %37 = vst [vmem:[%s95_s1 + $0x4] sm:$0x1] %v36_v4  ;;  %v40_v6 = vld [vmem:[%s94_s0 + $0x6] ss:$0 sm:$0xff] }
   0x5   :  { %39 = vst [vmem:[%s95_s1 + $0x5] sm:$0x1] %v38_v5  ;;  %41 = vst [vmem:[%s95_s1 + $0x6] sm:$0x1] %v40_v6 }

// kernel: tile.202
= control target key start
LH: loop header
LB: loop body
LE: loop exit
PB: predicated region body
PF: predicated region fallthrough
CT: control target
= control target key end

     0   :  { %s94_s0 = inlined_call_operand.vmem [shape: f32[896], index: 0, kind: input, shape index: {}]   ;;  %s95_s1 = inlined_call_operand.vmem [shape: f32[1,896], index: 1, kind: output, shape index: {}]  }
   0x1   :  { %v4_v0 = vld [vmem:[%s94_s0] ss:$0 sm:$0xff]  ;;  %v30_v1 = vld [vmem:[%s94_s0 + $0x1] ss:$0 sm:$0xff]  ;;  %v32_v2 = vld [vmem:[%s94_s0 + $0x2] ss:$0 sm:$0xff] }
   0x2   :  { %5 = vst [vmem:[%s95_s1] sm:$0x1] %v4_v0  ;;  %31 = vst [vmem:[%s95_s1 + $0x1] sm:$0x1] %v30_v1  ;;  %v34_v3 = vld [vmem:[%s94_s0 + $0x3] ss:$0 sm:$0xff] }
   0x3   :  { %33 = vst [vmem:[%s95_s1 + $0x2] sm:$0x1] %v32_v2  ;;  %v36_v4 = vld [vmem:[%s94_s0 + $0x4] ss:$0 sm:$0xff]  ;;  %v38_v5 = vld [vmem:[%s94_s0 + $0x5] ss:$0 sm:$0xff] }
   0x4   :  { %35 = vst [vmem:[%s95_s1 + $0x3] sm:$0x1] %v34_v3  ;;  %37 = vst [vmem:[%s95_s1 + $0x4] sm:$0x1] %v36_v4  ;;  %v40_v6 = vld [vmem:[%s94_s0 + $0x6] ss:$0 sm:$0xff] }
   0x5   :  { %39 = vst [vmem:[%s95_s1 + $0x5] sm:$0x1] %v38_v5  ;;  %41 = vst [vmem:[%s95_s1 + $0x6] sm:$0x1] %v40_v6 }

// kernel: densenet121_forward.193
= control target key start
LH: loop header
LB: loop body
LE: loop exit
PB: predicated region body
PF: predicated region fallthrough
CT: control target
= control target key end

     0   :  { %s821_s21 = smov 0   ;;  %s823_s22 = smov 0   ;;  %s891_s0 = inlined_call_operand.vmem [shape: bf16[8,896], index: 0, kind: input, shape index: {}]   ;;  %s892_s1 = inlined_call_operand.vmem [shape: bf16[896,128], index: 1, kind: input, shape index: {}]   ;;  %s893_s2 = inlined_call_operand.vmem [shape: f32[1,896], index: 2, kind: input, shape index: {}]   ;;  %s894_s3 = inlined_call_operand.vmem [shape: f32[1,896], index: 3, kind: input, shape index: {}]   ;;  %s895_s4 = inlined_call_operand.vmem [shape: f32[1,128], index: 4, kind: input, shape index: {}]   ;;  %s896_s5 = inlined_call_operand.vmem [shape: f32[1,128], index: 5, kind: input, shape index: {}]   ;;  %s897_s6 = inlined_call_operand.vmem [shape: bf16[8,128], index: 6, kind: output, shape index: {}]  }
   0x1   :  { %s825_s23 = smov 0  }
   0x2 LB: > { %s28_s24 = sadd.s32 1, %s777_s22  ;;  %p674_p0 = scmp.ge.s32.totalorder %s781_s23, 1  ;;  %s781_s23 = sphi %s825_s23, %s16_s23   ;;  %s777_s22 = sphi %s823_s22, %s899_s22   ;;  %s773_s21 = sphi %s821_s21, %s898_s21  }
   0x3   : > { %p29_p1 = scmp.ge.s32.totalorder %s28_s24, 7  ;;  %p286_p2 = scmp.lt.s32.totalorder %s781_s23, 8 }
   0x5   : > { %s901_s24 = smov (%p29_p1, %s28_s24), 0  ;;  %p287_p3 = pnand %p674_p0, %p286_p2 }
   0x6   : > { %p343_p4 = scmp.lt.s32.totalorder (!%p287_p3), %s773_s21, 6  ;;  %s676_s25 = sshll.u32 (!%p287_p3), %s773_s21, 4 }
   0x7   : > { %290 = sbr.rel (%p287_p3) target bundleno = 286 (0x11e), region = 44  ;;  %p350_p5 = scmp.lt.s32.totalorder (!%p287_p3), %s676_s25, 111 }
   0x8   : > { %p678_p6 = scmp.ne.s32.totalorder (!%p287_p3), %s773_s21, 0 }
   0xe   : > { %s844_s26 = scalar_select %p343_p4, %s773_s21, 6 }
   0xf   : > { %s903_s25 = smov (!%p350_p5, %s676_s25), 111  ;;  %381 = sbr.rel (%p678_p6) target bundleno = 22 (0x16), region = 48 }
  0x10   : > { %s675_s27 = sshll.u32 %s844_s26, 2  ;;  %s360_s30 = scalar_lea.vmem %s893_s2, %s844_s26  ;;  %v783_v0 = vmov (!%p678_p6), 0.0  }
  0x11   : > { %s348_s9 = scalar_lea.vmem %s891_s0, %s675_s27  ;;  %s677_s10 = sshll.u32 %s903_s25, 2  ;;  %382 = vst [vmem:[#allocation2] sm:$0xff] (!%p678_p6), %v783_v0 }
  0x12   : > { %s857_s13 = scalar_lea.vmem %s892_s1, %s677_s10  ;;  %s363_s16 = scalar_lea.vmem %s894_s3, %s844_s26 }
  0x16 PF: > { %v751_v1 = vld [vmem:[%s857_s13] sm:$0xff]   ;;  %v784_v2 = vmov 0.0   ;;  %v752_v3 = vld [vmem:[%s857_s13 + $0x8] sm:$0xff]   ;;  %vm785_vm0 = vmmov 0   ;;  %v753_v4 = vld [vmem:[%s857_s13 + $0x10] sm:$0xff]   ;;  %p689_p7 = scmp.ne.s32.totalorder %s773_s21, 6 }
  0x17   : > { %704 = vmatprep.subr.bf16.mxu0 %v784_v2  ;;  %720 = vmatprep.mubr.msk.bf16.mxu0 %vm785_vm0, %v784_v2  ;;  %v754_v5 = vld [vmem:[%s857_s13 + $0x18] sm:$0xff]   ;;  %v383_v6 = vld [vmem:[%s348_s9] sm:$0xf]  ;;  %v756_v11 = vld [vmem:[%s857_s13 + $0x28] sm:$0xff]  }
  0x18   : > { %705 = vmatpush3.bf16.msra.mxu0 %v751_v1  ;;  %v384_v7 = vunpack.c.l.bf16 %v383_v6  ;;  %v755_v8 = vld [vmem:[%s857_s13 + $0x20] sm:$0xff]   ;;  %v757_v14 = vld [vmem:[%s857_s13 + $0x30] sm:$0xff]   ;;  %v758_v16 = vld [vmem:[%s857_s13 + $0x38] sm:$0xff]  }
  0x19   : > { %706 = vmatprep.subr.bf16.mxu0 %v784_v2  ;;  %v679_v9 = vld [vmem:[%s360_s30] ss:$0 sm:$0xff] }
  0x1a   : > { %v392_v10 = vmul.f32 %v679_v9, %v384_v7  ;;  %v680_v12 = vld [vmem:[%s363_s16] ss:$0 sm:$0xff] }
  0x1b   : > { %v403_v18 = vld [vmem:[#allocation2] sm:$0xff] }
  0x1c   : > { %707 = vmatpush3.bf16.msra.mxu0 %v752_v3  ;;  %v400_v13 = vadd.f32 %v680_v12, %v392_v10  ;;  %v690_v25 = vld [vmem:[%s895_s4] ss:$0 sm:$0xff] (!%p689_p7) }
  0x1d   : > { %708 = vmatprep.subr.bf16.mxu0 %v784_v2  ;;  %v691_v26 = vld [vmem:[%s896_s5] ss:$0 sm:$0xff] (!%p689_p7) }
  0x1e   : > { %v401_v15 = vmax.f32 %v400_v13, 0.0 }
  0x20   : > { %709 = vmatpush3.bf16.msra.mxu0 %v753_v4  ;;  %v402_v17 = vpack.c.bf16 %v401_v15, %v401_v15 }
  0x21   : > { %710 = vmatprep.subr.bf16.mxu0 %v784_v2 }
  0x24   : > { %711 = vmatpush3.bf16.msra.mxu0 %v754_v5 }
  0x25   : > { %712 = vmatprep.subr.bf16.mxu0 %v784_v2 }
  0x28   : > { %713 = vmatpush3.bf16.msra.mxu0 %v755_v8 }
  0x29   : > { %714 = vmatprep.subr.bf16.mxu0 %v784_v2 }
  0x2c   : > { %715 = vmatpush3.bf16.msra.mxu0 %v756_v11 }
  0x2d   : > { %716 = vmatprep.subr.bf16.mxu0 %v784_v2 }
  0x30   : > { %717 = vmatpush3.bf16.msra.mxu0 %v757_v14 }
  0x31   : > { %718 = vmatprep.subr.bf16.mxu0 %v784_v2 }
  0x34   : > { %719 = vmatpush3.bf16.msra.mxu0 %v758_v16 }
  0x37   : > { %721 = vmatmul.mubr.bf16.vlgmr.msra.gmra.mrb[0].mxu0 %v402_v17 }
 0x107   : > { %513 = sbr.rel (%p689_p7) target bundleno = 286 (0x11e), region = 52 }
 0x10a   : > { %v502_v19 = vpop.f32.mrb[0].mxu0 }
 0x10b   : > { %v508_v20 = vadd.f32 %v502_v19, %v403_v18  ;;  %v722_v21 = vpop.f32.mrb[1].mxu0 }
 0x10c   : > { %v505_v22 = vpop.f32.mrb[2].mxu0 }
 0x10d   : > { %509 = vst [vmem:[#allocation2] sm:$0xff] %v508_v20  ;;  %v723_v23 = vpop.f32.mrb[3].mxu0 }
 0x114   : > { %v514_v24 = vld [vmem:[#allocation2] sm:$0xff] }
 0x115   : > { %v522_v27 = vmul.f32 %v690_v25, %v514_v24 }
 0x117   : > { %v530_v28 = vadd.f32 %v691_v26, %v522_v27 }
 0x119   : > { %v531_v29 = vmax.f32 %v530_v28, 0.0 }
 0x11b   : > { %v532_v30 = vpack.c.bf16 %v531_v29, %v531_v29 }
 0x11d   : > { %533 = vst [vmem:[%s897_s6] sm:$0xf] %v532_v30 }
 0x11e PF: > { %s16_s23 = sadd.s32 1, %s781_s23   ;;  %s898_s21 = smov %s777_s22 }
 0x11f   : > { %p13_p8 = scmp.ge.s32.totalorder %s16_s23, 9   ;;  %s899_s22 = smov %s901_s24 }
 0x121   :  { %15 = sbr.rel (!%p13_p8) target bundleno = 2 (0x2), region = 97 }

// kernel: densenet121_forward.201
= control target key start
LH: loop header
LB: loop body
LE: loop exit
PB: predicated region body
PF: predicated region fallthrough
CT: control target
= control target key end

     0   :  { %s1174_s21 = smov 0   ;;  %s1176_s22 = smov 0   ;;  %s1281_s0 = inlined_call_operand.vmem [shape: bf16[8,1024], index: 0, kind: input, shape index: {}]   ;;  %s1282_s1 = inlined_call_operand.vmem [shape: bf16[1024,128], index: 1, kind: input, shape index: {}]   ;;  %s1283_s2 = inlined_call_operand.vmem [shape: f32[1,1024], index: 2, kind: input, shape index: {}]   ;;  %s1284_s3 = inlined_call_operand.vmem [shape: f32[1,1024], index: 3, kind: input, shape index: {}]   ;;  %s1285_s4 = inlined_call_operand.vmem [shape: f32[1,128], index: 4, kind: input, shape index: {}]   ;;  %s1286_s5 = inlined_call_operand.vmem [shape: f32[1,128], index: 5, kind: input, shape index: {}]   ;;  %s1287_s6 = inlined_call_operand.vmem [shape: bf16[8,128], index: 6, kind: output, shape index: {}]  }
   0x1   :  { %s1178_s23 = smov 0  }
   0x2 LB: > { %s28_s24 = sadd.s32 1, %s1132_s22  ;;  %p967_p0 = scmp.ge.s32.totalorder %s1136_s23, 1  ;;  %s1136_s23 = sphi %s1178_s23, %s16_s23   ;;  %s1132_s22 = sphi %s1176_s22, %s1289_s22   ;;  %s1128_s21 = sphi %s1174_s21, %s1288_s21  }
   0x3   : > { %p29_p1 = scmp.ge.s32.totalorder %s28_s24, 2  ;;  %p292_p2 = scmp.lt.s32.totalorder %s1136_s23, 3 }
   0x5   : > { %s1291_s24 = smov (%p29_p1, %s28_s24), 0  ;;  %p293_p3 = pnand %p967_p0, %p292_p2 }
   0x6   : > { %s968_s25 = sshll.u32 (!%p293_p3), %s1128_s21, 2  ;;  %s970_s26 = sshll.u32 (!%p293_p3), %s1128_s21, 6 }
   0x7   : > { %296 = sbr.rel (%p293_p3) target bundleno = 296 (0x128), region = 44  ;;  %p353_p4 = scmp.lt.s32.totalorder (!%p293_p3), %s968_s25, 7 }
   0x8   : > { %p361_p5 = scmp.lt.s32.totalorder (!%p293_p3), %s970_s26, 127  ;;  %p974_p6 = scmp.ne.s32.totalorder (!%p293_p3), %s1128_s21, 0 }
   0xe   : > { %s1293_s25 = smov (!%p353_p4, %s968_s25), 7  ;;  %s1295_s26 = smov (!%p361_p5, %s970_s26), 127 }
   0xf   : > { %s969_s27 = sshll.u32 %s1293_s25, 2  ;;  %s372_s30 = scalar_lea.vmem %s1283_s2, %s1293_s25  ;;  %v1138_v0 = vmov (!%p974_p6), 0.0  }
  0x10   : > { %s1206_s9 = scalar_lea.vmem %s1281_s0, %s969_s27  ;;  %s971_s10 = sshll.u32 %s1295_s26, 2  ;;  %397 = vst [vmem:[#allocation2] sm:$0xff] (!%p974_p6), %v1138_v0 }
  0x11   : > { %s1211_s13 = scalar_lea.vmem %s1282_s1, %s971_s10  ;;  %s377_s16 = scalar_lea.vmem %s1284_s3, %s1293_s25 }
  0x12   : > { %396 = sbr.rel (%p974_p6) target bundleno = 25 (0x19), region = 48 }
  0x19 PF: > { %v1082_v1 = vld [vmem:[%s1211_s13 + $0x40] sm:$0xff]   ;;  %v1086_v5 = vld [vmem:[%s1211_s13 + $0x48] sm:$0xff]   ;;  %v1090_v9 = vld [vmem:[%s1211_s13 + $0x50] sm:$0xff]   ;;  %v406_v22 = vlaneseq  ;;  %p1007_p7 = scmp.ne.s32.totalorder %s1128_s21, 1 }
  0x1a   : > { %v1083_v2 = vld [vmem:[%s1211_s13 + $0xc0] sm:$0xff]   ;;  %1013 = vmatprep.subr.bf16.mxu0 %v1082_v1  ;;  %v1087_v6 = vld [vmem:[%s1211_s13 + $0xc8] sm:$0xff]   ;;  %v1091_v10 = vld [vmem:[%s1211_s13 + $0xd0] sm:$0xff]  }
  0x1b   : > { %v1084_v3 = vld [vmem:[%s1211_s13] sm:$0xff]   ;;  %1035 = vmatprep.subr.bf16.mxu1 %v1083_v2  ;;  %v1088_v7 = vld [vmem:[%s1211_s13 + $0x8] sm:$0xff]   ;;  %v1092_v11 = vld [vmem:[%s1211_s13 + $0x10] sm:$0xff]   ;;  %v407_v27 = vshrl.u32 %v406_v22, 7 }
  0x1c   : > { %v1085_v4 = vld [vmem:[%s1211_s13 + $0x80] sm:$0xff]   ;;  %1014 = vmatpush3.bf16.msra.mxu0 %v1084_v3  ;;  %v1089_v8 = vld [vmem:[%s1211_s13 + $0x88] sm:$0xff]   ;;  %v1093_v12 = vld [vmem:[%s1211_s13 + $0x90] sm:$0xff]  }
  0x1d   : > { %1036 = vmatpush3.bf16.msra.mxu1 %v1085_v4  ;;  %1015 = vmatprep.subr.bf16.mxu0 %v1086_v5  ;;  %v1094_v13 = vld [vmem:[%s1211_s13 + $0x58] sm:$0xff]   ;;  %v1098_v17 = vld [vmem:[%s1211_s13 + $0x60] sm:$0xff]   ;;  %v1102_v21 = vld [vmem:[%s1211_s13 + $0x68] sm:$0xff]   ;;  %v412_v32 = vsub.s32 1, %v407_v27  ;;  %v420_v34 = vsub.s32 3, %v407_v27  ;;  %v408_v36 = vsub.s32 0, %v407_v27 }
  0x1e   : > { %1037 = vmatprep.subr.bf16.mxu1 %v1087_v6  ;;  %v1095_v14 = vld [vmem:[%s1211_s13 + $0xd8] sm:$0xff]   ;;  %v1099_v18 = vld [vmem:[%s1211_s13 + $0xe0] sm:$0xff]   ;;  %v1103_v23 = vld [vmem:[%s1211_s13 + $0xe8] sm:$0xff]   ;;  %v416_v38 = vsub.s32 2, %v407_v27 }
  0x1f   : > { %v1096_v15 = vld [vmem:[%s1211_s13 + $0x18] sm:$0xff]   ;;  %v1100_v19 = vld [vmem:[%s1211_s13 + $0x20] sm:$0xff]   ;;  %v1104_v24 = vld [vmem:[%s1211_s13 + $0x28] sm:$0xff]  }
  0x20   : > { %1016 = vmatpush3.bf16.msra.mxu0 %v1088_v7  ;;  %v1097_v16 = vld [vmem:[%s1211_s13 + $0x98] sm:$0xff]   ;;  %v1101_v20 = vld [vmem:[%s1211_s13 + $0xa0] sm:$0xff]   ;;  %v1105_v25 = vld [vmem:[%s1211_s13 + $0xa8] sm:$0xff]  }
  0x21   : > { %1038 = vmatpush3.bf16.msra.mxu1 %v1089_v8  ;;  %1017 = vmatprep.subr.bf16.mxu0 %v1090_v9  ;;  %v1106_v26 = vld [vmem:[%s1211_s13 + $0x70] sm:$0xff]   ;;  %v1110_v31 = vld [vmem:[%s1211_s13 + $0x78] sm:$0xff]   ;;  %v398_v39 = vld [vmem:[%s1206_s9] sm:$0xff] }
  0x22   : > { %1039 = vmatprep.subr.bf16.mxu1 %v1091_v10  ;;  %v1107_v28 = vld [vmem:[%s1211_s13 + $0xf0] sm:$0xff]   ;;  %v1111_v33 = vld [vmem:[%s1211_s13 + $0xf8] sm:$0xff]   ;;  %v404_v40 = vld [vmem:[%s372_s30] sm:$0xf]  ;;  %v400_v42 = vunpack.c.l.bf16 %v398_v39  ;;  %v401_v43 = vunpack.c.h.bf16 %v398_v39 }
  0x23   : > { %v1108_v29 = vld [vmem:[%s1211_s13 + $0x30] sm:$0xff]   ;;  %v1112_v35 = vld [vmem:[%s1211_s13 + $0x38] sm:$0xff]   ;;  %v430_v41 = vld [vmem:[%s377_s16] sm:$0xf]  ;;  %v413_v44 = vrot.slane %v404_v40, %v412_v32  ;;  %v421_v49 = vrot.slane %v404_v40, %v420_v34  ;;  %v409_v52 = vrot.slane %v404_v40, %v408_v36  ;;  %v417_v54 = vrot.slane %v404_v40, %v416_v38 }
  0x24   : > { %1018 = vmatpush3.bf16.msra.mxu0 %v1092_v11  ;;  %v1109_v30 = vld [vmem:[%s1211_s13 + $0xb0] sm:$0xff]   ;;  %v1113_v37 = vld [vmem:[%s1211_s13 + $0xb8] sm:$0xff]   ;;  %v439_v45 = vrot.slane %v430_v41, %v412_v32  ;;  %v399_v46 = vld [vmem:[%s1206_s9 + $0x8] sm:$0xff]  ;;  %v447_v50 = vrot.slane %v430_v41, %v420_v34  ;;  %v435_v53 = vrot.slane %v430_v41, %v408_v36  ;;  %v443_v56 = vrot.slane %v430_v41, %v416_v38 }
  0x25   : > { %1040 = vmatpush3.bf16.msra.mxu1 %v1093_v12  ;;  %1019 = vmatprep.subr.bf16.mxu0 %v1094_v13  ;;  %v402_v47 = vunpack.c.l.bf16 %v399_v46  ;;  %v403_v48 = vunpack.c.h.bf16 %v399_v46  ;;  %v427_v51 = vmul.f32 %v413_v44, %v401_v43  ;;  %v426_v58 = vmul.f32 %v409_v52, %v400_v42  ;;  %v1009_v22 = vld [vmem:[%s1286_s5] ss:$0 sm:$0xff] (!%p1007_p7) }
  0x26   : > { %1041 = vmatprep.subr.bf16.mxu1 %v1095_v14 }
  0x27   : > { %v429_v55 = vmul.f32 %v421_v49, %v403_v48  ;;  %v453_v57 = vadd.f32 %v439_v45, %v427_v51  ;;  %v428_v59 = vmul.f32 %v417_v54, %v402_v47  ;;  %v452_v62 = vadd.f32 %v435_v53, %v426_v58 }
  0x28   : > { %1020 = vmatpush3.bf16.msra.mxu0 %v1096_v15  ;;  %v464_v15 = vld [vmem:[#allocation2] sm:$0xff] }
  0x29   : > { %1042 = vmatpush3.bf16.msra.mxu1 %v1097_v16  ;;  %1021 = vmatprep.subr.bf16.mxu0 %v1098_v17  ;;  %v455_v60 = vadd.f32 %v447_v50, %v429_v55  ;;  %v457_v61 = vmax.f32 %v453_v57, 0.0  ;;  %v454_v63 = vadd.f32 %v443_v56, %v428_v59  ;;  %v456_v2 = vmax.f32 %v452_v62, 0.0 }
  0x2a   : > { %1043 = vmatprep.subr.bf16.mxu1 %v1099_v18 }
  0x2b   : > { %v459_v0 = vmax.f32 %v455_v60, 0.0  ;;  %v461_v1 = vpack.c.bf16 %v457_v61, %v457_v61  ;;  %v458_v3 = vmax.f32 %v454_v63, 0.0  ;;  %v460_v5 = vpack.c.bf16 %v456_v2, %v456_v2 }
  0x2c   : > { %1022 = vmatpush3.bf16.msra.mxu0 %v1100_v19 }
  0x2d   : > { %1044 = vmatpush3.bf16.msra.mxu1 %v1101_v20  ;;  %1023 = vmatprep.subr.bf16.mxu0 %v1102_v21  ;;  %v463_v4 = vpack.c.bf16 %v459_v0, %v459_v0  ;;  %v462_v6 = vpack.c.bf16 %v458_v3, %v458_v3  ;;  %v1008_v21 = vld [vmem:[%s1285_s4] ss:$0 sm:$0xff] (!%p1007_p7) }
  0x2e   : > { %1045 = vmatprep.subr.bf16.mxu1 %v1103_v23  ;;  %753 = vmatprep.mubr.bf16.mxu0 %v461_v1 }
  0x2f   : > { %793 = vmatprep.mubr.bf16.mxu1 %v463_v4 }
  0x30   : > { %1024 = vmatpush3.bf16.msra.mxu0 %v1104_v24 }
  0x31   : > { %1046 = vmatpush3.bf16.msra.mxu1 %v1105_v25  ;;  %1025 = vmatprep.subr.bf16.mxu0 %v1106_v26 }
  0x32   : > { %1047 = vmatprep.subr.bf16.mxu1 %v1107_v28 }
  0x34   : > { %1026 = vmatpush3.bf16.msra.mxu0 %v1108_v29 }
  0x35   : > { %1048 = vmatpush3.bf16.msra.mxu1 %v1109_v30  ;;  %1027 = vmatprep.subr.bf16.mxu0 %v1110_v31 }
  0x36   : > { %1049 = vmatprep.subr.bf16.mxu1 %v1111_v33 }
  0x38   : > { %1028 = vmatpush3.bf16.msra.mxu0 %v1112_v35 }
  0x39   : > { %1050 = vmatpush3.bf16.msra.mxu1 %v1113_v37 }
  0x3b   : > { %754 = vmatmul.mubr.bf16.vlgmr.msra.gmra.mrb[0].mxu0 %v460_v5 }
  0x3c   : > { %794 = vmatmul.mubr.bf16.vlgmr.msra.gmra.mrb[0].mxu1 %v462_v6 }
 0x10e   : > { %v1029_v7 = vpop.f32.mrb[0].mxu0 }
 0x10f   : > { %v1051_v8 = vpop.f32.mrb[0].mxu1  ;;  %v1030_v9 = vpop.f32.mrb[1].mxu0 }
 0x110   : > { %v1052_v10 = vpop.f32.mrb[1].mxu1  ;;  %v1031_v11 = vadd.f32 %v1030_v9, %v1029_v7  ;;  %v1032_v13 = vpop.f32.mrb[2].mxu0 }
 0x111   : > { %v1053_v12 = vadd.f32 %v1052_v10, %v1051_v8  ;;  %v1054_v14 = vpop.f32.mrb[2].mxu1  ;;  %v1033_v16 = vpop.f32.mrb[3].mxu0  ;;  %806 = sbr.rel (%p1007_p7) target bundleno = 296 (0x128), region = 52 }
 0x112   : > { %v1055_v17 = vpop.f32.mrb[3].mxu1 }
 0x113   : > { %v796_v18 = vadd.f32 %v1053_v12, %v1031_v11 }
 0x115   : > { %v801_v19 = vadd.f32 %v796_v18, %v464_v15 }
 0x117   : > { %802 = vst [vmem:[#allocation2] sm:$0xff] %v801_v19 }
 0x11e   : > { %v807_v20 = vld [vmem:[#allocation2] sm:$0xff] }
 0x11f   : > { %v815_v23 = vmul.f32 %v1008_v21, %v807_v20 }
 0x121   : > { %v823_v24 = vadd.f32 %v1009_v22, %v815_v23 }
 0x123   : > { %v824_v25 = vmax.f32 %v823_v24, 0.0 }
 0x125   : > { %v825_v26 = vpack.c.bf16 %v824_v25, %v824_v25 }
 0x127   : > { %826 = vst [vmem:[%s1287_s6] sm:$0xf] %v825_v26 }
 0x128 PF: > { %s16_s23 = sadd.s32 1, %s1136_s23   ;;  %s1288_s21 = smov %s1132_s22 }
 0x129   : > { %p13_p8 = scmp.ge.s32.totalorder %s16_s23, 4   ;;  %s1289_s22 = smov %s1291_s24 }
 0x12b   :  { %15 = sbr.rel (!%p13_p8) target bundleno = 2 (0x2), region = 97 }

// kernel: densenet121_forward.207
= control target key start
LH: loop header
LB: loop body
LE: loop exit
PB: predicated region body
PF: predicated region fallthrough
CT: control target
= control target key end

     0   :  { %s1610_s15 = smov 0   ;;  %s1612_s16 = smov 0   ;;  %s1930_s0 = inlined_call_operand.vmem [shape: bf16[8,1024], index: 0, kind: input, shape index: {}]   ;;  %s1931_s1 = inlined_call_operand.vmem [shape: bf16[1024,512], index: 1, kind: input, shape index: {}]   ;;  %s1932_s2 = inlined_call_operand.vmem [shape: f32[1,1024], index: 2, kind: input, shape index: {}]   ;;  %s1933_s3 = inlined_call_operand.vmem [shape: f32[1,1024], index: 3, kind: input, shape index: {}]   ;;  %s1934_s4 = inlined_call_operand.vmem [shape: bf16[8,512], index: 4, kind: output, shape index: {}]  }
   0x1   :  { %s1614_s17 = smov 0   ;;  %s1616_s18 = smov 0  }
   0x2   :  { %s1618_s19 = smov 0   ;;  %s1620_s20 = smov 0  }
   0x3   :  { %s1622_s21 = smov 0  }
   0x4 LB: > { %s26_s22 = sadd.s32 1, %s1574_s19  ;;  %s29_s23 = sadd.s32 1, %s1578_s20  ;;  %s1582_s21 = sphi %s1622_s21, %s14_s21   ;;  %s1578_s20 = sphi %s1620_s20, %s1940_s20   ;;  %s1574_s19 = sphi %s1618_s19, %s1939_s19   ;;  %s1570_s18 = sphi %s1616_s18, %s1938_s18   ;;  %s1566_s17 = sphi %s1614_s17, %s1937_s17   ;;  %s1562_s16 = sphi %s1612_s16, %s1936_s16   ;;  %s1558_s15 = sphi %s1610_s15, %s1935_s15  }
   0x5   : > { %p27_p0 = scmp.ge.s32.totalorder %s26_s22, 2  ;;  %p77_p1 = scmp.ne.s32.totalorder %s1562_s16, %s1558_s15 }
   0x6   : > { %p78_p2 = scmp.eq.s32.totalorder %s1582_s21, 0  ;;  %s70_s27 = sadd.s32 1, %s1562_s16 }
   0x7   : > { %s1942_s22 = smov (%p27_p0, %s26_s22), 0  ;;  %s1944_s23 = smov (!%p27_p0, %s29_s23), %s1578_s20 }
   0x8   : > { %p79_p3 = por %p78_p2, %p77_p1  ;;  %p31_p4 = scmp.ge.s32.totalorder %s1944_s23, 2 }
   0x9   : > { %s65_s24 = ssub.s32 %s1574_s19, %s1942_s22  ;;  %p1290_p6 = scmp.ge.s32.totalorder %s1582_s21, 4 }
   0xa   : > { %s1946_s23 = smov (%p31_p4, %s1944_s23), 0 }
   0xb   : > { %s66_s25 = ssub.s32 %s1578_s20, %s1946_s23  ;;  %183 = sbr.rel (%p1290_p6) target bundleno = 57 (0x39), region = 16 }
   0xc   : > { %s67_s26 = sor.u32 %s66_s25, %s65_s24 }
   0xd   : > { %p68_p5 = scmp.eq.s32.totalorder %s67_s26, 0 }
   0xf   : > { %s1661_s28 = scalar_select %p68_p5, %s1562_s16, %s70_s27  }
  0x12   : > { %199 = sbr.rel (!%p79_p3) target bundleno = 57 (0x39), region = 24  ;;  %s201_s29 = sand.u32 (%p79_p3), 1, %s1562_s16  }
  0x13   : > { %s1293_s30 = sshll.u32 (%p79_p3), %s1578_s20, 1  ;;  %s1291_s5 = sshll.u32 (%p79_p3), %s201_s29, 9 }
  0x14   : > { %s1373_s6 = sshll.u32 (%p79_p3), %s1574_s19, 8  ;;  %s1675_s12 = scalar_lea.vmem (%p79_p3), [#allocation3], %s1291_s5 }
  0x15   : > { %s207_s7 = sadd.s32 (%p79_p3), %s1373_s6, %s1293_s30 }
  0x16   : > { %s1295_s8 = sshll.u32 (%p79_p3), %s207_s7, 2 }
  0x17   : > { %s1670_s11 = scalar_lea.vmem (%p79_p3), %s1931_s1, %s1295_s8 }
  0x18   : > { %v363_v0 = vld [vmem:[%s1670_s11] sm:$0xff] (%p79_p3)  ;;  %v365_v1 = vld [vmem:[%s1670_s11 + $0x10] sm:$0xff] (%p79_p3) }
  0x19   : > { %v367_v2 = vld [vmem:[%s1670_s11 + $0x20] sm:$0xff]  ;;  %364 = vst [vmem:[%s1675_s12] sm:$0xff] %v363_v0  ;;  %366 = vst [vmem:[%s1675_s12 + $0x8] sm:$0xff] %v365_v1  ;;  %v369_v3 = vld [vmem:[%s1670_s11 + $0x30] sm:$0xff] }
  0x1a   : > { %368 = vst [vmem:[%s1675_s12 + $0x10] sm:$0xff] %v367_v2  ;;  %v371_v4 = vld [vmem:[%s1670_s11 + $0x40] sm:$0xff]  ;;  %v373_v5 = vld [vmem:[%s1670_s11 + $0x50] sm:$0xff]  ;;  %370 = vst [vmem:[%s1675_s12 + $0x18] sm:$0xff] %v369_v3 }
  0x1b   : > { %372 = vst [vmem:[%s1675_s12 + $0x20] sm:$0xff] %v371_v4  ;;  %374 = vst [vmem:[%s1675_s12 + $0x28] sm:$0xff] %v373_v5  ;;  %v375_v6 = vld [vmem:[%s1670_s11 + $0x60] sm:$0xff]  ;;  %v377_v7 = vld [vmem:[%s1670_s11 + $0x70] sm:$0xff] }
  0x1c   : > { %v379_v8 = vld [vmem:[%s1670_s11 + $0x80] sm:$0xff]  ;;  %376 = vst [vmem:[%s1675_s12 + $0x30] sm:$0xff] %v375_v6  ;;  %378 = vst [vmem:[%s1675_s12 + $0x38] sm:$0xff] %v377_v7  ;;  %v381_v9 = vld [vmem:[%s1670_s11 + $0x90] sm:$0xff] }
  0x1d   : > { %380 = vst [vmem:[%s1675_s12 + $0x40] sm:$0xff] %v379_v8  ;;  %v383_v10 = vld [vmem:[%s1670_s11 + $0xa0] sm:$0xff]  ;;  %v385_v11 = vld [vmem:[%s1670_s11 + $0xb0] sm:$0xff]  ;;  %382 = vst [vmem:[%s1675_s12 + $0x48] sm:$0xff] %v381_v9 }
  0x1e   : > { %384 = vst [vmem:[%s1675_s12 + $0x50] sm:$0xff] %v383_v10  ;;  %386 = vst [vmem:[%s1675_s12 + $0x58] sm:$0xff] %v385_v11  ;;  %v387_v12 = vld [vmem:[%s1670_s11 + $0xc0] sm:$0xff]  ;;  %v389_v13 = vld [vmem:[%s1670_s11 + $0xd0] sm:$0xff] }
  0x1f   : > { %v391_v14 = vld [vmem:[%s1670_s11 + $0xe0] sm:$0xff]  ;;  %388 = vst [vmem:[%s1675_s12 + $0x60] sm:$0xff] %v387_v12  ;;  %390 = vst [vmem:[%s1675_s12 + $0x68] sm:$0xff] %v389_v13  ;;  %v393_v15 = vld [vmem:[%s1670_s11 + $0xf0] sm:$0xff] }
  0x20   : > { %392 = vst [vmem:[%s1675_s12 + $0x70] sm:$0xff] %v391_v14  ;;  %v395_v16 = vld [vmem:[%s1670_s11 + $0x100] sm:$0xff]  ;;  %v397_v17 = vld [vmem:[%s1670_s11 + $0x110] sm:$0xff]  ;;  %394 = vst [vmem:[%s1675_s12 + $0x78] sm:$0xff] %v393_v15 }
  0x21   : > { %396 = vst [vmem:[%s1675_s12 + $0x80] sm:$0xff] %v395_v16  ;;  %398 = vst [vmem:[%s1675_s12 + $0x88] sm:$0xff] %v397_v17  ;;  %v399_v18 = vld [vmem:[%s1670_s11 + $0x120] sm:$0xff]  ;;  %v401_v19 = vld [vmem:[%s1670_s11 + $0x130] sm:$0xff] }
  0x22   : > { %v403_v20 = vld [vmem:[%s1670_s11 + $0x140] sm:$0xff]  ;;  %400 = vst [vmem:[%s1675_s12 + $0x90] sm:$0xff] %v399_v18  ;;  %402 = vst [vmem:[%s1675_s12 + $0x98] sm:$0xff] %v401_v19  ;;  %v405_v21 = vld [vmem:[%s1670_s11 + $0x150] sm:$0xff] }
  0x23   : > { %404 = vst [vmem:[%s1675_s12 + $0xa0] sm:$0xff] %v403_v20  ;;  %v407_v22 = vld [vmem:[%s1670_s11 + $0x160] sm:$0xff]  ;;  %v409_v23 = vld [vmem:[%s1670_s11 + $0x170] sm:$0xff]  ;;  %406 = vst [vmem:[%s1675_s12 + $0xa8] sm:$0xff] %v405_v21 }
  0x24   : > { %408 = vst [vmem:[%s1675_s12 + $0xb0] sm:$0xff] %v407_v22  ;;  %410 = vst [vmem:[%s1675_s12 + $0xb8] sm:$0xff] %v409_v23  ;;  %v411_v24 = vld [vmem:[%s1670_s11 + $0x180] sm:$0xff]  ;;  %v413_v25 = vld [vmem:[%s1670_s11 + $0x190] sm:$0xff] }
  0x25   : > { %v415_v26 = vld [vmem:[%s1670_s11 + $0x1a0] sm:$0xff]  ;;  %412 = vst [vmem:[%s1675_s12 + $0xc0] sm:$0xff] %v411_v24  ;;  %414 = vst [vmem:[%s1675_s12 + $0xc8] sm:$0xff] %v413_v25  ;;  %v417_v27 = vld [vmem:[%s1670_s11 + $0x1b0] sm:$0xff] }
  0x26   : > { %416 = vst [vmem:[%s1675_s12 + $0xd0] sm:$0xff] %v415_v26  ;;  %v419_v28 = vld [vmem:[%s1670_s11 + $0x1c0] sm:$0xff]  ;;  %v421_v29 = vld [vmem:[%s1670_s11 + $0x1d0] sm:$0xff]  ;;  %418 = vst [vmem:[%s1675_s12 + $0xd8] sm:$0xff] %v417_v27 }
  0x27   : > { %420 = vst [vmem:[%s1675_s12 + $0xe0] sm:$0xff] %v419_v28  ;;  %422 = vst [vmem:[%s1675_s12 + $0xe8] sm:$0xff] %v421_v29  ;;  %v423_v30 = vld [vmem:[%s1670_s11 + $0x1e0] sm:$0xff]  ;;  %v425_v31 = vld [vmem:[%s1670_s11 + $0x1f0] sm:$0xff] }
  0x28   : > { %v427_v32 = vld [vmem:[%s1670_s11 + $0x200] sm:$0xff]  ;;  %424 = vst [vmem:[%s1675_s12 + $0xf0] sm:$0xff] %v423_v30  ;;  %426 = vst [vmem:[%s1675_s12 + $0xf8] sm:$0xff] %v425_v31  ;;  %v429_v33 = vld [vmem:[%s1670_s11 + $0x210] sm:$0xff] }
  0x29   : > { %428 = vst [vmem:[%s1675_s12 + $0x100] sm:$0xff] %v427_v32  ;;  %v431_v34 = vld [vmem:[%s1670_s11 + $0x220] sm:$0xff]  ;;  %v433_v35 = vld [vmem:[%s1670_s11 + $0x230] sm:$0xff]  ;;  %430 = vst [vmem:[%s1675_s12 + $0x108] sm:$0xff] %v429_v33 }
  0x2a   : > { %432 = vst [vmem:[%s1675_s12 + $0x110] sm:$0xff] %v431_v34  ;;  %434 = vst [vmem:[%s1675_s12 + $0x118] sm:$0xff] %v433_v35  ;;  %v435_v36 = vld [vmem:[%s1670_s11 + $0x240] sm:$0xff]  ;;  %v437_v37 = vld [vmem:[%s1670_s11 + $0x250] sm:$0xff] }
  0x2b   : > { %v439_v38 = vld [vmem:[%s1670_s11 + $0x260] sm:$0xff]  ;;  %436 = vst [vmem:[%s1675_s12 + $0x120] sm:$0xff] %v435_v36  ;;  %438 = vst [vmem:[%s1675_s12 + $0x128] sm:$0xff] %v437_v37  ;;  %v441_v39 = vld [vmem:[%s1670_s11 + $0x270] sm:$0xff] }
  0x2c   : > { %440 = vst [vmem:[%s1675_s12 + $0x130] sm:$0xff] %v439_v38  ;;  %v443_v40 = vld [vmem:[%s1670_s11 + $0x280] sm:$0xff]  ;;  %v445_v41 = vld [vmem:[%s1670_s11 + $0x290] sm:$0xff]  ;;  %442 = vst [vmem:[%s1675_s12 + $0x138] sm:$0xff] %v441_v39 }
  0x2d   : > { %444 = vst [vmem:[%s1675_s12 + $0x140] sm:$0xff] %v443_v40  ;;  %446 = vst [vmem:[%s1675_s12 + $0x148] sm:$0xff] %v445_v41  ;;  %v447_v42 = vld [vmem:[%s1670_s11 + $0x2a0] sm:$0xff]  ;;  %v449_v43 = vld [vmem:[%s1670_s11 + $0x2b0] sm:$0xff] }
  0x2e   : > { %v451_v44 = vld [vmem:[%s1670_s11 + $0x2c0] sm:$0xff]  ;;  %448 = vst [vmem:[%s1675_s12 + $0x150] sm:$0xff] %v447_v42  ;;  %450 = vst [vmem:[%s1675_s12 + $0x158] sm:$0xff] %v449_v43  ;;  %v453_v45 = vld [vmem:[%s1670_s11 + $0x2d0] sm:$0xff] }
  0x2f   : > { %452 = vst [vmem:[%s1675_s12 + $0x160] sm:$0xff] %v451_v44  ;;  %v455_v46 = vld [vmem:[%s1670_s11 + $0x2e0] sm:$0xff]  ;;  %v457_v47 = vld [vmem:[%s1670_s11 + $0x2f0] sm:$0xff]  ;;  %454 = vst [vmem:[%s1675_s12 + $0x168] sm:$0xff] %v453_v45 }
  0x30   : > { %456 = vst [vmem:[%s1675_s12 + $0x170] sm:$0xff] %v455_v46  ;;  %458 = vst [vmem:[%s1675_s12 + $0x178] sm:$0xff] %v457_v47  ;;  %v459_v48 = vld [vmem:[%s1670_s11 + $0x300] sm:$0xff]  ;;  %v461_v49 = vld [vmem:[%s1670_s11 + $0x310] sm:$0xff] }
  0x31   : > { %v463_v50 = vld [vmem:[%s1670_s11 + $0x320] sm:$0xff]  ;;  %460 = vst [vmem:[%s1675_s12 + $0x180] sm:$0xff] %v459_v48  ;;  %462 = vst [vmem:[%s1675_s12 + $0x188] sm:$0xff] %v461_v49  ;;  %v465_v51 = vld [vmem:[%s1670_s11 + $0x330] sm:$0xff] }
  0x32   : > { %464 = vst [vmem:[%s1675_s12 + $0x190] sm:$0xff] %v463_v50  ;;  %v467_v52 = vld [vmem:[%s1670_s11 + $0x340] sm:$0xff]  ;;  %v469_v53 = vld [vmem:[%s1670_s11 + $0x350] sm:$0xff]  ;;  %466 = vst [vmem:[%s1675_s12 + $0x198] sm:$0xff] %v465_v51 }
  0x33   : > { %468 = vst [vmem:[%s1675_s12 + $0x1a0] sm:$0xff] %v467_v52  ;;  %470 = vst [vmem:[%s1675_s12 + $0x1a8] sm:$0xff] %v469_v53  ;;  %v471_v54 = vld [vmem:[%s1670_s11 + $0x360] sm:$0xff]  ;;  %v473_v55 = vld [vmem:[%s1670_s11 + $0x370] sm:$0xff] }
  0x34   : > { %v475_v56 = vld [vmem:[%s1670_s11 + $0x380] sm:$0xff]  ;;  %472 = vst [vmem:[%s1675_s12 + $0x1b0] sm:$0xff] %v471_v54  ;;  %474 = vst [vmem:[%s1675_s12 + $0x1b8] sm:$0xff] %v473_v55  ;;  %v477_v57 = vld [vmem:[%s1670_s11 + $0x390] sm:$0xff] }
  0x35   : > { %476 = vst [vmem:[%s1675_s12 + $0x1c0] sm:$0xff] %v475_v56  ;;  %v479_v58 = vld [vmem:[%s1670_s11 + $0x3a0] sm:$0xff]  ;;  %v481_v59 = vld [vmem:[%s1670_s11 + $0x3b0] sm:$0xff]  ;;  %478 = vst [vmem:[%s1675_s12 + $0x1c8] sm:$0xff] %v477_v57 }
  0x36   : > { %480 = vst [vmem:[%s1675_s12 + $0x1d0] sm:$0xff] %v479_v58  ;;  %482 = vst [vmem:[%s1675_s12 + $0x1d8] sm:$0xff] %v481_v59  ;;  %v483_v60 = vld [vmem:[%s1670_s11 + $0x3c0] sm:$0xff]  ;;  %v485_v61 = vld [vmem:[%s1670_s11 + $0x3d0] sm:$0xff] }
  0x37   : > { %v487_v62 = vld [vmem:[%s1670_s11 + $0x3e0] sm:$0xff]  ;;  %484 = vst [vmem:[%s1675_s12 + $0x1e0] sm:$0xff] %v483_v60  ;;  %486 = vst [vmem:[%s1675_s12 + $0x1e8] sm:$0xff] %v485_v61  ;;  %v489_v63 = vld [vmem:[%s1670_s11 + $0x3f0] sm:$0xff] }
  0x38   : > { %488 = vst [vmem:[%s1675_s12 + $0x1f0] sm:$0xff] %v487_v62  ;;  %490 = vst [vmem:[%s1675_s12 + $0x1f8] sm:$0xff] %v489_v63 }
  0x39 PF: > { %p1296_p7 = scmp.ge.s32.totalorder %s1582_s21, 1  ;;  %p511_p8 = scmp.lt.s32.totalorder %s1582_s21, 5 }
  0x3b   : > { %p512_p9 = pnand %p1296_p7, %p511_p8 }
  0x3c   : > { %s518_s13 = sand.u32 (!%p512_p9), 1, %s1558_s15   ;;  %s1298_s14 = sshll.u32 (!%p512_p9), %s1566_s17, 2 }
  0x3d   : > { %515 = sbr.rel (%p512_p9) target bundleno = 372 (0x174), region = 70  ;;  %s1297_s24 = sshll.u32 (!%p512_p9), %s518_s13, 9 }
  0x3e   : > { %p567_p10 = scmp.lt.s32.totalorder (!%p512_p9), %s1298_s14, 7  ;;  %s1302_s25 = sshll.u32 (!%p512_p9), %s1570_s18, 1 }
  0x3f   : > { %p589_p11 = scmp.lt.s32.totalorder (!%p512_p9), %s1302_s25, 3  ;;  %s1828_s13 = scalar_lea.vmem (!%p512_p9), [#allocation3], %s1297_s24 }
  0x40   : > { %p1304_p12 = scmp.ne.s32.totalorder (!%p512_p9), %s1566_s17, 0 }
  0x44   : > { %s1948_s14 = smov (!%p567_p10, %s1298_s14), 7  ;;  %s1950_s25 = smov (!%p589_p11, %s1302_s25), 3 }
  0x45   : > { %s1299_s26 = sshll.u32 %s1948_s14, 2  ;;  %s579_s30 = scalar_lea.vmem %s1932_s2, %s1948_s14  ;;  %v1584_v0 = vmov (!%p1304_p12), 0.0  }
  0x46   : > { %s1817_s7 = scalar_lea.vmem %s1930_s0, %s1299_s26  ;;  %s584_s18 = scalar_lea.vmem %s1933_s3, %s1948_s14  ;;  %600 = vst [vmem:[#allocation2] sm:$0xff] (!%p1304_p12), %v1584_v0  ;;  %601 = vst [vmem:[#allocation2 + $0x8] sm:$0xff] (!%p1304_p12), %v1584_v0 }
  0x47   : > { %s1303_s9 = sshll.u32 %s1950_s25, 2  ;;  %599 = sbr.rel (%p1304_p12) target bundleno = 78 (0x4e), region = 78 }
  0x48   : > { %s1826_s12 = scalar_lea.vmem %s1934_s4, %s1303_s9 }
  0x4e PF: > { %v1432_v1 = vld [vmem:[%s1828_s13 + $0x4] ss:$8 sps:$4 sm:$0xff]   ;;  %v1436_v3 = vld [vmem:[%s1828_s13] ss:$8 sps:$4 sm:$0xff]   ;;  %v1438_v5 = vld [vmem:[%s1828_s13 + $0x14] ss:$8 sps:$4 sm:$0xff]   ;;  %v610_v38 = vlaneseq }
  0x4f   : > { %v1434_v2 = vld [vmem:[%s1828_s13 + $0x104] ss:$8 sps:$4 sm:$0xff]   ;;  %1054 = vmatprep.subr.bf16.mxu0 %v1432_v1  ;;  %v1437_v4 = vld [vmem:[%s1828_s13 + $0x100] ss:$8 sps:$4 sm:$0xff]   ;;  %v1440_v6 = vld [vmem:[%s1828_s13 + $0x114] ss:$8 sps:$4 sm:$0xff]  }
  0x50   : > { %1095 = vmatprep.subr.bf16.mxu1 %v1434_v2  ;;  %1055 = vmatpush1.bf16.msra.mxu0 %v1436_v3  ;;  %v1442_v7 = vld [vmem:[%s1828_s13 + $0x10] ss:$8 sps:$4 sm:$0xff]   ;;  %v1444_v9 = vld [vmem:[%s1828_s13 + $0x24] ss:$8 sps:$4 sm:$0xff]   ;;  %v1448_v11 = vld [vmem:[%s1828_s13 + $0x20] ss:$8 sps:$4 sm:$0xff]  }
  0x51   : > { %1096 = vmatpush1.bf16.msra.mxu1 %v1437_v4  ;;  %1056 = vmatprep.subr.bf16.mxu0 %v1438_v5  ;;  %v1443_v8 = vld [vmem:[%s1828_s13 + $0x110] ss:$8 sps:$4 sm:$0xff]   ;;  %v1446_v10 = vld [vmem:[%s1828_s13 + $0x124] ss:$8 sps:$4 sm:$0xff]   ;;  %v1449_v12 = vld [vmem:[%s1828_s13 + $0x120] ss:$8 sps:$4 sm:$0xff]  }
  0x52   : > { %1097 = vmatprep.subr.bf16.mxu1 %v1440_v6  ;;  %v1450_v13 = vld [vmem:[%s1828_s13 + $0x34] ss:$8 sps:$4 sm:$0xff]   ;;  %v1454_v15 = vld [vmem:[%s1828_s13 + $0x30] ss:$8 sps:$4 sm:$0xff]   ;;  %v1456_v17 = vld [vmem:[%s1828_s13 + $0x44] ss:$8 sps:$4 sm:$0xff]  }
  0x53   : > { %v1452_v14 = vld [vmem:[%s1828_s13 + $0x134] ss:$8 sps:$4 sm:$0xff]   ;;  %v1455_v16 = vld [vmem:[%s1828_s13 + $0x130] ss:$8 sps:$4 sm:$0xff]   ;;  %v1458_v18 = vld [vmem:[%s1828_s13 + $0x144] ss:$8 sps:$4 sm:$0xff]  }
  0x54   : > { %1057 = vmatpush1.bf16.msra.mxu0 %v1442_v7  ;;  %v1460_v19 = vld [vmem:[%s1828_s13 + $0x40] ss:$8 sps:$4 sm:$0xff]   ;;  %v1462_v21 = vld [vmem:[%s1828_s13 + $0x54] ss:$8 sps:$4 sm:$0xff]   ;;  %v1466_v23 = vld [vmem:[%s1828_s13 + $0x50] ss:$8 sps:$4 sm:$0xff]  }
  0x55   : > { %1098 = vmatpush1.bf16.msra.mxu1 %v1443_v8  ;;  %1058 = vmatprep.subr.bf16.mxu0 %v1444_v9  ;;  %v1461_v20 = vld [vmem:[%s1828_s13 + $0x140] ss:$8 sps:$4 sm:$0xff]   ;;  %v1464_v22 = vld [vmem:[%s1828_s13 + $0x154] ss:$8 sps:$4 sm:$0xff]   ;;  %v1467_v24 = vld [vmem:[%s1828_s13 + $0x150] ss:$8 sps:$4 sm:$0xff]  }
  0x56   : > { %1099 = vmatprep.subr.bf16.mxu1 %v1446_v10  ;;  %v1468_v25 = vld [vmem:[%s1828_s13 + $0x64] ss:$8 sps:$4 sm:$0xff]   ;;  %v1472_v27 = vld [vmem:[%s1828_s13 + $0x60] ss:$8 sps:$4 sm:$0xff]   ;;  %v1474_v29 = vld [vmem:[%s1828_s13 + $0x74] ss:$8 sps:$4 sm:$0xff]  }
  0x57   : > { %v1470_v26 = vld [vmem:[%s1828_s13 + $0x164] ss:$8 sps:$4 sm:$0xff]   ;;  %v1473_v28 = vld [vmem:[%s1828_s13 + $0x160] ss:$8 sps:$4 sm:$0xff]   ;;  %v1476_v30 = vld [vmem:[%s1828_s13 + $0x174] ss:$8 sps:$4 sm:$0xff]  }
  0x58   : > { %1059 = vmatpush1.bf16.msra.mxu0 %v1448_v11  ;;  %v1478_v31 = vld [vmem:[%s1828_s13 + $0x70] ss:$8 sps:$4 sm:$0xff]   ;;  %v1480_v33 = vld [vmem:[%s1828_s13 + $0x84] ss:$8 sps:$4 sm:$0xff]   ;;  %v1484_v35 = vld [vmem:[%s1828_s13 + $0x80] ss:$8 sps:$4 sm:$0xff]  }
  0x59   : > { %1100 = vmatpush1.bf16.msra.mxu1 %v1449_v12  ;;  %1060 = vmatprep.subr.bf16.mxu0 %v1450_v13  ;;  %v1479_v32 = vld [vmem:[%s1828_s13 + $0x170] ss:$8 sps:$4 sm:$0xff]   ;;  %v1482_v34 = vld [vmem:[%s1828_s13 + $0x184] ss:$8 sps:$4 sm:$0xff]   ;;  %v1485_v36 = vld [vmem:[%s1828_s13 + $0x180] ss:$8 sps:$4 sm:$0xff]  }
  0x5a   : > { %1101 = vmatprep.subr.bf16.mxu1 %v1452_v14  ;;  %v1486_v37 = vld [vmem:[%s1828_s13 + $0x94] ss:$8 sps:$4 sm:$0xff]   ;;  %v1490_v40 = vld [vmem:[%s1828_s13 + $0x90] ss:$8 sps:$4 sm:$0xff]   ;;  %v1492_v42 = vld [vmem:[%s1828_s13 + $0xa4] ss:$8 sps:$4 sm:$0xff]  }
  0x5b   : > { %v1488_v39 = vld [vmem:[%s1828_s13 + $0x194] ss:$8 sps:$4 sm:$0xff]   ;;  %v1491_v41 = vld [vmem:[%s1828_s13 + $0x190] ss:$8 sps:$4 sm:$0xff]   ;;  %v611_v43 = vshrl.u32 %v610_v38, 7  ;;  %p1369_p13 = scmp.ne.s32.totalorder %s1566_s17, 1 }
  0x5c   : > { %1061 = vmatpush1.bf16.msra.mxu0 %v1454_v15  ;;  %v1494_v44 = vld [vmem:[%s1828_s13 + $0x1a4] ss:$8 sps:$4 sm:$0xff]   ;;  %v1496_v45 = vld [vmem:[%s1828_s13 + $0xa0] ss:$8 sps:$4 sm:$0xff]   ;;  %v1498_v47 = vld [vmem:[%s1828_s13 + $0xb4] ss:$8 sps:$4 sm:$0xff]  }
  0x5d   : > { %1102 = vmatpush1.bf16.msra.mxu1 %v1455_v16  ;;  %1062 = vmatprep.subr.bf16.mxu0 %v1456_v17  ;;  %v1497_v46 = vld [vmem:[%s1828_s13 + $0x1a0] ss:$8 sps:$4 sm:$0xff]   ;;  %v616_v48 = vsub.s32 1, %v611_v43  ;;  %v1500_v49 = vld [vmem:[%s1828_s13 + $0x1b4] ss:$8 sps:$4 sm:$0xff]   ;;  %v624_v50 = vsub.s32 3, %v611_v43 }
  0x5e   : > { %1103 = vmatprep.subr.bf16.mxu1 %v1458_v18  ;;  %v602_v51 = vld [vmem:[%s1817_s7] sm:$0xff]  ;;  %v612_v52 = vsub.s32 0, %v611_v43  ;;  %v603_v56 = vld [vmem:[%s1817_s7 + $0x8] sm:$0xff]  ;;  %v620_v57 = vsub.s32 2, %v611_v43  ;;  %v1504_v63 = vld [vmem:[%s1828_s13 + $0xc4] ss:$8 sps:$4 sm:$0xff]  }
  0x5f   : > { %v605_v53 = vunpack.c.h.bf16 %v602_v51  ;;  %v608_v54 = vld [vmem:[%s579_s30] sm:$0xf]  ;;  %v607_v62 = vunpack.c.h.bf16 %v603_v56  ;;  %v1506_v0 = vld [vmem:[%s1828_s13 + $0x1c4] ss:$8 sps:$4 sm:$0xff]   ;;  %v604_v3 = vunpack.c.l.bf16 %v602_v51  ;;  %v606_v5 = vunpack.c.l.bf16 %v603_v56  ;;  %v1508_v9 = vld [vmem:[%s1828_s13 + $0xc0] ss:$8 sps:$4 sm:$0xff]  }
  0x60   : > { %1063 = vmatpush1.bf16.msra.mxu0 %v1460_v19  ;;  %v634_v55 = vld [vmem:[%s584_s18] sm:$0xf]  ;;  %v617_v60 = vrot.slane %v608_v54, %v616_v48  ;;  %v625_v1 = vrot.slane %v608_v54, %v624_v50  ;;  %v613_v7 = vrot.slane %v608_v54, %v612_v52  ;;  %v621_v8 = vrot.slane %v608_v54, %v620_v57  ;;  %v1509_v10 = vld [vmem:[%s1828_s13 + $0x1c0] ss:$8 sps:$4 sm:$0xff]   ;;  %v1510_v12 = vld [vmem:[%s1828_s13 + $0xd4] ss:$8 sps:$4 sm:$0xff]  }
  0x61   : > { %1104 = vmatpush1.bf16.msra.mxu1 %v1461_v20  ;;  %1064 = vmatprep.subr.bf16.mxu0 %v1462_v21  ;;  %v1502_v58 = vld [vmem:[%s1828_s13 + $0xb0] ss:$8 sps:$4 sm:$0xff]   ;;  %v643_v61 = vrot.slane %v634_v55, %v616_v48  ;;  %v651_v2 = vrot.slane %v634_v55, %v624_v50  ;;  %v1512_v13 = vld [vmem:[%s1828_s13 + $0x1d4] ss:$8 sps:$4 sm:$0xff]   ;;  %v639_v16 = vrot.slane %v634_v55, %v612_v52 }
  0x62   : > { %1105 = vmatprep.subr.bf16.mxu1 %v1464_v22  ;;  %v1503_v59 = vld [vmem:[%s1828_s13 + $0x1b0] ss:$8 sps:$4 sm:$0xff]   ;;  %v631_v4 = vmul.f32 %v617_v60, %v605_v53  ;;  %v633_v6 = vmul.f32 %v625_v1, %v607_v62  ;;  %v630_v18 = vmul.f32 %v613_v7, %v604_v3  ;;  %v632_v19 = vmul.f32 %v621_v8, %v606_v5 }
  0x63   : > { %v647_v20 = vrot.slane %v634_v55, %v620_v57  ;;  %v1514_v21 = vld [vmem:[%s1828_s13 + $0xd0] ss:$8 sps:$4 sm:$0xff]  }
  0x64   : > { %1065 = vmatpush1.bf16.msra.mxu0 %v1466_v23  ;;  %v657_v11 = vadd.f32 %v643_v61, %v631_v4  ;;  %v659_v14 = vadd.f32 %v651_v2, %v633_v6  ;;  %v1515_v22 = vld [vmem:[%s1828_s13 + $0x1d0] ss:$8 sps:$4 sm:$0xff]  }
  0x65   : > { %1106 = vmatpush1.bf16.msra.mxu1 %v1467_v24  ;;  %1066 = vmatprep.subr.bf16.mxu0 %v1468_v25  ;;  %v1516_v24 = vld [vmem:[%s1828_s13 + $0xe4] ss:$8 sps:$4 sm:$0xff]  }
  0x66   : > { %1107 = vmatprep.subr.bf16.mxu1 %v1470_v26  ;;  %v661_v15 = vmax.f32 %v657_v11, 0.0  ;;  %v663_v17 = vmax.f32 %v659_v14, 0.0  ;;  %v1518_v25 = vld [vmem:[%s1828_s13 + $0x1e4] ss:$8 sps:$4 sm:$0xff]  }
  0x68   : > { %1067 = vmatpush1.bf16.msra.mxu0 %v1472_v27  ;;  %v665_v23 = vpack.c.bf16 %v661_v15, %v661_v15  ;;  %v667_v26 = vpack.c.bf16 %v663_v17, %v663_v17  ;;  %v656_v27 = vadd.f32 %v639_v16, %v630_v18 }
  0x69   : > { %1108 = vmatpush1.bf16.msra.mxu1 %v1473_v28  ;;  %1068 = vmatprep.subr.bf16.mxu0 %v1474_v29  ;;  %v658_v28 = vadd.f32 %v647_v20, %v632_v19  ;;  %v1520_v29 = vld [vmem:[%s1828_s13 + $0xe0] ss:$8 sps:$4 sm:$0xff]  }
  0x6a   : > { %1109 = vmatprep.subr.bf16.mxu1 %v1476_v30  ;;  %1086 = vmatprep.mubr.bf16.mxu0 %v665_v23  ;;  %v1521_v30 = vld [vmem:[%s1828_s13 + $0x1e0] ss:$8 sps:$4 sm:$0xff]  }
  0x6b   : > { %1127 = vmatprep.mubr.bf16.mxu1 %v667_v26 }
  0x6c   : > { %1069 = vmatpush1.bf16.msra.mxu0 %v1478_v31  ;;  %v1522_v31 = vld [vmem:[%s1828_s13 + $0xf4] ss:$8 sps:$4 sm:$0xff]  }
  0x6d   : > { %1110 = vmatpush1.bf16.msra.mxu1 %v1479_v32  ;;  %1070 = vmatprep.subr.bf16.mxu0 %v1480_v33  ;;  %v1524_v32 = vld [vmem:[%s1828_s13 + $0x1f4] ss:$8 sps:$4 sm:$0xff]   ;;  %v660_v33 = vmax.f32 %v656_v27, 0.0 }
  0x6e   : > { %1111 = vmatprep.subr.bf16.mxu1 %v1482_v34  ;;  %v662_v34 = vmax.f32 %v658_v28, 0.0 }
  0x70   : > { %1071 = vmatpush1.bf16.msra.mxu0 %v1484_v35  ;;  %v1526_v35 = vld [vmem:[%s1828_s13 + $0xf0] ss:$8 sps:$4 sm:$0xff]   ;;  %v666_v38 = vpack.c.bf16 %v662_v34, %v662_v34 }
  0x71   : > { %1112 = vmatpush1.bf16.msra.mxu1 %v1485_v36  ;;  %1072 = vmatprep.subr.bf16.mxu0 %v1486_v37  ;;  %v1527_v36 = vld [vmem:[%s1828_s13 + $0x1f0] ss:$8 sps:$4 sm:$0xff]   ;;  %v664_v37 = vpack.c.bf16 %v660_v33, %v660_v33 }
  0x72   : > { %1113 = vmatprep.subr.bf16.mxu1 %v1488_v39 }
  0x74   : > { %1073 = vmatpush1.bf16.msra.mxu0 %v1490_v40  ;;  %v668_v40 = vld [vmem:[#allocation2] sm:$0xff] }
  0x75   : > { %1114 = vmatpush1.bf16.msra.mxu1 %v1491_v41  ;;  %1074 = vmatprep.subr.bf16.mxu0 %v1492_v42 }
  0x76   : > { %1115 = vmatprep.subr.bf16.mxu1 %v1494_v44  ;;  %v669_v44 = vld [vmem:[#allocation2 + $0x8] sm:$0xff] }
  0x78   : > { %1075 = vmatpush1.bf16.msra.mxu0 %v1496_v45 }
  0x79   : > { %1116 = vmatpush1.bf16.msra.mxu1 %v1497_v46  ;;  %1076 = vmatprep.subr.bf16.mxu0 %v1498_v47 }
  0x7a   : > { %1117 = vmatprep.subr.bf16.mxu1 %v1500_v49 }
  0x7c   : > { %1077 = vmatpush1.bf16.msra.mxu0 %v1502_v58 }
  0x7d   : > { %1118 = vmatpush1.bf16.msra.mxu1 %v1503_v59  ;;  %1078 = vmatprep.subr.bf16.mxu0 %v1504_v63 }
  0x7e   : > { %1119 = vmatprep.subr.bf16.mxu1 %v1506_v0 }
  0x80   : > { %1079 = vmatpush1.bf16.msra.mxu0 %v1508_v9 }
  0x81   : > { %1120 = vmatpush1.bf16.msra.mxu1 %v1509_v10  ;;  %1080 = vmatprep.subr.bf16.mxu0 %v1510_v12 }
  0x82   : > { %1121 = vmatprep.subr.bf16.mxu1 %v1512_v13 }
  0x84   : > { %1081 = vmatpush1.bf16.msra.mxu0 %v1514_v21 }
  0x85   : > { %1122 = vmatpush1.bf16.msra.mxu1 %v1515_v22  ;;  %1082 = vmatprep.subr.bf16.mxu0 %v1516_v24 }
  0x86   : > { %1123 = vmatprep.subr.bf16.mxu1 %v1518_v25 }
  0x88   : > { %1083 = vmatpush1.bf16.msra.mxu0 %v1520_v29 }
  0x89   : > { %1124 = vmatpush1.bf16.msra.mxu1 %v1521_v30  ;;  %1084 = vmatprep.subr.bf16.mxu0 %v1522_v31 }
  0x8a   : > { %1125 = vmatprep.subr.bf16.mxu1 %v1524_v32 }
  0x8c   : > { %1085 = vmatpush1.bf16.msra.mxu0 %v1526_v35 }
  0x8d   : > { %1126 = vmatpush1.bf16.msra.mxu1 %v1527_v36 }
  0x8f   : > { %1087 = vmatmul.mubr.bf16.vlgmr.msra.gmra.mrb[0].mxu0 %v664_v37 }
  0x90   : > { %1128 = vmatmul.mubr.bf16.vlgmr.msra.gmra.mrb[0].mxu1 %v666_v38 }
 0x162   : > { %v1088_v39 = vpop.f32.mrb[0].mxu0 }
 0x163   : > { %v1129_v41 = vpop.f32.mrb[0].mxu1  ;;  %v1090_v43 = vpop.f32.mrb[1].mxu0  ;;  %1143 = sbr.rel (%p1369_p13) target bundleno = 372 (0x174), region = 82 }
 0x164   : > { %v1130_v42 = vadd.f32 %v1129_v41, %v1088_v39  ;;  %v1131_v45 = vpop.f32.mrb[1].mxu1  ;;  %v1092_v47 = vpop.f32.mrb[2].mxu0 }
 0x165   : > { %v1132_v46 = vadd.f32 %v1131_v45, %v1090_v43  ;;  %v1133_v48 = vpop.f32.mrb[2].mxu1  ;;  %v1093_v50 = vpop.f32.mrb[3].mxu0 }
 0x166   : > { %v1136_v49 = vadd.f32 %v1130_v42, %v668_v40  ;;  %v1134_v51 = vpop.f32.mrb[3].mxu1 }
 0x167   : > { %v1137_v52 = vadd.f32 %v1132_v46, %v669_v44 }
 0x168   : > { %1138 = vst [vmem:[#allocation2] sm:$0xff] %v1136_v49 }
 0x169   : > { %1139 = vst [vmem:[#allocation2 + $0x8] sm:$0xff] %v1137_v52 }
 0x16f   : > { %v1144_v53 = vld [vmem:[#allocation2] sm:$0xff] }
 0x170   : > { %v1145_v54 = vld [vmem:[#allocation2 + $0x8] sm:$0xff] }
 0x171   : > { %v1374_v55 = vpack.c.bf16 %v1145_v54, %v1144_v53 }
 0x173   : > { %1154 = vst [vmem:[%s1826_s12] sm:$0xff] %v1374_v55 }
 0x174 PF: > { %s14_s21 = sadd.s32 1, %s1582_s21   ;;  %s1935_s15 = smov %s1562_s16 }
 0x175   : > { %p11_p0 = scmp.ge.s32.totalorder %s14_s21, 6   ;;  %s1936_s16 = smov %s1661_s28 }
 0x176   : > { %s1937_s17 = smov %s1574_s19  ;;  %s1938_s18 = smov %s1578_s20 }
 0x177   : > { %s1939_s19 = smov %s1942_s22  ;;  %s1940_s20 = smov %s1946_s23 }
 0x178   :  { %13 = sbr.rel (!%p11_p0) target bundleno = 4 (0x4), region = 126 }

</bundles_post_ra>
